<compile_context>
chip_gen: v7x
topology: tpu7x:2x2x1
jax: 0.10.0
libtpu: 0.0.40
codegen_flags: <defaults>
</compile_context>

<pallas_src>
import numpy as np

import jax
import jax.numpy as jnp
from jax import lax
from jax.experimental import pallas as pl
from jax.experimental.pallas import tpu as pltpu

# ----------------------- synthetic config -----------------------
CHANNEL_SIZE = 1
NROF_CLASSES = 10
FEAT_DIM = 16          # cfg.train.discriminator_feat_dim
FC_DIM = 32            # cfg.train.discriminator_fc_dim
BN_EPS = 1e-5
LRELU_SLOPE = 0.2
KH = KW = 4
STRIDE = 2
PAD = 1
IMG_HW = 16


def _lrelu(v):
    return jnp.where(v > 0, v, LRELU_SLOPE * v)


# ----------------------- fused Pallas kernel -----------------------
def _disc_kernel(
    x_ref,       # (N, 256, 1)  f32   image, rows = h*16+w
    y11_ref,     # (N, 11)      f32   [0, one_hot]          (conv1 class channels)
    y21_ref,     # (N, 21)      f32   [0*11, one_hot]       (conv2 class channels)
    sel1_ref,    # (16, 64, 256) bf16 per-tap 0/1 spatial gather, conv1 (pad folded in)
    w1_ref,      # (16, 11, 21)  bf16 per-tap conv1 weights, out lanes 11..20 are zero
    b1_ref,      # (1, 21)       f32
    sel2_ref,    # (16, 16, 64)  bf16 per-tap 0/1 spatial gather, conv2
    w2_ref,      # (16, 21, 26)  bf16
    b2_ref,      # (1, 26)       f32
    g2_ref,      # (1, 26)       f32  BN2d gamma
    beta2_ref,   # (1, 26)       f32  BN2d beta
    wf1m_ref,    # (16, 26, 32)  bf16 fc1 weights regrouped per spatial position
    wf1c_ref,    # (11, 32)      bf16 fc1 weights for [0, one_hot]
    bf1_ref,     # (1, 32)       f32
    gf_ref,      # (1, 32)       f32  BN1d gamma
    betaf_ref,   # (1, 32)       f32  BN1d beta
    wf2m_ref,    # (1, 32)       f32  fc2 weights (main)
    wf2c_ref,    # (1, 11)       f32  fc2 weights for [0, one_hot]
    bf2_ref,     # (1, 1)        f32
    out_ref,     # (N, 1)        f32
):
    f32 = jnp.float32
    bf16 = jnp.bfloat16

    n_batch = x_ref.shape[0]
    taps = sel1_ref.shape[0]
    r1, s1 = sel1_ref.shape[1], sel1_ref.shape[2]   # 64, 256
    r2 = sel2_ref.shape[1]                          # 16
    c1_in = w1_ref.shape[1]                         # 11
    c1p = w1_ref.shape[2]                           # 21 (11 real + 10 zero lanes)
    c2 = w2_ref.shape[2]                            # 26

    y11 = y11_ref[...]
    y21 = y21_ref[...]
    b1 = b1_ref[...]
    b2 = b2_ref[...]
    g2 = g2_ref[...]
    beta2 = beta2_ref[...]
    bf1 = bf1_ref[...]
    gf = gf_ref[...]
    betaf = betaf_ref[...]
    wf1c = wf1c_ref[...]
    wf2m = wf2m_ref[...]
    wf2c = wf2c_ref[...]
    bf2 = bf2_ref[...]

    # lane index used to splice the image channel (lane 0) with the class channels
    lane1 = lax.broadcasted_iota(jnp.int32, (s1, c1_in), 1)

    # ---------------- conv1 / conv2 (per sample; batch is tiny & static) ----------------
    conv2_pre = []
    for n in range(n_batch):
        x_n = x_ref[n]                       # (256, 1) f32
        y11_n = y11[n:n + 1, :]              # (1, 11)
        y21_n = y21[n:n + 1, :]              # (1, 21)

        # conv1 input in (rows=spatial, lanes=channel) layout:
        #   lane 0 = image, lanes 1..10 = one-hot (conv_cond_concat), no concat needed.
        x1 = jnp.where(lane1 == 0,
                       jnp.broadcast_to(x_n, (s1, c1_in)),
                       jnp.broadcast_to(y11_n, (s1, c1_in))).astype(bf16)

        # conv1: k=4, s=2, p=1 : 16x16x11 -> 8x8x11 (stored in 21 lanes, last 10 zero)
        acc1 = jnp.zeros((r1, c1p), f32) + b1
        for t in range(taps):
            p = jnp.dot(sel1_ref[t], x1, preferred_element_type=f32)       # (64, 11)
            acc1 = acc1 + jnp.dot(p.astype(bf16), w1_ref[t],
                                  preferred_element_type=f32)              # (64, 21)
        h0 = _lrelu(acc1)                    # lanes 11..20 stay exactly 0

        # conv_cond_concat for conv2: class channels occupy the zero lanes -> plain add.
        x2 = (h0 + y21_n).astype(bf16)       # (64, 21)

        # conv2: 8x8x21 -> 4x4x26 (pre-BN, with conv bias)
        acc2 = jnp.zeros((r2, c2), f32) + b2
        for t in range(taps):
            p = jnp.dot(sel2_ref[t], x2, preferred_element_type=f32)       # (16, 21)
            acc2 = acc2 + jnp.dot(p.astype(bf16), w2_ref[t],
                                  preferred_element_type=f32)              # (16, 26)
        conv2_pre.append(acc2)

    # ---------------- BatchNorm2d (batch statistics, biased var) + LeakyReLU ----------------
    cnt2 = float(n_batch * r2)
    mean2 = sum(jnp.sum(a, axis=0, keepdims=True) for a in conv2_pre) / cnt2
    var2 = sum(jnp.sum((a - mean2) * (a - mean2), axis=0, keepdims=True)
               for a in conv2_pre) / cnt2
    scale2 = lax.rsqrt(var2 + BN_EPS) * g2
    h1 = [_lrelu((a - mean2) * scale2 + beta2) for a in conv2_pre]          # (16, 26) each

    # ---------------- fc1 (flatten folded into the weight layout) ----------------
    fc1_pre = []
    for n in range(n_batch):
        y11_n_bf = y11[n:n + 1, :].astype(bf16)
        acc = bf1 + jnp.dot(y11_n_bf, wf1c, preferred_element_type=f32)     # (1, 32)
        hn = h1[n]
        for s in range(r2):
            acc = acc + jnp.dot(hn[s:s + 1, :].astype(bf16), wf1m_ref[s],
                                preferred_element_type=f32)
        fc1_pre.append(acc)

    # ---------------- BatchNorm1d over the batch + LeakyReLU ----------------
    cntf = float(n_batch)
    meanf = sum(fc1_pre) / cntf
    varf = sum((f - meanf) * (f - meanf) for f in fc1_pre) / cntf
    scalef = lax.rsqrt(varf + BN_EPS) * gf

    # ---------------- fc2 + numerically stable sigmoid ----------------
    outs = []
    for n in range(n_batch):
        v = (fc1_pre[n] - meanf) * scalef + betaf
        h2 = _lrelu(v)                                                      # (1, 32)
        z = (jnp.sum(h2 * wf2m, axis=1, keepdims=True)
             + jnp.sum(y11[n:n + 1, :] * wf2c, axis=1, keepdims=True)
             + bf2)                                                         # (1, 1)
        e = jnp.exp(-jnp.abs(z))
        pos = 1.0 / (1.0 + e)
        outs.append(jnp.where(z >= 0.0, pos, 1.0 - pos))

    out_ref[...] = jnp.concatenate(outs, axis=0)


# ----------------------- host-side (init-time) preprocessing -----------------------
def _conv_selection(ih, iw, oh, ow, kh, kw, stride, pad):
    """Per-tap 0/1 matrices gathering unpadded input spatial positions into output
    positions; taps that fall into the zero-padding simply have an all-zero row."""
    sel = np.zeros((kh * kw, oh * ow, ih * iw), np.float32)
    for ki in range(kh):
        for kj in range(kw):
            t = ki * kw + kj
            for a in range(oh):
                src_h = stride * a + ki - pad
                if not (0 <= src_h < ih):
                    continue
                for b in range(ow):
                    src_w = stride * b + kj - pad
                    if 0 <= src_w < iw:
                        sel[t, a * ow + b, src_h * iw + src_w] = 1.0
    return sel


def prepare_params(params):
    """One-time weight preprocessing (layout, padding, permutation, bf16 cast)."""
    f32 = jnp.float32
    bf16 = jnp.bfloat16

    def per_tap(w):  # (O, C, KH, KW) -> (KH*KW, C, O), tap index = ki*KW + kj
        o, c, kh, kw = w.shape
        return jnp.transpose(w, (2, 3, 1, 0)).reshape(kh * kw, c, o)

    c1_out = params["conv1_w"].shape[0]                  # 11
    c1p = c1_out + NROF_CLASSES                          # 21
    w1 = per_tap(params["conv1_w"])                      # (16, 11, 11)
    w1 = jnp.pad(w1, ((0, 0), (0, 0), (0, c1p - c1_out)))
    b1 = jnp.pad(params["conv1_b"], (0, c1p - c1_out)).reshape(1, c1p)

    w2 = per_tap(params["conv2_w"])                      # (16, 21, 26)
    c2 = params["conv2_w"].shape[0]                      # 26
    b2 = params["conv2_b"].reshape(1, c2)

    oh2 = ((IMG_HW + 2 * PAD - KH) // STRIDE + 1 + 2 * PAD - KH) // STRIDE + 1  # 4
    n_sp = oh2 * oh2                                     # 16
    fc1_w = params["fc1_w"]                              # (426, 32), rows = c*16 + s
    wf1m = fc1_w[: c2 * n_sp].reshape(c2, n_sp, FC_DIM).transpose(1, 0, 2)  # (16, 26, 32)
    wf1c = jnp.concatenate(
        [jnp.zeros((1, FC_DIM), fc1_w.dtype), fc1_w[c2 * n_sp:]], axis=0)   # (11, 32)

    fc2_w = params["fc2_w"]                              # (42, 1)
    wf2m = fc2_w[:FC_DIM].reshape(1, FC_DIM)             # (1, 32)
    wf2c = jnp.concatenate(
        [jnp.zeros((1, 1), fc2_w.dtype), fc2_w[FC_DIM:]], axis=0).reshape(1, NROF_CLASSES + 1)

    oh1 = (IMG_HW + 2 * PAD - KH) // STRIDE + 1          # 8
    sel1 = _conv_selection(IMG_HW, IMG_HW, oh1, oh1, KH, KW, STRIDE, PAD)   # (16, 64, 256)
    sel2 = _conv_selection(oh1, oh1, oh2, oh2, KH, KW, STRIDE, PAD)         # (16, 16, 64)

    return {
        "sel1": jnp.asarray(sel1, bf16),
        "w1": w1.astype(bf16),
        "b1": b1.astype(f32),
        "sel2": jnp.asarray(sel2, bf16),
        "w2": w2.astype(bf16),
        "b2": b2.astype(f32),
        "bn2_g": params["bn2_g"].reshape(1, c2).astype(f32),
        "bn2_b": params["bn2_b"].reshape(1, c2).astype(f32),
        "wf1m": wf1m.astype(bf16),
        "wf1c": wf1c.astype(bf16),
        "bf1": params["fc1_b"].reshape(1, FC_DIM).astype(f32),
        "bnf_g": params["bnf_g"].reshape(1, FC_DIM).astype(f32),
        "bnf_b": params["bnf_b"].reshape(1, FC_DIM).astype(f32),
        "wf2m": wf2m.astype(f32),
        "wf2c": wf2c.astype(f32),
        "bf2": params["fc2_b"].reshape(1, 1).astype(f32),
    }


# ----------------------- forward wrapper (single pallas_call) -----------------------
def discriminator_forward_mnist(prep, x, y):
    n, c, h, w = x.shape           # (N, 1, 16, 16)
    y_vec = jax.nn.one_hot(y, NROF_CLASSES, dtype=jnp.float32)           # (N, 10)
    y11 = jnp.pad(y_vec, ((0, 0), (CHANNEL_SIZE, 0)))                    # (N, 11)
    y21 = jnp.pad(y_vec, ((0, 0), (CHANNEL_SIZE + NROF_CLASSES, 0)))     # (N, 21)
    x_rows = x.astype(jnp.float32).reshape(n, h * w, 1)                  # (N, 256, 1)

    args = (
        x_rows, y11, y21,
        prep["sel1"], prep["w1"], prep["b1"],
        prep["sel2"], prep["w2"], prep["b2"], prep["bn2_g"], prep["bn2_b"],
        prep["wf1m"], prep["wf1c"], prep["bf1"], prep["bnf_g"], prep["bnf_b"],
        prep["wf2m"], prep["wf2c"], prep["bf2"],
    )
    return pl.pallas_call(
        _disc_kernel,
        out_shape=jax.ShapeDtypeStruct((n, 1), jnp.float32),
        in_specs=[pl.BlockSpec(memory_space=pltpu.MemorySpace.VMEM)] * len(args),
        out_specs=pl.BlockSpec(memory_space=pltpu.MemorySpace.VMEM),
        compiler_params=pltpu.CompilerParams(vmem_limit_bytes=32 * 1024 * 1024),
    )(*args)


# ----------------------- raw (PyTorch-layout) parameter init -----------------------
def init_params(key):
    c1_in = CHANNEL_SIZE + NROF_CLASSES                  # 11
    c1_out = CHANNEL_SIZE + NROF_CLASSES                 # 11
    c2_in = c1_out + NROF_CLASSES                        # 21
    c2_out = FEAT_DIM + NROF_CLASSES                     # 26
    fc1_in = c2_out * 4 * 4 + NROF_CLASSES               # 426
    fc2_in = FC_DIM + NROF_CLASSES                       # 42
    ks = jax.random.split(key, 4)
    s = 0.05
    return {
        "conv1_w": jax.random.normal(ks[0], (c1_out, c1_in, KH, KW), jnp.float32) * s,
        "conv1_b": jnp.zeros((c1_out,), jnp.float32),
        "conv2_w": jax.random.normal(ks[1], (c2_out, c2_in, KH, KW), jnp.float32) * s,
        "conv2_b": jnp.zeros((c2_out,), jnp.float32),
        "bn2_g": jnp.ones((c2_out,), jnp.float32),
        "bn2_b": jnp.zeros((c2_out,), jnp.float32),
        "fc1_w": jax.random.normal(ks[2], (fc1_in, FC_DIM), jnp.float32) * s,
        "fc1_b": jnp.zeros((FC_DIM,), jnp.float32),
        "bnf_g": jnp.ones((FC_DIM,), jnp.float32),
        "bnf_b": jnp.zeros((FC_DIM,), jnp.float32),
        "fc2_w": jax.random.normal(ks[3], (fc2_in, 1), jnp.float32) * s,
        "fc2_b": jnp.zeros((1,), jnp.float32),
    }


if __name__ == "__main__":
    key = jax.random.PRNGKey(0)
    kp, kx = jax.random.split(key)
    raw_params = init_params(kp)
    prep = prepare_params(raw_params)          # one-time host-side weight prep

    # small deterministic inputs: batch=2, 1-channel 16x16 images + integer labels
    x = jax.random.normal(kx, (2, CHANNEL_SIZE, IMG_HW, IMG_HW), jnp.float32)
    y = jnp.array([3, 7], dtype=jnp.int32)

    fwd = jax.jit(discriminator_forward_mnist)
    out = jax.block_until_ready(fwd(prep, x, y))

    assert out.shape == (2, 1)
    assert bool(jnp.all(jnp.isfinite(out)))
    assert bool(jnp.all((out >= 0.0) & (out <= 1.0)))
    print("KERNEL_OK")
</pallas_src>

<mosaic_0001>
module attributes {stable_mosaic.version = 11 : i64} {
  func.func @_disc_kernel(%arg0: memref<2x256x1xf32, #tpu.memory_space<vmem>>, %arg1: memref<2x11xf32, #tpu.memory_space<vmem>>, %arg2: memref<2x21xf32, #tpu.memory_space<vmem>>, %arg3: memref<16x64x256xbf16, #tpu.memory_space<vmem>>, %arg4: memref<16x11x21xbf16, #tpu.memory_space<vmem>>, %arg5: memref<1x21xf32, #tpu.memory_space<vmem>>, %arg6: memref<16x16x64xbf16, #tpu.memory_space<vmem>>, %arg7: memref<16x21x26xbf16, #tpu.memory_space<vmem>>, %arg8: memref<1x26xf32, #tpu.memory_space<vmem>>, %arg9: memref<1x26xf32, #tpu.memory_space<vmem>>, %arg10: memref<1x26xf32, #tpu.memory_space<vmem>>, %arg11: memref<16x26x32xbf16, #tpu.memory_space<vmem>>, %arg12: memref<11x32xbf16, #tpu.memory_space<vmem>>, %arg13: memref<1x32xf32, #tpu.memory_space<vmem>>, %arg14: memref<1x32xf32, #tpu.memory_space<vmem>>, %arg15: memref<1x32xf32, #tpu.memory_space<vmem>>, %arg16: memref<1x32xf32, #tpu.memory_space<vmem>>, %arg17: memref<1x11xf32, #tpu.memory_space<vmem>>, %arg18: memref<1x1xf32, #tpu.memory_space<vmem>>, %arg19: memref<2x1xf32, #tpu.memory_space<vmem>>) attributes {dimension_semantics = [], scalar_prefetch = 0 : i64, scratch_operands = 0 : i64, tpu.core_type = #tpu.core_type<tc>} {
    %c0 = arith.constant 0 : index
    %c0_0 = arith.constant 0 : index
    %0 = vector.load %arg1[%c0, %c0_0] : memref<2x11xf32, #tpu.memory_space<vmem>>, vector<2x11xf32>
    %c0_1 = arith.constant 0 : index
    %c0_2 = arith.constant 0 : index
    %1 = vector.load %arg2[%c0_1, %c0_2] : memref<2x21xf32, #tpu.memory_space<vmem>>, vector<2x21xf32>
    %c0_3 = arith.constant 0 : index
    %c0_4 = arith.constant 0 : index
    %2 = vector.load %arg5[%c0_3, %c0_4] : memref<1x21xf32, #tpu.memory_space<vmem>>, vector<1x21xf32>
    %c0_5 = arith.constant 0 : index
    %c0_6 = arith.constant 0 : index
    %3 = vector.load %arg8[%c0_5, %c0_6] : memref<1x26xf32, #tpu.memory_space<vmem>>, vector<1x26xf32>
    %c0_7 = arith.constant 0 : index
    %c0_8 = arith.constant 0 : index
    %4 = vector.load %arg9[%c0_7, %c0_8] : memref<1x26xf32, #tpu.memory_space<vmem>>, vector<1x26xf32>
    %c0_9 = arith.constant 0 : index
    %c0_10 = arith.constant 0 : index
    %5 = vector.load %arg10[%c0_9, %c0_10] : memref<1x26xf32, #tpu.memory_space<vmem>>, vector<1x26xf32>
    %c0_11 = arith.constant 0 : index
    %c0_12 = arith.constant 0 : index
    %6 = vector.load %arg13[%c0_11, %c0_12] : memref<1x32xf32, #tpu.memory_space<vmem>>, vector<1x32xf32>
    %c0_13 = arith.constant 0 : index
    %c0_14 = arith.constant 0 : index
    %7 = vector.load %arg14[%c0_13, %c0_14] : memref<1x32xf32, #tpu.memory_space<vmem>>, vector<1x32xf32>
    %c0_15 = arith.constant 0 : index
    %c0_16 = arith.constant 0 : index
    %8 = vector.load %arg15[%c0_15, %c0_16] : memref<1x32xf32, #tpu.memory_space<vmem>>, vector<1x32xf32>
    %c0_17 = arith.constant 0 : index
    %c0_18 = arith.constant 0 : index
    %9 = vector.load %arg12[%c0_17, %c0_18] : memref<11x32xbf16, #tpu.memory_space<vmem>>, vector<11x32xbf16>
    %c0_19 = arith.constant 0 : index
    %c0_20 = arith.constant 0 : index
    %10 = vector.load %arg16[%c0_19, %c0_20] : memref<1x32xf32, #tpu.memory_space<vmem>>, vector<1x32xf32>
    %c0_21 = arith.constant 0 : index
    %c0_22 = arith.constant 0 : index
    %11 = vector.load %arg17[%c0_21, %c0_22] : memref<1x11xf32, #tpu.memory_space<vmem>>, vector<1x11xf32>
    %c0_23 = arith.constant 0 : index
    %c0_24 = arith.constant 0 : index
    %12 = vector.load %arg18[%c0_23, %c0_24] : memref<1x1xf32, #tpu.memory_space<vmem>>, vector<1x1xf32>
    %13 = tpu.iota {dimensions = array<i32: 1>} : vector<256x11xi32>
    %c0_25 = arith.constant 0 : index
    %c0_26 = arith.constant 0 : index
    %c0_27 = arith.constant 0 : index
    %14 = vector.load %arg0[%c0_25, %c0_26, %c0_27] : memref<2x256x1xf32, #tpu.memory_space<vmem>>, vector<1x256x1xf32>
    %15 = vector.shape_cast %14 : vector<1x256x1xf32> to vector<256x1xf32>
    %16 = vector.extract_strided_slice %0 {offsets = [0, 0], sizes = [1, 11], strides = [1, 1]} : vector<2x11xf32> to vector<1x11xf32>
    %17 = vector.extract_strided_slice %1 {offsets = [0, 0], sizes = [1, 21], strides = [1, 1]} : vector<2x21xf32> to vector<1x21xf32>
    %c0_i32 = arith.constant 0 : i32
    %18 = vector.broadcast %c0_i32 : i32 to vector<256x11xi32>
    %19 = arith.cmpi eq, %13, %18 : vector<256x11xi32>
    %20 = vector.shape_cast %15 : vector<256x1xf32> to vector<256x1xf32>
    %21 = vector.broadcast %20 : vector<256x1xf32> to vector<256x11xf32>
    %22 = vector.shape_cast %16 : vector<1x11xf32> to vector<1x11xf32>
    %23 = vector.broadcast %22 : vector<1x11xf32> to vector<256x11xf32>
    %24 = arith.select %19, %21, %23 : vector<256x11xi1>, vector<256x11xf32>
    %25 = arith.truncf %24 : vector<256x11xf32> to vector<256x11xbf16>
    %cst = arith.constant 0.000000e+00 : f32
    %26 = vector.broadcast %cst : f32 to vector<64x21xf32>
    %27 = vector.broadcast %2 : vector<1x21xf32> to vector<64x21xf32>
    %28 = arith.addf %26, %27 : vector<64x21xf32>
    %c0_28 = arith.constant 0 : index
    %c0_29 = arith.constant 0 : index
    %c0_30 = arith.constant 0 : index
    %29 = vector.load %arg3[%c0_28, %c0_29, %c0_30] : memref<16x64x256xbf16, #tpu.memory_space<vmem>>, vector<1x64x256xbf16>
    %30 = vector.shape_cast %29 : vector<1x64x256xbf16> to vector<64x256xbf16>
    %cst_31 = arith.constant dense<0.000000e+00> : vector<64x11xf32>
    %31 = tpu.matmul %30, %25, %cst_31 {dimension_numbers = #tpu.dot_dimension_numbers<[1], [0], [0], [1], [0, 0, 1, 1], [], []>} : vector<64x256xbf16>, vector<256x11xbf16>, vector<64x11xf32> -> vector<64x11xf32>
    %32 = arith.truncf %31 : vector<64x11xf32> to vector<64x11xbf16>
    %c0_32 = arith.constant 0 : index
    %c0_33 = arith.constant 0 : index
    %c0_34 = arith.constant 0 : index
    %33 = vector.load %arg4[%c0_32, %c0_33, %c0_34] : memref<16x11x21xbf16, #tpu.memory_space<vmem>>, vector<1x11x21xbf16>
    %34 = vector.shape_cast %33 : vector<1x11x21xbf16> to vector<11x21xbf16>
    %cst_35 = arith.constant dense<0.000000e+00> : vector<64x21xf32>
    %35 = tpu.matmul %32, %34, %cst_35 {dimension_numbers = #tpu.dot_dimension_numbers<[1], [0], [0], [1], [0, 0, 1, 1], [], []>} : vector<64x11xbf16>, vector<11x21xbf16>, vector<64x21xf32> -> vector<64x21xf32>
    %36 = arith.addf %28, %35 : vector<64x21xf32>
    %c1 = arith.constant 1 : index
    %c0_36 = arith.constant 0 : index
    %c0_37 = arith.constant 0 : index
    %37 = vector.load %arg3[%c1, %c0_36, %c0_37] : memref<16x64x256xbf16, #tpu.memory_space<vmem>>, vector<1x64x256xbf16>
    %38 = vector.shape_cast %37 : vector<1x64x256xbf16> to vector<64x256xbf16>
    %cst_38 = arith.constant dense<0.000000e+00> : vector<64x11xf32>
    %39 = tpu.matmul %38, %25, %cst_38 {dimension_numbers = #tpu.dot_dimension_numbers<[1], [0], [0], [1], [0, 0, 1, 1], [], []>} : vector<64x256xbf16>, vector<256x11xbf16>, vector<64x11xf32> -> vector<64x11xf32>
    %40 = arith.truncf %39 : vector<64x11xf32> to vector<64x11xbf16>
    %c1_39 = arith.constant 1 : index
    %c0_40 = arith.constant 0 : index
    %c0_41 = arith.constant 0 : index
    %41 = vector.load %arg4[%c1_39, %c0_40, %c0_41] : memref<16x11x21xbf16, #tpu.memory_space<vmem>>, vector<1x11x21xbf16>
    %42 = vector.shape_cast %41 : vector<1x11x21xbf16> to vector<11x21xbf16>
    %cst_42 = arith.constant dense<0.000000e+00> : vector<64x21xf32>
    %43 = tpu.matmul %40, %42, %cst_42 {dimension_numbers = #tpu.dot_dimension_numbers<[1], [0], [0], [1], [0, 0, 1, 1], [], []>} : vector<64x11xbf16>, vector<11x21xbf16>, vector<64x21xf32> -> vector<64x21xf32>
    %44 = arith.addf %36, %43 : vector<64x21xf32>
    %c2 = arith.constant 2 : index
    %c0_43 = arith.constant 0 : index
    %c0_44 = arith.constant 0 : index
    %45 = vector.load %arg3[%c2, %c0_43, %c0_44] : memref<16x64x256xbf16, #tpu.memory_space<vmem>>, vector<1x64x256xbf16>
    %46 = vector.shape_cast %45 : vector<1x64x256xbf16> to vector<64x256xbf16>
    %cst_45 = arith.constant dense<0.000000e+00> : vector<64x11xf32>
    %47 = tpu.matmul %46, %25, %cst_45 {dimension_numbers = #tpu.dot_dimension_numbers<[1], [0], [0], [1], [0, 0, 1, 1], [], []>} : vector<64x256xbf16>, vector<256x11xbf16>, vector<64x11xf32> -> vector<64x11xf32>
    %48 = arith.truncf %47 : vector<64x11xf32> to vector<64x11xbf16>
    %c2_46 = arith.constant 2 : index
    %c0_47 = arith.constant 0 : index
    %c0_48 = arith.constant 0 : index
    %49 = vector.load %arg4[%c2_46, %c0_47, %c0_48] : memref<16x11x21xbf16, #tpu.memory_space<vmem>>, vector<1x11x21xbf16>
    %50 = vector.shape_cast %49 : vector<1x11x21xbf16> to vector<11x21xbf16>
    %cst_49 = arith.constant dense<0.000000e+00> : vector<64x21xf32>
    %51 = tpu.matmul %48, %50, %cst_49 {dimension_numbers = #tpu.dot_dimension_numbers<[1], [0], [0], [1], [0, 0, 1, 1], [], []>} : vector<64x11xbf16>, vector<11x21xbf16>, vector<64x21xf32> -> vector<64x21xf32>
    %52 = arith.addf %44, %51 : vector<64x21xf32>
    %c3 = arith.constant 3 : index
    %c0_50 = arith.constant 0 : index
    %c0_51 = arith.constant 0 : index
    %53 = vector.load %arg3[%c3, %c0_50, %c0_51] : memref<16x64x256xbf16, #tpu.memory_space<vmem>>, vector<1x64x256xbf16>
    %54 = vector.shape_cast %53 : vector<1x64x256xbf16> to vector<64x256xbf16>
    %cst_52 = arith.constant dense<0.000000e+00> : vector<64x11xf32>
    %55 = tpu.matmul %54, %25, %cst_52 {dimension_numbers = #tpu.dot_dimension_numbers<[1], [0], [0], [1], [0, 0, 1, 1], [], []>} : vector<64x256xbf16>, vector<256x11xbf16>, vector<64x11xf32> -> vector<64x11xf32>
    %56 = arith.truncf %55 : vector<64x11xf32> to vector<64x11xbf16>
    %c3_53 = arith.constant 3 : index
    %c0_54 = arith.constant 0 : index
    %c0_55 = arith.constant 0 : index
    %57 = vector.load %arg4[%c3_53, %c0_54, %c0_55] : memref<16x11x21xbf16, #tpu.memory_space<vmem>>, vector<1x11x21xbf16>
    %58 = vector.shape_cast %57 : vector<1x11x21xbf16> to vector<11x21xbf16>
    %cst_56 = arith.constant dense<0.000000e+00> : vector<64x21xf32>
    %59 = tpu.matmul %56, %58, %cst_56 {dimension_numbers = #tpu.dot_dimension_numbers<[1], [0], [0], [1], [0, 0, 1, 1], [], []>} : vector<64x11xbf16>, vector<11x21xbf16>, vector<64x21xf32> -> vector<64x21xf32>
    %60 = arith.addf %52, %59 : vector<64x21xf32>
    %c4 = arith.constant 4 : index
    %c0_57 = arith.constant 0 : index
    %c0_58 = arith.constant 0 : index
    %61 = vector.load %arg3[%c4, %c0_57, %c0_58] : memref<16x64x256xbf16, #tpu.memory_space<vmem>>, vector<1x64x256xbf16>
    %62 = vector.shape_cast %61 : vector<1x64x256xbf16> to vector<64x256xbf16>
    %cst_59 = arith.constant dense<0.000000e+00> : vector<64x11xf32>
    %63 = tpu.matmul %62, %25, %cst_59 {dimension_numbers = #tpu.dot_dimension_numbers<[1], [0], [0], [1], [0, 0, 1, 1], [], []>} : vector<64x256xbf16>, vector<256x11xbf16>, vector<64x11xf32> -> vector<64x11xf32>
    %64 = arith.truncf %63 : vector<64x11xf32> to vector<64x11xbf16>
    %c4_60 = arith.constant 4 : index
    %c0_61 = arith.constant 0 : index
    %c0_62 = arith.constant 0 : index
    %65 = vector.load %arg4[%c4_60, %c0_61, %c0_62] : memref<16x11x21xbf16, #tpu.memory_space<vmem>>, vector<1x11x21xbf16>
    %66 = vector.shape_cast %65 : vector<1x11x21xbf16> to vector<11x21xbf16>
    %cst_63 = arith.constant dense<0.000000e+00> : vector<64x21xf32>
    %67 = tpu.matmul %64, %66, %cst_63 {dimension_numbers = #tpu.dot_dimension_numbers<[1], [0], [0], [1], [0, 0, 1, 1], [], []>} : vector<64x11xbf16>, vector<11x21xbf16>, vector<64x21xf32> -> vector<64x21xf32>
    %68 = arith.addf %60, %67 : vector<64x21xf32>
    %c5 = arith.constant 5 : index
    %c0_64 = arith.constant 0 : index
    %c0_65 = arith.constant 0 : index
    %69 = vector.load %arg3[%c5, %c0_64, %c0_65] : memref<16x64x256xbf16, #tpu.memory_space<vmem>>, vector<1x64x256xbf16>
    %70 = vector.shape_cast %69 : vector<1x64x256xbf16> to vector<64x256xbf16>
    %cst_66 = arith.constant dense<0.000000e+00> : vector<64x11xf32>
    %71 = tpu.matmul %70, %25, %cst_66 {dimension_numbers = #tpu.dot_dimension_numbers<[1], [0], [0], [1], [0, 0, 1, 1], [], []>} : vector<64x256xbf16>, vector<256x11xbf16>, vector<64x11xf32> -> vector<64x11xf32>
    %72 = arith.truncf %71 : vector<64x11xf32> to vector<64x11xbf16>
    %c5_67 = arith.constant 5 : index
    %c0_68 = arith.constant 0 : index
    %c0_69 = arith.constant 0 : index
    %73 = vector.load %arg4[%c5_67, %c0_68, %c0_69] : memref<16x11x21xbf16, #tpu.memory_space<vmem>>, vector<1x11x21xbf16>
    %74 = vector.shape_cast %73 : vector<1x11x21xbf16> to vector<11x21xbf16>
    %cst_70 = arith.constant dense<0.000000e+00> : vector<64x21xf32>
    %75 = tpu.matmul %72, %74, %cst_70 {dimension_numbers = #tpu.dot_dimension_numbers<[1], [0], [0], [1], [0, 0, 1, 1], [], []>} : vector<64x11xbf16>, vector<11x21xbf16>, vector<64x21xf32> -> vector<64x21xf32>
    %76 = arith.addf %68, %75 : vector<64x21xf32>
    %c6 = arith.constant 6 : index
    %c0_71 = arith.constant 0 : index
    %c0_72 = arith.constant 0 : index
    %77 = vector.load %arg3[%c6, %c0_71, %c0_72] : memref<16x64x256xbf16, #tpu.memory_space<vmem>>, vector<1x64x256xbf16>
    %78 = vector.shape_cast %77 : vector<1x64x256xbf16> to vector<64x256xbf16>
    %cst_73 = arith.constant dense<0.000000e+00> : vector<64x11xf32>
    %79 = tpu.matmul %78, %25, %cst_73 {dimension_numbers = #tpu.dot_dimension_numbers<[1], [0], [0], [1], [0, 0, 1, 1], [], []>} : vector<64x256xbf16>, vector<256x11xbf16>, vector<64x11xf32> -> vector<64x11xf32>
    %80 = arith.truncf %79 : vector<64x11xf32> to vector<64x11xbf16>
    %c6_74 = arith.constant 6 : index
    %c0_75 = arith.constant 0 : index
    %c0_76 = arith.constant 0 : index
    %81 = vector.load %arg4[%c6_74, %c0_75, %c0_76] : memref<16x11x21xbf16, #tpu.memory_space<vmem>>, vector<1x11x21xbf16>
    %82 = vector.shape_cast %81 : vector<1x11x21xbf16> to vector<11x21xbf16>
    %cst_77 = arith.constant dense<0.000000e+00> : vector<64x21xf32>
    %83 = tpu.matmul %80, %82, %cst_77 {dimension_numbers = #tpu.dot_dimension_numbers<[1], [0], [0], [1], [0, 0, 1, 1], [], []>} : vector<64x11xbf16>, vector<11x21xbf16>, vector<64x21xf32> -> vector<64x21xf32>
    %84 = arith.addf %76, %83 : vector<64x21xf32>
    %c7 = arith.constant 7 : index
    %c0_78 = arith.constant 0 : index
    %c0_79 = arith.constant 0 : index
    %85 = vector.load %arg3[%c7, %c0_78, %c0_79] : memref<16x64x256xbf16, #tpu.memory_space<vmem>>, vector<1x64x256xbf16>
    %86 = vector.shape_cast %85 : vector<1x64x256xbf16> to vector<64x256xbf16>
    %cst_80 = arith.constant dense<0.000000e+00> : vector<64x11xf32>
    %87 = tpu.matmul %86, %25, %cst_80 {dimension_numbers = #tpu.dot_dimension_numbers<[1], [0], [0], [1], [0, 0, 1, 1], [], []>} : vector<64x256xbf16>, vector<256x11xbf16>, vector<64x11xf32> -> vector<64x11xf32>
    %88 = arith.truncf %87 : vector<64x11xf32> to vector<64x11xbf16>
    %c7_81 = arith.constant 7 : index
    %c0_82 = arith.constant 0 : index
    %c0_83 = arith.constant 0 : index
    %89 = vector.load %arg4[%c7_81, %c0_82, %c0_83] : memref<16x11x21xbf16, #tpu.memory_space<vmem>>, vector<1x11x21xbf16>
    %90 = vector.shape_cast %89 : vector<1x11x21xbf16> to vector<11x21xbf16>
    %cst_84 = arith.constant dense<0.000000e+00> : vector<64x21xf32>
    %91 = tpu.matmul %88, %90, %cst_84 {dimension_numbers = #tpu.dot_dimension_numbers<[1], [0], [0], [1], [0, 0, 1, 1], [], []>} : vector<64x11xbf16>, vector<11x21xbf16>, vector<64x21xf32> -> vector<64x21xf32>
    %92 = arith.addf %84, %91 : vector<64x21xf32>
    %c8 = arith.constant 8 : index
    %c0_85 = arith.constant 0 : index
    %c0_86 = arith.constant 0 : index
    %93 = vector.load %arg3[%c8, %c0_85, %c0_86] : memref<16x64x256xbf16, #tpu.memory_space<vmem>>, vector<1x64x256xbf16>
    %94 = vector.shape_cast %93 : vector<1x64x256xbf16> to vector<64x256xbf16>
    %cst_87 = arith.constant dense<0.000000e+00> : vector<64x11xf32>
    %95 = tpu.matmul %94, %25, %cst_87 {dimension_numbers = #tpu.dot_dimension_numbers<[1], [0], [0], [1], [0, 0, 1, 1], [], []>} : vector<64x256xbf16>, vector<256x11xbf16>, vector<64x11xf32> -> vector<64x11xf32>
    %96 = arith.truncf %95 : vector<64x11xf32> to vector<64x11xbf16>
    %c8_88 = arith.constant 8 : index
    %c0_89 = arith.constant 0 : index
    %c0_90 = arith.constant 0 : index
    %97 = vector.load %arg4[%c8_88, %c0_89, %c0_90] : memref<16x11x21xbf16, #tpu.memory_space<vmem>>, vector<1x11x21xbf16>
    %98 = vector.shape_cast %97 : vector<1x11x21xbf16> to vector<11x21xbf16>
    %cst_91 = arith.constant dense<0.000000e+00> : vector<64x21xf32>
    %99 = tpu.matmul %96, %98, %cst_91 {dimension_numbers = #tpu.dot_dimension_numbers<[1], [0], [0], [1], [0, 0, 1, 1], [], []>} : vector<64x11xbf16>, vector<11x21xbf16>, vector<64x21xf32> -> vector<64x21xf32>
    %100 = arith.addf %92, %99 : vector<64x21xf32>
    %c9 = arith.constant 9 : index
    %c0_92 = arith.constant 0 : index
    %c0_93 = arith.constant 0 : index
    %101 = vector.load %arg3[%c9, %c0_92, %c0_93] : memref<16x64x256xbf16, #tpu.memory_space<vmem>>, vector<1x64x256xbf16>
    %102 = vector.shape_cast %101 : vector<1x64x256xbf16> to vector<64x256xbf16>
    %cst_94 = arith.constant dense<0.000000e+00> : vector<64x11xf32>
    %103 = tpu.matmul %102, %25, %cst_94 {dimension_numbers = #tpu.dot_dimension_numbers<[1], [0], [0], [1], [0, 0, 1, 1], [], []>} : vector<64x256xbf16>, vector<256x11xbf16>, vector<64x11xf32> -> vector<64x11xf32>
    %104 = arith.truncf %103 : vector<64x11xf32> to vector<64x11xbf16>
    %c9_95 = arith.constant 9 : index
    %c0_96 = arith.constant 0 : index
    %c0_97 = arith.constant 0 : index
    %105 = vector.load %arg4[%c9_95, %c0_96, %c0_97] : memref<16x11x21xbf16, #tpu.memory_space<vmem>>, vector<1x11x21xbf16>
    %106 = vector.shape_cast %105 : vector<1x11x21xbf16> to vector<11x21xbf16>
    %cst_98 = arith.constant dense<0.000000e+00> : vector<64x21xf32>
    %107 = tpu.matmul %104, %106, %cst_98 {dimension_numbers = #tpu.dot_dimension_numbers<[1], [0], [0], [1], [0, 0, 1, 1], [], []>} : vector<64x11xbf16>, vector<11x21xbf16>, vector<64x21xf32> -> vector<64x21xf32>
    %108 = arith.addf %100, %107 : vector<64x21xf32>
    %c10 = arith.constant 10 : index
    %c0_99 = arith.constant 0 : index
    %c0_100 = arith.constant 0 : index
    %109 = vector.load %arg3[%c10, %c0_99, %c0_100] : memref<16x64x256xbf16, #tpu.memory_space<vmem>>, vector<1x64x256xbf16>
    %110 = vector.shape_cast %109 : vector<1x64x256xbf16> to vector<64x256xbf16>
    %cst_101 = arith.constant dense<0.000000e+00> : vector<64x11xf32>
    %111 = tpu.matmul %110, %25, %cst_101 {dimension_numbers = #tpu.dot_dimension_numbers<[1], [0], [0], [1], [0, 0, 1, 1], [], []>} : vector<64x256xbf16>, vector<256x11xbf16>, vector<64x11xf32> -> vector<64x11xf32>
    %112 = arith.truncf %111 : vector<64x11xf32> to vector<64x11xbf16>
    %c10_102 = arith.constant 10 : index
    %c0_103 = arith.constant 0 : index
    %c0_104 = arith.constant 0 : index
    %113 = vector.load %arg4[%c10_102, %c0_103, %c0_104] : memref<16x11x21xbf16, #tpu.memory_space<vmem>>, vector<1x11x21xbf16>
    %114 = vector.shape_cast %113 : vector<1x11x21xbf16> to vector<11x21xbf16>
    %cst_105 = arith.constant dense<0.000000e+00> : vector<64x21xf32>
    %115 = tpu.matmul %112, %114, %cst_105 {dimension_numbers = #tpu.dot_dimension_numbers<[1], [0], [0], [1], [0, 0, 1, 1], [], []>} : vector<64x11xbf16>, vector<11x21xbf16>, vector<64x21xf32> -> vector<64x21xf32>
    %116 = arith.addf %108, %115 : vector<64x21xf32>
    %c11 = arith.constant 11 : index
    %c0_106 = arith.constant 0 : index
    %c0_107 = arith.constant 0 : index
    %117 = vector.load %arg3[%c11, %c0_106, %c0_107] : memref<16x64x256xbf16, #tpu.memory_space<vmem>>, vector<1x64x256xbf16>
    %118 = vector.shape_cast %117 : vector<1x64x256xbf16> to vector<64x256xbf16>
    %cst_108 = arith.constant dense<0.000000e+00> : vector<64x11xf32>
    %119 = tpu.matmul %118, %25, %cst_108 {dimension_numbers = #tpu.dot_dimension_numbers<[1], [0], [0], [1], [0, 0, 1, 1], [], []>} : vector<64x256xbf16>, vector<256x11xbf16>, vector<64x11xf32> -> vector<64x11xf32>
    %120 = arith.truncf %119 : vector<64x11xf32> to vector<64x11xbf16>
    %c11_109 = arith.constant 11 : index
    %c0_110 = arith.constant 0 : index
    %c0_111 = arith.constant 0 : index
    %121 = vector.load %arg4[%c11_109, %c0_110, %c0_111] : memref<16x11x21xbf16, #tpu.memory_space<vmem>>, vector<1x11x21xbf16>
    %122 = vector.shape_cast %121 : vector<1x11x21xbf16> to vector<11x21xbf16>
    %cst_112 = arith.constant dense<0.000000e+00> : vector<64x21xf32>
    %123 = tpu.matmul %120, %122, %cst_112 {dimension_numbers = #tpu.dot_dimension_numbers<[1], [0], [0], [1], [0, 0, 1, 1], [], []>} : vector<64x11xbf16>, vector<11x21xbf16>, vector<64x21xf32> -> vector<64x21xf32>
    %124 = arith.addf %116, %123 : vector<64x21xf32>
    %c12 = arith.constant 12 : index
    %c0_113 = arith.constant 0 : index
    %c0_114 = arith.constant 0 : index
    %125 = vector.load %arg3[%c12, %c0_113, %c0_114] : memref<16x64x256xbf16, #tpu.memory_space<vmem>>, vector<1x64x256xbf16>
    %126 = vector.shape_cast %125 : vector<1x64x256xbf16> to vector<64x256xbf16>
    %cst_115 = arith.constant dense<0.000000e+00> : vector<64x11xf32>
    %127 = tpu.matmul %126, %25, %cst_115 {dimension_numbers = #tpu.dot_dimension_numbers<[1], [0], [0], [1], [0, 0, 1, 1], [], []>} : vector<64x256xbf16>, vector<256x11xbf16>, vector<64x11xf32> -> vector<64x11xf32>
    %128 = arith.truncf %127 : vector<64x11xf32> to vector<64x11xbf16>
    %c12_116 = arith.constant 12 : index
    %c0_117 = arith.constant 0 : index
    %c0_118 = arith.constant 0 : index
    %129 = vector.load %arg4[%c12_116, %c0_117, %c0_118] : memref<16x11x21xbf16, #tpu.memory_space<vmem>>, vector<1x11x21xbf16>
    %130 = vector.shape_cast %129 : vector<1x11x21xbf16> to vector<11x21xbf16>
    %cst_119 = arith.constant dense<0.000000e+00> : vector<64x21xf32>
    %131 = tpu.matmul %128, %130, %cst_119 {dimension_numbers = #tpu.dot_dimension_numbers<[1], [0], [0], [1], [0, 0, 1, 1], [], []>} : vector<64x11xbf16>, vector<11x21xbf16>, vector<64x21xf32> -> vector<64x21xf32>
    %132 = arith.addf %124, %131 : vector<64x21xf32>
    %c13 = arith.constant 13 : index
    %c0_120 = arith.constant 0 : index
    %c0_121 = arith.constant 0 : index
    %133 = vector.load %arg3[%c13, %c0_120, %c0_121] : memref<16x64x256xbf16, #tpu.memory_space<vmem>>, vector<1x64x256xbf16>
    %134 = vector.shape_cast %133 : vector<1x64x256xbf16> to vector<64x256xbf16>
    %cst_122 = arith.constant dense<0.000000e+00> : vector<64x11xf32>
    %135 = tpu.matmul %134, %25, %cst_122 {dimension_numbers = #tpu.dot_dimension_numbers<[1], [0], [0], [1], [0, 0, 1, 1], [], []>} : vector<64x256xbf16>, vector<256x11xbf16>, vector<64x11xf32> -> vector<64x11xf32>
    %136 = arith.truncf %135 : vector<64x11xf32> to vector<64x11xbf16>
    %c13_123 = arith.constant 13 : index
    %c0_124 = arith.constant 0 : index
    %c0_125 = arith.constant 0 : index
    %137 = vector.load %arg4[%c13_123, %c0_124, %c0_125] : memref<16x11x21xbf16, #tpu.memory_space<vmem>>, vector<1x11x21xbf16>
    %138 = vector.shape_cast %137 : vector<1x11x21xbf16> to vector<11x21xbf16>
    %cst_126 = arith.constant dense<0.000000e+00> : vector<64x21xf32>
    %139 = tpu.matmul %136, %138, %cst_126 {dimension_numbers = #tpu.dot_dimension_numbers<[1], [0], [0], [1], [0, 0, 1, 1], [], []>} : vector<64x11xbf16>, vector<11x21xbf16>, vector<64x21xf32> -> vector<64x21xf32>
    %140 = arith.addf %132, %139 : vector<64x21xf32>
    %c14 = arith.constant 14 : index
    %c0_127 = arith.constant 0 : index
    %c0_128 = arith.constant 0 : index
    %141 = vector.load %arg3[%c14, %c0_127, %c0_128] : memref<16x64x256xbf16, #tpu.memory_space<vmem>>, vector<1x64x256xbf16>
    %142 = vector.shape_cast %141 : vector<1x64x256xbf16> to vector<64x256xbf16>
    %cst_129 = arith.constant dense<0.000000e+00> : vector<64x11xf32>
    %143 = tpu.matmul %142, %25, %cst_129 {dimension_numbers = #tpu.dot_dimension_numbers<[1], [0], [0], [1], [0, 0, 1, 1], [], []>} : vector<64x256xbf16>, vector<256x11xbf16>, vector<64x11xf32> -> vector<64x11xf32>
    %144 = arith.truncf %143 : vector<64x11xf32> to vector<64x11xbf16>
    %c14_130 = arith.constant 14 : index
    %c0_131 = arith.constant 0 : index
    %c0_132 = arith.constant 0 : index
    %145 = vector.load %arg4[%c14_130, %c0_131, %c0_132] : memref<16x11x21xbf16, #tpu.memory_space<vmem>>, vector<1x11x21xbf16>
    %146 = vector.shape_cast %145 : vector<1x11x21xbf16> to vector<11x21xbf16>
    %cst_133 = arith.constant dense<0.000000e+00> : vector<64x21xf32>
    %147 = tpu.matmul %144, %146, %cst_133 {dimension_numbers = #tpu.dot_dimension_numbers<[1], [0], [0], [1], [0, 0, 1, 1], [], []>} : vector<64x11xbf16>, vector<11x21xbf16>, vector<64x21xf32> -> vector<64x21xf32>
    %148 = arith.addf %140, %147 : vector<64x21xf32>
    %c15 = arith.constant 15 : index
    %c0_134 = arith.constant 0 : index
    %c0_135 = arith.constant 0 : index
    %149 = vector.load %arg3[%c15, %c0_134, %c0_135] : memref<16x64x256xbf16, #tpu.memory_space<vmem>>, vector<1x64x256xbf16>
    %150 = vector.shape_cast %149 : vector<1x64x256xbf16> to vector<64x256xbf16>
    %cst_136 = arith.constant dense<0.000000e+00> : vector<64x11xf32>
    %151 = tpu.matmul %150, %25, %cst_136 {dimension_numbers = #tpu.dot_dimension_numbers<[1], [0], [0], [1], [0, 0, 1, 1], [], []>} : vector<64x256xbf16>, vector<256x11xbf16>, vector<64x11xf32> -> vector<64x11xf32>
    %152 = arith.truncf %151 : vector<64x11xf32> to vector<64x11xbf16>
    %c15_137 = arith.constant 15 : index
    %c0_138 = arith.constant 0 : index
    %c0_139 = arith.constant 0 : index
    %153 = vector.load %arg4[%c15_137, %c0_138, %c0_139] : memref<16x11x21xbf16, #tpu.memory_space<vmem>>, vector<1x11x21xbf16>
    %154 = vector.shape_cast %153 : vector<1x11x21xbf16> to vector<11x21xbf16>
    %cst_140 = arith.constant dense<0.000000e+00> : vector<64x21xf32>
    %155 = tpu.matmul %152, %154, %cst_140 {dimension_numbers = #tpu.dot_dimension_numbers<[1], [0], [0], [1], [0, 0, 1, 1], [], []>} : vector<64x11xbf16>, vector<11x21xbf16>, vector<64x21xf32> -> vector<64x21xf32>
    %156 = arith.addf %148, %155 : vector<64x21xf32>
    %cst_141 = arith.constant 0.000000e+00 : f32
    %157 = vector.broadcast %cst_141 : f32 to vector<64x21xf32>
    %158 = arith.cmpf ogt, %156, %157 : vector<64x21xf32>
    %cst_142 = arith.constant 2.000000e-01 : f32
    %159 = vector.broadcast %cst_142 : f32 to vector<64x21xf32>
    %160 = arith.mulf %159, %156 : vector<64x21xf32>
    %161 = arith.select %158, %156, %160 : vector<64x21xi1>, vector<64x21xf32>
    %162 = vector.broadcast %17 : vector<1x21xf32> to vector<64x21xf32>
    %163 = arith.addf %161, %162 : vector<64x21xf32>
    %164 = arith.truncf %163 : vector<64x21xf32> to vector<64x21xbf16>
    %cst_143 = arith.constant 0.000000e+00 : f32
    %165 = vector.broadcast %cst_143 : f32 to vector<16x26xf32>
    %166 = vector.broadcast %3 : vector<1x26xf32> to vector<16x26xf32>
    %167 = arith.addf %165, %166 : vector<16x26xf32>
    %c0_144 = arith.constant 0 : index
    %c0_145 = arith.constant 0 : index
    %c0_146 = arith.constant 0 : index
    %168 = vector.load %arg6[%c0_144, %c0_145, %c0_146] : memref<16x16x64xbf16, #tpu.memory_space<vmem>>, vector<1x16x64xbf16>
    %169 = vector.shape_cast %168 : vector<1x16x64xbf16> to vector<16x64xbf16>
    %cst_147 = arith.constant dense<0.000000e+00> : vector<16x21xf32>
    %170 = tpu.matmul %169, %164, %cst_147 {dimension_numbers = #tpu.dot_dimension_numbers<[1], [0], [0], [1], [0, 0, 1, 1], [], []>} : vector<16x64xbf16>, vector<64x21xbf16>, vector<16x21xf32> -> vector<16x21xf32>
    %171 = arith.truncf %170 : vector<16x21xf32> to vector<16x21xbf16>
    %c0_148 = arith.constant 0 : index
    %c0_149 = arith.constant 0 : index
    %c0_150 = arith.constant 0 : index
    %172 = vector.load %arg7[%c0_148, %c0_149, %c0_150] : memref<16x21x26xbf16, #tpu.memory_space<vmem>>, vector<1x21x26xbf16>
    %173 = vector.shape_cast %172 : vector<1x21x26xbf16> to vector<21x26xbf16>
    %cst_151 = arith.constant dense<0.000000e+00> : vector<16x26xf32>
    %174 = tpu.matmul %171, %173, %cst_151 {dimension_numbers = #tpu.dot_dimension_numbers<[1], [0], [0], [1], [0, 0, 1, 1], [], []>} : vector<16x21xbf16>, vector<21x26xbf16>, vector<16x26xf32> -> vector<16x26xf32>
    %175 = arith.addf %167, %174 : vector<16x26xf32>
    %c1_152 = arith.constant 1 : index
    %c0_153 = arith.constant 0 : index
    %c0_154 = arith.constant 0 : index
    %176 = vector.load %arg6[%c1_152, %c0_153, %c0_154] : memref<16x16x64xbf16, #tpu.memory_space<vmem>>, vector<1x16x64xbf16>
    %177 = vector.shape_cast %176 : vector<1x16x64xbf16> to vector<16x64xbf16>
    %cst_155 = arith.constant dense<0.000000e+00> : vector<16x21xf32>
    %178 = tpu.matmul %177, %164, %cst_155 {dimension_numbers = #tpu.dot_dimension_numbers<[1], [0], [0], [1], [0, 0, 1, 1], [], []>} : vector<16x64xbf16>, vector<64x21xbf16>, vector<16x21xf32> -> vector<16x21xf32>
    %179 = arith.truncf %178 : vector<16x21xf32> to vector<16x21xbf16>
    %c1_156 = arith.constant 1 : index
    %c0_157 = arith.constant 0 : index
    %c0_158 = arith.constant 0 : index
    %180 = vector.load %arg7[%c1_156, %c0_157, %c0_158] : memref<16x21x26xbf16, #tpu.memory_space<vmem>>, vector<1x21x26xbf16>
    %181 = vector.shape_cast %180 : vector<1x21x26xbf16> to vector<21x26xbf16>
    %cst_159 = arith.constant dense<0.000000e+00> : vector<16x26xf32>
    %182 = tpu.matmul %179, %181, %cst_159 {dimension_numbers = #tpu.dot_dimension_numbers<[1], [0], [0], [1], [0, 0, 1, 1], [], []>} : vector<16x21xbf16>, vector<21x26xbf16>, vector<16x26xf32> -> vector<16x26xf32>
    %183 = arith.addf %175, %182 : vector<16x26xf32>
    %c2_160 = arith.constant 2 : index
    %c0_161 = arith.constant 0 : index
    %c0_162 = arith.constant 0 : index
    %184 = vector.load %arg6[%c2_160, %c0_161, %c0_162] : memref<16x16x64xbf16, #tpu.memory_space<vmem>>, vector<1x16x64xbf16>
    %185 = vector.shape_cast %184 : vector<1x16x64xbf16> to vector<16x64xbf16>
    %cst_163 = arith.constant dense<0.000000e+00> : vector<16x21xf32>
    %186 = tpu.matmul %185, %164, %cst_163 {dimension_numbers = #tpu.dot_dimension_numbers<[1], [0], [0], [1], [0, 0, 1, 1], [], []>} : vector<16x64xbf16>, vector<64x21xbf16>, vector<16x21xf32> -> vector<16x21xf32>
    %187 = arith.truncf %186 : vector<16x21xf32> to vector<16x21xbf16>
    %c2_164 = arith.constant 2 : index
    %c0_165 = arith.constant 0 : index
    %c0_166 = arith.constant 0 : index
    %188 = vector.load %arg7[%c2_164, %c0_165, %c0_166] : memref<16x21x26xbf16, #tpu.memory_space<vmem>>, vector<1x21x26xbf16>
    %189 = vector.shape_cast %188 : vector<1x21x26xbf16> to vector<21x26xbf16>
    %cst_167 = arith.constant dense<0.000000e+00> : vector<16x26xf32>
    %190 = tpu.matmul %187, %189, %cst_167 {dimension_numbers = #tpu.dot_dimension_numbers<[1], [0], [0], [1], [0, 0, 1, 1], [], []>} : vector<16x21xbf16>, vector<21x26xbf16>, vector<16x26xf32> -> vector<16x26xf32>
    %191 = arith.addf %183, %190 : vector<16x26xf32>
    %c3_168 = arith.constant 3 : index
    %c0_169 = arith.constant 0 : index
    %c0_170 = arith.constant 0 : index
    %192 = vector.load %arg6[%c3_168, %c0_169, %c0_170] : memref<16x16x64xbf16, #tpu.memory_space<vmem>>, vector<1x16x64xbf16>
    %193 = vector.shape_cast %192 : vector<1x16x64xbf16> to vector<16x64xbf16>
    %cst_171 = arith.constant dense<0.000000e+00> : vector<16x21xf32>
    %194 = tpu.matmul %193, %164, %cst_171 {dimension_numbers = #tpu.dot_dimension_numbers<[1], [0], [0], [1], [0, 0, 1, 1], [], []>} : vector<16x64xbf16>, vector<64x21xbf16>, vector<16x21xf32> -> vector<16x21xf32>
    %195 = arith.truncf %194 : vector<16x21xf32> to vector<16x21xbf16>
    %c3_172 = arith.constant 3 : index
    %c0_173 = arith.constant 0 : index
    %c0_174 = arith.constant 0 : index
    %196 = vector.load %arg7[%c3_172, %c0_173, %c0_174] : memref<16x21x26xbf16, #tpu.memory_space<vmem>>, vector<1x21x26xbf16>
    %197 = vector.shape_cast %196 : vector<1x21x26xbf16> to vector<21x26xbf16>
    %cst_175 = arith.constant dense<0.000000e+00> : vector<16x26xf32>
    %198 = tpu.matmul %195, %197, %cst_175 {dimension_numbers = #tpu.dot_dimension_numbers<[1], [0], [0], [1], [0, 0, 1, 1], [], []>} : vector<16x21xbf16>, vector<21x26xbf16>, vector<16x26xf32> -> vector<16x26xf32>
    %199 = arith.addf %191, %198 : vector<16x26xf32>
    %c4_176 = arith.constant 4 : index
    %c0_177 = arith.constant 0 : index
    %c0_178 = arith.constant 0 : index
    %200 = vector.load %arg6[%c4_176, %c0_177, %c0_178] : memref<16x16x64xbf16, #tpu.memory_space<vmem>>, vector<1x16x64xbf16>
    %201 = vector.shape_cast %200 : vector<1x16x64xbf16> to vector<16x64xbf16>
    %cst_179 = arith.constant dense<0.000000e+00> : vector<16x21xf32>
    %202 = tpu.matmul %201, %164, %cst_179 {dimension_numbers = #tpu.dot_dimension_numbers<[1], [0], [0], [1], [0, 0, 1, 1], [], []>} : vector<16x64xbf16>, vector<64x21xbf16>, vector<16x21xf32> -> vector<16x21xf32>
    %203 = arith.truncf %202 : vector<16x21xf32> to vector<16x21xbf16>
    %c4_180 = arith.constant 4 : index
    %c0_181 = arith.constant 0 : index
    %c0_182 = arith.constant 0 : index
    %204 = vector.load %arg7[%c4_180, %c0_181, %c0_182] : memref<16x21x26xbf16, #tpu.memory_space<vmem>>, vector<1x21x26xbf16>
    %205 = vector.shape_cast %204 : vector<1x21x26xbf16> to vector<21x26xbf16>
    %cst_183 = arith.constant dense<0.000000e+00> : vector<16x26xf32>
    %206 = tpu.matmul %203, %205, %cst_183 {dimension_numbers = #tpu.dot_dimension_numbers<[1], [0], [0], [1], [0, 0, 1, 1], [], []>} : vector<16x21xbf16>, vector<21x26xbf16>, vector<16x26xf32> -> vector<16x26xf32>
    %207 = arith.addf %199, %206 : vector<16x26xf32>
    %c5_184 = arith.constant 5 : index
    %c0_185 = arith.constant 0 : index
    %c0_186 = arith.constant 0 : index
    %208 = vector.load %arg6[%c5_184, %c0_185, %c0_186] : memref<16x16x64xbf16, #tpu.memory_space<vmem>>, vector<1x16x64xbf16>
    %209 = vector.shape_cast %208 : vector<1x16x64xbf16> to vector<16x64xbf16>
    %cst_187 = arith.constant dense<0.000000e+00> : vector<16x21xf32>
    %210 = tpu.matmul %209, %164, %cst_187 {dimension_numbers = #tpu.dot_dimension_numbers<[1], [0], [0], [1], [0, 0, 1, 1], [], []>} : vector<16x64xbf16>, vector<64x21xbf16>, vector<16x21xf32> -> vector<16x21xf32>
    %211 = arith.truncf %210 : vector<16x21xf32> to vector<16x21xbf16>
    %c5_188 = arith.constant 5 : index
    %c0_189 = arith.constant 0 : index
    %c0_190 = arith.constant 0 : index
    %212 = vector.load %arg7[%c5_188, %c0_189, %c0_190] : memref<16x21x26xbf16, #tpu.memory_space<vmem>>, vector<1x21x26xbf16>
    %213 = vector.shape_cast %212 : vector<1x21x26xbf16> to vector<21x26xbf16>
    %cst_191 = arith.constant dense<0.000000e+00> : vector<16x26xf32>
    %214 = tpu.matmul %211, %213, %cst_191 {dimension_numbers = #tpu.dot_dimension_numbers<[1], [0], [0], [1], [0, 0, 1, 1], [], []>} : vector<16x21xbf16>, vector<21x26xbf16>, vector<16x26xf32> -> vector<16x26xf32>
    %215 = arith.addf %207, %214 : vector<16x26xf32>
    %c6_192 = arith.constant 6 : index
    %c0_193 = arith.constant 0 : index
    %c0_194 = arith.constant 0 : index
    %216 = vector.load %arg6[%c6_192, %c0_193, %c0_194] : memref<16x16x64xbf16, #tpu.memory_space<vmem>>, vector<1x16x64xbf16>
    %217 = vector.shape_cast %216 : vector<1x16x64xbf16> to vector<16x64xbf16>
    %cst_195 = arith.constant dense<0.000000e+00> : vector<16x21xf32>
    %218 = tpu.matmul %217, %164, %cst_195 {dimension_numbers = #tpu.dot_dimension_numbers<[1], [0], [0], [1], [0, 0, 1, 1], [], []>} : vector<16x64xbf16>, vector<64x21xbf16>, vector<16x21xf32> -> vector<16x21xf32>
    %219 = arith.truncf %218 : vector<16x21xf32> to vector<16x21xbf16>
    %c6_196 = arith.constant 6 : index
    %c0_197 = arith.constant 0 : index
    %c0_198 = arith.constant 0 : index
    %220 = vector.load %arg7[%c6_196, %c0_197, %c0_198] : memref<16x21x26xbf16, #tpu.memory_space<vmem>>, vector<1x21x26xbf16>
    %221 = vector.shape_cast %220 : vector<1x21x26xbf16> to vector<21x26xbf16>
    %cst_199 = arith.constant dense<0.000000e+00> : vector<16x26xf32>
    %222 = tpu.matmul %219, %221, %cst_199 {dimension_numbers = #tpu.dot_dimension_numbers<[1], [0], [0], [1], [0, 0, 1, 1], [], []>} : vector<16x21xbf16>, vector<21x26xbf16>, vector<16x26xf32> -> vector<16x26xf32>
    %223 = arith.addf %215, %222 : vector<16x26xf32>
    %c7_200 = arith.constant 7 : index
    %c0_201 = arith.constant 0 : index
    %c0_202 = arith.constant 0 : index
    %224 = vector.load %arg6[%c7_200, %c0_201, %c0_202] : memref<16x16x64xbf16, #tpu.memory_space<vmem>>, vector<1x16x64xbf16>
    %225 = vector.shape_cast %224 : vector<1x16x64xbf16> to vector<16x64xbf16>
    %cst_203 = arith.constant dense<0.000000e+00> : vector<16x21xf32>
    %226 = tpu.matmul %225, %164, %cst_203 {dimension_numbers = #tpu.dot_dimension_numbers<[1], [0], [0], [1], [0, 0, 1, 1], [], []>} : vector<16x64xbf16>, vector<64x21xbf16>, vector<16x21xf32> -> vector<16x21xf32>
    %227 = arith.truncf %226 : vector<16x21xf32> to vector<16x21xbf16>
    %c7_204 = arith.constant 7 : index
    %c0_205 = arith.constant 0 : index
    %c0_206 = arith.constant 0 : index
    %228 = vector.load %arg7[%c7_204, %c0_205, %c0_206] : memref<16x21x26xbf16, #tpu.memory_space<vmem>>, vector<1x21x26xbf16>
    %229 = vector.shape_cast %228 : vector<1x21x26xbf16> to vector<21x26xbf16>
    %cst_207 = arith.constant dense<0.000000e+00> : vector<16x26xf32>
    %230 = tpu.matmul %227, %229, %cst_207 {dimension_numbers = #tpu.dot_dimension_numbers<[1], [0], [0], [1], [0, 0, 1, 1], [], []>} : vector<16x21xbf16>, vector<21x26xbf16>, vector<16x26xf32> -> vector<16x26xf32>
    %231 = arith.addf %223, %230 : vector<16x26xf32>
    %c8_208 = arith.constant 8 : index
    %c0_209 = arith.constant 0 : index
    %c0_210 = arith.constant 0 : index
    %232 = vector.load %arg6[%c8_208, %c0_209, %c0_210] : memref<16x16x64xbf16, #tpu.memory_space<vmem>>, vector<1x16x64xbf16>
    %233 = vector.shape_cast %232 : vector<1x16x64xbf16> to vector<16x64xbf16>
    %cst_211 = arith.constant dense<0.000000e+00> : vector<16x21xf32>
    %234 = tpu.matmul %233, %164, %cst_211 {dimension_numbers = #tpu.dot_dimension_numbers<[1], [0], [0], [1], [0, 0, 1, 1], [], []>} : vector<16x64xbf16>, vector<64x21xbf16>, vector<16x21xf32> -> vector<16x21xf32>
    %235 = arith.truncf %234 : vector<16x21xf32> to vector<16x21xbf16>
    %c8_212 = arith.constant 8 : index
    %c0_213 = arith.constant 0 : index
    %c0_214 = arith.constant 0 : index
    %236 = vector.load %arg7[%c8_212, %c0_213, %c0_214] : memref<16x21x26xbf16, #tpu.memory_space<vmem>>, vector<1x21x26xbf16>
    %237 = vector.shape_cast %236 : vector<1x21x26xbf16> to vector<21x26xbf16>
    %cst_215 = arith.constant dense<0.000000e+00> : vector<16x26xf32>
    %238 = tpu.matmul %235, %237, %cst_215 {dimension_numbers = #tpu.dot_dimension_numbers<[1], [0], [0], [1], [0, 0, 1, 1], [], []>} : vector<16x21xbf16>, vector<21x26xbf16>, vector<16x26xf32> -> vector<16x26xf32>
    %239 = arith.addf %231, %238 : vector<16x26xf32>
    %c9_216 = arith.constant 9 : index
    %c0_217 = arith.constant 0 : index
    %c0_218 = arith.constant 0 : index
    %240 = vector.load %arg6[%c9_216, %c0_217, %c0_218] : memref<16x16x64xbf16, #tpu.memory_space<vmem>>, vector<1x16x64xbf16>
    %241 = vector.shape_cast %240 : vector<1x16x64xbf16> to vector<16x64xbf16>
    %cst_219 = arith.constant dense<0.000000e+00> : vector<16x21xf32>
    %242 = tpu.matmul %241, %164, %cst_219 {dimension_numbers = #tpu.dot_dimension_numbers<[1], [0], [0], [1], [0, 0, 1, 1], [], []>} : vector<16x64xbf16>, vector<64x21xbf16>, vector<16x21xf32> -> vector<16x21xf32>
    %243 = arith.truncf %242 : vector<16x21xf32> to vector<16x21xbf16>
    %c9_220 = arith.constant 9 : index
    %c0_221 = arith.constant 0 : index
    %c0_222 = arith.constant 0 : index
    %244 = vector.load %arg7[%c9_220, %c0_221, %c0_222] : memref<16x21x26xbf16, #tpu.memory_space<vmem>>, vector<1x21x26xbf16>
    %245 = vector.shape_cast %244 : vector<1x21x26xbf16> to vector<21x26xbf16>
    %cst_223 = arith.constant dense<0.000000e+00> : vector<16x26xf32>
    %246 = tpu.matmul %243, %245, %cst_223 {dimension_numbers = #tpu.dot_dimension_numbers<[1], [0], [0], [1], [0, 0, 1, 1], [], []>} : vector<16x21xbf16>, vector<21x26xbf16>, vector<16x26xf32> -> vector<16x26xf32>
    %247 = arith.addf %239, %246 : vector<16x26xf32>
    %c10_224 = arith.constant 10 : index
    %c0_225 = arith.constant 0 : index
    %c0_226 = arith.constant 0 : index
    %248 = vector.load %arg6[%c10_224, %c0_225, %c0_226] : memref<16x16x64xbf16, #tpu.memory_space<vmem>>, vector<1x16x64xbf16>
    %249 = vector.shape_cast %248 : vector<1x16x64xbf16> to vector<16x64xbf16>
    %cst_227 = arith.constant dense<0.000000e+00> : vector<16x21xf32>
    %250 = tpu.matmul %249, %164, %cst_227 {dimension_numbers = #tpu.dot_dimension_numbers<[1], [0], [0], [1], [0, 0, 1, 1], [], []>} : vector<16x64xbf16>, vector<64x21xbf16>, vector<16x21xf32> -> vector<16x21xf32>
    %251 = arith.truncf %250 : vector<16x21xf32> to vector<16x21xbf16>
    %c10_228 = arith.constant 10 : index
    %c0_229 = arith.constant 0 : index
    %c0_230 = arith.constant 0 : index
    %252 = vector.load %arg7[%c10_228, %c0_229, %c0_230] : memref<16x21x26xbf16, #tpu.memory_space<vmem>>, vector<1x21x26xbf16>
    %253 = vector.shape_cast %252 : vector<1x21x26xbf16> to vector<21x26xbf16>
    %cst_231 = arith.constant dense<0.000000e+00> : vector<16x26xf32>
    %254 = tpu.matmul %251, %253, %cst_231 {dimension_numbers = #tpu.dot_dimension_numbers<[1], [0], [0], [1], [0, 0, 1, 1], [], []>} : vector<16x21xbf16>, vector<21x26xbf16>, vector<16x26xf32> -> vector<16x26xf32>
    %255 = arith.addf %247, %254 : vector<16x26xf32>
    %c11_232 = arith.constant 11 : index
    %c0_233 = arith.constant 0 : index
    %c0_234 = arith.constant 0 : index
    %256 = vector.load %arg6[%c11_232, %c0_233, %c0_234] : memref<16x16x64xbf16, #tpu.memory_space<vmem>>, vector<1x16x64xbf16>
    %257 = vector.shape_cast %256 : vector<1x16x64xbf16> to vector<16x64xbf16>
    %cst_235 = arith.constant dense<0.000000e+00> : vector<16x21xf32>
    %258 = tpu.matmul %257, %164, %cst_235 {dimension_numbers = #tpu.dot_dimension_numbers<[1], [0], [0], [1], [0, 0, 1, 1], [], []>} : vector<16x64xbf16>, vector<64x21xbf16>, vector<16x21xf32> -> vector<16x21xf32>
    %259 = arith.truncf %258 : vector<16x21xf32> to vector<16x21xbf16>
    %c11_236 = arith.constant 11 : index
    %c0_237 = arith.constant 0 : index
    %c0_238 = arith.constant 0 : index
    %260 = vector.load %arg7[%c11_236, %c0_237, %c0_238] : memref<16x21x26xbf16, #tpu.memory_space<vmem>>, vector<1x21x26xbf16>
    %261 = vector.shape_cast %260 : vector<1x21x26xbf16> to vector<21x26xbf16>
    %cst_239 = arith.constant dense<0.000000e+00> : vector<16x26xf32>
    %262 = tpu.matmul %259, %261, %cst_239 {dimension_numbers = #tpu.dot_dimension_numbers<[1], [0], [0], [1], [0, 0, 1, 1], [], []>} : vector<16x21xbf16>, vector<21x26xbf16>, vector<16x26xf32> -> vector<16x26xf32>
    %263 = arith.addf %255, %262 : vector<16x26xf32>
    %c12_240 = arith.constant 12 : index
    %c0_241 = arith.constant 0 : index
    %c0_242 = arith.constant 0 : index
    %264 = vector.load %arg6[%c12_240, %c0_241, %c0_242] : memref<16x16x64xbf16, #tpu.memory_space<vmem>>, vector<1x16x64xbf16>
    %265 = vector.shape_cast %264 : vector<1x16x64xbf16> to vector<16x64xbf16>
    %cst_243 = arith.constant dense<0.000000e+00> : vector<16x21xf32>
    %266 = tpu.matmul %265, %164, %cst_243 {dimension_numbers = #tpu.dot_dimension_numbers<[1], [0], [0], [1], [0, 0, 1, 1], [], []>} : vector<16x64xbf16>, vector<64x21xbf16>, vector<16x21xf32> -> vector<16x21xf32>
    %267 = arith.truncf %266 : vector<16x21xf32> to vector<16x21xbf16>
    %c12_244 = arith.constant 12 : index
    %c0_245 = arith.constant 0 : index
    %c0_246 = arith.constant 0 : index
    %268 = vector.load %arg7[%c12_244, %c0_245, %c0_246] : memref<16x21x26xbf16, #tpu.memory_space<vmem>>, vector<1x21x26xbf16>
    %269 = vector.shape_cast %268 : vector<1x21x26xbf16> to vector<21x26xbf16>
    %cst_247 = arith.constant dense<0.000000e+00> : vector<16x26xf32>
    %270 = tpu.matmul %267, %269, %cst_247 {dimension_numbers = #tpu.dot_dimension_numbers<[1], [0], [0], [1], [0, 0, 1, 1], [], []>} : vector<16x21xbf16>, vector<21x26xbf16>, vector<16x26xf32> -> vector<16x26xf32>
    %271 = arith.addf %263, %270 : vector<16x26xf32>
    %c13_248 = arith.constant 13 : index
    %c0_249 = arith.constant 0 : index
    %c0_250 = arith.constant 0 : index
    %272 = vector.load %arg6[%c13_248, %c0_249, %c0_250] : memref<16x16x64xbf16, #tpu.memory_space<vmem>>, vector<1x16x64xbf16>
    %273 = vector.shape_cast %272 : vector<1x16x64xbf16> to vector<16x64xbf16>
    %cst_251 = arith.constant dense<0.000000e+00> : vector<16x21xf32>
    %274 = tpu.matmul %273, %164, %cst_251 {dimension_numbers = #tpu.dot_dimension_numbers<[1], [0], [0], [1], [0, 0, 1, 1], [], []>} : vector<16x64xbf16>, vector<64x21xbf16>, vector<16x21xf32> -> vector<16x21xf32>
    %275 = arith.truncf %274 : vector<16x21xf32> to vector<16x21xbf16>
    %c13_252 = arith.constant 13 : index
    %c0_253 = arith.constant 0 : index
    %c0_254 = arith.constant 0 : index
    %276 = vector.load %arg7[%c13_252, %c0_253, %c0_254] : memref<16x21x26xbf16, #tpu.memory_space<vmem>>, vector<1x21x26xbf16>
    %277 = vector.shape_cast %276 : vector<1x21x26xbf16> to vector<21x26xbf16>
    %cst_255 = arith.constant dense<0.000000e+00> : vector<16x26xf32>
    %278 = tpu.matmul %275, %277, %cst_255 {dimension_numbers = #tpu.dot_dimension_numbers<[1], [0], [0], [1], [0, 0, 1, 1], [], []>} : vector<16x21xbf16>, vector<21x26xbf16>, vector<16x26xf32> -> vector<16x26xf32>
    %279 = arith.addf %271, %278 : vector<16x26xf32>
    %c14_256 = arith.constant 14 : index
    %c0_257 = arith.constant 0 : index
    %c0_258 = arith.constant 0 : index
    %280 = vector.load %arg6[%c14_256, %c0_257, %c0_258] : memref<16x16x64xbf16, #tpu.memory_space<vmem>>, vector<1x16x64xbf16>
    %281 = vector.shape_cast %280 : vector<1x16x64xbf16> to vector<16x64xbf16>
    %cst_259 = arith.constant dense<0.000000e+00> : vector<16x21xf32>
    %282 = tpu.matmul %281, %164, %cst_259 {dimension_numbers = #tpu.dot_dimension_numbers<[1], [0], [0], [1], [0, 0, 1, 1], [], []>} : vector<16x64xbf16>, vector<64x21xbf16>, vector<16x21xf32> -> vector<16x21xf32>
    %283 = arith.truncf %282 : vector<16x21xf32> to vector<16x21xbf16>
    %c14_260 = arith.constant 14 : index
    %c0_261 = arith.constant 0 : index
    %c0_262 = arith.constant 0 : index
    %284 = vector.load %arg7[%c14_260, %c0_261, %c0_262] : memref<16x21x26xbf16, #tpu.memory_space<vmem>>, vector<1x21x26xbf16>
    %285 = vector.shape_cast %284 : vector<1x21x26xbf16> to vector<21x26xbf16>
    %cst_263 = arith.constant dense<0.000000e+00> : vector<16x26xf32>
    %286 = tpu.matmul %283, %285, %cst_263 {dimension_numbers = #tpu.dot_dimension_numbers<[1], [0], [0], [1], [0, 0, 1, 1], [], []>} : vector<16x21xbf16>, vector<21x26xbf16>, vector<16x26xf32> -> vector<16x26xf32>
    %287 = arith.addf %279, %286 : vector<16x26xf32>
    %c15_264 = arith.constant 15 : index
    %c0_265 = arith.constant 0 : index
    %c0_266 = arith.constant 0 : index
    %288 = vector.load %arg6[%c15_264, %c0_265, %c0_266] : memref<16x16x64xbf16, #tpu.memory_space<vmem>>, vector<1x16x64xbf16>
    %289 = vector.shape_cast %288 : vector<1x16x64xbf16> to vector<16x64xbf16>
    %cst_267 = arith.constant dense<0.000000e+00> : vector<16x21xf32>
    %290 = tpu.matmul %289, %164, %cst_267 {dimension_numbers = #tpu.dot_dimension_numbers<[1], [0], [0], [1], [0, 0, 1, 1], [], []>} : vector<16x64xbf16>, vector<64x21xbf16>, vector<16x21xf32> -> vector<16x21xf32>
    %291 = arith.truncf %290 : vector<16x21xf32> to vector<16x21xbf16>
    %c15_268 = arith.constant 15 : index
    %c0_269 = arith.constant 0 : index
    %c0_270 = arith.constant 0 : index
    %292 = vector.load %arg7[%c15_268, %c0_269, %c0_270] : memref<16x21x26xbf16, #tpu.memory_space<vmem>>, vector<1x21x26xbf16>
    %293 = vector.shape_cast %292 : vector<1x21x26xbf16> to vector<21x26xbf16>
    %cst_271 = arith.constant dense<0.000000e+00> : vector<16x26xf32>
    %294 = tpu.matmul %291, %293, %cst_271 {dimension_numbers = #tpu.dot_dimension_numbers<[1], [0], [0], [1], [0, 0, 1, 1], [], []>} : vector<16x21xbf16>, vector<21x26xbf16>, vector<16x26xf32> -> vector<16x26xf32>
    %295 = arith.addf %287, %294 : vector<16x26xf32>
    %c1_272 = arith.constant 1 : index
    %c0_273 = arith.constant 0 : index
    %c0_274 = arith.constant 0 : index
    %296 = vector.load %arg0[%c1_272, %c0_273, %c0_274] : memref<2x256x1xf32, #tpu.memory_space<vmem>>, vector<1x256x1xf32>
    %297 = vector.shape_cast %296 : vector<1x256x1xf32> to vector<256x1xf32>
    %298 = vector.extract_strided_slice %0 {offsets = [1, 0], sizes = [1, 11], strides = [1, 1]} : vector<2x11xf32> to vector<1x11xf32>
    %299 = vector.extract_strided_slice %1 {offsets = [1, 0], sizes = [1, 21], strides = [1, 1]} : vector<2x21xf32> to vector<1x21xf32>
    %c0_i32_275 = arith.constant 0 : i32
    %300 = vector.broadcast %c0_i32_275 : i32 to vector<256x11xi32>
    %301 = arith.cmpi eq, %13, %300 : vector<256x11xi32>
    %302 = vector.shape_cast %297 : vector<256x1xf32> to vector<256x1xf32>
    %303 = vector.broadcast %302 : vector<256x1xf32> to vector<256x11xf32>
    %304 = vector.shape_cast %298 : vector<1x11xf32> to vector<1x11xf32>
    %305 = vector.broadcast %304 : vector<1x11xf32> to vector<256x11xf32>
    %306 = arith.select %301, %303, %305 : vector<256x11xi1>, vector<256x11xf32>
    %307 = arith.truncf %306 : vector<256x11xf32> to vector<256x11xbf16>
    %cst_276 = arith.constant 0.000000e+00 : f32
    %308 = vector.broadcast %cst_276 : f32 to vector<64x21xf32>
    %309 = vector.broadcast %2 : vector<1x21xf32> to vector<64x21xf32>
    %310 = arith.addf %308, %309 : vector<64x21xf32>
    %c0_277 = arith.constant 0 : index
    %c0_278 = arith.constant 0 : index
    %c0_279 = arith.constant 0 : index
    %311 = vector.load %arg3[%c0_277, %c0_278, %c0_279] : memref<16x64x256xbf16, #tpu.memory_space<vmem>>, vector<1x64x256xbf16>
    %312 = vector.shape_cast %311 : vector<1x64x256xbf16> to vector<64x256xbf16>
    %cst_280 = arith.constant dense<0.000000e+00> : vector<64x11xf32>
    %313 = tpu.matmul %312, %307, %cst_280 {dimension_numbers = #tpu.dot_dimension_numbers<[1], [0], [0], [1], [0, 0, 1, 1], [], []>} : vector<64x256xbf16>, vector<256x11xbf16>, vector<64x11xf32> -> vector<64x11xf32>
    %314 = arith.truncf %313 : vector<64x11xf32> to vector<64x11xbf16>
    %c0_281 = arith.constant 0 : index
    %c0_282 = arith.constant 0 : index
    %c0_283 = arith.constant 0 : index
    %315 = vector.load %arg4[%c0_281, %c0_282, %c0_283] : memref<16x11x21xbf16, #tpu.memory_space<vmem>>, vector<1x11x21xbf16>
    %316 = vector.shape_cast %315 : vector<1x11x21xbf16> to vector<11x21xbf16>
    %cst_284 = arith.constant dense<0.000000e+00> : vector<64x21xf32>
    %317 = tpu.matmul %314, %316, %cst_284 {dimension_numbers = #tpu.dot_dimension_numbers<[1], [0], [0], [1], [0, 0, 1, 1], [], []>} : vector<64x11xbf16>, vector<11x21xbf16>, vector<64x21xf32> -> vector<64x21xf32>
    %318 = arith.addf %310, %317 : vector<64x21xf32>
    %c1_285 = arith.constant 1 : index
    %c0_286 = arith.constant 0 : index
    %c0_287 = arith.constant 0 : index
    %319 = vector.load %arg3[%c1_285, %c0_286, %c0_287] : memref<16x64x256xbf16, #tpu.memory_space<vmem>>, vector<1x64x256xbf16>
    %320 = vector.shape_cast %319 : vector<1x64x256xbf16> to vector<64x256xbf16>
    %cst_288 = arith.constant dense<0.000000e+00> : vector<64x11xf32>
    %321 = tpu.matmul %320, %307, %cst_288 {dimension_numbers = #tpu.dot_dimension_numbers<[1], [0], [0], [1], [0, 0, 1, 1], [], []>} : vector<64x256xbf16>, vector<256x11xbf16>, vector<64x11xf32> -> vector<64x11xf32>
    %322 = arith.truncf %321 : vector<64x11xf32> to vector<64x11xbf16>
    %c1_289 = arith.constant 1 : index
    %c0_290 = arith.constant 0 : index
    %c0_291 = arith.constant 0 : index
    %323 = vector.load %arg4[%c1_289, %c0_290, %c0_291] : memref<16x11x21xbf16, #tpu.memory_space<vmem>>, vector<1x11x21xbf16>
    %324 = vector.shape_cast %323 : vector<1x11x21xbf16> to vector<11x21xbf16>
    %cst_292 = arith.constant dense<0.000000e+00> : vector<64x21xf32>
    %325 = tpu.matmul %322, %324, %cst_292 {dimension_numbers = #tpu.dot_dimension_numbers<[1], [0], [0], [1], [0, 0, 1, 1], [], []>} : vector<64x11xbf16>, vector<11x21xbf16>, vector<64x21xf32> -> vector<64x21xf32>
    %326 = arith.addf %318, %325 : vector<64x21xf32>
    %c2_293 = arith.constant 2 : index
    %c0_294 = arith.constant 0 : index
    %c0_295 = arith.constant 0 : index
    %327 = vector.load %arg3[%c2_293, %c0_294, %c0_295] : memref<16x64x256xbf16, #tpu.memory_space<vmem>>, vector<1x64x256xbf16>
    %328 = vector.shape_cast %327 : vector<1x64x256xbf16> to vector<64x256xbf16>
    %cst_296 = arith.constant dense<0.000000e+00> : vector<64x11xf32>
    %329 = tpu.matmul %328, %307, %cst_296 {dimension_numbers = #tpu.dot_dimension_numbers<[1], [0], [0], [1], [0, 0, 1, 1], [], []>} : vector<64x256xbf16>, vector<256x11xbf16>, vector<64x11xf32> -> vector<64x11xf32>
    %330 = arith.truncf %329 : vector<64x11xf32> to vector<64x11xbf16>
    %c2_297 = arith.constant 2 : index
    %c0_298 = arith.constant 0 : index
    %c0_299 = arith.constant 0 : index
    %331 = vector.load %arg4[%c2_297, %c0_298, %c0_299] : memref<16x11x21xbf16, #tpu.memory_space<vmem>>, vector<1x11x21xbf16>
    %332 = vector.shape_cast %331 : vector<1x11x21xbf16> to vector<11x21xbf16>
    %cst_300 = arith.constant dense<0.000000e+00> : vector<64x21xf32>
    %333 = tpu.matmul %330, %332, %cst_300 {dimension_numbers = #tpu.dot_dimension_numbers<[1], [0], [0], [1], [0, 0, 1, 1], [], []>} : vector<64x11xbf16>, vector<11x21xbf16>, vector<64x21xf32> -> vector<64x21xf32>
    %334 = arith.addf %326, %333 : vector<64x21xf32>
    %c3_301 = arith.constant 3 : index
    %c0_302 = arith.constant 0 : index
    %c0_303 = arith.constant 0 : index
    %335 = vector.load %arg3[%c3_301, %c0_302, %c0_303] : memref<16x64x256xbf16, #tpu.memory_space<vmem>>, vector<1x64x256xbf16>
    %336 = vector.shape_cast %335 : vector<1x64x256xbf16> to vector<64x256xbf16>
    %cst_304 = arith.constant dense<0.000000e+00> : vector<64x11xf32>
    %337 = tpu.matmul %336, %307, %cst_304 {dimension_numbers = #tpu.dot_dimension_numbers<[1], [0], [0], [1], [0, 0, 1, 1], [], []>} : vector<64x256xbf16>, vector<256x11xbf16>, vector<64x11xf32> -> vector<64x11xf32>
    %338 = arith.truncf %337 : vector<64x11xf32> to vector<64x11xbf16>
    %c3_305 = arith.constant 3 : index
    %c0_306 = arith.constant 0 : index
    %c0_307 = arith.constant 0 : index
    %339 = vector.load %arg4[%c3_305, %c0_306, %c0_307] : memref<16x11x21xbf16, #tpu.memory_space<vmem>>, vector<1x11x21xbf16>
    %340 = vector.shape_cast %339 : vector<1x11x21xbf16> to vector<11x21xbf16>
    %cst_308 = arith.constant dense<0.000000e+00> : vector<64x21xf32>
    %341 = tpu.matmul %338, %340, %cst_308 {dimension_numbers = #tpu.dot_dimension_numbers<[1], [0], [0], [1], [0, 0, 1, 1], [], []>} : vector<64x11xbf16>, vector<11x21xbf16>, vector<64x21xf32> -> vector<64x21xf32>
    %342 = arith.addf %334, %341 : vector<64x21xf32>
    %c4_309 = arith.constant 4 : index
    %c0_310 = arith.constant 0 : index
    %c0_311 = arith.constant 0 : index
    %343 = vector.load %arg3[%c4_309, %c0_310, %c0_311] : memref<16x64x256xbf16, #tpu.memory_space<vmem>>, vector<1x64x256xbf16>
    %344 = vector.shape_cast %343 : vector<1x64x256xbf16> to vector<64x256xbf16>
    %cst_312 = arith.constant dense<0.000000e+00> : vector<64x11xf32>
    %345 = tpu.matmul %344, %307, %cst_312 {dimension_numbers = #tpu.dot_dimension_numbers<[1], [0], [0], [1], [0, 0, 1, 1], [], []>} : vector<64x256xbf16>, vector<256x11xbf16>, vector<64x11xf32> -> vector<64x11xf32>
    %346 = arith.truncf %345 : vector<64x11xf32> to vector<64x11xbf16>
    %c4_313 = arith.constant 4 : index
    %c0_314 = arith.constant 0 : index
    %c0_315 = arith.constant 0 : index
    %347 = vector.load %arg4[%c4_313, %c0_314, %c0_315] : memref<16x11x21xbf16, #tpu.memory_space<vmem>>, vector<1x11x21xbf16>
    %348 = vector.shape_cast %347 : vector<1x11x21xbf16> to vector<11x21xbf16>
    %cst_316 = arith.constant dense<0.000000e+00> : vector<64x21xf32>
    %349 = tpu.matmul %346, %348, %cst_316 {dimension_numbers = #tpu.dot_dimension_numbers<[1], [0], [0], [1], [0, 0, 1, 1], [], []>} : vector<64x11xbf16>, vector<11x21xbf16>, vector<64x21xf32> -> vector<64x21xf32>
    %350 = arith.addf %342, %349 : vector<64x21xf32>
    %c5_317 = arith.constant 5 : index
    %c0_318 = arith.constant 0 : index
    %c0_319 = arith.constant 0 : index
    %351 = vector.load %arg3[%c5_317, %c0_318, %c0_319] : memref<16x64x256xbf16, #tpu.memory_space<vmem>>, vector<1x64x256xbf16>
    %352 = vector.shape_cast %351 : vector<1x64x256xbf16> to vector<64x256xbf16>
    %cst_320 = arith.constant dense<0.000000e+00> : vector<64x11xf32>
    %353 = tpu.matmul %352, %307, %cst_320 {dimension_numbers = #tpu.dot_dimension_numbers<[1], [0], [0], [1], [0, 0, 1, 1], [], []>} : vector<64x256xbf16>, vector<256x11xbf16>, vector<64x11xf32> -> vector<64x11xf32>
    %354 = arith.truncf %353 : vector<64x11xf32> to vector<64x11xbf16>
    %c5_321 = arith.constant 5 : index
    %c0_322 = arith.constant 0 : index
    %c0_323 = arith.constant 0 : index
    %355 = vector.load %arg4[%c5_321, %c0_322, %c0_323] : memref<16x11x21xbf16, #tpu.memory_space<vmem>>, vector<1x11x21xbf16>
    %356 = vector.shape_cast %355 : vector<1x11x21xbf16> to vector<11x21xbf16>
    %cst_324 = arith.constant dense<0.000000e+00> : vector<64x21xf32>
    %357 = tpu.matmul %354, %356, %cst_324 {dimension_numbers = #tpu.dot_dimension_numbers<[1], [0], [0], [1], [0, 0, 1, 1], [], []>} : vector<64x11xbf16>, vector<11x21xbf16>, vector<64x21xf32> -> vector<64x21xf32>
    %358 = arith.addf %350, %357 : vector<64x21xf32>
    %c6_325 = arith.constant 6 : index
    %c0_326 = arith.constant 0 : index
    %c0_327 = arith.constant 0 : index
    %359 = vector.load %arg3[%c6_325, %c0_326, %c0_327] : memref<16x64x256xbf16, #tpu.memory_space<vmem>>, vector<1x64x256xbf16>
    %360 = vector.shape_cast %359 : vector<1x64x256xbf16> to vector<64x256xbf16>
    %cst_328 = arith.constant dense<0.000000e+00> : vector<64x11xf32>
    %361 = tpu.matmul %360, %307, %cst_328 {dimension_numbers = #tpu.dot_dimension_numbers<[1], [0], [0], [1], [0, 0, 1, 1], [], []>} : vector<64x256xbf16>, vector<256x11xbf16>, vector<64x11xf32> -> vector<64x11xf32>
    %362 = arith.truncf %361 : vector<64x11xf32> to vector<64x11xbf16>
    %c6_329 = arith.constant 6 : index
    %c0_330 = arith.constant 0 : index
    %c0_331 = arith.constant 0 : index
    %363 = vector.load %arg4[%c6_329, %c0_330, %c0_331] : memref<16x11x21xbf16, #tpu.memory_space<vmem>>, vector<1x11x21xbf16>
    %364 = vector.shape_cast %363 : vector<1x11x21xbf16> to vector<11x21xbf16>
    %cst_332 = arith.constant dense<0.000000e+00> : vector<64x21xf32>
    %365 = tpu.matmul %362, %364, %cst_332 {dimension_numbers = #tpu.dot_dimension_numbers<[1], [0], [0], [1], [0, 0, 1, 1], [], []>} : vector<64x11xbf16>, vector<11x21xbf16>, vector<64x21xf32> -> vector<64x21xf32>
    %366 = arith.addf %358, %365 : vector<64x21xf32>
    %c7_333 = arith.constant 7 : index
    %c0_334 = arith.constant 0 : index
    %c0_335 = arith.constant 0 : index
    %367 = vector.load %arg3[%c7_333, %c0_334, %c0_335] : memref<16x64x256xbf16, #tpu.memory_space<vmem>>, vector<1x64x256xbf16>
    %368 = vector.shape_cast %367 : vector<1x64x256xbf16> to vector<64x256xbf16>
    %cst_336 = arith.constant dense<0.000000e+00> : vector<64x11xf32>
    %369 = tpu.matmul %368, %307, %cst_336 {dimension_numbers = #tpu.dot_dimension_numbers<[1], [0], [0], [1], [0, 0, 1, 1], [], []>} : vector<64x256xbf16>, vector<256x11xbf16>, vector<64x11xf32> -> vector<64x11xf32>
    %370 = arith.truncf %369 : vector<64x11xf32> to vector<64x11xbf16>
    %c7_337 = arith.constant 7 : index
    %c0_338 = arith.constant 0 : index
    %c0_339 = arith.constant 0 : index
    %371 = vector.load %arg4[%c7_337, %c0_338, %c0_339] : memref<16x11x21xbf16, #tpu.memory_space<vmem>>, vector<1x11x21xbf16>
    %372 = vector.shape_cast %371 : vector<1x11x21xbf16> to vector<11x21xbf16>
    %cst_340 = arith.constant dense<0.000000e+00> : vector<64x21xf32>
    %373 = tpu.matmul %370, %372, %cst_340 {dimension_numbers = #tpu.dot_dimension_numbers<[1], [0], [0], [1], [0, 0, 1, 1], [], []>} : vector<64x11xbf16>, vector<11x21xbf16>, vector<64x21xf32> -> vector<64x21xf32>
    %374 = arith.addf %366, %373 : vector<64x21xf32>
    %c8_341 = arith.constant 8 : index
    %c0_342 = arith.constant 0 : index
    %c0_343 = arith.constant 0 : index
    %375 = vector.load %arg3[%c8_341, %c0_342, %c0_343] : memref<16x64x256xbf16, #tpu.memory_space<vmem>>, vector<1x64x256xbf16>
    %376 = vector.shape_cast %375 : vector<1x64x256xbf16> to vector<64x256xbf16>
    %cst_344 = arith.constant dense<0.000000e+00> : vector<64x11xf32>
    %377 = tpu.matmul %376, %307, %cst_344 {dimension_numbers = #tpu.dot_dimension_numbers<[1], [0], [0], [1], [0, 0, 1, 1], [], []>} : vector<64x256xbf16>, vector<256x11xbf16>, vector<64x11xf32> -> vector<64x11xf32>
    %378 = arith.truncf %377 : vector<64x11xf32> to vector<64x11xbf16>
    %c8_345 = arith.constant 8 : index
    %c0_346 = arith.constant 0 : index
    %c0_347 = arith.constant 0 : index
    %379 = vector.load %arg4[%c8_345, %c0_346, %c0_347] : memref<16x11x21xbf16, #tpu.memory_space<vmem>>, vector<1x11x21xbf16>
    %380 = vector.shape_cast %379 : vector<1x11x21xbf16> to vector<11x21xbf16>
    %cst_348 = arith.constant dense<0.000000e+00> : vector<64x21xf32>
    %381 = tpu.matmul %378, %380, %cst_348 {dimension_numbers = #tpu.dot_dimension_numbers<[1], [0], [0], [1], [0, 0, 1, 1], [], []>} : vector<64x11xbf16>, vector<11x21xbf16>, vector<64x21xf32> -> vector<64x21xf32>
    %382 = arith.addf %374, %381 : vector<64x21xf32>
    %c9_349 = arith.constant 9 : index
    %c0_350 = arith.constant 0 : index
    %c0_351 = arith.constant 0 : index
    %383 = vector.load %arg3[%c9_349, %c0_350, %c0_351] : memref<16x64x256xbf16, #tpu.memory_space<vmem>>, vector<1x64x256xbf16>
    %384 = vector.shape_cast %383 : vector<1x64x256xbf16> to vector<64x256xbf16>
    %cst_352 = arith.constant dense<0.000000e+00> : vector<64x11xf32>
    %385 = tpu.matmul %384, %307, %cst_352 {dimension_numbers = #tpu.dot_dimension_numbers<[1], [0], [0], [1], [0, 0, 1, 1], [], []>} : vector<64x256xbf16>, vector<256x11xbf16>, vector<64x11xf32> -> vector<64x11xf32>
    %386 = arith.truncf %385 : vector<64x11xf32> to vector<64x11xbf16>
    %c9_353 = arith.constant 9 : index
    %c0_354 = arith.constant 0 : index
    %c0_355 = arith.constant 0 : index
    %387 = vector.load %arg4[%c9_353, %c0_354, %c0_355] : memref<16x11x21xbf16, #tpu.memory_space<vmem>>, vector<1x11x21xbf16>
    %388 = vector.shape_cast %387 : vector<1x11x21xbf16> to vector<11x21xbf16>
    %cst_356 = arith.constant dense<0.000000e+00> : vector<64x21xf32>
    %389 = tpu.matmul %386, %388, %cst_356 {dimension_numbers = #tpu.dot_dimension_numbers<[1], [0], [0], [1], [0, 0, 1, 1], [], []>} : vector<64x11xbf16>, vector<11x21xbf16>, vector<64x21xf32> -> vector<64x21xf32>
    %390 = arith.addf %382, %389 : vector<64x21xf32>
    %c10_357 = arith.constant 10 : index
    %c0_358 = arith.constant 0 : index
    %c0_359 = arith.constant 0 : index
    %391 = vector.load %arg3[%c10_357, %c0_358, %c0_359] : memref<16x64x256xbf16, #tpu.memory_space<vmem>>, vector<1x64x256xbf16>
    %392 = vector.shape_cast %391 : vector<1x64x256xbf16> to vector<64x256xbf16>
    %cst_360 = arith.constant dense<0.000000e+00> : vector<64x11xf32>
    %393 = tpu.matmul %392, %307, %cst_360 {dimension_numbers = #tpu.dot_dimension_numbers<[1], [0], [0], [1], [0, 0, 1, 1], [], []>} : vector<64x256xbf16>, vector<256x11xbf16>, vector<64x11xf32> -> vector<64x11xf32>
    %394 = arith.truncf %393 : vector<64x11xf32> to vector<64x11xbf16>
    %c10_361 = arith.constant 10 : index
    %c0_362 = arith.constant 0 : index
    %c0_363 = arith.constant 0 : index
    %395 = vector.load %arg4[%c10_361, %c0_362, %c0_363] : memref<16x11x21xbf16, #tpu.memory_space<vmem>>, vector<1x11x21xbf16>
    %396 = vector.shape_cast %395 : vector<1x11x21xbf16> to vector<11x21xbf16>
    %cst_364 = arith.constant dense<0.000000e+00> : vector<64x21xf32>
    %397 = tpu.matmul %394, %396, %cst_364 {dimension_numbers = #tpu.dot_dimension_numbers<[1], [0], [0], [1], [0, 0, 1, 1], [], []>} : vector<64x11xbf16>, vector<11x21xbf16>, vector<64x21xf32> -> vector<64x21xf32>
    %398 = arith.addf %390, %397 : vector<64x21xf32>
    %c11_365 = arith.constant 11 : index
    %c0_366 = arith.constant 0 : index
    %c0_367 = arith.constant 0 : index
    %399 = vector.load %arg3[%c11_365, %c0_366, %c0_367] : memref<16x64x256xbf16, #tpu.memory_space<vmem>>, vector<1x64x256xbf16>
    %400 = vector.shape_cast %399 : vector<1x64x256xbf16> to vector<64x256xbf16>
    %cst_368 = arith.constant dense<0.000000e+00> : vector<64x11xf32>
    %401 = tpu.matmul %400, %307, %cst_368 {dimension_numbers = #tpu.dot_dimension_numbers<[1], [0], [0], [1], [0, 0, 1, 1], [], []>} : vector<64x256xbf16>, vector<256x11xbf16>, vector<64x11xf32> -> vector<64x11xf32>
    %402 = arith.truncf %401 : vector<64x11xf32> to vector<64x11xbf16>
    %c11_369 = arith.constant 11 : index
    %c0_370 = arith.constant 0 : index
    %c0_371 = arith.constant 0 : index
    %403 = vector.load %arg4[%c11_369, %c0_370, %c0_371] : memref<16x11x21xbf16, #tpu.memory_space<vmem>>, vector<1x11x21xbf16>
    %404 = vector.shape_cast %403 : vector<1x11x21xbf16> to vector<11x21xbf16>
    %cst_372 = arith.constant dense<0.000000e+00> : vector<64x21xf32>
    %405 = tpu.matmul %402, %404, %cst_372 {dimension_numbers = #tpu.dot_dimension_numbers<[1], [0], [0], [1], [0, 0, 1, 1], [], []>} : vector<64x11xbf16>, vector<11x21xbf16>, vector<64x21xf32> -> vector<64x21xf32>
    %406 = arith.addf %398, %405 : vector<64x21xf32>
    %c12_373 = arith.constant 12 : index
    %c0_374 = arith.constant 0 : index
    %c0_375 = arith.constant 0 : index
    %407 = vector.load %arg3[%c12_373, %c0_374, %c0_375] : memref<16x64x256xbf16, #tpu.memory_space<vmem>>, vector<1x64x256xbf16>
    %408 = vector.shape_cast %407 : vector<1x64x256xbf16> to vector<64x256xbf16>
    %cst_376 = arith.constant dense<0.000000e+00> : vector<64x11xf32>
    %409 = tpu.matmul %408, %307, %cst_376 {dimension_numbers = #tpu.dot_dimension_numbers<[1], [0], [0], [1], [0, 0, 1, 1], [], []>} : vector<64x256xbf16>, vector<256x11xbf16>, vector<64x11xf32> -> vector<64x11xf32>
    %410 = arith.truncf %409 : vector<64x11xf32> to vector<64x11xbf16>
    %c12_377 = arith.constant 12 : index
    %c0_378 = arith.constant 0 : index
    %c0_379 = arith.constant 0 : index
    %411 = vector.load %arg4[%c12_377, %c0_378, %c0_379] : memref<16x11x21xbf16, #tpu.memory_space<vmem>>, vector<1x11x21xbf16>
    %412 = vector.shape_cast %411 : vector<1x11x21xbf16> to vector<11x21xbf16>
    %cst_380 = arith.constant dense<0.000000e+00> : vector<64x21xf32>
    %413 = tpu.matmul %410, %412, %cst_380 {dimension_numbers = #tpu.dot_dimension_numbers<[1], [0], [0], [1], [0, 0, 1, 1], [], []>} : vector<64x11xbf16>, vector<11x21xbf16>, vector<64x21xf32> -> vector<64x21xf32>
    %414 = arith.addf %406, %413 : vector<64x21xf32>
    %c13_381 = arith.constant 13 : index
    %c0_382 = arith.constant 0 : index
    %c0_383 = arith.constant 0 : index
    %415 = vector.load %arg3[%c13_381, %c0_382, %c0_383] : memref<16x64x256xbf16, #tpu.memory_space<vmem>>, vector<1x64x256xbf16>
    %416 = vector.shape_cast %415 : vector<1x64x256xbf16> to vector<64x256xbf16>
    %cst_384 = arith.constant dense<0.000000e+00> : vector<64x11xf32>
    %417 = tpu.matmul %416, %307, %cst_384 {dimension_numbers = #tpu.dot_dimension_numbers<[1], [0], [0], [1], [0, 0, 1, 1], [], []>} : vector<64x256xbf16>, vector<256x11xbf16>, vector<64x11xf32> -> vector<64x11xf32>
    %418 = arith.truncf %417 : vector<64x11xf32> to vector<64x11xbf16>
    %c13_385 = arith.constant 13 : index
    %c0_386 = arith.constant 0 : index
    %c0_387 = arith.constant 0 : index
    %419 = vector.load %arg4[%c13_385, %c0_386, %c0_387] : memref<16x11x21xbf16, #tpu.memory_space<vmem>>, vector<1x11x21xbf16>
    %420 = vector.shape_cast %419 : vector<1x11x21xbf16> to vector<11x21xbf16>
    %cst_388 = arith.constant dense<0.000000e+00> : vector<64x21xf32>
    %421 = tpu.matmul %418, %420, %cst_388 {dimension_numbers = #tpu.dot_dimension_numbers<[1], [0], [0], [1], [0, 0, 1, 1], [], []>} : vector<64x11xbf16>, vector<11x21xbf16>, vector<64x21xf32> -> vector<64x21xf32>
    %422 = arith.addf %414, %421 : vector<64x21xf32>
    %c14_389 = arith.constant 14 : index
    %c0_390 = arith.constant 0 : index
    %c0_391 = arith.constant 0 : index
    %423 = vector.load %arg3[%c14_389, %c0_390, %c0_391] : memref<16x64x256xbf16, #tpu.memory_space<vmem>>, vector<1x64x256xbf16>
    %424 = vector.shape_cast %423 : vector<1x64x256xbf16> to vector<64x256xbf16>
    %cst_392 = arith.constant dense<0.000000e+00> : vector<64x11xf32>
    %425 = tpu.matmul %424, %307, %cst_392 {dimension_numbers = #tpu.dot_dimension_numbers<[1], [0], [0], [1], [0, 0, 1, 1], [], []>} : vector<64x256xbf16>, vector<256x11xbf16>, vector<64x11xf32> -> vector<64x11xf32>
    %426 = arith.truncf %425 : vector<64x11xf32> to vector<64x11xbf16>
    %c14_393 = arith.constant 14 : index
    %c0_394 = arith.constant 0 : index
    %c0_395 = arith.constant 0 : index
    %427 = vector.load %arg4[%c14_393, %c0_394, %c0_395] : memref<16x11x21xbf16, #tpu.memory_space<vmem>>, vector<1x11x21xbf16>
    %428 = vector.shape_cast %427 : vector<1x11x21xbf16> to vector<11x21xbf16>
    %cst_396 = arith.constant dense<0.000000e+00> : vector<64x21xf32>
    %429 = tpu.matmul %426, %428, %cst_396 {dimension_numbers = #tpu.dot_dimension_numbers<[1], [0], [0], [1], [0, 0, 1, 1], [], []>} : vector<64x11xbf16>, vector<11x21xbf16>, vector<64x21xf32> -> vector<64x21xf32>
    %430 = arith.addf %422, %429 : vector<64x21xf32>
    %c15_397 = arith.constant 15 : index
    %c0_398 = arith.constant 0 : index
    %c0_399 = arith.constant 0 : index
    %431 = vector.load %arg3[%c15_397, %c0_398, %c0_399] : memref<16x64x256xbf16, #tpu.memory_space<vmem>>, vector<1x64x256xbf16>
    %432 = vector.shape_cast %431 : vector<1x64x256xbf16> to vector<64x256xbf16>
    %cst_400 = arith.constant dense<0.000000e+00> : vector<64x11xf32>
    %433 = tpu.matmul %432, %307, %cst_400 {dimension_numbers = #tpu.dot_dimension_numbers<[1], [0], [0], [1], [0, 0, 1, 1], [], []>} : vector<64x256xbf16>, vector<256x11xbf16>, vector<64x11xf32> -> vector<64x11xf32>
    %434 = arith.truncf %433 : vector<64x11xf32> to vector<64x11xbf16>
    %c15_401 = arith.constant 15 : index
    %c0_402 = arith.constant 0 : index
    %c0_403 = arith.constant 0 : index
    %435 = vector.load %arg4[%c15_401, %c0_402, %c0_403] : memref<16x11x21xbf16, #tpu.memory_space<vmem>>, vector<1x11x21xbf16>
    %436 = vector.shape_cast %435 : vector<1x11x21xbf16> to vector<11x21xbf16>
    %cst_404 = arith.constant dense<0.000000e+00> : vector<64x21xf32>
    %437 = tpu.matmul %434, %436, %cst_404 {dimension_numbers = #tpu.dot_dimension_numbers<[1], [0], [0], [1], [0, 0, 1, 1], [], []>} : vector<64x11xbf16>, vector<11x21xbf16>, vector<64x21xf32> -> vector<64x21xf32>
    %438 = arith.addf %430, %437 : vector<64x21xf32>
    %cst_405 = arith.constant 0.000000e+00 : f32
    %439 = vector.broadcast %cst_405 : f32 to vector<64x21xf32>
    %440 = arith.cmpf ogt, %438, %439 : vector<64x21xf32>
    %cst_406 = arith.constant 2.000000e-01 : f32
    %441 = vector.broadcast %cst_406 : f32 to vector<64x21xf32>
    %442 = arith.mulf %441, %438 : vector<64x21xf32>
    %443 = arith.select %440, %438, %442 : vector<64x21xi1>, vector<64x21xf32>
    %444 = vector.broadcast %299 : vector<1x21xf32> to vector<64x21xf32>
    %445 = arith.addf %443, %444 : vector<64x21xf32>
    %446 = arith.truncf %445 : vector<64x21xf32> to vector<64x21xbf16>
    %cst_407 = arith.constant 0.000000e+00 : f32
    %447 = vector.broadcast %cst_407 : f32 to vector<16x26xf32>
    %448 = vector.broadcast %3 : vector<1x26xf32> to vector<16x26xf32>
    %449 = arith.addf %447, %448 : vector<16x26xf32>
    %c0_408 = arith.constant 0 : index
    %c0_409 = arith.constant 0 : index
    %c0_410 = arith.constant 0 : index
    %450 = vector.load %arg6[%c0_408, %c0_409, %c0_410] : memref<16x16x64xbf16, #tpu.memory_space<vmem>>, vector<1x16x64xbf16>
    %451 = vector.shape_cast %450 : vector<1x16x64xbf16> to vector<16x64xbf16>
    %cst_411 = arith.constant dense<0.000000e+00> : vector<16x21xf32>
    %452 = tpu.matmul %451, %446, %cst_411 {dimension_numbers = #tpu.dot_dimension_numbers<[1], [0], [0], [1], [0, 0, 1, 1], [], []>} : vector<16x64xbf16>, vector<64x21xbf16>, vector<16x21xf32> -> vector<16x21xf32>
    %453 = arith.truncf %452 : vector<16x21xf32> to vector<16x21xbf16>
    %c0_412 = arith.constant 0 : index
    %c0_413 = arith.constant 0 : index
    %c0_414 = arith.constant 0 : index
    %454 = vector.load %arg7[%c0_412, %c0_413, %c0_414] : memref<16x21x26xbf16, #tpu.memory_space<vmem>>, vector<1x21x26xbf16>
    %455 = vector.shape_cast %454 : vector<1x21x26xbf16> to vector<21x26xbf16>
    %cst_415 = arith.constant dense<0.000000e+00> : vector<16x26xf32>
    %456 = tpu.matmul %453, %455, %cst_415 {dimension_numbers = #tpu.dot_dimension_numbers<[1], [0], [0], [1], [0, 0, 1, 1], [], []>} : vector<16x21xbf16>, vector<21x26xbf16>, vector<16x26xf32> -> vector<16x26xf32>
    %457 = arith.addf %449, %456 : vector<16x26xf32>
    %c1_416 = arith.constant 1 : index
    %c0_417 = arith.constant 0 : index
    %c0_418 = arith.constant 0 : index
    %458 = vector.load %arg6[%c1_416, %c0_417, %c0_418] : memref<16x16x64xbf16, #tpu.memory_space<vmem>>, vector<1x16x64xbf16>
    %459 = vector.shape_cast %458 : vector<1x16x64xbf16> to vector<16x64xbf16>
    %cst_419 = arith.constant dense<0.000000e+00> : vector<16x21xf32>
    %460 = tpu.matmul %459, %446, %cst_419 {dimension_numbers = #tpu.dot_dimension_numbers<[1], [0], [0], [1], [0, 0, 1, 1], [], []>} : vector<16x64xbf16>, vector<64x21xbf16>, vector<16x21xf32> -> vector<16x21xf32>
    %461 = arith.truncf %460 : vector<16x21xf32> to vector<16x21xbf16>
    %c1_420 = arith.constant 1 : index
    %c0_421 = arith.constant 0 : index
    %c0_422 = arith.constant 0 : index
    %462 = vector.load %arg7[%c1_420, %c0_421, %c0_422] : memref<16x21x26xbf16, #tpu.memory_space<vmem>>, vector<1x21x26xbf16>
    %463 = vector.shape_cast %462 : vector<1x21x26xbf16> to vector<21x26xbf16>
    %cst_423 = arith.constant dense<0.000000e+00> : vector<16x26xf32>
    %464 = tpu.matmul %461, %463, %cst_423 {dimension_numbers = #tpu.dot_dimension_numbers<[1], [0], [0], [1], [0, 0, 1, 1], [], []>} : vector<16x21xbf16>, vector<21x26xbf16>, vector<16x26xf32> -> vector<16x26xf32>
    %465 = arith.addf %457, %464 : vector<16x26xf32>
    %c2_424 = arith.constant 2 : index
    %c0_425 = arith.constant 0 : index
    %c0_426 = arith.constant 0 : index
    %466 = vector.load %arg6[%c2_424, %c0_425, %c0_426] : memref<16x16x64xbf16, #tpu.memory_space<vmem>>, vector<1x16x64xbf16>
    %467 = vector.shape_cast %466 : vector<1x16x64xbf16> to vector<16x64xbf16>
    %cst_427 = arith.constant dense<0.000000e+00> : vector<16x21xf32>
    %468 = tpu.matmul %467, %446, %cst_427 {dimension_numbers = #tpu.dot_dimension_numbers<[1], [0], [0], [1], [0, 0, 1, 1], [], []>} : vector<16x64xbf16>, vector<64x21xbf16>, vector<16x21xf32> -> vector<16x21xf32>
    %469 = arith.truncf %468 : vector<16x21xf32> to vector<16x21xbf16>
    %c2_428 = arith.constant 2 : index
    %c0_429 = arith.constant 0 : index
    %c0_430 = arith.constant 0 : index
    %470 = vector.load %arg7[%c2_428, %c0_429, %c0_430] : memref<16x21x26xbf16, #tpu.memory_space<vmem>>, vector<1x21x26xbf16>
    %471 = vector.shape_cast %470 : vector<1x21x26xbf16> to vector<21x26xbf16>
    %cst_431 = arith.constant dense<0.000000e+00> : vector<16x26xf32>
    %472 = tpu.matmul %469, %471, %cst_431 {dimension_numbers = #tpu.dot_dimension_numbers<[1], [0], [0], [1], [0, 0, 1, 1], [], []>} : vector<16x21xbf16>, vector<21x26xbf16>, vector<16x26xf32> -> vector<16x26xf32>
    %473 = arith.addf %465, %472 : vector<16x26xf32>
    %c3_432 = arith.constant 3 : index
    %c0_433 = arith.constant 0 : index
    %c0_434 = arith.constant 0 : index
    %474 = vector.load %arg6[%c3_432, %c0_433, %c0_434] : memref<16x16x64xbf16, #tpu.memory_space<vmem>>, vector<1x16x64xbf16>
    %475 = vector.shape_cast %474 : vector<1x16x64xbf16> to vector<16x64xbf16>
    %cst_435 = arith.constant dense<0.000000e+00> : vector<16x21xf32>
    %476 = tpu.matmul %475, %446, %cst_435 {dimension_numbers = #tpu.dot_dimension_numbers<[1], [0], [0], [1], [0, 0, 1, 1], [], []>} : vector<16x64xbf16>, vector<64x21xbf16>, vector<16x21xf32> -> vector<16x21xf32>
    %477 = arith.truncf %476 : vector<16x21xf32> to vector<16x21xbf16>
    %c3_436 = arith.constant 3 : index
    %c0_437 = arith.constant 0 : index
    %c0_438 = arith.constant 0 : index
    %478 = vector.load %arg7[%c3_436, %c0_437, %c0_438] : memref<16x21x26xbf16, #tpu.memory_space<vmem>>, vector<1x21x26xbf16>
    %479 = vector.shape_cast %478 : vector<1x21x26xbf16> to vector<21x26xbf16>
    %cst_439 = arith.constant dense<0.000000e+00> : vector<16x26xf32>
    %480 = tpu.matmul %477, %479, %cst_439 {dimension_numbers = #tpu.dot_dimension_numbers<[1], [0], [0], [1], [0, 0, 1, 1], [], []>} : vector<16x21xbf16>, vector<21x26xbf16>, vector<16x26xf32> -> vector<16x26xf32>
    %481 = arith.addf %473, %480 : vector<16x26xf32>
    %c4_440 = arith.constant 4 : index
    %c0_441 = arith.constant 0 : index
    %c0_442 = arith.constant 0 : index
    %482 = vector.load %arg6[%c4_440, %c0_441, %c0_442] : memref<16x16x64xbf16, #tpu.memory_space<vmem>>, vector<1x16x64xbf16>
    %483 = vector.shape_cast %482 : vector<1x16x64xbf16> to vector<16x64xbf16>
    %cst_443 = arith.constant dense<0.000000e+00> : vector<16x21xf32>
    %484 = tpu.matmul %483, %446, %cst_443 {dimension_numbers = #tpu.dot_dimension_numbers<[1], [0], [0], [1], [0, 0, 1, 1], [], []>} : vector<16x64xbf16>, vector<64x21xbf16>, vector<16x21xf32> -> vector<16x21xf32>
    %485 = arith.truncf %484 : vector<16x21xf32> to vector<16x21xbf16>
    %c4_444 = arith.constant 4 : index
    %c0_445 = arith.constant 0 : index
    %c0_446 = arith.constant 0 : index
    %486 = vector.load %arg7[%c4_444, %c0_445, %c0_446] : memref<16x21x26xbf16, #tpu.memory_space<vmem>>, vector<1x21x26xbf16>
    %487 = vector.shape_cast %486 : vector<1x21x26xbf16> to vector<21x26xbf16>
    %cst_447 = arith.constant dense<0.000000e+00> : vector<16x26xf32>
    %488 = tpu.matmul %485, %487, %cst_447 {dimension_numbers = #tpu.dot_dimension_numbers<[1], [0], [0], [1], [0, 0, 1, 1], [], []>} : vector<16x21xbf16>, vector<21x26xbf16>, vector<16x26xf32> -> vector<16x26xf32>
    %489 = arith.addf %481, %488 : vector<16x26xf32>
    %c5_448 = arith.constant 5 : index
    %c0_449 = arith.constant 0 : index
    %c0_450 = arith.constant 0 : index
    %490 = vector.load %arg6[%c5_448, %c0_449, %c0_450] : memref<16x16x64xbf16, #tpu.memory_space<vmem>>, vector<1x16x64xbf16>
    %491 = vector.shape_cast %490 : vector<1x16x64xbf16> to vector<16x64xbf16>
    %cst_451 = arith.constant dense<0.000000e+00> : vector<16x21xf32>
    %492 = tpu.matmul %491, %446, %cst_451 {dimension_numbers = #tpu.dot_dimension_numbers<[1], [0], [0], [1], [0, 0, 1, 1], [], []>} : vector<16x64xbf16>, vector<64x21xbf16>, vector<16x21xf32> -> vector<16x21xf32>
    %493 = arith.truncf %492 : vector<16x21xf32> to vector<16x21xbf16>
    %c5_452 = arith.constant 5 : index
    %c0_453 = arith.constant 0 : index
    %c0_454 = arith.constant 0 : index
    %494 = vector.load %arg7[%c5_452, %c0_453, %c0_454] : memref<16x21x26xbf16, #tpu.memory_space<vmem>>, vector<1x21x26xbf16>
    %495 = vector.shape_cast %494 : vector<1x21x26xbf16> to vector<21x26xbf16>
    %cst_455 = arith.constant dense<0.000000e+00> : vector<16x26xf32>
    %496 = tpu.matmul %493, %495, %cst_455 {dimension_numbers = #tpu.dot_dimension_numbers<[1], [0], [0], [1], [0, 0, 1, 1], [], []>} : vector<16x21xbf16>, vector<21x26xbf16>, vector<16x26xf32> -> vector<16x26xf32>
    %497 = arith.addf %489, %496 : vector<16x26xf32>
    %c6_456 = arith.constant 6 : index
    %c0_457 = arith.constant 0 : index
    %c0_458 = arith.constant 0 : index
    %498 = vector.load %arg6[%c6_456, %c0_457, %c0_458] : memref<16x16x64xbf16, #tpu.memory_space<vmem>>, vector<1x16x64xbf16>
    %499 = vector.shape_cast %498 : vector<1x16x64xbf16> to vector<16x64xbf16>
    %cst_459 = arith.constant dense<0.000000e+00> : vector<16x21xf32>
    %500 = tpu.matmul %499, %446, %cst_459 {dimension_numbers = #tpu.dot_dimension_numbers<[1], [0], [0], [1], [0, 0, 1, 1], [], []>} : vector<16x64xbf16>, vector<64x21xbf16>, vector<16x21xf32> -> vector<16x21xf32>
    %501 = arith.truncf %500 : vector<16x21xf32> to vector<16x21xbf16>
    %c6_460 = arith.constant 6 : index
    %c0_461 = arith.constant 0 : index
    %c0_462 = arith.constant 0 : index
    %502 = vector.load %arg7[%c6_460, %c0_461, %c0_462] : memref<16x21x26xbf16, #tpu.memory_space<vmem>>, vector<1x21x26xbf16>
    %503 = vector.shape_cast %502 : vector<1x21x26xbf16> to vector<21x26xbf16>
    %cst_463 = arith.constant dense<0.000000e+00> : vector<16x26xf32>
    %504 = tpu.matmul %501, %503, %cst_463 {dimension_numbers = #tpu.dot_dimension_numbers<[1], [0], [0], [1], [0, 0, 1, 1], [], []>} : vector<16x21xbf16>, vector<21x26xbf16>, vector<16x26xf32> -> vector<16x26xf32>
    %505 = arith.addf %497, %504 : vector<16x26xf32>
    %c7_464 = arith.constant 7 : index
    %c0_465 = arith.constant 0 : index
    %c0_466 = arith.constant 0 : index
    %506 = vector.load %arg6[%c7_464, %c0_465, %c0_466] : memref<16x16x64xbf16, #tpu.memory_space<vmem>>, vector<1x16x64xbf16>
    %507 = vector.shape_cast %506 : vector<1x16x64xbf16> to vector<16x64xbf16>
    %cst_467 = arith.constant dense<0.000000e+00> : vector<16x21xf32>
    %508 = tpu.matmul %507, %446, %cst_467 {dimension_numbers = #tpu.dot_dimension_numbers<[1], [0], [0], [1], [0, 0, 1, 1], [], []>} : vector<16x64xbf16>, vector<64x21xbf16>, vector<16x21xf32> -> vector<16x21xf32>
    %509 = arith.truncf %508 : vector<16x21xf32> to vector<16x21xbf16>
    %c7_468 = arith.constant 7 : index
    %c0_469 = arith.constant 0 : index
    %c0_470 = arith.constant 0 : index
    %510 = vector.load %arg7[%c7_468, %c0_469, %c0_470] : memref<16x21x26xbf16, #tpu.memory_space<vmem>>, vector<1x21x26xbf16>
    %511 = vector.shape_cast %510 : vector<1x21x26xbf16> to vector<21x26xbf16>
    %cst_471 = arith.constant dense<0.000000e+00> : vector<16x26xf32>
    %512 = tpu.matmul %509, %511, %cst_471 {dimension_numbers = #tpu.dot_dimension_numbers<[1], [0], [0], [1], [0, 0, 1, 1], [], []>} : vector<16x21xbf16>, vector<21x26xbf16>, vector<16x26xf32> -> vector<16x26xf32>
    %513 = arith.addf %505, %512 : vector<16x26xf32>
    %c8_472 = arith.constant 8 : index
    %c0_473 = arith.constant 0 : index
    %c0_474 = arith.constant 0 : index
    %514 = vector.load %arg6[%c8_472, %c0_473, %c0_474] : memref<16x16x64xbf16, #tpu.memory_space<vmem>>, vector<1x16x64xbf16>
    %515 = vector.shape_cast %514 : vector<1x16x64xbf16> to vector<16x64xbf16>
    %cst_475 = arith.constant dense<0.000000e+00> : vector<16x21xf32>
    %516 = tpu.matmul %515, %446, %cst_475 {dimension_numbers = #tpu.dot_dimension_numbers<[1], [0], [0], [1], [0, 0, 1, 1], [], []>} : vector<16x64xbf16>, vector<64x21xbf16>, vector<16x21xf32> -> vector<16x21xf32>
    %517 = arith.truncf %516 : vector<16x21xf32> to vector<16x21xbf16>
    %c8_476 = arith.constant 8 : index
    %c0_477 = arith.constant 0 : index
    %c0_478 = arith.constant 0 : index
    %518 = vector.load %arg7[%c8_476, %c0_477, %c0_478] : memref<16x21x26xbf16, #tpu.memory_space<vmem>>, vector<1x21x26xbf16>
    %519 = vector.shape_cast %518 : vector<1x21x26xbf16> to vector<21x26xbf16>
    %cst_479 = arith.constant dense<0.000000e+00> : vector<16x26xf32>
    %520 = tpu.matmul %517, %519, %cst_479 {dimension_numbers = #tpu.dot_dimension_numbers<[1], [0], [0], [1], [0, 0, 1, 1], [], []>} : vector<16x21xbf16>, vector<21x26xbf16>, vector<16x26xf32> -> vector<16x26xf32>
    %521 = arith.addf %513, %520 : vector<16x26xf32>
    %c9_480 = arith.constant 9 : index
    %c0_481 = arith.constant 0 : index
    %c0_482 = arith.constant 0 : index
    %522 = vector.load %arg6[%c9_480, %c0_481, %c0_482] : memref<16x16x64xbf16, #tpu.memory_space<vmem>>, vector<1x16x64xbf16>
    %523 = vector.shape_cast %522 : vector<1x16x64xbf16> to vector<16x64xbf16>
    %cst_483 = arith.constant dense<0.000000e+00> : vector<16x21xf32>
    %524 = tpu.matmul %523, %446, %cst_483 {dimension_numbers = #tpu.dot_dimension_numbers<[1], [0], [0], [1], [0, 0, 1, 1], [], []>} : vector<16x64xbf16>, vector<64x21xbf16>, vector<16x21xf32> -> vector<16x21xf32>
    %525 = arith.truncf %524 : vector<16x21xf32> to vector<16x21xbf16>
    %c9_484 = arith.constant 9 : index
    %c0_485 = arith.constant 0 : index
    %c0_486 = arith.constant 0 : index
    %526 = vector.load %arg7[%c9_484, %c0_485, %c0_486] : memref<16x21x26xbf16, #tpu.memory_space<vmem>>, vector<1x21x26xbf16>
    %527 = vector.shape_cast %526 : vector<1x21x26xbf16> to vector<21x26xbf16>
    %cst_487 = arith.constant dense<0.000000e+00> : vector<16x26xf32>
    %528 = tpu.matmul %525, %527, %cst_487 {dimension_numbers = #tpu.dot_dimension_numbers<[1], [0], [0], [1], [0, 0, 1, 1], [], []>} : vector<16x21xbf16>, vector<21x26xbf16>, vector<16x26xf32> -> vector<16x26xf32>
    %529 = arith.addf %521, %528 : vector<16x26xf32>
    %c10_488 = arith.constant 10 : index
    %c0_489 = arith.constant 0 : index
    %c0_490 = arith.constant 0 : index
    %530 = vector.load %arg6[%c10_488, %c0_489, %c0_490] : memref<16x16x64xbf16, #tpu.memory_space<vmem>>, vector<1x16x64xbf16>
    %531 = vector.shape_cast %530 : vector<1x16x64xbf16> to vector<16x64xbf16>
    %cst_491 = arith.constant dense<0.000000e+00> : vector<16x21xf32>
    %532 = tpu.matmul %531, %446, %cst_491 {dimension_numbers = #tpu.dot_dimension_numbers<[1], [0], [0], [1], [0, 0, 1, 1], [], []>} : vector<16x64xbf16>, vector<64x21xbf16>, vector<16x21xf32> -> vector<16x21xf32>
    %533 = arith.truncf %532 : vector<16x21xf32> to vector<16x21xbf16>
    %c10_492 = arith.constant 10 : index
    %c0_493 = arith.constant 0 : index
    %c0_494 = arith.constant 0 : index
    %534 = vector.load %arg7[%c10_492, %c0_493, %c0_494] : memref<16x21x26xbf16, #tpu.memory_space<vmem>>, vector<1x21x26xbf16>
    %535 = vector.shape_cast %534 : vector<1x21x26xbf16> to vector<21x26xbf16>
    %cst_495 = arith.constant dense<0.000000e+00> : vector<16x26xf32>
    %536 = tpu.matmul %533, %535, %cst_495 {dimension_numbers = #tpu.dot_dimension_numbers<[1], [0], [0], [1], [0, 0, 1, 1], [], []>} : vector<16x21xbf16>, vector<21x26xbf16>, vector<16x26xf32> -> vector<16x26xf32>
    %537 = arith.addf %529, %536 : vector<16x26xf32>
    %c11_496 = arith.constant 11 : index
    %c0_497 = arith.constant 0 : index
    %c0_498 = arith.constant 0 : index
    %538 = vector.load %arg6[%c11_496, %c0_497, %c0_498] : memref<16x16x64xbf16, #tpu.memory_space<vmem>>, vector<1x16x64xbf16>
    %539 = vector.shape_cast %538 : vector<1x16x64xbf16> to vector<16x64xbf16>
    %cst_499 = arith.constant dense<0.000000e+00> : vector<16x21xf32>
    %540 = tpu.matmul %539, %446, %cst_499 {dimension_numbers = #tpu.dot_dimension_numbers<[1], [0], [0], [1], [0, 0, 1, 1], [], []>} : vector<16x64xbf16>, vector<64x21xbf16>, vector<16x21xf32> -> vector<16x21xf32>
    %541 = arith.truncf %540 : vector<16x21xf32> to vector<16x21xbf16>
    %c11_500 = arith.constant 11 : index
    %c0_501 = arith.constant 0 : index
    %c0_502 = arith.constant 0 : index
    %542 = vector.load %arg7[%c11_500, %c0_501, %c0_502] : memref<16x21x26xbf16, #tpu.memory_space<vmem>>, vector<1x21x26xbf16>
    %543 = vector.shape_cast %542 : vector<1x21x26xbf16> to vector<21x26xbf16>
    %cst_503 = arith.constant dense<0.000000e+00> : vector<16x26xf32>
    %544 = tpu.matmul %541, %543, %cst_503 {dimension_numbers = #tpu.dot_dimension_numbers<[1], [0], [0], [1], [0, 0, 1, 1], [], []>} : vector<16x21xbf16>, vector<21x26xbf16>, vector<16x26xf32> -> vector<16x26xf32>
    %545 = arith.addf %537, %544 : vector<16x26xf32>
    %c12_504 = arith.constant 12 : index
    %c0_505 = arith.constant 0 : index
    %c0_506 = arith.constant 0 : index
    %546 = vector.load %arg6[%c12_504, %c0_505, %c0_506] : memref<16x16x64xbf16, #tpu.memory_space<vmem>>, vector<1x16x64xbf16>
    %547 = vector.shape_cast %546 : vector<1x16x64xbf16> to vector<16x64xbf16>
    %cst_507 = arith.constant dense<0.000000e+00> : vector<16x21xf32>
    %548 = tpu.matmul %547, %446, %cst_507 {dimension_numbers = #tpu.dot_dimension_numbers<[1], [0], [0], [1], [0, 0, 1, 1], [], []>} : vector<16x64xbf16>, vector<64x21xbf16>, vector<16x21xf32> -> vector<16x21xf32>
    %549 = arith.truncf %548 : vector<16x21xf32> to vector<16x21xbf16>
    %c12_508 = arith.constant 12 : index
    %c0_509 = arith.constant 0 : index
    %c0_510 = arith.constant 0 : index
    %550 = vector.load %arg7[%c12_508, %c0_509, %c0_510] : memref<16x21x26xbf16, #tpu.memory_space<vmem>>, vector<1x21x26xbf16>
    %551 = vector.shape_cast %550 : vector<1x21x26xbf16> to vector<21x26xbf16>
    %cst_511 = arith.constant dense<0.000000e+00> : vector<16x26xf32>
    %552 = tpu.matmul %549, %551, %cst_511 {dimension_numbers = #tpu.dot_dimension_numbers<[1], [0], [0], [1], [0, 0, 1, 1], [], []>} : vector<16x21xbf16>, vector<21x26xbf16>, vector<16x26xf32> -> vector<16x26xf32>
    %553 = arith.addf %545, %552 : vector<16x26xf32>
    %c13_512 = arith.constant 13 : index
    %c0_513 = arith.constant 0 : index
    %c0_514 = arith.constant 0 : index
    %554 = vector.load %arg6[%c13_512, %c0_513, %c0_514] : memref<16x16x64xbf16, #tpu.memory_space<vmem>>, vector<1x16x64xbf16>
    %555 = vector.shape_cast %554 : vector<1x16x64xbf16> to vector<16x64xbf16>
    %cst_515 = arith.constant dense<0.000000e+00> : vector<16x21xf32>
    %556 = tpu.matmul %555, %446, %cst_515 {dimension_numbers = #tpu.dot_dimension_numbers<[1], [0], [0], [1], [0, 0, 1, 1], [], []>} : vector<16x64xbf16>, vector<64x21xbf16>, vector<16x21xf32> -> vector<16x21xf32>
    %557 = arith.truncf %556 : vector<16x21xf32> to vector<16x21xbf16>
    %c13_516 = arith.constant 13 : index
    %c0_517 = arith.constant 0 : index
    %c0_518 = arith.constant 0 : index
    %558 = vector.load %arg7[%c13_516, %c0_517, %c0_518] : memref<16x21x26xbf16, #tpu.memory_space<vmem>>, vector<1x21x26xbf16>
    %559 = vector.shape_cast %558 : vector<1x21x26xbf16> to vector<21x26xbf16>
    %cst_519 = arith.constant dense<0.000000e+00> : vector<16x26xf32>
    %560 = tpu.matmul %557, %559, %cst_519 {dimension_numbers = #tpu.dot_dimension_numbers<[1], [0], [0], [1], [0, 0, 1, 1], [], []>} : vector<16x21xbf16>, vector<21x26xbf16>, vector<16x26xf32> -> vector<16x26xf32>
    %561 = arith.addf %553, %560 : vector<16x26xf32>
    %c14_520 = arith.constant 14 : index
    %c0_521 = arith.constant 0 : index
    %c0_522 = arith.constant 0 : index
    %562 = vector.load %arg6[%c14_520, %c0_521, %c0_522] : memref<16x16x64xbf16, #tpu.memory_space<vmem>>, vector<1x16x64xbf16>
    %563 = vector.shape_cast %562 : vector<1x16x64xbf16> to vector<16x64xbf16>
    %cst_523 = arith.constant dense<0.000000e+00> : vector<16x21xf32>
    %564 = tpu.matmul %563, %446, %cst_523 {dimension_numbers = #tpu.dot_dimension_numbers<[1], [0], [0], [1], [0, 0, 1, 1], [], []>} : vector<16x64xbf16>, vector<64x21xbf16>, vector<16x21xf32> -> vector<16x21xf32>
    %565 = arith.truncf %564 : vector<16x21xf32> to vector<16x21xbf16>
    %c14_524 = arith.constant 14 : index
    %c0_525 = arith.constant 0 : index
    %c0_526 = arith.constant 0 : index
    %566 = vector.load %arg7[%c14_524, %c0_525, %c0_526] : memref<16x21x26xbf16, #tpu.memory_space<vmem>>, vector<1x21x26xbf16>
    %567 = vector.shape_cast %566 : vector<1x21x26xbf16> to vector<21x26xbf16>
    %cst_527 = arith.constant dense<0.000000e+00> : vector<16x26xf32>
    %568 = tpu.matmul %565, %567, %cst_527 {dimension_numbers = #tpu.dot_dimension_numbers<[1], [0], [0], [1], [0, 0, 1, 1], [], []>} : vector<16x21xbf16>, vector<21x26xbf16>, vector<16x26xf32> -> vector<16x26xf32>
    %569 = arith.addf %561, %568 : vector<16x26xf32>
    %c15_528 = arith.constant 15 : index
    %c0_529 = arith.constant 0 : index
    %c0_530 = arith.constant 0 : index
    %570 = vector.load %arg6[%c15_528, %c0_529, %c0_530] : memref<16x16x64xbf16, #tpu.memory_space<vmem>>, vector<1x16x64xbf16>
    %571 = vector.shape_cast %570 : vector<1x16x64xbf16> to vector<16x64xbf16>
    %cst_531 = arith.constant dense<0.000000e+00> : vector<16x21xf32>
    %572 = tpu.matmul %571, %446, %cst_531 {dimension_numbers = #tpu.dot_dimension_numbers<[1], [0], [0], [1], [0, 0, 1, 1], [], []>} : vector<16x64xbf16>, vector<64x21xbf16>, vector<16x21xf32> -> vector<16x21xf32>
    %573 = arith.truncf %572 : vector<16x21xf32> to vector<16x21xbf16>
    %c15_532 = arith.constant 15 : index
    %c0_533 = arith.constant 0 : index
    %c0_534 = arith.constant 0 : index
    %574 = vector.load %arg7[%c15_532, %c0_533, %c0_534] : memref<16x21x26xbf16, #tpu.memory_space<vmem>>, vector<1x21x26xbf16>
    %575 = vector.shape_cast %574 : vector<1x21x26xbf16> to vector<21x26xbf16>
    %cst_535 = arith.constant dense<0.000000e+00> : vector<16x26xf32>
    %576 = tpu.matmul %573, %575, %cst_535 {dimension_numbers = #tpu.dot_dimension_numbers<[1], [0], [0], [1], [0, 0, 1, 1], [], []>} : vector<16x21xbf16>, vector<21x26xbf16>, vector<16x26xf32> -> vector<16x26xf32>
    %577 = arith.addf %569, %576 : vector<16x26xf32>
    %cst_536 = arith.constant dense<0.000000e+00> : vector<26xf32>
    %578 = vector.multi_reduction <add>, %295, %cst_536 [0] : vector<16x26xf32> to vector<26xf32>
    %579 = vector.shape_cast %578 : vector<26xf32> to vector<1x26xf32>
    %cst_537 = arith.constant 0.000000e+00 : f32
    %580 = vector.broadcast %cst_537 : f32 to vector<1x26xf32>
    %581 = arith.addf %580, %579 : vector<1x26xf32>
    %cst_538 = arith.constant dense<0.000000e+00> : vector<26xf32>
    %582 = vector.multi_reduction <add>, %577, %cst_538 [0] : vector<16x26xf32> to vector<26xf32>
    %583 = vector.shape_cast %582 : vector<26xf32> to vector<1x26xf32>
    %584 = arith.addf %581, %583 : vector<1x26xf32>
    %cst_539 = arith.constant 3.200000e+01 : f32
    %585 = vector.broadcast %cst_539 : f32 to vector<1x26xf32>
    %586 = arith.divf %584, %585 : vector<1x26xf32>
    %587 = vector.broadcast %586 : vector<1x26xf32> to vector<16x26xf32>
    %588 = arith.subf %295, %587 : vector<16x26xf32>
    %589 = vector.broadcast %586 : vector<1x26xf32> to vector<16x26xf32>
    %590 = arith.subf %295, %589 : vector<16x26xf32>
    %591 = arith.mulf %588, %590 : vector<16x26xf32>
    %cst_540 = arith.constant dense<0.000000e+00> : vector<26xf32>
    %592 = vector.multi_reduction <add>, %591, %cst_540 [0] : vector<16x26xf32> to vector<26xf32>
    %593 = vector.shape_cast %592 : vector<26xf32> to vector<1x26xf32>
    %cst_541 = arith.constant 0.000000e+00 : f32
    %594 = vector.broadcast %cst_541 : f32 to vector<1x26xf32>
    %595 = arith.addf %594, %593 : vector<1x26xf32>
    %596 = vector.broadcast %586 : vector<1x26xf32> to vector<16x26xf32>
    %597 = arith.subf %577, %596 : vector<16x26xf32>
    %598 = vector.broadcast %586 : vector<1x26xf32> to vector<16x26xf32>
    %599 = arith.subf %577, %598 : vector<16x26xf32>
    %600 = arith.mulf %597, %599 : vector<16x26xf32>
    %cst_542 = arith.constant dense<0.000000e+00> : vector<26xf32>
    %601 = vector.multi_reduction <add>, %600, %cst_542 [0] : vector<16x26xf32> to vector<26xf32>
    %602 = vector.shape_cast %601 : vector<26xf32> to vector<1x26xf32>
    %603 = arith.addf %595, %602 : vector<1x26xf32>
    %cst_543 = arith.constant 3.200000e+01 : f32
    %604 = vector.broadcast %cst_543 : f32 to vector<1x26xf32>
    %605 = arith.divf %603, %604 : vector<1x26xf32>
    %cst_544 = arith.constant 9.99999974E-6 : f32
    %606 = vector.broadcast %cst_544 : f32 to vector<1x26xf32>
    %607 = arith.addf %605, %606 : vector<1x26xf32>
    %608 = math.rsqrt %607 : vector<1x26xf32>
    %609 = arith.mulf %608, %4 : vector<1x26xf32>
    %610 = vector.broadcast %586 : vector<1x26xf32> to vector<16x26xf32>
    %611 = arith.subf %295, %610 : vector<16x26xf32>
    %612 = vector.broadcast %609 : vector<1x26xf32> to vector<16x26xf32>
    %613 = arith.mulf %611, %612 : vector<16x26xf32>
    %614 = vector.broadcast %5 : vector<1x26xf32> to vector<16x26xf32>
    %615 = arith.addf %613, %614 : vector<16x26xf32>
    %cst_545 = arith.constant 0.000000e+00 : f32
    %616 = vector.broadcast %cst_545 : f32 to vector<16x26xf32>
    %617 = arith.cmpf ogt, %615, %616 : vector<16x26xf32>
    %cst_546 = arith.constant 2.000000e-01 : f32
    %618 = vector.broadcast %cst_546 : f32 to vector<16x26xf32>
    %619 = arith.mulf %618, %615 : vector<16x26xf32>
    %620 = arith.select %617, %615, %619 : vector<16x26xi1>, vector<16x26xf32>
    %621 = vector.broadcast %586 : vector<1x26xf32> to vector<16x26xf32>
    %622 = arith.subf %577, %621 : vector<16x26xf32>
    %623 = vector.broadcast %609 : vector<1x26xf32> to vector<16x26xf32>
    %624 = arith.mulf %622, %623 : vector<16x26xf32>
    %625 = vector.broadcast %5 : vector<1x26xf32> to vector<16x26xf32>
    %626 = arith.addf %624, %625 : vector<16x26xf32>
    %cst_547 = arith.constant 0.000000e+00 : f32
    %627 = vector.broadcast %cst_547 : f32 to vector<16x26xf32>
    %628 = arith.cmpf ogt, %626, %627 : vector<16x26xf32>
    %cst_548 = arith.constant 2.000000e-01 : f32
    %629 = vector.broadcast %cst_548 : f32 to vector<16x26xf32>
    %630 = arith.mulf %629, %626 : vector<16x26xf32>
    %631 = arith.select %628, %626, %630 : vector<16x26xi1>, vector<16x26xf32>
    %632 = vector.extract_strided_slice %0 {offsets = [0, 0], sizes = [1, 11], strides = [1, 1]} : vector<2x11xf32> to vector<1x11xf32>
    %633 = arith.truncf %632 : vector<1x11xf32> to vector<1x11xbf16>
    %cst_549 = arith.constant dense<0.000000e+00> : vector<1x32xf32>
    %634 = tpu.matmul %633, %9, %cst_549 {dimension_numbers = #tpu.dot_dimension_numbers<[1], [0], [0], [1], [0, 0, 1, 1], [], []>} : vector<1x11xbf16>, vector<11x32xbf16>, vector<1x32xf32> -> vector<1x32xf32>
    %635 = arith.addf %6, %634 : vector<1x32xf32>
    %636 = vector.extract_strided_slice %620 {offsets = [0, 0], sizes = [1, 26], strides = [1, 1]} : vector<16x26xf32> to vector<1x26xf32>
    %637 = arith.truncf %636 : vector<1x26xf32> to vector<1x26xbf16>
    %c0_550 = arith.constant 0 : index
    %c0_551 = arith.constant 0 : index
    %c0_552 = arith.constant 0 : index
    %638 = vector.load %arg11[%c0_550, %c0_551, %c0_552] : memref<16x26x32xbf16, #tpu.memory_space<vmem>>, vector<1x26x32xbf16>
    %639 = vector.shape_cast %638 : vector<1x26x32xbf16> to vector<26x32xbf16>
    %cst_553 = arith.constant dense<0.000000e+00> : vector<1x32xf32>
    %640 = tpu.matmul %637, %639, %cst_553 {dimension_numbers = #tpu.dot_dimension_numbers<[1], [0], [0], [1], [0, 0, 1, 1], [], []>} : vector<1x26xbf16>, vector<26x32xbf16>, vector<1x32xf32> -> vector<1x32xf32>
    %641 = arith.addf %635, %640 : vector<1x32xf32>
    %642 = vector.extract_strided_slice %620 {offsets = [1, 0], sizes = [1, 26], strides = [1, 1]} : vector<16x26xf32> to vector<1x26xf32>
    %643 = arith.truncf %642 : vector<1x26xf32> to vector<1x26xbf16>
    %c1_554 = arith.constant 1 : index
    %c0_555 = arith.constant 0 : index
    %c0_556 = arith.constant 0 : index
    %644 = vector.load %arg11[%c1_554, %c0_555, %c0_556] : memref<16x26x32xbf16, #tpu.memory_space<vmem>>, vector<1x26x32xbf16>
    %645 = vector.shape_cast %644 : vector<1x26x32xbf16> to vector<26x32xbf16>
    %cst_557 = arith.constant dense<0.000000e+00> : vector<1x32xf32>
    %646 = tpu.matmul %643, %645, %cst_557 {dimension_numbers = #tpu.dot_dimension_numbers<[1], [0], [0], [1], [0, 0, 1, 1], [], []>} : vector<1x26xbf16>, vector<26x32xbf16>, vector<1x32xf32> -> vector<1x32xf32>
    %647 = arith.addf %641, %646 : vector<1x32xf32>
    %648 = vector.extract_strided_slice %620 {offsets = [2, 0], sizes = [1, 26], strides = [1, 1]} : vector<16x26xf32> to vector<1x26xf32>
    %649 = arith.truncf %648 : vector<1x26xf32> to vector<1x26xbf16>
    %c2_558 = arith.constant 2 : index
    %c0_559 = arith.constant 0 : index
    %c0_560 = arith.constant 0 : index
    %650 = vector.load %arg11[%c2_558, %c0_559, %c0_560] : memref<16x26x32xbf16, #tpu.memory_space<vmem>>, vector<1x26x32xbf16>
    %651 = vector.shape_cast %650 : vector<1x26x32xbf16> to vector<26x32xbf16>
    %cst_561 = arith.constant dense<0.000000e+00> : vector<1x32xf32>
    %652 = tpu.matmul %649, %651, %cst_561 {dimension_numbers = #tpu.dot_dimension_numbers<[1], [0], [0], [1], [0, 0, 1, 1], [], []>} : vector<1x26xbf16>, vector<26x32xbf16>, vector<1x32xf32> -> vector<1x32xf32>
    %653 = arith.addf %647, %652 : vector<1x32xf32>
    %654 = vector.extract_strided_slice %620 {offsets = [3, 0], sizes = [1, 26], strides = [1, 1]} : vector<16x26xf32> to vector<1x26xf32>
    %655 = arith.truncf %654 : vector<1x26xf32> to vector<1x26xbf16>
    %c3_562 = arith.constant 3 : index
    %c0_563 = arith.constant 0 : index
    %c0_564 = arith.constant 0 : index
    %656 = vector.load %arg11[%c3_562, %c0_563, %c0_564] : memref<16x26x32xbf16, #tpu.memory_space<vmem>>, vector<1x26x32xbf16>
    %657 = vector.shape_cast %656 : vector<1x26x32xbf16> to vector<26x32xbf16>
    %cst_565 = arith.constant dense<0.000000e+00> : vector<1x32xf32>
    %658 = tpu.matmul %655, %657, %cst_565 {dimension_numbers = #tpu.dot_dimension_numbers<[1], [0], [0], [1], [0, 0, 1, 1], [], []>} : vector<1x26xbf16>, vector<26x32xbf16>, vector<1x32xf32> -> vector<1x32xf32>
    %659 = arith.addf %653, %658 : vector<1x32xf32>
    %660 = vector.extract_strided_slice %620 {offsets = [4, 0], sizes = [1, 26], strides = [1, 1]} : vector<16x26xf32> to vector<1x26xf32>
    %661 = arith.truncf %660 : vector<1x26xf32> to vector<1x26xbf16>
    %c4_566 = arith.constant 4 : index
    %c0_567 = arith.constant 0 : index
    %c0_568 = arith.constant 0 : index
    %662 = vector.load %arg11[%c4_566, %c0_567, %c0_568] : memref<16x26x32xbf16, #tpu.memory_space<vmem>>, vector<1x26x32xbf16>
    %663 = vector.shape_cast %662 : vector<1x26x32xbf16> to vector<26x32xbf16>
    %cst_569 = arith.constant dense<0.000000e+00> : vector<1x32xf32>
    %664 = tpu.matmul %661, %663, %cst_569 {dimension_numbers = #tpu.dot_dimension_numbers<[1], [0], [0], [1], [0, 0, 1, 1], [], []>} : vector<1x26xbf16>, vector<26x32xbf16>, vector<1x32xf32> -> vector<1x32xf32>
    %665 = arith.addf %659, %664 : vector<1x32xf32>
    %666 = vector.extract_strided_slice %620 {offsets = [5, 0], sizes = [1, 26], strides = [1, 1]} : vector<16x26xf32> to vector<1x26xf32>
    %667 = arith.truncf %666 : vector<1x26xf32> to vector<1x26xbf16>
    %c5_570 = arith.constant 5 : index
    %c0_571 = arith.constant 0 : index
    %c0_572 = arith.constant 0 : index
    %668 = vector.load %arg11[%c5_570, %c0_571, %c0_572] : memref<16x26x32xbf16, #tpu.memory_space<vmem>>, vector<1x26x32xbf16>
    %669 = vector.shape_cast %668 : vector<1x26x32xbf16> to vector<26x32xbf16>
    %cst_573 = arith.constant dense<0.000000e+00> : vector<1x32xf32>
    %670 = tpu.matmul %667, %669, %cst_573 {dimension_numbers = #tpu.dot_dimension_numbers<[1], [0], [0], [1], [0, 0, 1, 1], [], []>} : vector<1x26xbf16>, vector<26x32xbf16>, vector<1x32xf32> -> vector<1x32xf32>
    %671 = arith.addf %665, %670 : vector<1x32xf32>
    %672 = vector.extract_strided_slice %620 {offsets = [6, 0], sizes = [1, 26], strides = [1, 1]} : vector<16x26xf32> to vector<1x26xf32>
    %673 = arith.truncf %672 : vector<1x26xf32> to vector<1x26xbf16>
    %c6_574 = arith.constant 6 : index
    %c0_575 = arith.constant 0 : index
    %c0_576 = arith.constant 0 : index
    %674 = vector.load %arg11[%c6_574, %c0_575, %c0_576] : memref<16x26x32xbf16, #tpu.memory_space<vmem>>, vector<1x26x32xbf16>
    %675 = vector.shape_cast %674 : vector<1x26x32xbf16> to vector<26x32xbf16>
    %cst_577 = arith.constant dense<0.000000e+00> : vector<1x32xf32>
    %676 = tpu.matmul %673, %675, %cst_577 {dimension_numbers = #tpu.dot_dimension_numbers<[1], [0], [0], [1], [0, 0, 1, 1], [], []>} : vector<1x26xbf16>, vector<26x32xbf16>, vector<1x32xf32> -> vector<1x32xf32>
    %677 = arith.addf %671, %676 : vector<1x32xf32>
    %678 = vector.extract_strided_slice %620 {offsets = [7, 0], sizes = [1, 26], strides = [1, 1]} : vector<16x26xf32> to vector<1x26xf32>
    %679 = arith.truncf %678 : vector<1x26xf32> to vector<1x26xbf16>
    %c7_578 = arith.constant 7 : index
    %c0_579 = arith.constant 0 : index
    %c0_580 = arith.constant 0 : index
    %680 = vector.load %arg11[%c7_578, %c0_579, %c0_580] : memref<16x26x32xbf16, #tpu.memory_space<vmem>>, vector<1x26x32xbf16>
    %681 = vector.shape_cast %680 : vector<1x26x32xbf16> to vector<26x32xbf16>
    %cst_581 = arith.constant dense<0.000000e+00> : vector<1x32xf32>
    %682 = tpu.matmul %679, %681, %cst_581 {dimension_numbers = #tpu.dot_dimension_numbers<[1], [0], [0], [1], [0, 0, 1, 1], [], []>} : vector<1x26xbf16>, vector<26x32xbf16>, vector<1x32xf32> -> vector<1x32xf32>
    %683 = arith.addf %677, %682 : vector<1x32xf32>
    %684 = vector.extract_strided_slice %620 {offsets = [8, 0], sizes = [1, 26], strides = [1, 1]} : vector<16x26xf32> to vector<1x26xf32>
    %685 = arith.truncf %684 : vector<1x26xf32> to vector<1x26xbf16>
    %c8_582 = arith.constant 8 : index
    %c0_583 = arith.constant 0 : index
    %c0_584 = arith.constant 0 : index
    %686 = vector.load %arg11[%c8_582, %c0_583, %c0_584] : memref<16x26x32xbf16, #tpu.memory_space<vmem>>, vector<1x26x32xbf16>
    %687 = vector.shape_cast %686 : vector<1x26x32xbf16> to vector<26x32xbf16>
    %cst_585 = arith.constant dense<0.000000e+00> : vector<1x32xf32>
    %688 = tpu.matmul %685, %687, %cst_585 {dimension_numbers = #tpu.dot_dimension_numbers<[1], [0], [0], [1], [0, 0, 1, 1], [], []>} : vector<1x26xbf16>, vector<26x32xbf16>, vector<1x32xf32> -> vector<1x32xf32>
    %689 = arith.addf %683, %688 : vector<1x32xf32>
    %690 = vector.extract_strided_slice %620 {offsets = [9, 0], sizes = [1, 26], strides = [1, 1]} : vector<16x26xf32> to vector<1x26xf32>
    %691 = arith.truncf %690 : vector<1x26xf32> to vector<1x26xbf16>
    %c9_586 = arith.constant 9 : index
    %c0_587 = arith.constant 0 : index
    %c0_588 = arith.constant 0 : index
    %692 = vector.load %arg11[%c9_586, %c0_587, %c0_588] : memref<16x26x32xbf16, #tpu.memory_space<vmem>>, vector<1x26x32xbf16>
    %693 = vector.shape_cast %692 : vector<1x26x32xbf16> to vector<26x32xbf16>
    %cst_589 = arith.constant dense<0.000000e+00> : vector<1x32xf32>
    %694 = tpu.matmul %691, %693, %cst_589 {dimension_numbers = #tpu.dot_dimension_numbers<[1], [0], [0], [1], [0, 0, 1, 1], [], []>} : vector<1x26xbf16>, vector<26x32xbf16>, vector<1x32xf32> -> vector<1x32xf32>
    %695 = arith.addf %689, %694 : vector<1x32xf32>
    %696 = vector.extract_strided_slice %620 {offsets = [10, 0], sizes = [1, 26], strides = [1, 1]} : vector<16x26xf32> to vector<1x26xf32>
    %697 = arith.truncf %696 : vector<1x26xf32> to vector<1x26xbf16>
    %c10_590 = arith.constant 10 : index
    %c0_591 = arith.constant 0 : index
    %c0_592 = arith.constant 0 : index
    %698 = vector.load %arg11[%c10_590, %c0_591, %c0_592] : memref<16x26x32xbf16, #tpu.memory_space<vmem>>, vector<1x26x32xbf16>
    %699 = vector.shape_cast %698 : vector<1x26x32xbf16> to vector<26x32xbf16>
    %cst_593 = arith.constant dense<0.000000e+00> : vector<1x32xf32>
    %700 = tpu.matmul %697, %699, %cst_593 {dimension_numbers = #tpu.dot_dimension_numbers<[1], [0], [0], [1], [0, 0, 1, 1], [], []>} : vector<1x26xbf16>, vector<26x32xbf16>, vector<1x32xf32> -> vector<1x32xf32>
    %701 = arith.addf %695, %700 : vector<1x32xf32>
    %702 = vector.extract_strided_slice %620 {offsets = [11, 0], sizes = [1, 26], strides = [1, 1]} : vector<16x26xf32> to vector<1x26xf32>
    %703 = arith.truncf %702 : vector<1x26xf32> to vector<1x26xbf16>
    %c11_594 = arith.constant 11 : index
    %c0_595 = arith.constant 0 : index
    %c0_596 = arith.constant 0 : index
    %704 = vector.load %arg11[%c11_594, %c0_595, %c0_596] : memref<16x26x32xbf16, #tpu.memory_space<vmem>>, vector<1x26x32xbf16>
    %705 = vector.shape_cast %704 : vector<1x26x32xbf16> to vector<26x32xbf16>
    %cst_597 = arith.constant dense<0.000000e+00> : vector<1x32xf32>
    %706 = tpu.matmul %703, %705, %cst_597 {dimension_numbers = #tpu.dot_dimension_numbers<[1], [0], [0], [1], [0, 0, 1, 1], [], []>} : vector<1x26xbf16>, vector<26x32xbf16>, vector<1x32xf32> -> vector<1x32xf32>
    %707 = arith.addf %701, %706 : vector<1x32xf32>
    %708 = vector.extract_strided_slice %620 {offsets = [12, 0], sizes = [1, 26], strides = [1, 1]} : vector<16x26xf32> to vector<1x26xf32>
    %709 = arith.truncf %708 : vector<1x26xf32> to vector<1x26xbf16>
    %c12_598 = arith.constant 12 : index
    %c0_599 = arith.constant 0 : index
    %c0_600 = arith.constant 0 : index
    %710 = vector.load %arg11[%c12_598, %c0_599, %c0_600] : memref<16x26x32xbf16, #tpu.memory_space<vmem>>, vector<1x26x32xbf16>
    %711 = vector.shape_cast %710 : vector<1x26x32xbf16> to vector<26x32xbf16>
    %cst_601 = arith.constant dense<0.000000e+00> : vector<1x32xf32>
    %712 = tpu.matmul %709, %711, %cst_601 {dimension_numbers = #tpu.dot_dimension_numbers<[1], [0], [0], [1], [0, 0, 1, 1], [], []>} : vector<1x26xbf16>, vector<26x32xbf16>, vector<1x32xf32> -> vector<1x32xf32>
    %713 = arith.addf %707, %712 : vector<1x32xf32>
    %714 = vector.extract_strided_slice %620 {offsets = [13, 0], sizes = [1, 26], strides = [1, 1]} : vector<16x26xf32> to vector<1x26xf32>
    %715 = arith.truncf %714 : vector<1x26xf32> to vector<1x26xbf16>
    %c13_602 = arith.constant 13 : index
    %c0_603 = arith.constant 0 : index
    %c0_604 = arith.constant 0 : index
    %716 = vector.load %arg11[%c13_602, %c0_603, %c0_604] : memref<16x26x32xbf16, #tpu.memory_space<vmem>>, vector<1x26x32xbf16>
    %717 = vector.shape_cast %716 : vector<1x26x32xbf16> to vector<26x32xbf16>
    %cst_605 = arith.constant dense<0.000000e+00> : vector<1x32xf32>
    %718 = tpu.matmul %715, %717, %cst_605 {dimension_numbers = #tpu.dot_dimension_numbers<[1], [0], [0], [1], [0, 0, 1, 1], [], []>} : vector<1x26xbf16>, vector<26x32xbf16>, vector<1x32xf32> -> vector<1x32xf32>
    %719 = arith.addf %713, %718 : vector<1x32xf32>
    %720 = vector.extract_strided_slice %620 {offsets = [14, 0], sizes = [1, 26], strides = [1, 1]} : vector<16x26xf32> to vector<1x26xf32>
    %721 = arith.truncf %720 : vector<1x26xf32> to vector<1x26xbf16>
    %c14_606 = arith.constant 14 : index
    %c0_607 = arith.constant 0 : index
    %c0_608 = arith.constant 0 : index
    %722 = vector.load %arg11[%c14_606, %c0_607, %c0_608] : memref<16x26x32xbf16, #tpu.memory_space<vmem>>, vector<1x26x32xbf16>
    %723 = vector.shape_cast %722 : vector<1x26x32xbf16> to vector<26x32xbf16>
    %cst_609 = arith.constant dense<0.000000e+00> : vector<1x32xf32>
    %724 = tpu.matmul %721, %723, %cst_609 {dimension_numbers = #tpu.dot_dimension_numbers<[1], [0], [0], [1], [0, 0, 1, 1], [], []>} : vector<1x26xbf16>, vector<26x32xbf16>, vector<1x32xf32> -> vector<1x32xf32>
    %725 = arith.addf %719, %724 : vector<1x32xf32>
    %726 = vector.extract_strided_slice %620 {offsets = [15, 0], sizes = [1, 26], strides = [1, 1]} : vector<16x26xf32> to vector<1x26xf32>
    %727 = arith.truncf %726 : vector<1x26xf32> to vector<1x26xbf16>
    %c15_610 = arith.constant 15 : index
    %c0_611 = arith.constant 0 : index
    %c0_612 = arith.constant 0 : index
    %728 = vector.load %arg11[%c15_610, %c0_611, %c0_612] : memref<16x26x32xbf16, #tpu.memory_space<vmem>>, vector<1x26x32xbf16>
    %729 = vector.shape_cast %728 : vector<1x26x32xbf16> to vector<26x32xbf16>
    %cst_613 = arith.constant dense<0.000000e+00> : vector<1x32xf32>
    %730 = tpu.matmul %727, %729, %cst_613 {dimension_numbers = #tpu.dot_dimension_numbers<[1], [0], [0], [1], [0, 0, 1, 1], [], []>} : vector<1x26xbf16>, vector<26x32xbf16>, vector<1x32xf32> -> vector<1x32xf32>
    %731 = arith.addf %725, %730 : vector<1x32xf32>
    %732 = vector.extract_strided_slice %0 {offsets = [1, 0], sizes = [1, 11], strides = [1, 1]} : vector<2x11xf32> to vector<1x11xf32>
    %733 = arith.truncf %732 : vector<1x11xf32> to vector<1x11xbf16>
    %cst_614 = arith.constant dense<0.000000e+00> : vector<1x32xf32>
    %734 = tpu.matmul %733, %9, %cst_614 {dimension_numbers = #tpu.dot_dimension_numbers<[1], [0], [0], [1], [0, 0, 1, 1], [], []>} : vector<1x11xbf16>, vector<11x32xbf16>, vector<1x32xf32> -> vector<1x32xf32>
    %735 = arith.addf %6, %734 : vector<1x32xf32>
    %736 = vector.extract_strided_slice %631 {offsets = [0, 0], sizes = [1, 26], strides = [1, 1]} : vector<16x26xf32> to vector<1x26xf32>
    %737 = arith.truncf %736 : vector<1x26xf32> to vector<1x26xbf16>
    %c0_615 = arith.constant 0 : index
    %c0_616 = arith.constant 0 : index
    %c0_617 = arith.constant 0 : index
    %738 = vector.load %arg11[%c0_615, %c0_616, %c0_617] : memref<16x26x32xbf16, #tpu.memory_space<vmem>>, vector<1x26x32xbf16>
    %739 = vector.shape_cast %738 : vector<1x26x32xbf16> to vector<26x32xbf16>
    %cst_618 = arith.constant dense<0.000000e+00> : vector<1x32xf32>
    %740 = tpu.matmul %737, %739, %cst_618 {dimension_numbers = #tpu.dot_dimension_numbers<[1], [0], [0], [1], [0, 0, 1, 1], [], []>} : vector<1x26xbf16>, vector<26x32xbf16>, vector<1x32xf32> -> vector<1x32xf32>
    %741 = arith.addf %735, %740 : vector<1x32xf32>
    %742 = vector.extract_strided_slice %631 {offsets = [1, 0], sizes = [1, 26], strides = [1, 1]} : vector<16x26xf32> to vector<1x26xf32>
    %743 = arith.truncf %742 : vector<1x26xf32> to vector<1x26xbf16>
    %c1_619 = arith.constant 1 : index
    %c0_620 = arith.constant 0 : index
    %c0_621 = arith.constant 0 : index
    %744 = vector.load %arg11[%c1_619, %c0_620, %c0_621] : memref<16x26x32xbf16, #tpu.memory_space<vmem>>, vector<1x26x32xbf16>
    %745 = vector.shape_cast %744 : vector<1x26x32xbf16> to vector<26x32xbf16>
    %cst_622 = arith.constant dense<0.000000e+00> : vector<1x32xf32>
    %746 = tpu.matmul %743, %745, %cst_622 {dimension_numbers = #tpu.dot_dimension_numbers<[1], [0], [0], [1], [0, 0, 1, 1], [], []>} : vector<1x26xbf16>, vector<26x32xbf16>, vector<1x32xf32> -> vector<1x32xf32>
    %747 = arith.addf %741, %746 : vector<1x32xf32>
    %748 = vector.extract_strided_slice %631 {offsets = [2, 0], sizes = [1, 26], strides = [1, 1]} : vector<16x26xf32> to vector<1x26xf32>
    %749 = arith.truncf %748 : vector<1x26xf32> to vector<1x26xbf16>
    %c2_623 = arith.constant 2 : index
    %c0_624 = arith.constant 0 : index
    %c0_625 = arith.constant 0 : index
    %750 = vector.load %arg11[%c2_623, %c0_624, %c0_625] : memref<16x26x32xbf16, #tpu.memory_space<vmem>>, vector<1x26x32xbf16>
    %751 = vector.shape_cast %750 : vector<1x26x32xbf16> to vector<26x32xbf16>
    %cst_626 = arith.constant dense<0.000000e+00> : vector<1x32xf32>
    %752 = tpu.matmul %749, %751, %cst_626 {dimension_numbers = #tpu.dot_dimension_numbers<[1], [0], [0], [1], [0, 0, 1, 1], [], []>} : vector<1x26xbf16>, vector<26x32xbf16>, vector<1x32xf32> -> vector<1x32xf32>
    %753 = arith.addf %747, %752 : vector<1x32xf32>
    %754 = vector.extract_strided_slice %631 {offsets = [3, 0], sizes = [1, 26], strides = [1, 1]} : vector<16x26xf32> to vector<1x26xf32>
    %755 = arith.truncf %754 : vector<1x26xf32> to vector<1x26xbf16>
    %c3_627 = arith.constant 3 : index
    %c0_628 = arith.constant 0 : index
    %c0_629 = arith.constant 0 : index
    %756 = vector.load %arg11[%c3_627, %c0_628, %c0_629] : memref<16x26x32xbf16, #tpu.memory_space<vmem>>, vector<1x26x32xbf16>
    %757 = vector.shape_cast %756 : vector<1x26x32xbf16> to vector<26x32xbf16>
    %cst_630 = arith.constant dense<0.000000e+00> : vector<1x32xf32>
    %758 = tpu.matmul %755, %757, %cst_630 {dimension_numbers = #tpu.dot_dimension_numbers<[1], [0], [0], [1], [0, 0, 1, 1], [], []>} : vector<1x26xbf16>, vector<26x32xbf16>, vector<1x32xf32> -> vector<1x32xf32>
    %759 = arith.addf %753, %758 : vector<1x32xf32>
    %760 = vector.extract_strided_slice %631 {offsets = [4, 0], sizes = [1, 26], strides = [1, 1]} : vector<16x26xf32> to vector<1x26xf32>
    %761 = arith.truncf %760 : vector<1x26xf32> to vector<1x26xbf16>
    %c4_631 = arith.constant 4 : index
    %c0_632 = arith.constant 0 : index
    %c0_633 = arith.constant 0 : index
    %762 = vector.load %arg11[%c4_631, %c0_632, %c0_633] : memref<16x26x32xbf16, #tpu.memory_space<vmem>>, vector<1x26x32xbf16>
    %763 = vector.shape_cast %762 : vector<1x26x32xbf16> to vector<26x32xbf16>
    %cst_634 = arith.constant dense<0.000000e+00> : vector<1x32xf32>
    %764 = tpu.matmul %761, %763, %cst_634 {dimension_numbers = #tpu.dot_dimension_numbers<[1], [0], [0], [1], [0, 0, 1, 1], [], []>} : vector<1x26xbf16>, vector<26x32xbf16>, vector<1x32xf32> -> vector<1x32xf32>
    %765 = arith.addf %759, %764 : vector<1x32xf32>
    %766 = vector.extract_strided_slice %631 {offsets = [5, 0], sizes = [1, 26], strides = [1, 1]} : vector<16x26xf32> to vector<1x26xf32>
    %767 = arith.truncf %766 : vector<1x26xf32> to vector<1x26xbf16>
    %c5_635 = arith.constant 5 : index
    %c0_636 = arith.constant 0 : index
    %c0_637 = arith.constant 0 : index
    %768 = vector.load %arg11[%c5_635, %c0_636, %c0_637] : memref<16x26x32xbf16, #tpu.memory_space<vmem>>, vector<1x26x32xbf16>
    %769 = vector.shape_cast %768 : vector<1x26x32xbf16> to vector<26x32xbf16>
    %cst_638 = arith.constant dense<0.000000e+00> : vector<1x32xf32>
    %770 = tpu.matmul %767, %769, %cst_638 {dimension_numbers = #tpu.dot_dimension_numbers<[1], [0], [0], [1], [0, 0, 1, 1], [], []>} : vector<1x26xbf16>, vector<26x32xbf16>, vector<1x32xf32> -> vector<1x32xf32>
    %771 = arith.addf %765, %770 : vector<1x32xf32>
    %772 = vector.extract_strided_slice %631 {offsets = [6, 0], sizes = [1, 26], strides = [1, 1]} : vector<16x26xf32> to vector<1x26xf32>
    %773 = arith.truncf %772 : vector<1x26xf32> to vector<1x26xbf16>
    %c6_639 = arith.constant 6 : index
    %c0_640 = arith.constant 0 : index
    %c0_641 = arith.constant 0 : index
    %774 = vector.load %arg11[%c6_639, %c0_640, %c0_641] : memref<16x26x32xbf16, #tpu.memory_space<vmem>>, vector<1x26x32xbf16>
    %775 = vector.shape_cast %774 : vector<1x26x32xbf16> to vector<26x32xbf16>
    %cst_642 = arith.constant dense<0.000000e+00> : vector<1x32xf32>
    %776 = tpu.matmul %773, %775, %cst_642 {dimension_numbers = #tpu.dot_dimension_numbers<[1], [0], [0], [1], [0, 0, 1, 1], [], []>} : vector<1x26xbf16>, vector<26x32xbf16>, vector<1x32xf32> -> vector<1x32xf32>
    %777 = arith.addf %771, %776 : vector<1x32xf32>
    %778 = vector.extract_strided_slice %631 {offsets = [7, 0], sizes = [1, 26], strides = [1, 1]} : vector<16x26xf32> to vector<1x26xf32>
    %779 = arith.truncf %778 : vector<1x26xf32> to vector<1x26xbf16>
    %c7_643 = arith.constant 7 : index
    %c0_644 = arith.constant 0 : index
    %c0_645 = arith.constant 0 : index
    %780 = vector.load %arg11[%c7_643, %c0_644, %c0_645] : memref<16x26x32xbf16, #tpu.memory_space<vmem>>, vector<1x26x32xbf16>
    %781 = vector.shape_cast %780 : vector<1x26x32xbf16> to vector<26x32xbf16>
    %cst_646 = arith.constant dense<0.000000e+00> : vector<1x32xf32>
    %782 = tpu.matmul %779, %781, %cst_646 {dimension_numbers = #tpu.dot_dimension_numbers<[1], [0], [0], [1], [0, 0, 1, 1], [], []>} : vector<1x26xbf16>, vector<26x32xbf16>, vector<1x32xf32> -> vector<1x32xf32>
    %783 = arith.addf %777, %782 : vector<1x32xf32>
    %784 = vector.extract_strided_slice %631 {offsets = [8, 0], sizes = [1, 26], strides = [1, 1]} : vector<16x26xf32> to vector<1x26xf32>
    %785 = arith.truncf %784 : vector<1x26xf32> to vector<1x26xbf16>
    %c8_647 = arith.constant 8 : index
    %c0_648 = arith.constant 0 : index
    %c0_649 = arith.constant 0 : index
    %786 = vector.load %arg11[%c8_647, %c0_648, %c0_649] : memref<16x26x32xbf16, #tpu.memory_space<vmem>>, vector<1x26x32xbf16>
    %787 = vector.shape_cast %786 : vector<1x26x32xbf16> to vector<26x32xbf16>
    %cst_650 = arith.constant dense<0.000000e+00> : vector<1x32xf32>
    %788 = tpu.matmul %785, %787, %cst_650 {dimension_numbers = #tpu.dot_dimension_numbers<[1], [0], [0], [1], [0, 0, 1, 1], [], []>} : vector<1x26xbf16>, vector<26x32xbf16>, vector<1x32xf32> -> vector<1x32xf32>
    %789 = arith.addf %783, %788 : vector<1x32xf32>
    %790 = vector.extract_strided_slice %631 {offsets = [9, 0], sizes = [1, 26], strides = [1, 1]} : vector<16x26xf32> to vector<1x26xf32>
    %791 = arith.truncf %790 : vector<1x26xf32> to vector<1x26xbf16>
    %c9_651 = arith.constant 9 : index
    %c0_652 = arith.constant 0 : index
    %c0_653 = arith.constant 0 : index
    %792 = vector.load %arg11[%c9_651, %c0_652, %c0_653] : memref<16x26x32xbf16, #tpu.memory_space<vmem>>, vector<1x26x32xbf16>
    %793 = vector.shape_cast %792 : vector<1x26x32xbf16> to vector<26x32xbf16>
    %cst_654 = arith.constant dense<0.000000e+00> : vector<1x32xf32>
    %794 = tpu.matmul %791, %793, %cst_654 {dimension_numbers = #tpu.dot_dimension_numbers<[1], [0], [0], [1], [0, 0, 1, 1], [], []>} : vector<1x26xbf16>, vector<26x32xbf16>, vector<1x32xf32> -> vector<1x32xf32>
    %795 = arith.addf %789, %794 : vector<1x32xf32>
    %796 = vector.extract_strided_slice %631 {offsets = [10, 0], sizes = [1, 26], strides = [1, 1]} : vector<16x26xf32> to vector<1x26xf32>
    %797 = arith.truncf %796 : vector<1x26xf32> to vector<1x26xbf16>
    %c10_655 = arith.constant 10 : index
    %c0_656 = arith.constant 0 : index
    %c0_657 = arith.constant 0 : index
    %798 = vector.load %arg11[%c10_655, %c0_656, %c0_657] : memref<16x26x32xbf16, #tpu.memory_space<vmem>>, vector<1x26x32xbf16>
    %799 = vector.shape_cast %798 : vector<1x26x32xbf16> to vector<26x32xbf16>
    %cst_658 = arith.constant dense<0.000000e+00> : vector<1x32xf32>
    %800 = tpu.matmul %797, %799, %cst_658 {dimension_numbers = #tpu.dot_dimension_numbers<[1], [0], [0], [1], [0, 0, 1, 1], [], []>} : vector<1x26xbf16>, vector<26x32xbf16>, vector<1x32xf32> -> vector<1x32xf32>
    %801 = arith.addf %795, %800 : vector<1x32xf32>
    %802 = vector.extract_strided_slice %631 {offsets = [11, 0], sizes = [1, 26], strides = [1, 1]} : vector<16x26xf32> to vector<1x26xf32>
    %803 = arith.truncf %802 : vector<1x26xf32> to vector<1x26xbf16>
    %c11_659 = arith.constant 11 : index
    %c0_660 = arith.constant 0 : index
    %c0_661 = arith.constant 0 : index
    %804 = vector.load %arg11[%c11_659, %c0_660, %c0_661] : memref<16x26x32xbf16, #tpu.memory_space<vmem>>, vector<1x26x32xbf16>
    %805 = vector.shape_cast %804 : vector<1x26x32xbf16> to vector<26x32xbf16>
    %cst_662 = arith.constant dense<0.000000e+00> : vector<1x32xf32>
    %806 = tpu.matmul %803, %805, %cst_662 {dimension_numbers = #tpu.dot_dimension_numbers<[1], [0], [0], [1], [0, 0, 1, 1], [], []>} : vector<1x26xbf16>, vector<26x32xbf16>, vector<1x32xf32> -> vector<1x32xf32>
    %807 = arith.addf %801, %806 : vector<1x32xf32>
    %808 = vector.extract_strided_slice %631 {offsets = [12, 0], sizes = [1, 26], strides = [1, 1]} : vector<16x26xf32> to vector<1x26xf32>
    %809 = arith.truncf %808 : vector<1x26xf32> to vector<1x26xbf16>
    %c12_663 = arith.constant 12 : index
    %c0_664 = arith.constant 0 : index
    %c0_665 = arith.constant 0 : index
    %810 = vector.load %arg11[%c12_663, %c0_664, %c0_665] : memref<16x26x32xbf16, #tpu.memory_space<vmem>>, vector<1x26x32xbf16>
    %811 = vector.shape_cast %810 : vector<1x26x32xbf16> to vector<26x32xbf16>
    %cst_666 = arith.constant dense<0.000000e+00> : vector<1x32xf32>
    %812 = tpu.matmul %809, %811, %cst_666 {dimension_numbers = #tpu.dot_dimension_numbers<[1], [0], [0], [1], [0, 0, 1, 1], [], []>} : vector<1x26xbf16>, vector<26x32xbf16>, vector<1x32xf32> -> vector<1x32xf32>
    %813 = arith.addf %807, %812 : vector<1x32xf32>
    %814 = vector.extract_strided_slice %631 {offsets = [13, 0], sizes = [1, 26], strides = [1, 1]} : vector<16x26xf32> to vector<1x26xf32>
    %815 = arith.truncf %814 : vector<1x26xf32> to vector<1x26xbf16>
    %c13_667 = arith.constant 13 : index
    %c0_668 = arith.constant 0 : index
    %c0_669 = arith.constant 0 : index
    %816 = vector.load %arg11[%c13_667, %c0_668, %c0_669] : memref<16x26x32xbf16, #tpu.memory_space<vmem>>, vector<1x26x32xbf16>
    %817 = vector.shape_cast %816 : vector<1x26x32xbf16> to vector<26x32xbf16>
    %cst_670 = arith.constant dense<0.000000e+00> : vector<1x32xf32>
    %818 = tpu.matmul %815, %817, %cst_670 {dimension_numbers = #tpu.dot_dimension_numbers<[1], [0], [0], [1], [0, 0, 1, 1], [], []>} : vector<1x26xbf16>, vector<26x32xbf16>, vector<1x32xf32> -> vector<1x32xf32>
    %819 = arith.addf %813, %818 : vector<1x32xf32>
    %820 = vector.extract_strided_slice %631 {offsets = [14, 0], sizes = [1, 26], strides = [1, 1]} : vector<16x26xf32> to vector<1x26xf32>
    %821 = arith.truncf %820 : vector<1x26xf32> to vector<1x26xbf16>
    %c14_671 = arith.constant 14 : index
    %c0_672 = arith.constant 0 : index
    %c0_673 = arith.constant 0 : index
    %822 = vector.load %arg11[%c14_671, %c0_672, %c0_673] : memref<16x26x32xbf16, #tpu.memory_space<vmem>>, vector<1x26x32xbf16>
    %823 = vector.shape_cast %822 : vector<1x26x32xbf16> to vector<26x32xbf16>
    %cst_674 = arith.constant dense<0.000000e+00> : vector<1x32xf32>
    %824 = tpu.matmul %821, %823, %cst_674 {dimension_numbers = #tpu.dot_dimension_numbers<[1], [0], [0], [1], [0, 0, 1, 1], [], []>} : vector<1x26xbf16>, vector<26x32xbf16>, vector<1x32xf32> -> vector<1x32xf32>
    %825 = arith.addf %819, %824 : vector<1x32xf32>
    %826 = vector.extract_strided_slice %631 {offsets = [15, 0], sizes = [1, 26], strides = [1, 1]} : vector<16x26xf32> to vector<1x26xf32>
    %827 = arith.truncf %826 : vector<1x26xf32> to vector<1x26xbf16>
    %c15_675 = arith.constant 15 : index
    %c0_676 = arith.constant 0 : index
    %c0_677 = arith.constant 0 : index
    %828 = vector.load %arg11[%c15_675, %c0_676, %c0_677] : memref<16x26x32xbf16, #tpu.memory_space<vmem>>, vector<1x26x32xbf16>
    %829 = vector.shape_cast %828 : vector<1x26x32xbf16> to vector<26x32xbf16>
    %cst_678 = arith.constant dense<0.000000e+00> : vector<1x32xf32>
    %830 = tpu.matmul %827, %829, %cst_678 {dimension_numbers = #tpu.dot_dimension_numbers<[1], [0], [0], [1], [0, 0, 1, 1], [], []>} : vector<1x26xbf16>, vector<26x32xbf16>, vector<1x32xf32> -> vector<1x32xf32>
    %831 = arith.addf %825, %830 : vector<1x32xf32>
    %cst_679 = arith.constant 0.000000e+00 : f32
    %832 = vector.broadcast %cst_679 : f32 to vector<1x32xf32>
    %833 = arith.addf %832, %731 : vector<1x32xf32>
    %834 = arith.addf %833, %831 : vector<1x32xf32>
    %cst_680 = arith.constant 2.000000e+00 : f32
    %835 = vector.broadcast %cst_680 : f32 to vector<1x32xf32>
    %836 = arith.divf %834, %835 : vector<1x32xf32>
    %837 = arith.subf %731, %836 : vector<1x32xf32>
    %838 = arith.subf %731, %836 : vector<1x32xf32>
    %839 = arith.mulf %837, %838 : vector<1x32xf32>
    %cst_681 = arith.constant 0.000000e+00 : f32
    %840 = vector.broadcast %cst_681 : f32 to vector<1x32xf32>
    %841 = arith.addf %840, %839 : vector<1x32xf32>
    %842 = arith.subf %831, %836 : vector<1x32xf32>
    %843 = arith.subf %831, %836 : vector<1x32xf32>
    %844 = arith.mulf %842, %843 : vector<1x32xf32>
    %845 = arith.addf %841, %844 : vector<1x32xf32>
    %cst_682 = arith.constant 2.000000e+00 : f32
    %846 = vector.broadcast %cst_682 : f32 to vector<1x32xf32>
    %847 = arith.divf %845, %846 : vector<1x32xf32>
    %cst_683 = arith.constant 9.99999974E-6 : f32
    %848 = vector.broadcast %cst_683 : f32 to vector<1x32xf32>
    %849 = arith.addf %847, %848 : vector<1x32xf32>
    %850 = math.rsqrt %849 : vector<1x32xf32>
    %851 = arith.mulf %850, %7 : vector<1x32xf32>
    %852 = arith.subf %731, %836 : vector<1x32xf32>
    %853 = arith.mulf %852, %851 : vector<1x32xf32>
    %854 = arith.addf %853, %8 : vector<1x32xf32>
    %cst_684 = arith.constant 0.000000e+00 : f32
    %855 = vector.broadcast %cst_684 : f32 to vector<1x32xf32>
    %856 = arith.cmpf ogt, %854, %855 : vector<1x32xf32>
    %cst_685 = arith.constant 2.000000e-01 : f32
    %857 = vector.broadcast %cst_685 : f32 to vector<1x32xf32>
    %858 = arith.mulf %857, %854 : vector<1x32xf32>
    %859 = arith.select %856, %854, %858 : vector<1x32xi1>, vector<1x32xf32>
    %860 = arith.mulf %859, %10 : vector<1x32xf32>
    %cst_686 = arith.constant dense<0.000000e+00> : vector<1xf32>
    %861 = vector.multi_reduction <add>, %860, %cst_686 [1] : vector<1x32xf32> to vector<1xf32>
    %862 = vector.shape_cast %861 : vector<1xf32> to vector<1x1xf32>
    %863 = vector.extract_strided_slice %0 {offsets = [0, 0], sizes = [1, 11], strides = [1, 1]} : vector<2x11xf32> to vector<1x11xf32>
    %864 = arith.mulf %863, %11 : vector<1x11xf32>
    %cst_687 = arith.constant dense<0.000000e+00> : vector<1xf32>
    %865 = vector.multi_reduction <add>, %864, %cst_687 [1] : vector<1x11xf32> to vector<1xf32>
    %866 = vector.shape_cast %865 : vector<1xf32> to vector<1x1xf32>
    %867 = arith.addf %862, %866 : vector<1x1xf32>
    %868 = arith.addf %867, %12 : vector<1x1xf32>
    %869 = math.absf %868 : vector<1x1xf32>
    %cst_688 = arith.constant 0.000000e+00 : f32
    %870 = vector.broadcast %cst_688 : f32 to vector<1x1xf32>
    %871 = arith.subf %870, %869 : vector<1x1xf32>
    %872 = math.exp %871 : vector<1x1xf32>
    %cst_689 = arith.constant 1.000000e+00 : f32
    %873 = vector.broadcast %cst_689 : f32 to vector<1x1xf32>
    %874 = arith.addf %873, %872 : vector<1x1xf32>
    %cst_690 = arith.constant 1.000000e+00 : f32
    %875 = vector.broadcast %cst_690 : f32 to vector<1x1xf32>
    %876 = arith.divf %875, %874 : vector<1x1xf32>
    %cst_691 = arith.constant 0.000000e+00 : f32
    %877 = vector.broadcast %cst_691 : f32 to vector<1x1xf32>
    %878 = arith.cmpf oge, %868, %877 : vector<1x1xf32>
    %cst_692 = arith.constant 1.000000e+00 : f32
    %879 = vector.broadcast %cst_692 : f32 to vector<1x1xf32>
    %880 = arith.subf %879, %876 : vector<1x1xf32>
    %881 = arith.select %878, %876, %880 : vector<1x1xi1>, vector<1x1xf32>
    %882 = arith.subf %831, %836 : vector<1x32xf32>
    %883 = arith.mulf %882, %851 : vector<1x32xf32>
    %884 = arith.addf %883, %8 : vector<1x32xf32>
    %cst_693 = arith.constant 0.000000e+00 : f32
    %885 = vector.broadcast %cst_693 : f32 to vector<1x32xf32>
    %886 = arith.cmpf ogt, %884, %885 : vector<1x32xf32>
    %cst_694 = arith.constant 2.000000e-01 : f32
    %887 = vector.broadcast %cst_694 : f32 to vector<1x32xf32>
    %888 = arith.mulf %887, %884 : vector<1x32xf32>
    %889 = arith.select %886, %884, %888 : vector<1x32xi1>, vector<1x32xf32>
    %890 = arith.mulf %889, %10 : vector<1x32xf32>
    %cst_695 = arith.constant dense<0.000000e+00> : vector<1xf32>
    %891 = vector.multi_reduction <add>, %890, %cst_695 [1] : vector<1x32xf32> to vector<1xf32>
    %892 = vector.shape_cast %891 : vector<1xf32> to vector<1x1xf32>
    %893 = vector.extract_strided_slice %0 {offsets = [1, 0], sizes = [1, 11], strides = [1, 1]} : vector<2x11xf32> to vector<1x11xf32>
    %894 = arith.mulf %893, %11 : vector<1x11xf32>
    %cst_696 = arith.constant dense<0.000000e+00> : vector<1xf32>
    %895 = vector.multi_reduction <add>, %894, %cst_696 [1] : vector<1x11xf32> to vector<1xf32>
    %896 = vector.shape_cast %895 : vector<1xf32> to vector<1x1xf32>
    %897 = arith.addf %892, %896 : vector<1x1xf32>
    %898 = arith.addf %897, %12 : vector<1x1xf32>
    %899 = math.absf %898 : vector<1x1xf32>
    %cst_697 = arith.constant 0.000000e+00 : f32
    %900 = vector.broadcast %cst_697 : f32 to vector<1x1xf32>
    %901 = arith.subf %900, %899 : vector<1x1xf32>
    %902 = math.exp %901 : vector<1x1xf32>
    %cst_698 = arith.constant 1.000000e+00 : f32
    %903 = vector.broadcast %cst_698 : f32 to vector<1x1xf32>
    %904 = arith.addf %903, %902 : vector<1x1xf32>
    %cst_699 = arith.constant 1.000000e+00 : f32
    %905 = vector.broadcast %cst_699 : f32 to vector<1x1xf32>
    %906 = arith.divf %905, %904 : vector<1x1xf32>
    %cst_700 = arith.constant 0.000000e+00 : f32
    %907 = vector.broadcast %cst_700 : f32 to vector<1x1xf32>
    %908 = arith.cmpf oge, %898, %907 : vector<1x1xf32>
    %cst_701 = arith.constant 1.000000e+00 : f32
    %909 = vector.broadcast %cst_701 : f32 to vector<1x1xf32>
    %910 = arith.subf %909, %906 : vector<1x1xf32>
    %911 = arith.select %908, %906, %910 : vector<1x1xi1>, vector<1x1xf32>
    %912 = tpu.concatenate %881, %911 in 0 : vector<1x1xf32>, vector<1x1xf32> -> vector<2x1xf32>
    %c0_702 = arith.constant 0 : index
    %c0_703 = arith.constant 0 : index
    %913 = vector.load %arg19[%c0_702, %c0_703] : memref<2x1xf32, #tpu.memory_space<vmem>>, vector<2x1xf32>
    tpu.vector_store %arg19[%c0_702, %c0_703], %912 {strides = array<i32>} : memref<2x1xf32, #tpu.memory_space<vmem>>, vector<2x1xf32>,
    return
  }
}

</mosaic_0001>

<bundles_post_ra>
// kernel: discriminator_forward_mnist.1
= control target key start
LH: loop header
LB: loop body
LE: loop exit
PB: predicated region body
PF: predicated region fallthrough
CT: control target
= control target key end

     0   :  { %v16762_v0 = vmov 0   ;;  %vm470_vm0 = vcmask 1044480   ;;  %vm471_vm1 = vcmask 1045504   ;;  %v21027_v35 = vmov 65535   ;;  %s21002_s0 = inlined_call_operand.vmem [shape: f32[2,256,1], index: 0, kind: input, shape index: {}]   ;;  %s21003_s4 = inlined_call_operand.vmem [shape: bf16[16,11,21], index: 4, kind: input, shape index: {}]   ;;  %s21004_s3 = inlined_call_operand.vmem [shape: bf16[16,64,256], index: 3, kind: input, shape index: {}]   ;;  %s21005_s1 = inlined_call_operand.vmem [shape: f32[2,11], index: 1, kind: input, shape index: {}]   ;;  %s21006_s6 = inlined_call_operand.vmem [shape: bf16[16,16,64], index: 6, kind: input, shape index: {}]   ;;  %s21007_s7 = inlined_call_operand.vmem [shape: bf16[16,21,26], index: 7, kind: input, shape index: {}]   ;;  %s21008_s5 = inlined_call_operand.vmem [shape: f32[1,21], index: 5, kind: input, shape index: {}]   ;;  %s21009_s2 = inlined_call_operand.vmem [shape: f32[2,21], index: 2, kind: input, shape index: {}]   ;;  %s21010_s8 = inlined_call_operand.vmem [shape: f32[1,26], index: 8, kind: input, shape index: {}]   ;;  %s21011_s12 = inlined_call_operand.vmem [shape: bf16[11,32], index: 12, kind: input, shape index: {}]   ;;  %s21012_s11 = inlined_call_operand.vmem [shape: bf16[16,26,32], index: 11, kind: input, shape index: {}]   ;;  %s21013_s9 = inlined_call_operand.vmem [shape: f32[1,26], index: 9, kind: input, shape index: {}]   ;;  %s21014_s10 = inlined_call_operand.vmem [shape: f32[1,26], index: 10, kind: input, shape index: {}]   ;;  %s21015_s17 = inlined_call_operand.vmem [shape: f32[1,11], index: 17, kind: input, shape index: {}]   ;;  %s21016_s18 = inlined_call_operand.<no memory space> [shape: f32[1,1], index: 18, kind: input, shape index: {}]   ;;  %s21017_s13 = inlined_call_operand.vmem [shape: f32[1,32], index: 13, kind: input, shape index: {}]   ;;  %s21018_s14 = inlined_call_operand.vmem [shape: f32[1,32], index: 14, kind: input, shape index: {}]   ;;  %s21019_s15 = inlined_call_operand.vmem [shape: f32[1,32], index: 15, kind: input, shape index: {}]   ;;  %s21020_s16 = inlined_call_operand.vmem [shape: f32[1,32], index: 16, kind: input, shape index: {}]   ;;  %s21021_s19 = inlined_call_operand.vmem [shape: f32[2,1], index: 19, kind: output, shape index: {}]  }
   0x1   :  { %21124 = sst [smem:[#allocation52_spill]] %s21002_s0  ;;  %16146 = vset.pattern.permute.xlu1 %v16762_v0  ;;  %16135 = vset.pattern.permute.xlu0 %v16762_v0  ;;  %v472_v36 = vsel %vm470_vm0, 4294967295, %v21027_v35  ;;  %vm457_vm3 = vcmask 89088   ;;  %vm16765_vm4 = vmmov 0   ;;  %vm3814_vm13 = vcmask 523264  }
   0x2   :  { %21125 = sst [smem:[#allocation53_spill]] %s21003_s4  ;;  %s21128_s20 = sld [smem:[#allocation52_spill]]  ;;  %v16952_v43 = vsel %vm471_vm1, %v472_v36, 0  ;;  %vm3876_vm14 = vcmask 1041408   ;;  %vm3877_vm15 = vcmask 1042432   ;;  %vm3872_vm1 = vcmask 171008  }
   0x3   :  { %21126 = sst [smem:[#allocation54_spill]] %s21004_s3  ;;  %21129 = vst [vmem:[#allocation3_spill] sm:$0xff] %v16952_v43  ;;  %s21130_s23 = sld [smem:[#allocation53_spill]] }
   0x4   :  { %21127 = sst [smem:[#allocation55_spill]] %s21005_s1  ;;  %s21132_s3 = sld [smem:[#allocation54_spill]] }
   0x5   :  { %s21135_s4 = sld [smem:[#allocation55_spill]] }
   0x8   :  { %v99_v1 = vld [vmem:[%s21128_s20 + $0x90] sm:$0xff]  ;;  %v100_v2 = vld [vmem:[%s21128_s20 + $0x98] sm:$0xff]  ;;  %v97_v3 = vld [vmem:[%s21128_s20 + $0x80] sm:$0xff] }
   0x9   :  { %v16147_v4 = vpack.i.bf16 %v100_v2, %v99_v1  ;;  %v98_v5 = vld [vmem:[%s21128_s20 + $0x88] sm:$0xff]  ;;  %v83_v6 = vld [vmem:[%s21128_s20 + $0x10] sm:$0xff]  ;;  %v84_v7 = vld [vmem:[%s21128_s20 + $0x18] sm:$0xff] }
   0xa   :  { %v16136_v8 = vpack.i.bf16 %v98_v5, %v97_v3  ;;  %v81_v9 = vld [vmem:[%s21128_s20] sm:$0xff]  ;;  %v82_v10 = vld [vmem:[%s21128_s20 + $0x8] sm:$0xff]  ;;  %v16152_v11 = vpack.i.bf16 %v84_v7, %v83_v6  ;;  %v87_v19 = vld [vmem:[%s21128_s20 + $0x30] sm:$0xff] }
   0xb   :  { %16148 = vperm.xlu1 %16146, %v16147_v4   ;;  %v16141_v12 = vpack.i.bf16 %v82_v10, %v81_v9  ;;  %v85_v13 = vld [vmem:[%s21128_s20 + $0x20] sm:$0xff]  ;;  %v86_v14 = vld [vmem:[%s21128_s20 + $0x28] sm:$0xff]  ;;  %v88_v20 = vld [vmem:[%s21128_s20 + $0x38] sm:$0xff] }
   0xc   :  { %16137 = vperm.xlu0 %16135, %v16136_v8   ;;  %v101_v15 = vld [vmem:[%s21128_s20 + $0xa0] sm:$0xff]  ;;  %v102_v16 = vld [vmem:[%s21128_s20 + $0xa8] sm:$0xff]  ;;  %v16162_v17 = vpack.i.bf16 %v86_v14, %v85_v13  ;;  %v103_v21 = vld [vmem:[%s21128_s20 + $0xb0] sm:$0xff]  ;;  %v16172_v23 = vpack.i.bf16 %v88_v20, %v87_v19 }
   0xd   :  { %v16157_v18 = vpack.i.bf16 %v102_v16, %v101_v15  ;;  %v104_v22 = vld [vmem:[%s21128_s20 + $0xb8] sm:$0xff]  ;;  %v89_v25 = vld [vmem:[%s21128_s20 + $0x40] sm:$0xff]  ;;  %v90_v26 = vld [vmem:[%s21128_s20 + $0x48] sm:$0xff] }
   0xe   :  { %v16167_v24 = vpack.i.bf16 %v104_v22, %v103_v21  ;;  %v105_v27 = vld [vmem:[%s21128_s20 + $0xc0] sm:$0xff]  ;;  %v106_v28 = vld [vmem:[%s21128_s20 + $0xc8] sm:$0xff]  ;;  %v16182_v29 = vpack.i.bf16 %v90_v26, %v89_v25  ;;  %v91_v31 = vld [vmem:[%s21128_s20 + $0x50] sm:$0xff] }
   0xf   :  { %16153 = vperm.xlu1 %16146, %v16152_v11   ;;  %v16177_v30 = vpack.i.bf16 %v106_v28, %v105_v27  ;;  %v92_v32 = vld [vmem:[%s21128_s20 + $0x58] sm:$0xff]  ;;  %v107_v33 = vld [vmem:[%s21128_s20 + $0xd0] sm:$0xff]  ;;  %v93_v39 = vld [vmem:[%s21128_s20 + $0x60] sm:$0xff] }
  0x10   :  { %16142 = vperm.xlu0 %16135, %v16141_v12   ;;  %v108_v34 = vld [vmem:[%s21128_s20 + $0xd8] sm:$0xff]  ;;  %v16192_v37 = vpack.i.bf16 %v92_v32, %v91_v31  ;;  %v94_v40 = vld [vmem:[%s21128_s20 + $0x68] sm:$0xff]  ;;  %v109_v41 = vld [vmem:[%s21128_s20 + $0xe0] sm:$0xff] }
  0x11   :  { %v16187_v38 = vpack.i.bf16 %v108_v34, %v107_v33  ;;  %v110_v42 = vld [vmem:[%s21128_s20 + $0xe8] sm:$0xff]  ;;  %v95_v44 = vld [vmem:[%s21128_s20 + $0x70] sm:$0xff]  ;;  %v96_v45 = vld [vmem:[%s21128_s20 + $0x78] sm:$0xff]  ;;  %v16202_v47 = vpack.i.bf16 %v94_v40, %v93_v39  ;;  %v79_v40 = vlaneseq }
  0x12   :  { %v16297_v46 = vld [vmem:[%s21130_s23] sm:$0x3f]   ;;  %v111_v48 = vld [vmem:[%s21128_s20 + $0xf0] sm:$0xff]  ;;  %v112_v49 = vld [vmem:[%s21128_s20 + $0xf8] sm:$0xff]  ;;  %v16197_v50 = vpack.i.bf16 %v110_v42, %v109_v41  ;;  %v16212_v54 = vpack.i.bf16 %v96_v45, %v95_v44 }
  0x13   :  { %16163 = vperm.xlu1 %16146, %v16162_v17   ;;  %v16970_v51 = vand.u32 %v16297_v46, %v16952_v43  ;;  %v12345_v52 = vld [vmem:[%s21128_s20 + $0x100] sm:$0xff]  ;;  %v12346_v53 = vld [vmem:[%s21128_s20 + $0x108] sm:$0xff]  ;;  %v16207_v57 = vpack.i.bf16 %v112_v49, %v111_v48  ;;  %v12347_v58 = vld [vmem:[%s21128_s20 + $0x110] sm:$0xff]  ;;  %v17073_v41 = vshrl.u32 %v79_v40, 7  ;;  %v17083_v45 = vand.u32 127, %v79_v40 }
  0x14   :  { %16158 = vperm.xlu0 %16135, %v16157_v18   ;;  %v12361_v55 = vld [vmem:[%s21128_s20 + $0x180] sm:$0xff]  ;;  %v12362_v56 = vld [vmem:[%s21128_s20 + $0x188] sm:$0xff]  ;;  %v16222_v59 = vpack.i.bf16 %v12346_v53, %v12345_v52  ;;  %v12348_v61 = vld [vmem:[%s21128_s20 + $0x118] sm:$0xff] }
  0x15   :  { %21131 = vst [vmem:[#allocation4_spill] sm:$0xff] %v16970_v51  ;;  %14397 = vmatprep.subr.bf16.mxu1 %v16970_v51  ;;  %v16217_v60 = vpack.i.bf16 %v12362_v56, %v12361_v55  ;;  %v12363_v62 = vld [vmem:[%s21128_s20 + $0x190] sm:$0xff]  ;;  %v12364_v63 = vld [vmem:[%s21128_s20 + $0x198] sm:$0xff]  ;;  %v16232_v0 = vpack.i.bf16 %v12348_v61, %v12347_v58  ;;  %v12349_v2 = vld [vmem:[%s21128_s20 + $0x120] sm:$0xff]  ;;  %v17076_v42 = vsub.s32 0, %v17073_v41  ;;  %vm113_vm2 = vcmp.eq.s32.totalorder %v17083_v45, 0 }
  0x16   :  { %14398 = vmatpush3.bf16.msra.mxu1 %v16970_v51  ;;  %v16227_v1 = vpack.i.bf16 %v12364_v63, %v12363_v62  ;;  %v12350_v3 = vld [vmem:[%s21128_s20 + $0x128] sm:$0xff]  ;;  %v12365_v4 = vld [vmem:[%s21128_s20 + $0x1a0] sm:$0xff]  ;;  %v12351_v7 = vld [vmem:[%s21128_s20 + $0x130] sm:$0xff]  ;;  %21133 = vst [vmem:[#allocation5_spill] sm:$0xff] %v17073_v41 }
  0x17   :  { %16173 = vperm.xlu1 %16146, %v16172_v23   ;;  %v12366_v5 = vld [vmem:[%s21128_s20 + $0x1a8] sm:$0xff]  ;;  %v16242_v6 = vpack.i.bf16 %v12350_v3, %v12349_v2  ;;  %v12352_v9 = vld [vmem:[%s21128_s20 + $0x138] sm:$0xff]  ;;  %v12367_v10 = vld [vmem:[%s21128_s20 + $0x1b0] sm:$0xff]  ;;  %21134 = vst [vmem:[#allocation6_spill] sm:$0xff] %v17076_v42 }
  0x18   :  { %16168 = vperm.xlu0 %16135, %v16167_v24   ;;  %v16237_v8 = vpack.i.bf16 %v12366_v5, %v12365_v4  ;;  %v12368_v11 = vld [vmem:[%s21128_s20 + $0x1b8] sm:$0xff]  ;;  %v16300_v12 = vld [vmem:[%s21132_s3 + $0x4] ss:$8 sps:$4 sm:$0xff]   ;;  %v16252_v15 = vpack.i.bf16 %v12352_v9, %v12351_v7  ;;  %v12355_v19 = vld [vmem:[%s21128_s20 + $0x150] sm:$0xff]  ;;  %21136 = vst [vmem:[#allocation7_spill] sm:$0xff] %v17083_v45 }
  0x19   :  { %v12353_v13 = vld [vmem:[%s21128_s20 + $0x140] sm:$0xff]  ;;  %v12354_v14 = vld [vmem:[%s21128_s20 + $0x148] sm:$0xff]  ;;  %413 = vmatprep.mubr.bf16.mxu0 %v16300_v12  ;;  %v16247_v18 = vpack.i.bf16 %v12368_v11, %v12367_v10  ;;  %v12356_v20 = vld [vmem:[%s21128_s20 + $0x158] sm:$0xff] }
  0x1a   :  { %v12369_v16 = vld [vmem:[%s21128_s20 + $0x1c0] sm:$0xff]  ;;  %v12370_v17 = vld [vmem:[%s21128_s20 + $0x1c8] sm:$0xff]  ;;  %v16262_v21 = vpack.i.bf16 %v12354_v14, %v12353_v13  ;;  %v12371_v22 = vld [vmem:[%s21128_s20 + $0x1d0] sm:$0xff]  ;;  %v16272_v27 = vpack.i.bf16 %v12356_v20, %v12355_v19 }
  0x1b   :  { %16183 = vperm.xlu1 %16146, %v16182_v29   ;;  %v16257_v23 = vpack.i.bf16 %v12370_v17, %v12369_v16  ;;  %v12372_v24 = vld [vmem:[%s21128_s20 + $0x1d8] sm:$0xff]  ;;  %v12357_v25 = vld [vmem:[%s21128_s20 + $0x160] sm:$0xff]  ;;  %v12358_v26 = vld [vmem:[%s21128_s20 + $0x168] sm:$0xff] }
  0x1c   :  { %16178 = vperm.xlu0 %16135, %v16177_v30   ;;  %v12373_v28 = vld [vmem:[%s21128_s20 + $0x1e0] sm:$0xff]  ;;  %v12374_v29 = vld [vmem:[%s21128_s20 + $0x1e8] sm:$0xff]  ;;  %v16267_v30 = vpack.i.bf16 %v12372_v24, %v12371_v22  ;;  %v12359_v31 = vld [vmem:[%s21128_s20 + $0x170] sm:$0xff]  ;;  %v16282_v33 = vpack.i.bf16 %v12358_v26, %v12357_v25 }
  0x1d   :  { %v12360_v32 = vld [vmem:[%s21128_s20 + $0x178] sm:$0xff]  ;;  %v12375_v34 = vld [vmem:[%s21128_s20 + $0x1f0] sm:$0xff]  ;;  %v17081_v44 = vld [vmem:[%s21135_s4] sm:$0x3] }
  0x1e   :  { %v12376_v36 = vld [vmem:[%s21128_s20 + $0x1f8] sm:$0xff]  ;;  %v17087_v46 = vrot.slane %v17081_v44, %v17076_v42 }
  0x1f   :  { %16193 = vperm.xlu1 %16146, %v16192_v37   ;;  %v16277_v37 = vpack.i.bf16 %v12374_v29, %v12373_v28  ;;  %v16287_v39 = vpack.i.bf16 %v12376_v36, %v12375_v34 }
  0x20   :  { %16188 = vperm.xlu0 %16135, %v16187_v38   ;;  %v16292_v38 = vpack.i.bf16 %v12360_v32, %v12359_v31 }
  0x23   :  { %16203 = vperm.xlu1 %16146, %v16202_v47  }
  0x24   :  { %16198 = vperm.xlu0 %16135, %v16197_v50  }
  0x27   :  { %16213 = vperm.xlu1 %16146, %v16212_v54  }
  0x28   :  { %16208 = vperm.xlu0 %16135, %v16207_v57  }
  0x2b   :  { %16223 = vperm.xlu1 %16146, %v16222_v59  }
  0x2c   :  { %16218 = vperm.xlu0 %16135, %v16217_v60  }
  0x2f   :  { %16233 = vperm.xlu1 %16146, %v16232_v0  }
  0x30   :  { %16228 = vperm.xlu0 %16135, %v16227_v1  }
  0x33   :  { %16243 = vperm.xlu1 %16146, %v16242_v6  }
  0x34   :  { %16238 = vperm.xlu0 %16135, %v16237_v8  }
  0x37   :  { %16253 = vperm.xlu1 %16146, %v16252_v15  }
  0x38   :  { %16248 = vperm.xlu0 %16135, %v16247_v18  }
  0x3b   :  { %16263 = vperm.xlu1 %16146, %v16262_v21  }
  0x3c   :  { %16258 = vperm.xlu0 %16135, %v16257_v23  }
  0x3f   :  { %16273 = vperm.xlu1 %16146, %v16272_v27  }
  0x40   :  { %16268 = vperm.xlu0 %16135, %v16267_v30  }
  0x43   :  { %16283 = vperm.xlu1 %16146, %v16282_v33  }
  0x44   :  { %16278 = vperm.xlu0 %16135, %v16277_v37  }
  0x47   :  { %16293 = vperm.xlu1 %16146, %v16292_v38  }
  0x48   :  { %16288 = vperm.xlu0 %16135, %v16287_v39  }
  0x8a   :  { %v16149_v47 = vpop.permute.xlu1 %16148 }
  0x8b   :  { %v16151_v48 = vunpack.i.h.bf16 %v16149_v47  ;;  %v16150_v49 = vunpack.i.l.bf16 %v16149_v47  ;;  %v16138_v50 = vpop.permute.xlu0 %16137 }
  0x8c   :  { %v16140_v52 = vunpack.i.h.bf16 %v16138_v50  ;;  %v16139_v53 = vunpack.i.l.bf16 %v16138_v50 }
  0x8d   :  { %v297_v57 = vsel %vm113_vm2, %v16151_v48, %v17087_v46  ;;  %v296_v58 = vsel %vm113_vm2, %v16150_v49, %v17087_v46 }
  0x8e   :  { %v295_v54 = vsel %vm113_vm2, %v16140_v52, %v17087_v46  ;;  %v294_v55 = vsel %vm113_vm2, %v16139_v53, %v17087_v46  ;;  %v16154_v56 = vpop.permute.xlu1 %16153  ;;  %v17106_v1 = vpack.c.bf16 %v297_v57, %v296_v58 }
  0x8f   :  { %v17102_v59 = vpack.c.bf16 %v295_v54, %v294_v55  ;;  %v16143_v60 = vpop.permute.xlu0 %16142  ;;  %v16156_v61 = vunpack.i.h.bf16 %v16154_v56  ;;  %v16155_v62 = vunpack.i.l.bf16 %v16154_v56 }
  0x90   :  { %v16145_v63 = vunpack.i.h.bf16 %v16143_v60  ;;  %v16144_v0 = vunpack.i.l.bf16 %v16143_v60 }
  0x91   :  { %12601 = vmatprep.subr.bf16.mxu0 %v17102_v59  ;;  %12646 = vmatprep.subr.bf16.mxu1 %v17102_v59  ;;  %v281_v9 = vsel %vm113_vm2, %v16156_v61, %v17087_v46  ;;  %v280_v10 = vsel %vm113_vm2, %v16155_v62, %v17087_v46 }
  0x92   :  { %v279_v2 = vsel %vm113_vm2, %v16145_v63, %v17087_v46  ;;  %v278_v3 = vsel %vm113_vm2, %v16144_v0, %v17087_v46  ;;  %v16164_v4 = vpop.permute.xlu1 %16163  ;;  %v17130_v16 = vpack.c.bf16 %v281_v9, %v280_v10 }
  0x93   :  { %v17114_v5 = vpack.c.bf16 %v279_v2, %v278_v3  ;;  %v16166_v6 = vunpack.i.h.bf16 %v16164_v4  ;;  %v16165_v7 = vunpack.i.l.bf16 %v16164_v4  ;;  %v16159_v8 = vpop.permute.xlu0 %16158 }
  0x94   :  { %v16161_v11 = vunpack.i.h.bf16 %v16159_v8  ;;  %v16160_v12 = vunpack.i.l.bf16 %v16159_v8  ;;  %v21026_v8 = vsub.s32 1, %v17073_v41 }
  0x95   :  { %12602 = vmatpush3.bf16.msra.mxu0 %v17114_v5  ;;  %v283_v17 = vsel %vm113_vm2, %v16166_v6, %v17087_v46  ;;  %v282_v18 = vsel %vm113_vm2, %v16165_v7, %v17087_v46 }
  0x96   :  { %v299_v13 = vsel %vm113_vm2, %v16161_v11, %v17087_v46  ;;  %v298_v14 = vsel %vm113_vm2, %v16160_v12, %v17087_v46  ;;  %12603 = vmatprep.subr.bf16.mxu0 %v17106_v1  ;;  %v16174_v15 = vpop.permute.xlu1 %16173  ;;  %v17148_v28 = vpack.c.bf16 %v283_v17, %v282_v18 }
  0x97   :  { %v17138_v19 = vpack.c.bf16 %v299_v13, %v298_v14  ;;  %v16169_v20 = vpop.permute.xlu0 %16168  ;;  %v16176_v21 = vunpack.i.h.bf16 %v16174_v15  ;;  %v16175_v22 = vunpack.i.l.bf16 %v16174_v15 }
  0x98   :  { %v16171_v23 = vunpack.i.h.bf16 %v16169_v20  ;;  %v16170_v24 = vunpack.i.l.bf16 %v16169_v20 }
  0x99   :  { %12604 = vmatpush3.bf16.msra.mxu0 %v17130_v16  ;;  %v285_v33 = vsel %vm113_vm2, %v16176_v21, %v17087_v46  ;;  %v284_v34 = vsel %vm113_vm2, %v16175_v22, %v17087_v46 }
  0x9a   :  { %v301_v25 = vsel %vm113_vm2, %v16171_v23, %v17087_v46  ;;  %v300_v26 = vsel %vm113_vm2, %v16170_v24, %v17087_v46  ;;  %12605 = vmatprep.subr.bf16.mxu0 %v17138_v19  ;;  %v16184_v27 = vpop.permute.xlu1 %16183  ;;  %v17166_v47 = vpack.c.bf16 %v285_v33, %v284_v34  ;;  %v17217_v23 = vrot.slane %v17081_v44, %v21026_v8 }
  0x9b   :  { %v17150_v29 = vpack.c.bf16 %v301_v25, %v300_v26  ;;  %v16186_v30 = vunpack.i.h.bf16 %v16184_v27  ;;  %v16185_v31 = vunpack.i.l.bf16 %v16184_v27  ;;  %v16179_v32 = vpop.permute.xlu0 %16178 }
  0x9c   :  { %v16181_v36 = vunpack.i.h.bf16 %v16179_v32  ;;  %v16180_v37 = vunpack.i.l.bf16 %v16179_v32  ;;  %21138 = vst [vmem:[#allocation9_spill] sm:$0xff] %v17217_v23 }
  0x9d   :  { %12606 = vmatpush3.bf16.msra.mxu0 %v17148_v28  ;;  %v287_v48 = vsel %vm113_vm2, %v16186_v30, %v17087_v46  ;;  %v286_v49 = vsel %vm113_vm2, %v16185_v31, %v17087_v46 }
  0x9e   :  { %v303_v38 = vsel %vm113_vm2, %v16181_v36, %v17087_v46  ;;  %v302_v39 = vsel %vm113_vm2, %v16180_v37, %v17087_v46  ;;  %12607 = vmatprep.subr.bf16.mxu0 %v17150_v29  ;;  %v16194_v40 = vpop.permute.xlu1 %16193  ;;  %v17184_v61 = vpack.c.bf16 %v287_v48, %v286_v49 }
  0x9f   :  { %v17174_v50 = vpack.c.bf16 %v303_v38, %v302_v39  ;;  %v16189_v52 = vpop.permute.xlu0 %16188  ;;  %v16196_v53 = vunpack.i.h.bf16 %v16194_v40  ;;  %v16195_v54 = vunpack.i.l.bf16 %v16194_v40 }
  0xa0   :  { %v16191_v55 = vunpack.i.h.bf16 %v16189_v52  ;;  %v16190_v56 = vunpack.i.l.bf16 %v16189_v52 }
  0xa1   :  { %12608 = vmatpush3.bf16.msra.mxu0 %v17166_v47  ;;  %v289_v3 = vsel %vm113_vm2, %v16196_v53, %v17087_v46  ;;  %v288_v4 = vsel %vm113_vm2, %v16195_v54, %v17087_v46  ;;  %v16298_v54 = vld [vmem:[%s21132_s3] ss:$8 sps:$4 sm:$0xff]  }
  0xa2   :  { %v305_v57 = vsel %vm113_vm2, %v16191_v55, %v17087_v46  ;;  %v304_v58 = vsel %vm113_vm2, %v16190_v56, %v17087_v46  ;;  %12609 = vmatprep.subr.bf16.mxu0 %v17174_v50  ;;  %v16204_v60 = vpop.permute.xlu1 %16203  ;;  %v17203_v12 = vpack.c.bf16 %v289_v3, %v288_v4 }
  0xa3   :  { %v17186_v62 = vpack.c.bf16 %v305_v57, %v304_v58  ;;  %v16206_v63 = vunpack.i.h.bf16 %v16204_v60  ;;  %v16205_v0 = vunpack.i.l.bf16 %v16204_v60  ;;  %v16199_v2 = vpop.permute.xlu0 %16198  ;;  %v16301_v57 = vld [vmem:[%s21132_s3 + $0x14] ss:$8 sps:$4 sm:$0xff]  }
  0xa4   :  { %v16201_v6 = vunpack.i.h.bf16 %v16199_v2  ;;  %v16200_v7 = vunpack.i.l.bf16 %v16199_v2 }
  0xa5   :  { %12610 = vmatpush3.bf16.msra.mxu0 %v17184_v61  ;;  %v291_v13 = vsel %vm113_vm2, %v16206_v63, %v17087_v46  ;;  %v290_v14 = vsel %vm113_vm2, %v16205_v0, %v17087_v46 }
  0xa6   :  { %v307_v9 = vsel %vm113_vm2, %v16201_v6, %v17087_v46  ;;  %v306_v10 = vsel %vm113_vm2, %v16200_v7, %v17087_v46  ;;  %12611 = vmatprep.subr.bf16.mxu0 %v17186_v62  ;;  %v16214_v11 = vpop.permute.xlu1 %16213  ;;  %v17226_v27 = vpack.c.bf16 %v291_v13, %v290_v14 }
  0xa7   :  { %v17211_v15 = vpack.c.bf16 %v307_v9, %v306_v10  ;;  %v16209_v17 = vpop.permute.xlu0 %16208  ;;  %v16216_v18 = vunpack.i.h.bf16 %v16214_v11  ;;  %v16215_v20 = vunpack.i.l.bf16 %v16214_v11 }
  0xa8   :  { %v16211_v21 = vunpack.i.h.bf16 %v16209_v17  ;;  %v16210_v22 = vunpack.i.l.bf16 %v16209_v17  ;;  %21139 = vst [vmem:[#allocation10_spill] sm:$0xff] %v17226_v27 }
  0xa9   :  { %21137 = vst [vmem:[#allocation8_spill] sm:$0xff] %v17211_v15  ;;  %12612 = vmatpush3.bf16.msra.mxu0 %v17203_v12  ;;  %v293_v44 = vsel %vm113_vm2, %v16216_v18, %v17087_v46  ;;  %v292_v34 = vsel %vm113_vm2, %v16215_v20, %v17087_v46 }
  0xaa   :  { %v309_v24 = vsel %vm113_vm2, %v16211_v21, %v17087_v46  ;;  %v308_v25 = vsel %vm113_vm2, %v16210_v22, %v17087_v46  ;;  %12613 = vmatprep.subr.bf16.mxu0 %v17211_v15  ;;  %v16224_v26 = vpop.permute.xlu1 %16223  ;;  %v17248_v40 = vpack.c.bf16 %v293_v44, %v292_v34  ;;  %v16304_v34 = vld [vmem:[%s21132_s3 + $0x24] ss:$8 sps:$4 sm:$0xff]  }
  0xab   :  { %v17228_v30 = vpack.c.bf16 %v309_v24, %v308_v25  ;;  %v16226_v31 = vunpack.i.h.bf16 %v16224_v26  ;;  %v16225_v32 = vunpack.i.l.bf16 %v16224_v26  ;;  %v17230_v33 = vpop.permute.xlu0 %16218 }
  0xac   :  { %21141 = vst [vmem:[#allocation12_spill] sm:$0xff] %v17230_v33  ;;  %21143 = vst [vmem:[#allocation14_spill] sm:$0xff] %v17248_v40 }
  0xad   :  { %21140 = vst [vmem:[#allocation11_spill] sm:$0xff] %v17228_v30  ;;  %v5849_v36 = vsel %vm113_vm2, %v16226_v31, %v17217_v23  ;;  %v5848_v37 = vsel %vm113_vm2, %v16225_v32, %v17217_v23  ;;  %12614 = vmatpush3.bf16.msra.mxu0 %v17226_v27  ;;  %v16303_v31 = vld [vmem:[%s21132_s3 + $0x10] ss:$8 sps:$4 sm:$0xff]  }
  0xae   :  { %v17245_v38 = vpack.c.bf16 %v5849_v36, %v5848_v37  ;;  %12615 = vmatprep.subr.bf16.mxu0 %v17228_v30  ;;  %v16234_v39 = vpop.permute.xlu1 %16233 }
  0xaf   :  { %v16236_v48 = vunpack.i.h.bf16 %v16234_v39  ;;  %v16235_v49 = vunpack.i.l.bf16 %v16234_v39  ;;  %v16229_v46 = vpop.permute.xlu0 %16228 }
  0xb0   :  { %21142 = vst [vmem:[#allocation13_spill] sm:$0xff] %v17245_v38  ;;  %v16231_v52 = vunpack.i.h.bf16 %v16229_v46  ;;  %v16230_v53 = vunpack.i.l.bf16 %v16229_v46 }
  0xb1   :  { %v5851_v55 = vsel %vm113_vm2, %v16236_v48, %v17217_v23  ;;  %v5850_v56 = vsel %vm113_vm2, %v16235_v49, %v17217_v23  ;;  %12616 = vmatpush3.bf16.msra.mxu0 %v17248_v40 }
  0xb2   :  { %v17263_v58 = vpack.c.bf16 %v5851_v55, %v5850_v56  ;;  %v5867_v60 = vsel %vm113_vm2, %v16231_v52, %v17217_v23  ;;  %v5866_v63 = vsel %vm113_vm2, %v16230_v53, %v17217_v23  ;;  %12691 = vmatprep.subr.bf16.mxu0 %v17102_v59  ;;  %v16244_v0 = vpop.permute.xlu1 %16243 }
  0xb3   :  { %v17272_v2 = vpack.c.bf16 %v5867_v60, %v5866_v63  ;;  %v16246_v3 = vunpack.i.h.bf16 %v16244_v0  ;;  %v16245_v4 = vunpack.i.l.bf16 %v16244_v0  ;;  %v16239_v6 = vpop.permute.xlu0 %16238 }
  0xb4   :  { %21144 = vst [vmem:[#allocation15_spill] sm:$0xff] %v17263_v58  ;;  %v16241_v7 = vunpack.i.h.bf16 %v16239_v6  ;;  %v16240_v9 = vunpack.i.l.bf16 %v16239_v6  ;;  %414 = vmatmul.mubr.bf16.vlgmr.msra.gmra.mrb[0].mxu0 %v16298_v54 }
  0xb5   :  { %21145 = vst [vmem:[#allocation16_spill] sm:$0xff] %v17272_v2  ;;  %v5853_v10 = vsel %vm113_vm2, %v16246_v3, %v17217_v23  ;;  %v5852_v11 = vsel %vm113_vm2, %v16245_v4, %v17217_v23  ;;  %12692 = vmatpush3.bf16.msra.mxu0 %v17114_v5  ;;  %421 = vmatprep.mubr.bf16.mxu0 %v16301_v57 }
  0xb6   :  { %v17281_v13 = vpack.c.bf16 %v5853_v10, %v5852_v11  ;;  %v5869_v14 = vsel %vm113_vm2, %v16241_v7, %v17217_v23  ;;  %v5868_v17 = vsel %vm113_vm2, %v16240_v9, %v17217_v23  ;;  %12693 = vmatprep.subr.bf16.mxu0 %v17106_v1  ;;  %v16254_v18 = vpop.permute.xlu1 %16253 }
  0xb7   :  { %v17290_v20 = vpack.c.bf16 %v5869_v14, %v5868_v17  ;;  %v16256_v21 = vunpack.i.h.bf16 %v16254_v18  ;;  %v16255_v22 = vunpack.i.l.bf16 %v16254_v18  ;;  %v16249_v24 = vpop.permute.xlu0 %16248  ;;  %v16306_v14 = vld [vmem:[%s21132_s3 + $0x20] ss:$8 sps:$4 sm:$0xff]  }
  0xb8   :  { %21146 = vst [vmem:[#allocation17_spill] sm:$0xff] %v17281_v13  ;;  %v16251_v25 = vunpack.i.h.bf16 %v16249_v24  ;;  %v16250_v26 = vunpack.i.l.bf16 %v16249_v24 }
  0xb9   :  { %21147 = vst [vmem:[#allocation18_spill] sm:$0xff] %v17290_v20  ;;  %v5855_v32 = vsel %vm113_vm2, %v16256_v21, %v17217_v23  ;;  %v5854_v44 = vsel %vm113_vm2, %v16255_v22, %v17217_v23  ;;  %12694 = vmatpush3.bf16.msra.mxu0 %v17130_v16  ;;  %v16307_v21 = vld [vmem:[%s21132_s3 + $0x34] ss:$8 sps:$4 sm:$0xff]  }
  0xba   :  { %v17305_v36 = vpack.c.bf16 %v5855_v32, %v5854_v44  ;;  %v5871_v37 = vsel %vm113_vm2, %v16251_v25, %v17217_v23  ;;  %v5870_v39 = vsel %vm113_vm2, %v16250_v26, %v17217_v23  ;;  %12695 = vmatprep.subr.bf16.mxu0 %v17138_v19  ;;  %v16264_v48 = vpop.permute.xlu1 %16263 }
  0xbb   :  { %v17314_v49 = vpack.c.bf16 %v5871_v37, %v5870_v39  ;;  %v16266_v46 = vunpack.i.h.bf16 %v16264_v48  ;;  %v16265_v52 = vunpack.i.l.bf16 %v16264_v48  ;;  %v16259_v53 = vpop.permute.xlu0 %16258 }
  0xbc   :  { %21148 = vst [vmem:[#allocation19_spill] sm:$0xff] %v17305_v36  ;;  %v16261_v54 = vunpack.i.h.bf16 %v16259_v53  ;;  %v16260_v55 = vunpack.i.l.bf16 %v16259_v53  ;;  %422 = vmatmul.mubr.bf16.gmra.mrb[4].mxu0 %v16303_v31 }
  0xbd   :  { %21149 = vst [vmem:[#allocation20_spill] sm:$0xff] %v17314_v49  ;;  %v5857_v56 = vsel %vm113_vm2, %v16266_v46, %v17217_v23  ;;  %v5856_v57 = vsel %vm113_vm2, %v16265_v52, %v17217_v23  ;;  %12696 = vmatpush3.bf16.msra.mxu0 %v17148_v28  ;;  %429 = vmatprep.mubr.bf16.mxu0 %v16304_v34 }
  0xbe   :  { %v17323_v60 = vpack.c.bf16 %v5857_v56, %v5856_v57  ;;  %v5873_v63 = vsel %vm113_vm2, %v16261_v54, %v17217_v23  ;;  %v5872_v0 = vsel %vm113_vm2, %v16260_v55, %v17217_v23  ;;  %12697 = vmatprep.subr.bf16.mxu0 %v17150_v29  ;;  %v16274_v3 = vpop.permute.xlu1 %16273 }
  0xbf   :  { %v17332_v4 = vpack.c.bf16 %v5873_v63, %v5872_v0  ;;  %v16276_v6 = vunpack.i.h.bf16 %v16274_v3  ;;  %v16275_v7 = vunpack.i.l.bf16 %v16274_v3  ;;  %v16269_v9 = vpop.permute.xlu0 %16268 }
  0xc0   :  { %21150 = vst [vmem:[#allocation21_spill] sm:$0xff] %v17323_v60  ;;  %v16271_v10 = vunpack.i.h.bf16 %v16269_v9  ;;  %v16270_v11 = vunpack.i.l.bf16 %v16269_v9 }
  0xc1   :  { %21151 = vst [vmem:[#allocation22_spill] sm:$0xff] %v17332_v4  ;;  %v5859_v17 = vsel %vm113_vm2, %v16276_v6, %v17217_v23  ;;  %v5858_v18 = vsel %vm113_vm2, %v16275_v7, %v17217_v23  ;;  %12698 = vmatpush3.bf16.msra.mxu0 %v17166_v47  ;;  %v16309_v7 = vld [vmem:[%s21132_s3 + $0x30] ss:$8 sps:$4 sm:$0xff]  }
  0xc2   :  { %v17347_v22 = vpack.c.bf16 %v5859_v17, %v5858_v18  ;;  %v5875_v24 = vsel %vm113_vm2, %v16271_v10, %v17217_v23  ;;  %v5874_v25 = vsel %vm113_vm2, %v16270_v11, %v17217_v23  ;;  %12699 = vmatprep.subr.bf16.mxu0 %v17174_v50  ;;  %v16284_v26 = vpop.permute.xlu1 %16283  ;;  %v16312_v11 = vld [vmem:[%s21132_s3 + $0x84] ss:$8 sps:$4 sm:$0xff]  }
  0xc3   :  { %v17356_v31 = vpack.c.bf16 %v5875_v24, %v5874_v25  ;;  %v16286_v32 = vunpack.i.h.bf16 %v16284_v26  ;;  %v16285_v44 = vunpack.i.l.bf16 %v16284_v26  ;;  %v16279_v34 = vpop.permute.xlu0 %16278  ;;  %v16310_v24 = vld [vmem:[%s21132_s3 + $0x80] ss:$8 sps:$4 sm:$0xff]   ;;  %v16313_v25 = vld [vmem:[%s21132_s3 + $0x94] ss:$8 sps:$4 sm:$0xff]   ;;  %v16315_v26 = vld [vmem:[%s21132_s3 + $0x90] ss:$8 sps:$4 sm:$0xff]  }
  0xc4   :  { %21152 = vst [vmem:[#allocation23_spill] sm:$0xff] %v17347_v22  ;;  %v16281_v37 = vunpack.i.h.bf16 %v16279_v34  ;;  %v16280_v39 = vunpack.i.l.bf16 %v16279_v34  ;;  %430 = vmatmul.mubr.bf16.gmra.mrb[8].mxu0 %v16306_v14  ;;  %v16319_v34 = vld [vmem:[%s21132_s3 + $0xb4] ss:$8 sps:$4 sm:$0xff]  }
  0xc5   :  { %21153 = vst [vmem:[#allocation24_spill] sm:$0xff] %v17356_v31  ;;  %v5861_v48 = vsel %vm113_vm2, %v16286_v32, %v17217_v23  ;;  %v5860_v46 = vsel %vm113_vm2, %v16285_v44, %v17217_v23  ;;  %12700 = vmatpush3.bf16.msra.mxu0 %v17184_v61  ;;  %437 = vmatprep.mubr.bf16.mxu0 %v16307_v21  ;;  %v16316_v32 = vld [vmem:[%s21132_s3 + $0xa4] ss:$8 sps:$4 sm:$0xff]   ;;  %v16318_v44 = vld [vmem:[%s21132_s3 + $0xa0] ss:$8 sps:$4 sm:$0xff]  }
  0xc6   :  { %v17365_v52 = vpack.c.bf16 %v5861_v48, %v5860_v46  ;;  %v5877_v53 = vsel %vm113_vm2, %v16281_v37, %v17217_v23  ;;  %v5876_v54 = vsel %vm113_vm2, %v16280_v39, %v17217_v23  ;;  %12701 = vmatprep.subr.bf16.mxu0 %v17186_v62  ;;  %v16294_v55 = vpop.permute.xlu1 %16293  ;;  %v16321_v37 = vld [vmem:[%s21132_s3 + $0xb0] ss:$8 sps:$4 sm:$0xff]   ;;  %v16324_v39 = vld [vmem:[%s21132_s3 + $0xc4] ss:$8 sps:$4 sm:$0xff]   ;;  %v16322_v48 = vld [vmem:[%s21132_s3 + $0xc0] ss:$8 sps:$4 sm:$0xff]  }
  0xc7   :  { %v17374_v56 = vpack.c.bf16 %v5877_v53, %v5876_v54  ;;  %v16296_v57 = vunpack.i.h.bf16 %v16294_v55  ;;  %v16295_v63 = vunpack.i.l.bf16 %v16294_v55  ;;  %v16289_v0 = vpop.permute.xlu0 %16288  ;;  %v16325_v46 = vld [vmem:[%s21132_s3 + $0xd4] ss:$8 sps:$4 sm:$0xff]   ;;  %v16327_v53 = vld [vmem:[%s21132_s3 + $0xd0] ss:$8 sps:$4 sm:$0xff]   ;;  %v16328_v54 = vld [vmem:[%s21132_s3 + $0xe4] ss:$8 sps:$4 sm:$0xff]  }
  0xc8   :  { %21154 = vst [vmem:[#allocation25_spill] sm:$0xff] %v17365_v52  ;;  %v16291_v3 = vunpack.i.h.bf16 %v16289_v0  ;;  %v16290_v6 = vunpack.i.l.bf16 %v16289_v0  ;;  %v16330_v55 = vld [vmem:[%s21132_s3 + $0xe0] ss:$8 sps:$4 sm:$0xff]   ;;  %v16336_v0 = vld [vmem:[%s21132_s3 + $0x104] ss:$8 sps:$4 sm:$0xff]  }
  0xc9   :  { %21155 = vst [vmem:[#allocation26_spill] sm:$0xff] %v17374_v56  ;;  %v5863_v9 = vsel %vm113_vm2, %v16296_v57, %v17217_v23  ;;  %v5862_v10 = vsel %vm113_vm2, %v16295_v63, %v17217_v23  ;;  %12702 = vmatpush3.bf16.msra.mxu0 %v17203_v12  ;;  %v16331_v57 = vld [vmem:[%s21132_s3 + $0xf4] ss:$8 sps:$4 sm:$0xff]   ;;  %v16333_v63 = vld [vmem:[%s21132_s3 + $0xf0] ss:$8 sps:$4 sm:$0xff]  }
  0xca   :  { %v17389_v14 = vpack.c.bf16 %v5863_v9, %v5862_v10  ;;  %v5879_v17 = vsel %vm113_vm2, %v16291_v3, %v17217_v23  ;;  %v5878_v18 = vsel %vm113_vm2, %v16290_v6, %v17217_v23  ;;  %12703 = vmatprep.subr.bf16.mxu0 %v17211_v15  ;;  %v16334_v3 = vld [vmem:[%s21132_s3 + $0x100] ss:$8 sps:$4 sm:$0xff]   ;;  %v16337_v6 = vld [vmem:[%s21132_s3 + $0x114] ss:$8 sps:$4 sm:$0xff]   ;;  %v16340_v9 = vld [vmem:[%s21132_s3 + $0x124] ss:$8 sps:$4 sm:$0xff]  }
  0xcb   :  { %v17398_v21 = vpack.c.bf16 %v5879_v17, %v5878_v18  ;;  %v16342_v10 = vld [vmem:[%s21132_s3 + $0x120] ss:$8 sps:$4 sm:$0xff]   ;;  %v16345_v17 = vld [vmem:[%s21132_s3 + $0x130] ss:$8 sps:$4 sm:$0xff]   ;;  %v16348_v18 = vld [vmem:[%s21132_s3 + $0x184] ss:$8 sps:$4 sm:$0xff]  }
  0xcc   :  { %21156 = vst [vmem:[#allocation27_spill] sm:$0xff] %v17389_v14  ;;  %438 = vmatmul.mubr.bf16.gmra.mrb[12].mxu0 %v16309_v7  ;;  %v16339_v7 = vld [vmem:[%s21132_s3 + $0x110] ss:$8 sps:$4 sm:$0xff]  }
  0xcd   :  { %21157 = vst [vmem:[#allocation28_spill] sm:$0xff] %v17398_v21  ;;  %12704 = vmatpush3.bf16.msra.mxu0 %v17226_v27  ;;  %845 = vmatprep.mubr.bf16.mxu0 %v16312_v11  ;;  %v16343_v11 = vld [vmem:[%s21132_s3 + $0x134] ss:$8 sps:$4 sm:$0xff]  }
  0xce   :  { %12705 = vmatprep.subr.bf16.mxu0 %v17228_v30 }
  0xd1   :  { %12706 = vmatpush3.bf16.msra.mxu0 %v17248_v40 }
  0xd2   :  { %12736 = vmatprep.subr.bf16.mxu0 %v17102_v59 }
  0xd4   :  { %846 = vmatmul.mubr.bf16.vlgmr.msra.gmra.mrb[16].mxu0 %v16310_v24  ;;  %v16346_v24 = vld [vmem:[%s21132_s3 + $0x180] ss:$8 sps:$4 sm:$0xff]  }
  0xd5   :  { %12737 = vmatpush3.bf16.msra.mxu0 %v17114_v5  ;;  %853 = vmatprep.mubr.bf16.mxu0 %v16313_v25  ;;  %v16349_v25 = vld [vmem:[%s21132_s3 + $0x194] ss:$8 sps:$4 sm:$0xff]  }
  0xd6   :  { %12738 = vmatprep.subr.bf16.mxu0 %v17106_v1 }
  0xd9   :  { %12739 = vmatpush3.bf16.msra.mxu0 %v17130_v16 }
  0xda   :  { %12740 = vmatprep.subr.bf16.mxu0 %v17138_v19 }
  0xdc   :  { %854 = vmatmul.mubr.bf16.gmra.mrb[20].mxu0 %v16315_v26  ;;  %v16351_v26 = vld [vmem:[%s21132_s3 + $0x190] ss:$8 sps:$4 sm:$0xff]  }
  0xdd   :  { %12741 = vmatpush3.bf16.msra.mxu0 %v17148_v28  ;;  %861 = vmatprep.mubr.bf16.mxu0 %v16316_v32  ;;  %v16352_v32 = vld [vmem:[%s21132_s3 + $0x1a4] ss:$8 sps:$4 sm:$0xff]  }
  0xde   :  { %12742 = vmatprep.subr.bf16.mxu0 %v17150_v29 }
  0xe1   :  { %12743 = vmatpush3.bf16.msra.mxu0 %v17166_v47 }
  0xe2   :  { %12744 = vmatprep.subr.bf16.mxu0 %v17174_v50 }
  0xe4   :  { %862 = vmatmul.mubr.bf16.gmra.mrb[24].mxu0 %v16318_v44  ;;  %v16354_v44 = vld [vmem:[%s21132_s3 + $0x1a0] ss:$8 sps:$4 sm:$0xff]  }
  0xe5   :  { %12745 = vmatpush3.bf16.msra.mxu0 %v17184_v61  ;;  %869 = vmatprep.mubr.bf16.mxu0 %v16319_v34  ;;  %v16355_v34 = vld [vmem:[%s21132_s3 + $0x1b4] ss:$8 sps:$4 sm:$0xff]  }
  0xe6   :  { %12746 = vmatprep.subr.bf16.mxu0 %v17186_v62 }
  0xe9   :  { %12747 = vmatpush3.bf16.msra.mxu0 %v17203_v12 }
  0xea   :  { %12748 = vmatprep.subr.bf16.mxu0 %v17211_v15 }
  0xec   :  { %870 = vmatmul.mubr.bf16.gmra.mrb[28].mxu0 %v16321_v37  ;;  %v16357_v37 = vld [vmem:[%s21132_s3 + $0x1b0] ss:$8 sps:$4 sm:$0xff]  }
  0xed   :  { %12749 = vmatpush3.bf16.msra.mxu0 %v17226_v27  ;;  %1059 = vmatprep.mubr.bf16.mxu0 %v16324_v39  ;;  %v16360_v39 = vld [vmem:[%s21132_s3 + $0x1c4] ss:$8 sps:$4 sm:$0xff]  }
  0xee   :  { %12750 = vmatprep.subr.bf16.mxu0 %v17228_v30 }
  0xf1   :  { %12751 = vmatpush3.bf16.msra.mxu0 %v17248_v40 }
  0xf2   :  { %12781 = vmatprep.subr.bf16.mxu0 %v17102_v59 }
  0xf4   :  { %1060 = vmatmul.mubr.bf16.vlgmr.msra.gmra.mrb[32].mxu0 %v16322_v48  ;;  %v16358_v48 = vld [vmem:[%s21132_s3 + $0x1c0] ss:$8 sps:$4 sm:$0xff]  }
  0xf5   :  { %12782 = vmatpush3.bf16.msra.mxu0 %v17114_v5  ;;  %1067 = vmatprep.mubr.bf16.mxu0 %v16325_v46  ;;  %v16361_v46 = vld [vmem:[%s21132_s3 + $0x1d4] ss:$8 sps:$4 sm:$0xff]  }
  0xf6   :  { %12783 = vmatprep.subr.bf16.mxu0 %v17106_v1 }
  0xf9   :  { %12784 = vmatpush3.bf16.msra.mxu0 %v17130_v16 }
  0xfa   :  { %12785 = vmatprep.subr.bf16.mxu0 %v17138_v19 }
  0xfc   :  { %1068 = vmatmul.mubr.bf16.gmra.mrb[36].mxu0 %v16327_v53  ;;  %v16363_v53 = vld [vmem:[%s21132_s3 + $0x1d0] ss:$8 sps:$4 sm:$0xff]  }
  0xfd   :  { %12786 = vmatpush3.bf16.msra.mxu0 %v17148_v28  ;;  %1075 = vmatprep.mubr.bf16.mxu0 %v16328_v54  ;;  %v16364_v54 = vld [vmem:[%s21132_s3 + $0x1e4] ss:$8 sps:$4 sm:$0xff]  }
  0xfe   :  { %12787 = vmatprep.subr.bf16.mxu0 %v17150_v29 }
 0x101   :  { %12788 = vmatpush3.bf16.msra.mxu0 %v17166_v47 }
 0x102   :  { %12789 = vmatprep.subr.bf16.mxu0 %v17174_v50 }
 0x104   :  { %1076 = vmatmul.mubr.bf16.gmra.mrb[40].mxu0 %v16330_v55  ;;  %v16366_v55 = vld [vmem:[%s21132_s3 + $0x1e0] ss:$8 sps:$4 sm:$0xff]  }
 0x105   :  { %12790 = vmatpush3.bf16.msra.mxu0 %v17184_v61  ;;  %1083 = vmatprep.mubr.bf16.mxu0 %v16331_v57  ;;  %v16367_v57 = vld [vmem:[%s21132_s3 + $0x1f4] ss:$8 sps:$4 sm:$0xff]  }
 0x106   :  { %12791 = vmatprep.subr.bf16.mxu0 %v17186_v62 }
 0x109   :  { %12792 = vmatpush3.bf16.msra.mxu0 %v17203_v12 }
 0x10a   :  { %12793 = vmatprep.subr.bf16.mxu0 %v17211_v15 }
 0x10c   :  { %1084 = vmatmul.mubr.bf16.gmra.mrb[44].mxu0 %v16333_v63  ;;  %v16369_v63 = vld [vmem:[%s21132_s3 + $0x1f0] ss:$8 sps:$4 sm:$0xff]  }
 0x10d   :  { %12794 = vmatpush3.bf16.msra.mxu0 %v17226_v27  ;;  %1273 = vmatprep.mubr.bf16.mxu0 %v16336_v0  ;;  %v16372_v0 = vld [vmem:[%s21132_s3 + $0x204] ss:$8 sps:$4 sm:$0xff]  }
 0x10e   :  { %12795 = vmatprep.subr.bf16.mxu0 %v17228_v30 }
 0x111   :  { %12796 = vmatpush3.bf16.msra.mxu0 %v17248_v40 }
 0x112   :  { %12871 = vmatprep.subr.bf16.mxu0 %v17102_v59 }
 0x114   :  { %1274 = vmatmul.mubr.bf16.vlgmr.msra.gmra.mrb[48].mxu0 %v16334_v3  ;;  %v16370_v3 = vld [vmem:[%s21132_s3 + $0x200] ss:$8 sps:$4 sm:$0xff]  }
 0x115   :  { %12872 = vmatpush3.bf16.msra.mxu0 %v17114_v5  ;;  %1281 = vmatprep.mubr.bf16.mxu0 %v16337_v6  ;;  %v16373_v6 = vld [vmem:[%s21132_s3 + $0x214] ss:$8 sps:$4 sm:$0xff]  }
 0x116   :  { %12873 = vmatprep.subr.bf16.mxu0 %v17106_v1 }
 0x119   :  { %12874 = vmatpush3.bf16.msra.mxu0 %v17130_v16 }
 0x11a   :  { %12875 = vmatprep.subr.bf16.mxu0 %v17138_v19 }
 0x11c   :  { %1282 = vmatmul.mubr.bf16.gmra.mrb[52].mxu0 %v16339_v7  ;;  %v16375_v7 = vld [vmem:[%s21132_s3 + $0x210] ss:$8 sps:$4 sm:$0xff]  }
 0x11d   :  { %12876 = vmatpush3.bf16.msra.mxu0 %v17148_v28  ;;  %1289 = vmatprep.mubr.bf16.mxu0 %v16340_v9  ;;  %v16376_v9 = vld [vmem:[%s21132_s3 + $0x224] ss:$8 sps:$4 sm:$0xff]  }
 0x11e   :  { %12877 = vmatprep.subr.bf16.mxu0 %v17150_v29 }
 0x121   :  { %12878 = vmatpush3.bf16.msra.mxu0 %v17166_v47 }
 0x122   :  { %12879 = vmatprep.subr.bf16.mxu0 %v17174_v50 }
 0x124   :  { %1290 = vmatmul.mubr.bf16.gmra.mrb[56].mxu0 %v16342_v10  ;;  %v16378_v10 = vld [vmem:[%s21132_s3 + $0x220] ss:$8 sps:$4 sm:$0xff]  }
 0x125   :  { %12880 = vmatpush3.bf16.msra.mxu0 %v17184_v61  ;;  %1297 = vmatprep.mubr.bf16.mxu0 %v16343_v11  ;;  %v16379_v11 = vld [vmem:[%s21132_s3 + $0x234] ss:$8 sps:$4 sm:$0xff]  }
 0x126   :  { %12881 = vmatprep.subr.bf16.mxu0 %v17186_v62 }
 0x129   :  { %12882 = vmatpush3.bf16.msra.mxu0 %v17203_v12 }
 0x12a   :  { %12883 = vmatprep.subr.bf16.mxu0 %v17211_v15 }
 0x12c   :  { %1298 = vmatmul.mubr.bf16.gmra.mrb[60].mxu0 %v16345_v17 }
 0x12d   :  { %12884 = vmatpush3.bf16.msra.mxu0 %v17226_v27  ;;  %1701 = vmatprep.mubr.bf16.mxu0 %v16348_v18 }
 0x12e   :  { %12885 = vmatprep.subr.bf16.mxu0 %v17228_v30 }
 0x131   :  { %12886 = vmatpush3.bf16.msra.mxu0 %v17248_v40 }
 0x132   :  { %12916 = vmatprep.subr.bf16.mxu0 %v17102_v59 }
 0x134   :  { %1702 = vmatmul.mubr.bf16.vlgmr.msra.gmra.mrb[64].mxu0 %v16346_v24  ;;  %v16381_v24 = vld [vmem:[%s21132_s3 + $0x230] ss:$8 sps:$4 sm:$0xff]  }
 0x135   :  { %12917 = vmatpush3.bf16.msra.mxu0 %v17114_v5  ;;  %1709 = vmatprep.mubr.bf16.mxu0 %v16349_v25 }
 0x136   :  { %12918 = vmatprep.subr.bf16.mxu0 %v17106_v1 }
 0x139   :  { %12919 = vmatpush3.bf16.msra.mxu0 %v17130_v16 }
 0x13a   :  { %12920 = vmatprep.subr.bf16.mxu0 %v17138_v19 }
 0x13c   :  { %1710 = vmatmul.mubr.bf16.gmra.mrb[68].mxu0 %v16351_v26 }
 0x13d   :  { %12921 = vmatpush3.bf16.msra.mxu0 %v17148_v28  ;;  %1717 = vmatprep.mubr.bf16.mxu0 %v16352_v32  ;;  %v16384_v32 = vld [vmem:[%s21132_s3 + $0x244] ss:$8 sps:$4 sm:$0xff]  }
 0x13e   :  { %12922 = vmatprep.subr.bf16.mxu0 %v17150_v29 }
 0x141   :  { %12923 = vmatpush3.bf16.msra.mxu0 %v17166_v47 }
 0x142   :  { %12924 = vmatprep.subr.bf16.mxu0 %v17174_v50 }
 0x144   :  { %1718 = vmatmul.mubr.bf16.gmra.mrb[72].mxu0 %v16354_v44 }
 0x145   :  { %12925 = vmatpush3.bf16.msra.mxu0 %v17184_v61  ;;  %1725 = vmatprep.mubr.bf16.mxu0 %v16355_v34 }
 0x146   :  { %12926 = vmatprep.subr.bf16.mxu0 %v17186_v62 }
 0x149   :  { %12927 = vmatpush3.bf16.msra.mxu0 %v17203_v12 }
 0x14a   :  { %12928 = vmatprep.subr.bf16.mxu0 %v17211_v15 }
 0x14c   :  { %1726 = vmatmul.mubr.bf16.gmra.mrb[76].mxu0 %v16357_v37 }
 0x14d   :  { %12929 = vmatpush3.bf16.msra.mxu0 %v17226_v27  ;;  %1915 = vmatprep.mubr.bf16.mxu0 %v16360_v39 }
 0x14e   :  { %12930 = vmatprep.subr.bf16.mxu0 %v17228_v30 }
 0x151   :  { %12931 = vmatpush3.bf16.msra.mxu0 %v17248_v40 }
 0x152   :  { %12961 = vmatprep.subr.bf16.mxu0 %v17102_v59 }
 0x154   :  { %1916 = vmatmul.mubr.bf16.vlgmr.msra.gmra.mrb[80].mxu0 %v16358_v48 }
 0x155   :  { %12962 = vmatpush3.bf16.msra.mxu0 %v17114_v5  ;;  %1923 = vmatprep.mubr.bf16.mxu0 %v16361_v46  ;;  %v16382_v46 = vld [vmem:[%s21132_s3 + $0x240] ss:$8 sps:$4 sm:$0xff]  }
 0x156   :  { %12963 = vmatprep.subr.bf16.mxu0 %v17106_v1 }
 0x159   :  { %12964 = vmatpush3.bf16.msra.mxu0 %v17130_v16 }
 0x15a   :  { %12965 = vmatprep.subr.bf16.mxu0 %v17138_v19 }
 0x15c   :  { %1924 = vmatmul.mubr.bf16.gmra.mrb[84].mxu0 %v16363_v53 }
 0x15d   :  { %12966 = vmatpush3.bf16.msra.mxu0 %v17148_v28  ;;  %1931 = vmatprep.mubr.bf16.mxu0 %v16364_v54 }
 0x15e   :  { %12967 = vmatprep.subr.bf16.mxu0 %v17150_v29 }
 0x161   :  { %12968 = vmatpush3.bf16.msra.mxu0 %v17166_v47 }
 0x162   :  { %12969 = vmatprep.subr.bf16.mxu0 %v17174_v50 }
 0x164   :  { %1932 = vmatmul.mubr.bf16.gmra.mrb[88].mxu0 %v16366_v55  ;;  %v16385_v55 = vld [vmem:[%s21132_s3 + $0x254] ss:$8 sps:$4 sm:$0xff]  }
 0x165   :  { %12970 = vmatpush3.bf16.msra.mxu0 %v17184_v61  ;;  %1939 = vmatprep.mubr.bf16.mxu0 %v16367_v57 }
 0x166   :  { %12971 = vmatprep.subr.bf16.mxu0 %v17186_v62 }
 0x169   :  { %12972 = vmatpush3.bf16.msra.mxu0 %v17203_v12 }
 0x16a   :  { %12973 = vmatprep.subr.bf16.mxu0 %v17211_v15 }
 0x16c   :  { %1940 = vmatmul.mubr.bf16.gmra.mrb[92].mxu0 %v16369_v63 }
 0x16d   :  { %12974 = vmatpush3.bf16.msra.mxu0 %v17226_v27  ;;  %2129 = vmatprep.mubr.bf16.mxu0 %v16372_v0 }
 0x16e   :  { %12975 = vmatprep.subr.bf16.mxu0 %v17228_v30 }
 0x171   :  { %12976 = vmatpush3.bf16.msra.mxu0 %v17248_v40 }
 0x172   :  { %13006 = vmatprep.subr.bf16.mxu0 %v17102_v59 }
 0x174   :  { %2130 = vmatmul.mubr.bf16.vlgmr.msra.gmra.mrb[96].mxu0 %v16370_v3 }
 0x175   :  { %13007 = vmatpush3.bf16.msra.mxu0 %v17114_v5  ;;  %2137 = vmatprep.mubr.bf16.mxu0 %v16373_v6 }
 0x176   :  { %13008 = vmatprep.subr.bf16.mxu0 %v17106_v1 }
 0x179   :  { %13009 = vmatpush3.bf16.msra.mxu0 %v17130_v16 }
 0x17a   :  { %13010 = vmatprep.subr.bf16.mxu0 %v17138_v19 }
 0x17c   :  { %2138 = vmatmul.mubr.bf16.gmra.mrb[100].mxu0 %v16375_v7  ;;  %v16387_v7 = vld [vmem:[%s21132_s3 + $0x250] ss:$8 sps:$4 sm:$0xff]  }
 0x17d   :  { %13011 = vmatpush3.bf16.msra.mxu0 %v17148_v28  ;;  %2145 = vmatprep.mubr.bf16.mxu0 %v16376_v9 }
 0x17e   :  { %13012 = vmatprep.subr.bf16.mxu0 %v17150_v29 }
 0x181   :  { %13013 = vmatpush3.bf16.msra.mxu0 %v17166_v47 }
 0x182   :  { %13014 = vmatprep.subr.bf16.mxu0 %v17174_v50 }
 0x184   :  { %2146 = vmatmul.mubr.bf16.gmra.mrb[104].mxu0 %v16378_v10 }
 0x185   :  { %13015 = vmatpush3.bf16.msra.mxu0 %v17184_v61  ;;  %2153 = vmatprep.mubr.bf16.mxu0 %v16379_v11 }
 0x186   :  { %13016 = vmatprep.subr.bf16.mxu0 %v17186_v62 }
 0x187   :  { %v12617_v17 = vpop.f32.mrb[0].mxu0 }
 0x188   :  { %v12618_v18 = vpop.f32.mrb[1].mxu0 }
 0x189   :  { %v12620_v25 = vpop.f32.mrb[2].mxu0  ;;  %13017 = vmatpush3.bf16.msra.mxu0 %v17203_v12  ;;  %v12619_v26 = vadd.f32 %v12618_v18, %v12617_v17  ;;  %v16388_v17 = vld [vmem:[%s21132_s3 + $0x264] ss:$8 sps:$4 sm:$0xff]  }
 0x18a   :  { %v12621_v44 = vpop.f32.mrb[3].mxu0  ;;  %13018 = vmatprep.subr.bf16.mxu0 %v17211_v15 }
 0x18b   :  { %v12622_v34 = vadd.f32 %v12621_v44, %v12620_v25 }
 0x18c   :  { %2154 = vmatmul.mubr.bf16.gmra.mrb[108].mxu0 %v16381_v24 }
 0x18d   :  { %13019 = vmatpush3.bf16.msra.mxu0 %v17226_v27  ;;  %v446_v37 = vpack.c.bf16 %v12622_v34, %v12619_v26  ;;  %2343 = vmatprep.mubr.bf16.mxu0 %v16384_v32  ;;  %v16390_v32 = vld [vmem:[%s21132_s3 + $0x260] ss:$8 sps:$4 sm:$0xff]  }
 0x18e   :  { %13020 = vmatprep.subr.bf16.mxu0 %v17228_v30 }
 0x18f   :  { %v12623_v39 = vpop.f32.mrb[4].mxu0  ;;  %14399 = vmatprep.mubr.msk.bf16.mxu1 %vm457_vm3, %v446_v37 }
 0x190   :  { %v12624_v48 = vpop.f32.mrb[5].mxu0 }
 0x191   :  { %v12625_v53 = vadd.f32 %v12624_v48, %v12623_v39  ;;  %v12626_v54 = vpop.f32.mrb[6].mxu0  ;;  %13021 = vmatpush3.bf16.msra.mxu0 %v17248_v40  ;;  %v16391_v39 = vld [vmem:[%s21132_s3 + $0x274] ss:$8 sps:$4 sm:$0xff]  }
 0x192   :  { %v12627_v57 = vpop.f32.mrb[7].mxu0  ;;  %13096 = vmatprep.subr.bf16.mxu0 %v17102_v59 }
 0x193   :  { %v12628_v63 = vadd.f32 %v12627_v57, %v12626_v54 }
 0x194   :  { %2344 = vmatmul.mubr.bf16.vlgmr.msra.gmra.mrb[112].mxu0 %v16382_v46  ;;  %v16399_v46 = vld [vmem:[%s21132_s3 + $0x44] ss:$8 sps:$4 sm:$0xff]  }
 0x195   :  { %v447_v0 = vpack.c.bf16 %v12628_v63, %v12625_v53  ;;  %13097 = vmatpush3.bf16.msra.mxu0 %v17114_v5  ;;  %2351 = vmatprep.mubr.bf16.mxu0 %v16385_v55  ;;  %v16393_v55 = vld [vmem:[%s21132_s3 + $0x270] ss:$8 sps:$4 sm:$0xff]  }
 0x196   :  { %13098 = vmatprep.subr.bf16.mxu0 %v17106_v1 }
 0x197   :  { %14400 = vmatmul.mubr.msk.bf16.vlgmr.msra.gmra.mrb[0].mxu1 %vm457_vm3, %v447_v0  ;;  %v12629_v3 = vpop.f32.mrb[8].mxu0 }
 0x198   :  { %12647 = vmatpush3.bf16.msra.mxu1 %v17114_v5  ;;  %v12630_v6 = vpop.f32.mrb[9].mxu0 }
 0x199   :  { %12648 = vmatprep.subr.bf16.mxu1 %v17106_v1  ;;  %13099 = vmatpush3.bf16.msra.mxu0 %v17130_v16  ;;  %v12631_v9 = vadd.f32 %v12630_v6, %v12629_v3  ;;  %v12632_v10 = vpop.f32.mrb[10].mxu0  ;;  %v16396_v3 = vld [vmem:[%s21132_s3 + $0x2c4] ss:$8 sps:$4 sm:$0xff]  }
 0x19a   :  { %13100 = vmatprep.subr.bf16.mxu0 %v17138_v19  ;;  %v12633_v11 = vpop.f32.mrb[11].mxu0 }
 0x19b   :  { %v12634_v18 = vadd.f32 %v12633_v11, %v12632_v10  ;;  %v16394_v11 = vld [vmem:[%s21132_s3 + $0x2c0] ss:$8 sps:$4 sm:$0xff]  }
 0x19c   :  { %12649 = vmatpush3.bf16.msra.mxu1 %v17130_v16  ;;  %2352 = vmatmul.mubr.bf16.gmra.mrb[116].mxu0 %v16387_v7 }
 0x19d   :  { %12650 = vmatprep.subr.bf16.mxu1 %v17138_v19  ;;  %13101 = vmatpush3.bf16.msra.mxu0 %v17148_v28  ;;  %v448_v24 = vpack.c.bf16 %v12634_v18, %v12631_v9  ;;  %v16400_v18 = vld [vmem:[%s21132_s3 + $0x2d4] ss:$8 sps:$4 sm:$0xff]  }
 0x19e   :  { %13102 = vmatprep.subr.bf16.mxu0 %v17150_v29  ;;  %2359 = vmatprep.mubr.bf16.mxu0 %v16388_v17 }
 0x19f   :  { %v12635_v25 = vpop.f32.mrb[12].mxu0  ;;  %14403 = vmatprep.mubr.msk.bf16.mxu1 %vm457_vm3, %v448_v24 }
 0x1a0   :  { %12651 = vmatpush3.bf16.msra.mxu1 %v17148_v28  ;;  %v12636_v26 = vpop.f32.mrb[13].mxu0 }
 0x1a1   :  { %12652 = vmatprep.subr.bf16.mxu1 %v17150_v29  ;;  %13103 = vmatpush3.bf16.msra.mxu0 %v17166_v47  ;;  %v12637_v44 = vadd.f32 %v12636_v26, %v12635_v25  ;;  %v12638_v34 = vpop.f32.mrb[14].mxu0  ;;  %v16397_v26 = vld [vmem:[%s21132_s3 + $0x40] ss:$8 sps:$4 sm:$0xff]  }
 0x1a2   :  { %13104 = vmatprep.subr.bf16.mxu0 %v17174_v50  ;;  %v12639_v37 = vpop.f32.mrb[15].mxu0 }
 0x1a3   :  { %v12640_v48 = vadd.f32 %v12639_v37, %v12638_v34  ;;  %v16406_v34 = vld [vmem:[%s21132_s3 + $0x2e4] ss:$8 sps:$4 sm:$0xff]   ;;  %v16405_v37 = vld [vmem:[%s21132_s3 + $0x50] ss:$8 sps:$4 sm:$0xff]  }
 0x1a4   :  { %12653 = vmatpush3.bf16.msra.mxu1 %v17166_v47  ;;  %2360 = vmatmul.mubr.bf16.gmra.mrb[120].mxu0 %v16390_v32  ;;  %v16402_v32 = vld [vmem:[%s21132_s3 + $0x54] ss:$8 sps:$4 sm:$0xff]  }
 0x1a5   :  { %12654 = vmatprep.subr.bf16.mxu1 %v17174_v50  ;;  %13105 = vmatpush3.bf16.msra.mxu0 %v17184_v61  ;;  %v449_v53 = vpack.c.bf16 %v12640_v48, %v12637_v44  ;;  %v16404_v44 = vld [vmem:[%s21132_s3 + $0x2d0] ss:$8 sps:$4 sm:$0xff]   ;;  %v16410_v48 = vld [vmem:[%s21132_s3 + $0x2e0] ss:$8 sps:$4 sm:$0xff]  }
 0x1a6   :  { %13106 = vmatprep.subr.bf16.mxu0 %v17186_v62  ;;  %2367 = vmatprep.mubr.bf16.mxu0 %v16391_v39  ;;  %v16408_v39 = vld [vmem:[%s21132_s3 + $0x64] ss:$8 sps:$4 sm:$0xff]  }
 0x1a7   :  { %14404 = vmatmul.mubr.msk.bf16.gmra.mrb[4].mxu1 %vm457_vm3, %v449_v53  ;;  %v12707_v54 = vpop.f32.mrb[16].mxu0  ;;  %v16411_v53 = vld [vmem:[%s21132_s3 + $0x60] ss:$8 sps:$4 sm:$0xff]  }
 0x1a8   :  { %12655 = vmatpush3.bf16.msra.mxu1 %v17184_v61  ;;  %631 = vmatprep.mubr.bf16.mxu1 %v16399_v46  ;;  %v12708_v57 = vpop.f32.mrb[17].mxu0  ;;  %v16412_v46 = vld [vmem:[%s21132_s3 + $0x2f4] ss:$8 sps:$4 sm:$0xff]  }
 0x1a9   :  { %12656 = vmatprep.subr.bf16.mxu1 %v17186_v62  ;;  %13107 = vmatpush3.bf16.msra.mxu0 %v17203_v12  ;;  %v17693_v63 = vadd.f32 %v12708_v57, %v12707_v54  ;;  %v12710_v0 = vpop.f32.mrb[18].mxu0  ;;  %v16414_v54 = vld [vmem:[%s21132_s3 + $0x74] ss:$8 sps:$4 sm:$0xff]   ;;  %v16420_v57 = vld [vmem:[%s21132_s3 + $0x304] ss:$8 sps:$4 sm:$0xff]  }
 0x1aa   :  { %13108 = vmatprep.subr.bf16.mxu0 %v17211_v15  ;;  %v12711_v6 = vpop.f32.mrb[19].mxu0 }
 0x1ab   :  { %v17699_v7 = vadd.f32 %v12711_v6, %v12710_v0  ;;  %v16417_v0 = vld [vmem:[%s21132_s3 + $0x70] ss:$8 sps:$4 sm:$0xff]   ;;  %v16421_v6 = vld [vmem:[%s21132_s3 + $0x314] ss:$8 sps:$4 sm:$0xff]  }
 0x1ac   :  { %12657 = vmatpush3.bf16.msra.mxu1 %v17203_v12  ;;  %2368 = vmatmul.mubr.bf16.gmra.mrb[124].mxu0 %v16393_v55  ;;  %v16416_v55 = vld [vmem:[%s21132_s3 + $0x2f0] ss:$8 sps:$4 sm:$0xff]  }
 0x1ad   :  { %12658 = vmatprep.subr.bf16.mxu1 %v17211_v15  ;;  %13109 = vmatpush3.bf16.msra.mxu0 %v17226_v27 }
 0x1ae   :  { %13110 = vmatprep.subr.bf16.mxu0 %v17228_v30  ;;  %2771 = vmatprep.mubr.bf16.mxu0 %v16396_v3  ;;  %v16418_v3 = vld [vmem:[%s21132_s3 + $0x300] ss:$8 sps:$4 sm:$0xff]  }
 0x1af   :  { %v12713_v10 = vpop.f32.mrb[20].mxu0 }
 0x1b0   :  { %12659 = vmatpush3.bf16.msra.mxu1 %v17226_v27  ;;  %v12714_v17 = vpop.f32.mrb[21].mxu0 }
 0x1b1   :  { %12660 = vmatprep.subr.bf16.mxu1 %v17228_v30  ;;  %13111 = vmatpush3.bf16.msra.mxu0 %v17248_v40  ;;  %v17716_v24 = vadd.f32 %v12714_v17, %v12713_v10  ;;  %v17718_v25 = vpop.f32.mrb[22].mxu0  ;;  %v16423_v10 = vld [vmem:[%s21132_s3 + $0x310] ss:$8 sps:$4 sm:$0xff]   ;;  %v16426_v17 = vld [vmem:[%s21132_s3 + $0x320] ss:$8 sps:$4 sm:$0xff]  }
 0x1b2   :  { %13141 = vmatprep.subr.bf16.mxu0 %v17102_v59 }
 0x1b4   :  { %12661 = vmatpush3.bf16.msra.mxu1 %v17248_v40  ;;  %2772 = vmatmul.mubr.bf16.vlgmr.msra.gmra.mrb[128].mxu0 %v16394_v11  ;;  %v16424_v11 = vld [vmem:[%s21132_s3 + $0x324] ss:$8 sps:$4 sm:$0xff]  }
 0x1b5   :  { %13142 = vmatpush3.bf16.msra.mxu0 %v17114_v5  ;;  %2779 = vmatprep.mubr.bf16.mxu0 %v16400_v18  ;;  %v16427_v18 = vld [vmem:[%s21132_s3 + $0x334] ss:$8 sps:$4 sm:$0xff]  }
 0x1b6   :  { %13143 = vmatprep.subr.bf16.mxu0 %v17106_v1 }
 0x1b7   :  { %632 = vmatmul.mubr.bf16.vlgmr.msra.gmra.mrb[8].mxu1 %v16397_v26  ;;  %v16429_v26 = vld [vmem:[%s21132_s3 + $0x330] ss:$8 sps:$4 sm:$0xff]  }
 0x1b8   :  { %639 = vmatprep.mubr.bf16.mxu1 %v16402_v32  ;;  %v16432_v32 = vld [vmem:[%s21132_s3 + $0x344] ss:$8 sps:$4 sm:$0xff]  }
 0x1b9   :  { %13144 = vmatpush3.bf16.msra.mxu0 %v17130_v16 }
 0x1ba   :  { %13145 = vmatprep.subr.bf16.mxu0 %v17138_v19 }
 0x1bc   :  { %2780 = vmatmul.mubr.bf16.gmra.mrb[132].mxu0 %v16404_v44  ;;  %v16430_v44 = vld [vmem:[%s21132_s3 + $0x340] ss:$8 sps:$4 sm:$0xff]  }
 0x1bd   :  { %13146 = vmatpush3.bf16.msra.mxu0 %v17148_v28  ;;  %2787 = vmatprep.mubr.bf16.mxu0 %v16406_v34  ;;  %v16433_v34 = vld [vmem:[%s21130_s23 + $0x8] sm:$0x3f]  }
 0x1be   :  { %13147 = vmatprep.subr.bf16.mxu0 %v17150_v29 }
 0x1bf   :  { %640 = vmatmul.mubr.bf16.gmra.mrb[12].mxu1 %v16405_v37  ;;  %v12717_v37 = vpop.f32.mrb[23].mxu0 }
 0x1c0   :  { %647 = vmatprep.mubr.bf16.mxu1 %v16408_v39  ;;  %v17836_v39 = vadd.f32 %v12717_v37, %v17718_v25 }
 0x1c1   :  { %13148 = vmatpush3.bf16.msra.mxu0 %v17166_v47 }
 0x1c2   :  { %13149 = vmatprep.subr.bf16.mxu0 %v17174_v50 }
 0x1c4   :  { %2788 = vmatmul.mubr.bf16.gmra.mrb[136].mxu0 %v16410_v48  ;;  %v17839_v48 = vand.u32 %v16433_v34, %v16952_v43 }
 0x1c5   :  { %13150 = vmatpush3.bf16.msra.mxu0 %v17184_v61  ;;  %2795 = vmatprep.mubr.bf16.mxu0 %v16412_v46 }
 0x1c6   :  { %13151 = vmatprep.subr.bf16.mxu0 %v17186_v62  ;;  %21158 = vst [vmem:[#allocation29_spill] sm:$0xff] %v17839_v48  ;;  %14407 = vmatprep.subr.bf16.mxu1 %v17839_v48 }
 0x1c7   :  { %648 = vmatmul.mubr.bf16.gmra.mrb[16].mxu1 %v16411_v53  ;;  %v12719_v53 = vpop.f32.mrb[24].mxu0 }
 0x1c8   :  { %655 = vmatprep.mubr.bf16.mxu1 %v16414_v54  ;;  %14408 = vmatpush3.bf16.msra.mxu1 %v17839_v48  ;;  %v12720_v54 = vpop.f32.mrb[25].mxu0 }
 0x1c9   :  { %13152 = vmatpush3.bf16.msra.mxu0 %v17203_v12  ;;  %v17848_v25 = vadd.f32 %v12720_v54, %v12719_v53 }
 0x1ca   :  { %13153 = vmatprep.subr.bf16.mxu0 %v17211_v15 }
 0x1cc   :  { %2796 = vmatmul.mubr.bf16.gmra.mrb[140].mxu0 %v16416_v55  ;;  %v12722_v55 = vpop.f32.mrb[26].mxu0 }
 0x1cd   :  { %13154 = vmatpush3.bf16.msra.mxu0 %v17226_v27  ;;  %2985 = vmatprep.mubr.bf16.mxu0 %v16420_v57  ;;  %v12723_v57 = vpop.f32.mrb[27].mxu0 }
 0x1ce   :  { %13155 = vmatprep.subr.bf16.mxu0 %v17228_v30 }
 0x1cf   :  { %656 = vmatmul.mubr.bf16.gmra.mrb[20].mxu1 %v16417_v0  ;;  %v17850_v0 = vadd.f32 %v12723_v57, %v12722_v55 }
 0x1d1   :  { %13156 = vmatpush3.bf16.msra.mxu0 %v17248_v40 }
 0x1d2   :  { %13186 = vmatprep.subr.bf16.mxu0 %v17102_v59 }
 0x1d4   :  { %2986 = vmatmul.mubr.bf16.vlgmr.msra.gmra.mrb[144].mxu0 %v16418_v3 }
 0x1d5   :  { %13187 = vmatpush3.bf16.msra.mxu0 %v17114_v5  ;;  %2993 = vmatprep.mubr.bf16.mxu0 %v16421_v6  ;;  %v12725_v6 = vpop.f32.mrb[28].mxu0 }
 0x1d6   :  { %13188 = vmatprep.subr.bf16.mxu0 %v17106_v1 }
 0x1d9   :  { %13189 = vmatpush3.bf16.msra.mxu0 %v17130_v16 }
 0x1da   :  { %13190 = vmatprep.subr.bf16.mxu0 %v17138_v19 }
 0x1dc   :  { %2994 = vmatmul.mubr.bf16.gmra.mrb[148].mxu0 %v16423_v10  ;;  %v12726_v10 = vpop.f32.mrb[29].mxu0 }
 0x1dd   :  { %13191 = vmatpush3.bf16.msra.mxu0 %v17148_v28  ;;  %3001 = vmatprep.mubr.bf16.mxu0 %v16424_v11  ;;  %v17854_v11 = vadd.f32 %v12726_v10, %v12725_v6 }
 0x1de   :  { %13192 = vmatprep.subr.bf16.mxu0 %v17150_v29 }
 0x1e1   :  { %13193 = vmatpush3.bf16.msra.mxu0 %v17166_v47 }
 0x1e2   :  { %13194 = vmatprep.subr.bf16.mxu0 %v17174_v50 }
 0x1e4   :  { %3002 = vmatmul.mubr.bf16.gmra.mrb[152].mxu0 %v16426_v17  ;;  %v12728_v17 = vpop.f32.mrb[30].mxu0 }
 0x1e5   :  { %13195 = vmatpush3.bf16.msra.mxu0 %v17184_v61  ;;  %3009 = vmatprep.mubr.bf16.mxu0 %v16427_v18  ;;  %v12729_v18 = vpop.f32.mrb[31].mxu0 }
 0x1e6   :  { %13196 = vmatprep.subr.bf16.mxu0 %v17186_v62 }
 0x1e9   :  { %13197 = vmatpush3.bf16.msra.mxu0 %v17203_v12 }
 0x1ea   :  { %13198 = vmatprep.subr.bf16.mxu0 %v17211_v15 }
 0x1ec   :  { %3010 = vmatmul.mubr.bf16.gmra.mrb[156].mxu0 %v16429_v26  ;;  %v17856_v26 = vadd.f32 %v12729_v18, %v12728_v17  ;;  %v16434_v18 = vld [vmem:[%s21130_s23 + $0x10] sm:$0x3f]  }
 0x1ed   :  { %13199 = vmatpush3.bf16.msra.mxu0 %v17226_v27  ;;  %3199 = vmatprep.mubr.bf16.mxu0 %v16432_v32 }
 0x1ee   :  { %13200 = vmatprep.subr.bf16.mxu0 %v17228_v30 }
 0x1f1   :  { %13201 = vmatpush3.bf16.msra.mxu0 %v17248_v40 }
 0x1f2   :  { %13231 = vmatprep.subr.bf16.mxu0 %v17102_v59 }
 0x1f4   :  { %3200 = vmatmul.mubr.bf16.vlgmr.msra.gmra.mrb[160].mxu0 %v16430_v44  ;;  %v12752_v44 = vpop.f32.mrb[32].mxu0 }
 0x1f5   :  { %13232 = vmatpush3.bf16.msra.mxu0 %v17114_v5  ;;  %v12753_v34 = vpop.f32.mrb[33].mxu0 }
 0x1f6   :  { %13233 = vmatprep.subr.bf16.mxu0 %v17106_v1  ;;  %v17860_v37 = vadd.f32 %v12753_v34, %v12752_v44  ;;  %v12755_v53 = vpop.f32.mrb[34].mxu0  ;;  %v17874_v34 = vand.u32 %v16434_v18, %v16952_v43 }
 0x1f7   :  { %v12756_v54 = vpop.f32.mrb[35].mxu0 }
 0x1f8   :  { %v17862_v55 = vadd.f32 %v12756_v54, %v12755_v53  ;;  %v12758_v6 = vpop.f32.mrb[36].mxu0  ;;  %21159 = vst [vmem:[#allocation30_spill] sm:$0xff] %v17874_v34  ;;  %14417 = vmatprep.subr.bf16.mxu1 %v17874_v34 }
 0x1f9   :  { %13234 = vmatpush3.bf16.msra.mxu0 %v17130_v16  ;;  %v12759_v10 = vpop.f32.mrb[37].mxu0 }
 0x1fa   :  { %13235 = vmatprep.subr.bf16.mxu0 %v17138_v19  ;;  %v17866_v8 = vadd.f32 %v12759_v10, %v12758_v6  ;;  %v12761_v17 = vpop.f32.mrb[38].mxu0 }
 0x1fb   :  { %v12762_v35 = vpop.f32.mrb[39].mxu0 }
 0x1fc   :  { %v17871_v32 = vadd.f32 %v12762_v35, %v12761_v17  ;;  %v12764_v44 = vpop.f32.mrb[40].mxu0 }
 0x1fd   :  { %13236 = vmatpush3.bf16.msra.mxu0 %v17148_v28  ;;  %v12765_v53 = vpop.f32.mrb[41].mxu0 }
 0x1fe   :  { %13237 = vmatprep.subr.bf16.mxu0 %v17150_v29  ;;  %v17878_v57 = vadd.f32 %v12765_v53, %v12764_v44  ;;  %v12767_v6 = vpop.f32.mrb[42].mxu0 }
 0x1ff   :  { %v12768_v10 = vpop.f32.mrb[43].mxu0 }
 0x200   :  { %v17881_v3 = vadd.f32 %v12768_v10, %v12767_v6  ;;  %v12770_v46 = vpop.f32.mrb[44].mxu0 }
 0x201   :  { %13238 = vmatpush3.bf16.msra.mxu0 %v17166_v47  ;;  %v12771_v9 = vpop.f32.mrb[45].mxu0 }
 0x202   :  { %13239 = vmatprep.subr.bf16.mxu0 %v17174_v50  ;;  %v17885_v17 = vadd.f32 %v12771_v9, %v12770_v46  ;;  %v12773_v18 = vpop.f32.mrb[46].mxu0 }
 0x203   :  { %v12774_v41 = vpop.f32.mrb[47].mxu0 }
 0x204   :  { %v17887_v48 = vadd.f32 %v12774_v41, %v12773_v18  ;;  %v12797_v54 = vpop.f32.mrb[48].mxu0 }
 0x205   :  { %13240 = vmatpush3.bf16.msra.mxu0 %v17184_v61  ;;  %v12798_v44 = vpop.f32.mrb[49].mxu0 }
 0x206   :  { %13241 = vmatprep.subr.bf16.mxu0 %v17186_v62  ;;  %v17891_v14 = vadd.f32 %v12798_v44, %v12797_v54  ;;  %v12800_v6 = vpop.f32.mrb[50].mxu0 }
 0x207   :  { %v12801_v10 = vpop.f32.mrb[51].mxu0 }
 0x208   :  { %v17893_v21 = vadd.f32 %v12801_v10, %v12800_v6  ;;  %v12803_v52 = vpop.f32.mrb[52].mxu0 }
 0x209   :  { %13242 = vmatpush3.bf16.msra.mxu0 %v17203_v12  ;;  %v12804_v46 = vpop.f32.mrb[53].mxu0 }
 0x20a   :  { %13243 = vmatprep.subr.bf16.mxu0 %v17211_v15  ;;  %v17897_v35 = vadd.f32 %v12804_v46, %v12803_v52  ;;  %v12806_v41 = vpop.f32.mrb[54].mxu0 }
 0x20b   :  { %v12807_v18 = vpop.f32.mrb[55].mxu0 }
 0x20c   :  { %v17899_v56 = vadd.f32 %v12807_v18, %v12806_v41  ;;  %v12809_v54 = vpop.f32.mrb[56].mxu0 }
 0x20d   :  { %13244 = vmatpush3.bf16.msra.mxu0 %v17226_v27  ;;  %v12810_v44 = vpop.f32.mrb[57].mxu0 }
 0x20e   :  { %13245 = vmatprep.subr.bf16.mxu0 %v17228_v30  ;;  %v17903_v22 = vadd.f32 %v12810_v44, %v12809_v54  ;;  %v12812_v6 = vpop.f32.mrb[58].mxu0 }
 0x20f   :  { %v12813_v10 = vpop.f32.mrb[59].mxu0 }
 0x210   :  { %v17905_v31 = vadd.f32 %v12813_v10, %v12812_v6  ;;  %v12815_v52 = vpop.f32.mrb[60].mxu0 }
 0x211   :  { %13246 = vmatpush3.bf16.msra.mxu0 %v17248_v40  ;;  %v12816_v46 = vpop.f32.mrb[61].mxu0 }
 0x212   :  { %v17909_v60 = vadd.f32 %v12816_v46, %v12815_v52  ;;  %v12818_v41 = vpop.f32.mrb[62].mxu0 }
 0x213   :  { %v12819_v18 = vpop.f32.mrb[63].mxu0 }
 0x214   :  { %v17911_v4 = vadd.f32 %v12819_v18, %v12818_v41  ;;  %v12887_v44 = vpop.f32.mrb[64].mxu0 }
 0x215   :  { %v12888_v49 = vpop.f32.mrb[65].mxu0 }
 0x216   :  { %v17915_v13 = vadd.f32 %v12888_v49, %v12887_v44  ;;  %v12890_v9 = vpop.f32.mrb[66].mxu0 }
 0x217   :  { %v12891_v58 = vpop.f32.mrb[67].mxu0 }
 0x218   :  { %v17917_v46 = vadd.f32 %v12891_v58, %v12890_v9  ;;  %v12893_v2 = vpop.f32.mrb[68].mxu0 }
 0x219   :  { %v12894_v41 = vpop.f32.mrb[69].mxu0 }
 0x21a   :  { %v17921_v38 = vadd.f32 %v12894_v41, %v12893_v2  ;;  %v12896_v51 = vpop.f32.mrb[70].mxu0 }
 0x21b   :  { %v12897_v45 = vpop.f32.mrb[71].mxu0 }
 0x21c   :  { %v17924_v49 = vadd.f32 %v12897_v45, %v12896_v51 }
 0x28a   :  { %v12662_v54 = vpop.f32.mrb[8].mxu1 }
 0x28b   :  { %v12663_v36 = vpop.f32.mrb[9].mxu1 }
 0x28c   :  { %v12664_v6 = vadd.f32 %v12663_v36, %v12662_v54  ;;  %v12665_v10 = vpop.f32.mrb[10].mxu1  ;;  %v12899_v54 = vpop.f32.mrb[72].mxu0 }
 0x28d   :  { %v12666_v20 = vpop.f32.mrb[11].mxu1 }
 0x28e   :  { %v12667_v52 = vadd.f32 %v12666_v20, %v12665_v10  ;;  %v12900_v20 = vpop.f32.mrb[73].mxu0 }
 0x28f   :  { %v17931_v10 = vadd.f32 %v12900_v20, %v12899_v54 }
 0x290   :  { %v664_v18 = vpack.c.bf16 %v12667_v52, %v12664_v6  ;;  %v16435_v6 = vld [vmem:[%s21130_s23 + $0x18] sm:$0x3f]   ;;  %v12902_v52 = vpop.f32.mrb[74].mxu0 }
 0x291   :  { %21160 = vst [vmem:[#allocation31_spill] sm:$0xff] %v17931_v10  ;;  %v12903_v53 = vpop.f32.mrb[75].mxu0 }
 0x292   :  { %v12668_v36 = vpop.f32.mrb[12].mxu1  ;;  %14409 = vmatprep.mubr.msk.bf16.mxu1 %vm457_vm3, %v664_v18  ;;  %v17933_v51 = vadd.f32 %v12903_v53, %v12902_v52  ;;  %v12905_v45 = vpop.f32.mrb[76].mxu0 }
 0x293   :  { %v12669_v44 = vpop.f32.mrb[13].mxu1  ;;  %v12906_v23 = vpop.f32.mrb[77].mxu0 }
 0x294   :  { %v12670_v58 = vadd.f32 %v12669_v44, %v12668_v36  ;;  %v12671_v9 = vpop.f32.mrb[14].mxu1  ;;  %21161 = vst [vmem:[#allocation32_spill] sm:$0xff] %v17933_v51  ;;  %v17936_v36 = vand.u32 %v16435_v6, %v16952_v43  ;;  %v17940_v42 = vadd.f32 %v12906_v23, %v12905_v45  ;;  %v17942_v2 = vpop.f32.mrb[78].mxu0 }
 0x295   :  { %v12672_v41 = vpop.f32.mrb[15].mxu1 }
 0x296   :  { %v12673_v18 = vadd.f32 %v12672_v41, %v12671_v9  ;;  %21162 = vst [vmem:[#allocation33_spill] sm:$0xff] %v17936_v36 }
 0x298   :  { %v665_v33 = vpack.c.bf16 %v12673_v18, %v12670_v58 }
 0x29a   :  { %v12674_v54 = vpop.f32.mrb[16].mxu1  ;;  %14410 = vmatmul.mubr.msk.bf16.vlgmr.msra.gmra.mrb[0].mxu1 %vm457_vm3, %v665_v33  ;;  %v21163_v33 = vpack.c.bf16 %v17699_v7, %v17693_v63  ;;  %v21167_v63 = vpack.c.bf16 %v17856_v26, %v17854_v11  ;;  %v21168_v7 = vpack.c.bf16 %v17862_v55, %v17860_v37  ;;  %v16448_v11 = vld [vmem:[%s21132_s3 + $0x170] ss:$8 sps:$4 sm:$0xff]   ;;  %v16449_v26 = vld [vmem:[%s21130_s23 + $0x28] sm:$0x3f]  }
 0x29b   :  { %v12675_v20 = vpop.f32.mrb[17].mxu1  ;;  %14418 = vmatpush3.bf16.msra.mxu1 %v17874_v34  ;;  %v18053_v55 = vand.u32 %v16449_v26, %v16952_v43 }
 0x29c   :  { %v12676_v53 = vadd.f32 %v12675_v20, %v12674_v54  ;;  %v12677_v9 = vpop.f32.mrb[18].mxu1  ;;  %14427 = vmatprep.subr.bf16.mxu1 %v17936_v36  ;;  %v16436_v54 = vld [vmem:[%s21130_s23 + $0x20] sm:$0x3f]  }
 0x29d   :  { %v12678_v58 = vpop.f32.mrb[19].mxu1  ;;  %v17957_v20 = vand.u32 %v16436_v54, %v16952_v43  ;;  %21176 = vst [vmem:[#allocation35_spill] sm:$0xff] %v18053_v55 }
 0x29e   :  { %v12679_v6 = vadd.f32 %v12678_v58, %v12677_v9 }
 0x29f   :  { %21164 = vst [vmem:[#allocation34_spill] sm:$0xff] %v17957_v20 }
 0x2a0   :  { %v666_v52 = vpack.c.bf16 %v12679_v6, %v12676_v53  ;;  %v21165_v53 = vpack.c.bf16 %v17836_v39, %v17716_v24  ;;  %v21169_v24 = vpack.c.bf16 %v17871_v32, %v17866_v8  ;;  %v21170_v39 = vpack.c.bf16 %v17881_v3, %v17878_v57  ;;  %v12909_v32 = vpop.f32.mrb[79].mxu0 }
 0x2a1   :  { %v21173_v8 = vpack.c.bf16 %v17899_v56, %v17897_v35  ;;  %v21174_v3 = vpack.c.bf16 %v17905_v31, %v17903_v22  ;;  %v21175_v56 = vpack.c.bf16 %v17911_v4, %v17909_v60  ;;  %v16437_v60 = vld [vmem:[%s21132_s3 + $0x140] ss:$8 sps:$4 sm:$0xff]   ;;  %v16440_v4 = vld [vmem:[%s21132_s3 + $0x154] ss:$8 sps:$4 sm:$0xff]   ;;  %v16442_v22 = vld [vmem:[%s21132_s3 + $0x150] ss:$8 sps:$4 sm:$0xff]   ;;  %v18050_v37 = vadd.f32 %v12909_v32, %v17942_v2 }
 0x2a2   :  { %v12680_v41 = vpop.f32.mrb[20].mxu1  ;;  %14413 = vmatprep.mubr.msk.bf16.mxu1 %vm457_vm3, %v666_v52  ;;  %v16443_v31 = vld [vmem:[%s21132_s3 + $0x164] ss:$8 sps:$4 sm:$0xff]   ;;  %v12932_v35 = vpop.f32.mrb[80].mxu0 }
 0x2a3   :  { %v12681_v23 = vpop.f32.mrb[21].mxu1 }
 0x2a4   :  { %v12682_v18 = vadd.f32 %v12681_v23, %v12680_v41  ;;  %v12683_v45 = vpop.f32.mrb[22].mxu1 }
 0x2a5   :  { %v12684_v44 = vpop.f32.mrb[23].mxu1 }
 0x2a6   :  { %v12685_v10 = vadd.f32 %v12684_v44, %v12683_v45 }
 0x2a8   :  { %v667_v51 = vpack.c.bf16 %v12685_v10, %v12682_v18  ;;  %v21166_v10 = vpack.c.bf16 %v17850_v0, %v17848_v25  ;;  %v21171_v25 = vpack.c.bf16 %v17887_v48, %v17885_v17  ;;  %v21172_v0 = vpack.c.bf16 %v17893_v21, %v17891_v14  ;;  %v16439_v14 = vld [vmem:[%s21132_s3 + $0x144] ss:$8 sps:$4 sm:$0xff]   ;;  %v16445_v21 = vld [vmem:[%s21132_s3 + $0x160] ss:$8 sps:$4 sm:$0xff]   ;;  %v16446_v48 = vld [vmem:[%s21132_s3 + $0x174] ss:$8 sps:$4 sm:$0xff]  }
 0x2a9   :  { %v12933_v17 = vpop.f32.mrb[81].mxu0 }
 0x2aa   :  { %14414 = vmatmul.mubr.msk.bf16.gmra.mrb[4].mxu1 %vm457_vm3, %v667_v51  ;;  %v18059_v51 = vadd.f32 %v12933_v17, %v12932_v35  ;;  %v12935_v44 = vpop.f32.mrb[82].mxu0 }
 0x2ab   :  { %14419 = vmatprep.mubr.msk.bf16.mxu1 %vm457_vm3, %v21163_v33  ;;  %v12936_v9 = vpop.f32.mrb[83].mxu0 }
 0x2ac   :  { %v18061_v58 = vadd.f32 %v12936_v9, %v12935_v44  ;;  %v12938_v6 = vpop.f32.mrb[84].mxu0 }
 0x2ad   :  { %v12939_v52 = vpop.f32.mrb[85].mxu0 }
 0x2ae   :  { %v18065_v41 = vadd.f32 %v12939_v52, %v12938_v6  ;;  %v12941_v23 = vpop.f32.mrb[86].mxu0 }
 0x2af   :  { %v12942_v18 = vpop.f32.mrb[87].mxu0 }
 0x2b0   :  { %v18067_v45 = vadd.f32 %v12942_v18, %v12941_v23  ;;  %v12944_v54 = vpop.f32.mrb[88].mxu0 }
 0x2b2   :  { %14420 = vmatmul.mubr.msk.bf16.vlgmr.msra.gmra.mrb[0].mxu1 %vm457_vm3, %v21165_v53  ;;  %v12945_v53 = vpop.f32.mrb[89].mxu0 }
 0x2b3   :  { %14423 = vmatprep.mubr.msk.bf16.mxu1 %vm457_vm3, %v21166_v10  ;;  %14428 = vmatpush3.bf16.msra.mxu1 %v17936_v36  ;;  %v18071_v10 = vadd.f32 %v12945_v53, %v12944_v54 }
 0x2b4   :  { %14437 = vmatprep.subr.bf16.mxu1 %v17957_v20 }
 0x2ba   :  { %14424 = vmatmul.mubr.msk.bf16.gmra.mrb[4].mxu1 %vm457_vm3, %v21167_v63  ;;  %v12947_v63 = vpop.f32.mrb[90].mxu0 }
 0x2bb   :  { %14429 = vmatprep.mubr.msk.bf16.mxu1 %vm457_vm3, %v21168_v7  ;;  %v12948_v7 = vpop.f32.mrb[91].mxu0 }
 0x2c2   :  { %14430 = vmatmul.mubr.msk.bf16.vlgmr.msra.gmra.mrb[0].mxu1 %vm457_vm3, %v21169_v24  ;;  %v18073_v24 = vadd.f32 %v12948_v7, %v12947_v63 }
 0x2c3   :  { %14438 = vmatpush3.bf16.msra.mxu1 %v17957_v20  ;;  %14433 = vmatprep.mubr.msk.bf16.mxu1 %vm457_vm3, %v21170_v39 }
 0x2c4   :  { %12826 = vmatprep.subr.bf16.mxu1 %v17102_v59 }
 0x2ca   :  { %14434 = vmatmul.mubr.msk.bf16.gmra.mrb[4].mxu1 %vm457_vm3, %v21171_v25  ;;  %v12950_v25 = vpop.f32.mrb[92].mxu0 }
 0x2cb   :  { %14439 = vmatprep.mubr.msk.bf16.mxu1 %vm457_vm3, %v21172_v0  ;;  %v12951_v0 = vpop.f32.mrb[93].mxu0 }
 0x2d2   :  { %14440 = vmatmul.mubr.msk.bf16.vlgmr.msra.gmra.mrb[0].mxu1 %vm457_vm3, %v21173_v8  ;;  %v18077_v8 = vadd.f32 %v12951_v0, %v12950_v25 }
 0x2d3   :  { %12827 = vmatpush3.bf16.msra.mxu1 %v17114_v5  ;;  %14443 = vmatprep.mubr.msk.bf16.mxu1 %vm457_vm3, %v21174_v3  ;;  %v12953_v3 = vpop.f32.mrb[94].mxu0 }
 0x2d4   :  { %12828 = vmatprep.subr.bf16.mxu1 %v17106_v1 }
 0x2d7   :  { %12829 = vmatpush3.bf16.msra.mxu1 %v17130_v16 }
 0x2d8   :  { %12830 = vmatprep.subr.bf16.mxu1 %v17138_v19 }
 0x2da   :  { %14444 = vmatmul.mubr.msk.bf16.gmra.mrb[4].mxu1 %vm457_vm3, %v21175_v56  ;;  %v12954_v56 = vpop.f32.mrb[95].mxu0 }
 0x2db   :  { %12831 = vmatpush3.bf16.msra.mxu1 %v17148_v28  ;;  %1487 = vmatprep.mubr.bf16.mxu1 %v16439_v14  ;;  %v16450_v14 = vld [vmem:[%s21130_s23 + $0x30] sm:$0x3f]  }
 0x2dc   :  { %12832 = vmatprep.subr.bf16.mxu1 %v17150_v29 }
 0x2df   :  { %12833 = vmatpush3.bf16.msra.mxu1 %v17166_v47 }
 0x2e0   :  { %12834 = vmatprep.subr.bf16.mxu1 %v17174_v50 }
 0x2e3   :  { %12835 = vmatpush3.bf16.msra.mxu1 %v17184_v61 }
 0x2e4   :  { %12836 = vmatprep.subr.bf16.mxu1 %v17186_v62 }
 0x2e7   :  { %12837 = vmatpush3.bf16.msra.mxu1 %v17203_v12 }
 0x2e8   :  { %12838 = vmatprep.subr.bf16.mxu1 %v17211_v15 }
 0x2eb   :  { %12839 = vmatpush3.bf16.msra.mxu1 %v17226_v27 }
 0x2ec   :  { %12840 = vmatprep.subr.bf16.mxu1 %v17228_v30 }
 0x2ef   :  { %12841 = vmatpush3.bf16.msra.mxu1 %v17248_v40 }
 0x2f0   :  { %14447 = vmatprep.subr.bf16.mxu1 %v18053_v55 }
 0x2f2   :  { %1488 = vmatmul.mubr.bf16.vlgmr.msra.gmra.mrb[24].mxu1 %v16437_v60  ;;  %v18082_v60 = vadd.f32 %v12954_v56, %v12953_v3 }
 0x2f3   :  { %1495 = vmatprep.mubr.bf16.mxu1 %v16440_v4  ;;  %14448 = vmatpush3.bf16.msra.mxu1 %v18053_v55  ;;  %v12977_v4 = vpop.f32.mrb[96].mxu0 }
 0x2fa   :  { %1496 = vmatmul.mubr.bf16.gmra.mrb[28].mxu1 %v16442_v22  ;;  %v18085_v22 = vand.u32 %v16450_v14, %v16952_v43 }
 0x2fb   :  { %1503 = vmatprep.mubr.bf16.mxu1 %v16443_v31  ;;  %v12978_v31 = vpop.f32.mrb[97].mxu0 }
 0x2fc   :  { %21177 = vst [vmem:[#allocation36_spill] sm:$0xff] %v18085_v22  ;;  %14457 = vmatprep.subr.bf16.mxu1 %v18085_v22 }
 0x302   :  { %1504 = vmatmul.mubr.bf16.gmra.mrb[32].mxu1 %v16445_v21 }
 0x303   :  { %1511 = vmatprep.mubr.bf16.mxu1 %v16446_v48  ;;  %v18089_v48 = vadd.f32 %v12978_v31, %v12977_v4 }
 0x30a   :  { %1512 = vmatmul.mubr.bf16.gmra.mrb[36].mxu1 %v16448_v11  ;;  %v12980_v11 = vpop.f32.mrb[98].mxu0 }
 0x30b   :  { %v12981_v26 = vpop.f32.mrb[99].mxu0 }
 0x30c   :  { %v18092_v32 = vadd.f32 %v12981_v26, %v12980_v11  ;;  %v12983_v35 = vpop.f32.mrb[100].mxu0 }
 0x30d   :  { %v12984_v17 = vpop.f32.mrb[101].mxu0 }
 0x30e   :  { %v18096_v9 = vadd.f32 %v12984_v17, %v12983_v35  ;;  %v12986_v6 = vpop.f32.mrb[102].mxu0 }
 0x30f   :  { %v12987_v52 = vpop.f32.mrb[103].mxu0 }
 0x310   :  { %v18098_v23 = vadd.f32 %v12987_v52, %v12986_v6  ;;  %v12989_v18 = vpop.f32.mrb[104].mxu0 }
 0x311   :  { %v12990_v54 = vpop.f32.mrb[105].mxu0 }
 0x312   :  { %v18102_v63 = vadd.f32 %v12990_v54, %v12989_v18  ;;  %v12992_v7 = vpop.f32.mrb[106].mxu0 }
 0x313   :  { %v12993_v25 = vpop.f32.mrb[107].mxu0 }
 0x314   :  { %v18104_v0 = vadd.f32 %v12993_v25, %v12992_v7  ;;  %v12995_v3 = vpop.f32.mrb[108].mxu0 }
 0x315   :  { %v12996_v14 = vpop.f32.mrb[109].mxu0 }
 0x316   :  { %v18108_v4 = vadd.f32 %v12996_v14, %v12995_v3  ;;  %v12998_v31 = vpop.f32.mrb[110].mxu0 }
 0x317   :  { %v12999_v11 = vpop.f32.mrb[111].mxu0 }
 0x318   :  { %v18110_v26 = vadd.f32 %v12999_v11, %v12998_v31  ;;  %v13022_v35 = vpop.f32.mrb[112].mxu0 }
 0x319   :  { %v13023_v17 = vpop.f32.mrb[113].mxu0 }
 0x31a   :  { %v18114_v52 = vadd.f32 %v13023_v17, %v13022_v35  ;;  %v13025_v18 = vpop.f32.mrb[114].mxu0 }
 0x31b   :  { %v13026_v54 = vpop.f32.mrb[115].mxu0 }
 0x31c   :  { %v18116_v7 = vadd.f32 %v13026_v54, %v13025_v18  ;;  %v13028_v25 = vpop.f32.mrb[116].mxu0 }
 0x31d   :  { %v13029_v14 = vpop.f32.mrb[117].mxu0 }
 0x31e   :  { %v18120_v56 = vadd.f32 %v13029_v14, %v13028_v25  ;;  %v13031_v31 = vpop.f32.mrb[118].mxu0 }
 0x31f   :  { %v13032_v11 = vpop.f32.mrb[119].mxu0 }
 0x320   :  { %v18122_v53 = vadd.f32 %v13032_v11, %v13031_v31  ;;  %v13034_v35 = vpop.f32.mrb[120].mxu0 }
 0x321   :  { %v13035_v17 = vpop.f32.mrb[121].mxu0 }
 0x322   :  { %v18126_v44 = vadd.f32 %v13035_v17, %v13034_v35  ;;  %v13037_v18 = vpop.f32.mrb[122].mxu0 }
 0x323   :  { %v13038_v54 = vpop.f32.mrb[123].mxu0 }
 0x324   :  { %v18128_v21 = vadd.f32 %v13038_v54, %v13037_v18  ;;  %v13040_v25 = vpop.f32.mrb[124].mxu0 }
 0x325   :  { %v13041_v14 = vpop.f32.mrb[125].mxu0 }
 0x326   :  { %v18132_v39 = vadd.f32 %v13041_v14, %v13040_v25  ;;  %v13043_v31 = vpop.f32.mrb[126].mxu0 }
 0x327   :  { %v13044_v11 = vpop.f32.mrb[127].mxu0 }
 0x328   :  { %v18134_v33 = vadd.f32 %v13044_v11, %v13043_v31  ;;  %v16451_v31 = vld [vmem:[%s21130_s23 + $0x38] sm:$0x3f]  }
 0x329   :  { %v18143_v34 = vand.u32 %v16451_v31, %v16952_v43 }
 0x32b   :  { %21178 = vst [vmem:[#allocation37_spill] sm:$0xff] %v18143_v34 }
 0x3c5   :  { %v12842_v35 = vpop.f32.mrb[24].mxu1 }
 0x3c6   :  { %v12843_v17 = vpop.f32.mrb[25].mxu1 }
 0x3c7   :  { %v12844_v2 = vadd.f32 %v12843_v17, %v12842_v35  ;;  %v12845_v57 = vpop.f32.mrb[26].mxu1 }
 0x3c8   :  { %v12846_v18 = vpop.f32.mrb[27].mxu1 }
 0x3c9   :  { %v12847_v54 = vadd.f32 %v12846_v18, %v12845_v57  ;;  %v13112_v57 = vpop.f32.mrb[128].mxu0 }
 0x3cb   :  { %v1520_v55 = vpack.c.bf16 %v12847_v54, %v12844_v2 }
 0x3cd   :  { %v12848_v20 = vpop.f32.mrb[28].mxu1  ;;  %14449 = vmatprep.mubr.msk.bf16.mxu1 %vm457_vm3, %v1520_v55  ;;  %v16466_v55 = vld [vmem:[%s21132_s3 + $0x354] ss:$8 sps:$4 sm:$0xff]  }
 0x3ce   :  { %v12849_v3 = vpop.f32.mrb[29].mxu1  ;;  %3207 = vmatprep.mubr.bf16.mxu0 %v16466_v55 }
 0x3cf   :  { %v12850_v25 = vadd.f32 %v12849_v3, %v12848_v20  ;;  %v12851_v14 = vpop.f32.mrb[30].mxu1  ;;  %v16468_v20 = vld [vmem:[%s21132_s3 + $0x350] ss:$8 sps:$4 sm:$0xff]   ;;  %v13113_v3 = vpop.f32.mrb[129].mxu0 }
 0x3d0   :  { %v12852_v11 = vpop.f32.mrb[31].mxu1  ;;  %v13115_v54 = vpop.f32.mrb[130].mxu0  ;;  %3208 = vmatmul.mubr.bf16.gmra.mrb[164].mxu0 %v16468_v20  ;;  %v16472_v20 = vld [vmem:[%s21132_s3 + $0x374] ss:$8 sps:$4 sm:$0xff]  }
 0x3d1   :  { %v12853_v36 = vadd.f32 %v12852_v11, %v12851_v14  ;;  %v13116_v14 = vpop.f32.mrb[131].mxu0 }
 0x3d2   :  { %v18159_v11 = vadd.f32 %v13116_v14, %v13115_v54  ;;  %v13118_v30 = vpop.f32.mrb[132].mxu0 }
 0x3d3   :  { %v1521_v6 = vpack.c.bf16 %v12853_v36, %v12850_v25  ;;  %v16469_v36 = vld [vmem:[%s21132_s3 + $0x364] ss:$8 sps:$4 sm:$0xff]   ;;  %v13119_v55 = vpop.f32.mrb[133].mxu0 }
 0x3d4   :  { %3215 = vmatprep.mubr.bf16.mxu0 %v16469_v36  ;;  %21180 = vst [vmem:[#allocation39_spill] sm:$0xff] %v18159_v11  ;;  %v13121_v36 = vpop.f32.mrb[134].mxu0 }
 0x3d5   :  { %v12854_v35 = vpop.f32.mrb[32].mxu1  ;;  %14450 = vmatmul.mubr.msk.bf16.vlgmr.msra.gmra.mrb[0].mxu1 %vm457_vm3, %v1521_v6  ;;  %v18157_v6 = vadd.f32 %v13113_v3, %v13112_v57 }
 0x3d6   :  { %v12855_v2 = vpop.f32.mrb[33].mxu1  ;;  %14458 = vmatpush3.bf16.msra.mxu1 %v18085_v22 }
 0x3d7   :  { %v12856_v17 = vadd.f32 %v12855_v2, %v12854_v35  ;;  %v12857_v18 = vpop.f32.mrb[34].mxu1  ;;  %14467 = vmatprep.subr.bf16.mxu1 %v18143_v34  ;;  %21179 = vst [vmem:[#allocation38_spill] sm:$0xff] %v18157_v6  ;;  %v16471_v35 = vld [vmem:[%s21132_s3 + $0x360] ss:$8 sps:$4 sm:$0xff]   ;;  %v18170_v2 = vadd.f32 %v13119_v55, %v13118_v30 }
 0x3d8   :  { %v12858_v25 = vpop.f32.mrb[35].mxu1  ;;  %3216 = vmatmul.mubr.bf16.gmra.mrb[168].mxu0 %v16471_v35  ;;  %v16477_v35 = vld [vmem:[%s21132_s3 + $0x384] ss:$8 sps:$4 sm:$0xff]  }
 0x3d9   :  { %v12859_v31 = vadd.f32 %v12858_v25, %v12857_v18  ;;  %3223 = vmatprep.mubr.bf16.mxu0 %v16472_v20 }
 0x3db   :  { %v1522_v22 = vpack.c.bf16 %v12859_v31, %v12856_v17  ;;  %v13122_v17 = vpop.f32.mrb[135].mxu0 }
 0x3dc   :  { %v18172_v25 = vadd.f32 %v13122_v17, %v13121_v36  ;;  %v13124_v14 = vpop.f32.mrb[136].mxu0  ;;  %v16474_v36 = vld [vmem:[%s21132_s3 + $0x370] ss:$8 sps:$4 sm:$0xff]   ;;  %v21181_v17 = vpack.c.bf16 %v17917_v46, %v17915_v13  ;;  %v16478_v13 = vld [vmem:[%s21132_s3 + $0x394] ss:$8 sps:$4 sm:$0xff]  }
 0x3dd   :  { %v12860_v57 = vpop.f32.mrb[36].mxu1  ;;  %14453 = vmatprep.mubr.msk.bf16.mxu1 %vm457_vm3, %v1522_v22  ;;  %v13125_v40 = vpop.f32.mrb[137].mxu0  ;;  %v21184_v46 = vld [vmem:[#allocation32_spill] sm:$0xff] }
 0x3de   :  { %v12861_v3 = vpop.f32.mrb[37].mxu1  ;;  %v18176_v11 = vadd.f32 %v13125_v40, %v13124_v14  ;;  %v13127_v30 = vpop.f32.mrb[138].mxu0  ;;  %v21183_v14 = vpack.c.bf16 %v17924_v49, %v17921_v38  ;;  %v16480_v38 = vld [vmem:[%s21132_s3 + $0x390] ss:$8 sps:$4 sm:$0xff]   ;;  %v21187_v49 = vpack.c.bf16 %v18050_v37, %v17940_v42  ;;  %v16483_v42 = vld [vmem:[%s21132_s3 + $0x3a0] ss:$8 sps:$4 sm:$0xff]   ;;  %v21190_v37 = vpack.c.bf16 %v18067_v45, %v18065_v41 }
 0x3df   :  { %v12862_v18 = vadd.f32 %v12861_v3, %v12860_v57  ;;  %v12863_v54 = vpop.f32.mrb[38].mxu1  ;;  %v13128_v55 = vpop.f32.mrb[139].mxu0  ;;  %v16486_v41 = vld [vmem:[%s21132_s3 + $0x3b0] ss:$8 sps:$4 sm:$0xff]   ;;  %v21192_v45 = vpack.c.bf16 %v18082_v60, %v18077_v8  ;;  %v21196_v8 = vpack.c.bf16 %v18110_v26, %v18108_v4  ;;  %v21197_v60 = vpack.c.bf16 %v18116_v7, %v18114_v52  ;;  %v16462_v4 = vld [vmem:[%s21132_s3 + $0x2a0] ss:$8 sps:$4 sm:$0xff]  }
 0x3e0   :  { %v12864_v31 = vpop.f32.mrb[39].mxu1  ;;  %v18178_v15 = vadd.f32 %v13128_v55, %v13127_v30  ;;  %v13130_v57 = vpop.f32.mrb[140].mxu0  ;;  %3224 = vmatmul.mubr.bf16.gmra.mrb[172].mxu0 %v16474_v36  ;;  %v16481_v55 = vld [vmem:[%s21132_s3 + $0x3a4] ss:$8 sps:$4 sm:$0xff]   ;;  %v16463_v26 = vld [vmem:[%s21132_s3 + $0x2b4] ss:$8 sps:$4 sm:$0xff]  }
 0x3e1   :  { %v12865_v6 = vadd.f32 %v12864_v31, %v12863_v54  ;;  %v13131_v3 = vpop.f32.mrb[141].mxu0  ;;  %3413 = vmatprep.mubr.bf16.mxu0 %v16477_v35  ;;  %v16475_v54 = vld [vmem:[%s21132_s3 + $0x380] ss:$8 sps:$4 sm:$0xff]   ;;  %v21195_v35 = vpack.c.bf16 %v18104_v0, %v18102_v63  ;;  %v16457_v63 = vld [vmem:[%s21132_s3 + $0x294] ss:$8 sps:$4 sm:$0xff]  }
 0x3e2   :  { %v18189_v20 = vadd.f32 %v13131_v3, %v13130_v57  ;;  %v21185_v31 = vld [vmem:[#allocation31_spill] sm:$0xff]  ;;  %v21188_v57 = vpack.c.bf16 %v18061_v58, %v18059_v51  ;;  %v16484_v51 = vld [vmem:[%s21132_s3 + $0x3b4] ss:$8 sps:$4 sm:$0xff]   ;;  %v21191_v58 = vpack.c.bf16 %v18073_v24, %v18071_v10  ;;  %v21193_v10 = vpack.c.bf16 %v18092_v32, %v18089_v48  ;;  %v16459_v0 = vld [vmem:[%s21132_s3 + $0x290] ss:$8 sps:$4 sm:$0xff]  }
 0x3e3   :  { %v1523_v27 = vpack.c.bf16 %v12865_v6, %v12862_v18  ;;  %v18191_v6 = vpop.f32.mrb[142].mxu0  ;;  %v21186_v30 = vpack.c.bf16 %v21184_v46, %v21185_v31  ;;  %v16453_v36 = vld [vmem:[%s21130_s23 + $0x48] sm:$0x3f]   ;;  %v21194_v24 = vpack.c.bf16 %v18098_v23, %v18096_v9  ;;  %v21198_v48 = vpack.c.bf16 %v18122_v53, %v18120_v56  ;;  %v21204_v53 = vld [vmem:[#allocation14_spill] sm:$0xff]  ;;  %v16487_v7 = vld [vmem:[%s21130_s23 + $0x50] sm:$0x3f]  }
 0x3e4   :  { %v18237_v3 = vand.u32 %v16453_v36, %v16952_v43  ;;  %v21199_v32 = vpack.c.bf16 %v18128_v21, %v18126_v44  ;;  %v16456_v9 = vld [vmem:[%s21132_s3 + $0x284] ss:$8 sps:$4 sm:$0xff]   ;;  %v21200_v23 = vpack.c.bf16 %v18134_v33, %v18132_v39  ;;  %v21202_v33 = vld [vmem:[#allocation10_spill] sm:$0xff] }
 0x3e5   :  { %14454 = vmatmul.mubr.msk.bf16.gmra.mrb[4].mxu1 %vm457_vm3, %v1523_v27  ;;  %v16452_v27 = vld [vmem:[%s21130_s23 + $0x40] sm:$0x3f]   ;;  %v21201_v21 = vld [vmem:[#allocation8_spill] sm:$0xff] }
 0x3e6   :  { %14459 = vmatprep.mubr.msk.bf16.mxu1 %vm457_vm3, %v21181_v17  ;;  %v18201_v18 = vand.u32 %v16452_v27, %v16952_v43  ;;  %21189 = vst [vmem:[#allocation32_spill] sm:$0xff] %v18237_v3  ;;  %v21203_v39 = vld [vmem:[#allocation11_spill] sm:$0xff]  ;;  %v16465_v52 = vld [vmem:[%s21132_s3 + $0x2b0] ss:$8 sps:$4 sm:$0xff]   ;;  %v13134_v17 = vpop.f32.mrb[143].mxu0 }
 0x3e7   :  { %v16454_v44 = vld [vmem:[%s21132_s3 + $0x280] ss:$8 sps:$4 sm:$0xff]   ;;  %v16460_v56 = vld [vmem:[%s21132_s3 + $0x2a4] ss:$8 sps:$4 sm:$0xff]   ;;  %v18339_v27 = vadd.f32 %v13134_v17, %v18191_v6 }
 0x3e8   :  { %21182 = vst [vmem:[#allocation40_spill] sm:$0xff] %v18201_v18  ;;  %3414 = vmatmul.mubr.bf16.vlgmr.msra.gmra.mrb[176].mxu0 %v16475_v54  ;;  %v18342_v54 = vand.u32 %v16487_v7, %v16952_v43 }
 0x3e9   :  { %3421 = vmatprep.mubr.bf16.mxu0 %v16478_v13  ;;  %v13157_v13 = vpop.f32.mrb[144].mxu0 }
 0x3ea   :  { %21205 = vst [vmem:[#allocation31_spill] sm:$0xff] %v18342_v54  ;;  %v13158_v46 = vpop.f32.mrb[145].mxu0 }
 0x3eb   :  { %v18348_v31 = vadd.f32 %v13158_v46, %v13157_v13 }
 0x3ed   :  { %14460 = vmatmul.mubr.msk.bf16.vlgmr.msra.gmra.mrb[0].mxu1 %vm457_vm3, %v21183_v14 }
 0x3ee   :  { %14463 = vmatprep.mubr.msk.bf16.mxu1 %vm457_vm3, %v21186_v30  ;;  %14468 = vmatpush3.bf16.msra.mxu1 %v18143_v34  ;;  %v13160_v30 = vpop.f32.mrb[146].mxu0 }
 0x3ef   :  { %14477 = vmatprep.subr.bf16.mxu1 %v18201_v18 }
 0x3f0   :  { %3422 = vmatmul.mubr.bf16.gmra.mrb[180].mxu0 %v16480_v38  ;;  %v13161_v38 = vpop.f32.mrb[147].mxu0 }
 0x3f1   :  { %3429 = vmatprep.mubr.bf16.mxu0 %v16481_v55  ;;  %v13163_v55 = vpop.f32.mrb[148].mxu0 }
 0x3f5   :  { %14464 = vmatmul.mubr.msk.bf16.gmra.mrb[4].mxu1 %vm457_vm3, %v21187_v49  ;;  %v18350_v49 = vadd.f32 %v13161_v38, %v13160_v30 }
 0x3f6   :  { %14469 = vmatprep.mubr.msk.bf16.mxu1 %vm457_vm3, %v21188_v57  ;;  %v13164_v57 = vpop.f32.mrb[149].mxu0 }
 0x3f7   :  { %v18354_v36 = vadd.f32 %v13164_v57, %v13163_v55 }
 0x3f8   :  { %3430 = vmatmul.mubr.bf16.gmra.mrb[184].mxu0 %v16483_v42  ;;  %v13166_v42 = vpop.f32.mrb[150].mxu0 }
 0x3f9   :  { %3437 = vmatprep.mubr.bf16.mxu0 %v16484_v51 }
 0x3fd   :  { %14470 = vmatmul.mubr.msk.bf16.vlgmr.msra.gmra.mrb[0].mxu1 %vm457_vm3, %v21190_v37  ;;  %v13167_v37 = vpop.f32.mrb[151].mxu0 }
 0x3fe   :  { %14473 = vmatprep.mubr.msk.bf16.mxu1 %vm457_vm3, %v21191_v58  ;;  %14478 = vmatpush3.bf16.msra.mxu1 %v18201_v18  ;;  %v18356_v51 = vadd.f32 %v13167_v37, %v13166_v42 }
 0x3ff   :  { %14487 = vmatprep.subr.bf16.mxu1 %v18237_v3 }
 0x400   :  { %3438 = vmatmul.mubr.bf16.gmra.mrb[188].mxu0 %v16486_v41  ;;  %v13169_v41 = vpop.f32.mrb[152].mxu0 }
 0x405   :  { %14474 = vmatmul.mubr.msk.bf16.gmra.mrb[4].mxu1 %vm457_vm3, %v21192_v45  ;;  %v13170_v45 = vpop.f32.mrb[153].mxu0 }
 0x406   :  { %14479 = vmatprep.mubr.msk.bf16.mxu1 %vm457_vm3, %v21193_v10  ;;  %v18360_v10 = vadd.f32 %v13170_v45, %v13169_v41 }
 0x40d   :  { %14480 = vmatmul.mubr.msk.bf16.vlgmr.msra.gmra.mrb[0].mxu1 %vm457_vm3, %v21194_v24  ;;  %v13172_v24 = vpop.f32.mrb[154].mxu0 }
 0x40e   :  { %14488 = vmatpush3.bf16.msra.mxu1 %v18237_v3  ;;  %14483 = vmatprep.mubr.msk.bf16.mxu1 %vm457_vm3, %v21195_v35  ;;  %v13173_v35 = vpop.f32.mrb[155].mxu0 }
 0x40f   :  { %13051 = vmatprep.subr.bf16.mxu1 %v17102_v59 }
 0x415   :  { %14484 = vmatmul.mubr.msk.bf16.gmra.mrb[4].mxu1 %vm457_vm3, %v21196_v8  ;;  %v18362_v8 = vadd.f32 %v13173_v35, %v13172_v24 }
 0x416   :  { %14489 = vmatprep.mubr.msk.bf16.mxu1 %vm457_vm3, %v21197_v60 }
 0x41d   :  { %14490 = vmatmul.mubr.msk.bf16.vlgmr.msra.gmra.mrb[0].mxu1 %vm457_vm3, %v21198_v48  ;;  %v13175_v48 = vpop.f32.mrb[156].mxu0 }
 0x41e   :  { %13052 = vmatpush3.bf16.msra.mxu1 %v17114_v5  ;;  %14493 = vmatprep.mubr.msk.bf16.mxu1 %vm457_vm3, %v21199_v32  ;;  %v13176_v32 = vpop.f32.mrb[157].mxu0 }
 0x41f   :  { %13053 = vmatprep.subr.bf16.mxu1 %v17106_v1 }
 0x422   :  { %13054 = vmatpush3.bf16.msra.mxu1 %v17130_v16 }
 0x423   :  { %13055 = vmatprep.subr.bf16.mxu1 %v17138_v19 }
 0x425   :  { %14494 = vmatmul.mubr.msk.bf16.gmra.mrb[4].mxu1 %vm457_vm3, %v21200_v23  ;;  %v13178_v23 = vpop.f32.mrb[158].mxu0 }
 0x426   :  { %13056 = vmatpush3.bf16.msra.mxu1 %v17148_v28  ;;  %2557 = vmatprep.mubr.bf16.mxu1 %v16456_v9  ;;  %v18366_v9 = vadd.f32 %v13176_v32, %v13175_v48 }
 0x427   :  { %13057 = vmatprep.subr.bf16.mxu1 %v17150_v29 }
 0x42a   :  { %13058 = vmatpush3.bf16.msra.mxu1 %v17166_v47 }
 0x42b   :  { %13059 = vmatprep.subr.bf16.mxu1 %v17174_v50 }
 0x42e   :  { %13060 = vmatpush3.bf16.msra.mxu1 %v17184_v61 }
 0x42f   :  { %13061 = vmatprep.subr.bf16.mxu1 %v17186_v62 }
 0x432   :  { %13062 = vmatpush3.bf16.msra.mxu1 %v17203_v12 }
 0x433   :  { %13063 = vmatprep.subr.bf16.mxu1 %v21201_v21 }
 0x436   :  { %13064 = vmatpush3.bf16.msra.mxu1 %v21202_v33 }
 0x437   :  { %13065 = vmatprep.subr.bf16.mxu1 %v21203_v39 }
 0x43a   :  { %13066 = vmatpush3.bf16.msra.mxu1 %v21204_v53 }
 0x43b   :  { %14497 = vmatprep.subr.bf16.mxu1 %v18342_v54 }
 0x43d   :  { %2558 = vmatmul.mubr.bf16.vlgmr.msra.gmra.mrb[40].mxu1 %v16454_v44  ;;  %v16488_v44 = vld [vmem:[%s21130_s23 + $0x58] sm:$0x3f]  }
 0x43e   :  { %2565 = vmatprep.mubr.bf16.mxu1 %v16457_v63  ;;  %14498 = vmatpush3.bf16.msra.mxu1 %v18342_v54  ;;  %v13179_v63 = vpop.f32.mrb[159].mxu0 }
 0x445   :  { %2566 = vmatmul.mubr.bf16.gmra.mrb[44].mxu1 %v16459_v0  ;;  %v18371_v0 = vadd.f32 %v13179_v63, %v13178_v23 }
 0x446   :  { %2573 = vmatprep.mubr.bf16.mxu1 %v16460_v56  ;;  %v13202_v56 = vpop.f32.mrb[160].mxu0 }
 0x44d   :  { %2574 = vmatmul.mubr.bf16.gmra.mrb[48].mxu1 %v16462_v4  ;;  %v18374_v4 = vand.u32 %v16488_v44, %v16952_v43 }
 0x44e   :  { %2581 = vmatprep.mubr.bf16.mxu1 %v16463_v26  ;;  %v13203_v26 = vpop.f32.mrb[161].mxu0 }
 0x44f   :  { %21206 = vst [vmem:[#allocation8_spill] sm:$0xff] %v18374_v4  ;;  %v13205_v7 = vpop.f32.mrb[162].mxu0  ;;  %14507 = vmatprep.subr.bf16.mxu1 %v18374_v4  ;;  %v18379_v46 = vadd.f32 %v13203_v26, %v13202_v56 }
 0x450   :  { %v13206_v17 = vpop.f32.mrb[163].mxu0 }
 0x451   :  { %v18381_v30 = vadd.f32 %v13206_v17, %v13205_v7 }
 0x455   :  { %2582 = vmatmul.mubr.bf16.gmra.mrb[52].mxu1 %v16465_v52 }
 0x4a3   :  { %v13208_v13 = vpop.f32.mrb[164].mxu0 }
 0x4a4   :  { %v13209_v38 = vpop.f32.mrb[165].mxu0 }
 0x4a5   :  { %v18383_v55 = vadd.f32 %v13209_v38, %v13208_v13  ;;  %v13211_v57 = vpop.f32.mrb[166].mxu0 }
 0x4a6   :  { %v13212_v37 = vpop.f32.mrb[167].mxu0 }
 0x4a7   :  { %v18387_v41 = vadd.f32 %v13212_v37, %v13211_v57 }
 0x4ab   :  { %v13214_v45 = vpop.f32.mrb[168].mxu0 }
 0x4ac   :  { %v13215_v24 = vpop.f32.mrb[169].mxu0 }
 0x4ad   :  { %v18391_v48 = vadd.f32 %v13215_v24, %v13214_v45  ;;  %v13217_v32 = vpop.f32.mrb[170].mxu0 }
 0x4ae   :  { %v13218_v23 = vpop.f32.mrb[171].mxu0 }
 0x4af   :  { %v18393_v44 = vadd.f32 %v13218_v23, %v13217_v32 }
 0x4b3   :  { %v13220_v63 = vpop.f32.mrb[172].mxu0 }
 0x4b4   :  { %v13221_v56 = vpop.f32.mrb[173].mxu0 }
 0x4b5   :  { %v18397_v7 = vadd.f32 %v13221_v56, %v13220_v63  ;;  %v13223_v17 = vpop.f32.mrb[174].mxu0 }
 0x4b6   :  { %v13224_v13 = vpop.f32.mrb[175].mxu0 }
 0x4b7   :  { %v18399_v38 = vadd.f32 %v13224_v13, %v13223_v17 }
 0x4bb   :  { %v13247_v57 = vpop.f32.mrb[176].mxu0 }
 0x4bc   :  { %v13248_v37 = vpop.f32.mrb[177].mxu0 }
 0x4bd   :  { %v18403_v24 = vadd.f32 %v13248_v37, %v13247_v57  ;;  %v13250_v32 = vpop.f32.mrb[178].mxu0 }
 0x4be   :  { %v13251_v23 = vpop.f32.mrb[179].mxu0 }
 0x4bf   :  { %v18405_v35 = vadd.f32 %v13251_v23, %v13250_v32 }
 0x4c3   :  { %v13253_v42 = vpop.f32.mrb[180].mxu0 }
 0x4c4   :  { %v13254_v56 = vpop.f32.mrb[181].mxu0 }
 0x4c5   :  { %v18409_v26 = vadd.f32 %v13254_v56, %v13253_v42  ;;  %v13256_v17 = vpop.f32.mrb[182].mxu0 }
 0x4c6   :  { %v13257_v13 = vpop.f32.mrb[183].mxu0 }
 0x4c7   :  { %v18411_v52 = vadd.f32 %v13257_v13, %v13256_v17 }
 0x4cb   :  { %v13259_v57 = vpop.f32.mrb[184].mxu0 }
 0x4cc   :  { %v13260_v37 = vpop.f32.mrb[185].mxu0 }
 0x4cd   :  { %v13262_v60 = vpop.f32.mrb[186].mxu0  ;;  %v18415_v32 = vadd.f32 %v13260_v37, %v13259_v57 }
 0x4ce   :  { %v13263_v58 = vpop.f32.mrb[187].mxu0 }
 0x4cf   :  { %v18417_v23 = vadd.f32 %v13263_v58, %v13262_v60 }
 0x4d3   :  { %v13265_v6 = vpop.f32.mrb[188].mxu0 }
 0x4d4   :  { %v13266_v56 = vpop.f32.mrb[189].mxu0 }
 0x4d5   :  { %v18421_v63 = vadd.f32 %v13266_v56, %v13265_v6  ;;  %v13268_v17 = vpop.f32.mrb[190].mxu0 }
 0x4d6   :  { %v13269_v13 = vpop.f32.mrb[191].mxu0 }
 0x4d7   :  { %v18423_v14 = vadd.f32 %v13269_v13, %v13268_v17  ;;  %v16489_v17 = vld [vmem:[%s21130_s23 + $0x60] sm:$0x3f]  }
 0x4d8   :  { %v18432_v34 = vand.u32 %v16489_v17, %v16952_v43 }
 0x4da   :  { %21207 = vst [vmem:[#allocation10_spill] sm:$0xff] %v18432_v34 }
 0x510   :  { %v13067_v40 = vpop.f32.mrb[40].mxu1 }
 0x511   :  { %v13068_v22 = vpop.f32.mrb[41].mxu1 }
 0x512   :  { %v13069_v57 = vadd.f32 %v13068_v22, %v13067_v40  ;;  %v13070_v37 = vpop.f32.mrb[42].mxu1 }
 0x513   :  { %v13071_v58 = vpop.f32.mrb[43].mxu1 }
 0x514   :  { %v13072_v60 = vadd.f32 %v13071_v58, %v13070_v37 }
 0x516   :  { %v2590_v54 = vpack.c.bf16 %v13072_v60, %v13069_v57 }
 0x518   :  { %v13073_v3 = vpop.f32.mrb[44].mxu1  ;;  %14499 = vmatprep.mubr.msk.bf16.mxu1 %vm457_vm3, %v2590_v54 }
 0x519   :  { %v13074_v42 = vpop.f32.mrb[45].mxu1 }
 0x51a   :  { %v13075_v6 = vadd.f32 %v13074_v42, %v13073_v3  ;;  %v13076_v56 = vpop.f32.mrb[46].mxu1 }
 0x51b   :  { %v13077_v13 = vpop.f32.mrb[47].mxu1 }
 0x51c   :  { %v13078_v18 = vadd.f32 %v13077_v13, %v13076_v56 }
 0x51e   :  { %v2591_v45 = vpack.c.bf16 %v13078_v18, %v13075_v6 }
 0x520   :  { %v13079_v22 = vpop.f32.mrb[48].mxu1  ;;  %14500 = vmatmul.mubr.msk.bf16.vlgmr.msra.gmra.mrb[0].mxu1 %vm457_vm3, %v2591_v45  ;;  %v21208_v45 = vld [vmem:[#allocation39_spill] sm:$0xff] }
 0x521   :  { %v13080_v40 = vpop.f32.mrb[49].mxu1  ;;  %14508 = vmatpush3.bf16.msra.mxu1 %v18374_v4  ;;  %v21209_v4 = vld [vmem:[#allocation38_spill] sm:$0xff] }
 0x522   :  { %v13081_v54 = vadd.f32 %v13080_v40, %v13079_v22  ;;  %v13082_v57 = vpop.f32.mrb[50].mxu1  ;;  %14517 = vmatprep.subr.bf16.mxu1 %v18432_v34  ;;  %v21210_v22 = vpack.c.bf16 %v21208_v45, %v21209_v4  ;;  %v16490_v40 = vld [vmem:[%s21130_s23 + $0x68] sm:$0x3f]   ;;  %v21214_v4 = vpack.c.bf16 %v18339_v27, %v18189_v20  ;;  %v21219_v20 = vpack.c.bf16 %v18371_v0, %v18366_v9  ;;  %v66_v45 = vld [vmem:[%s21009_s2] sm:$0x3] }
 0x523   :  { %v13083_v3 = vpop.f32.mrb[51].mxu1  ;;  %v21220_v27 = vpack.c.bf16 %v18381_v30, %v18379_v46  ;;  %v21227_v9 = vpack.c.bf16 %v18423_v14, %v18421_v63 }
 0x524   :  { %v13084_v42 = vadd.f32 %v13083_v3, %v13082_v57  ;;  %v21212_v57 = vpack.c.bf16 %v18172_v25, %v18170_v2  ;;  %v21213_v3 = vpack.c.bf16 %v18178_v15, %v18176_v11  ;;  %v16491_v15 = vld [vmem:[%s21130_s23 + $0x70] sm:$0x3f]   ;;  %v21217_v2 = vpack.c.bf16 %v18356_v51, %v18354_v36 }
 0x525   :  { %v18471_v11 = vand.u32 %v16491_v15, %v16952_v43  ;;  %v21218_v25 = vpack.c.bf16 %v18362_v8, %v18360_v10  ;;  %v21223_v36 = vpack.c.bf16 %v18399_v38, %v18397_v7  ;;  %v21224_v51 = vpack.c.bf16 %v18405_v35, %v18403_v24  ;;  %v16494_v8 = vld [vmem:[%s21132_s3 + $0x3c4] ss:$8 sps:$4 sm:$0xff]  }
 0x526   :  { %v2592_v37 = vpack.c.bf16 %v13084_v42, %v13081_v54  ;;  %v18447_v54 = vand.u32 %v16490_v40, %v16952_v43  ;;  %v21215_v42 = vpack.c.bf16 %v18350_v49, %v18348_v31  ;;  %v21221_v31 = vpack.c.bf16 %v18387_v41, %v18383_v55 }
 0x527   :  { %21216 = vst [vmem:[#allocation14_spill] sm:$0xff] %v18471_v11  ;;  %v21222_v49 = vpack.c.bf16 %v18393_v44, %v18391_v48  ;;  %v21225_v10 = vpack.c.bf16 %v18411_v52, %v18409_v26 }
 0x528   :  { %v13085_v58 = vpop.f32.mrb[52].mxu1  ;;  %14503 = vmatprep.mubr.msk.bf16.mxu1 %vm457_vm3, %v2592_v37  ;;  %21211 = vst [vmem:[#allocation11_spill] sm:$0xff] %v18447_v54 }
 0x529   :  { %v13086_v18 = vpop.f32.mrb[53].mxu1 }
 0x52a   :  { %v13087_v60 = vadd.f32 %v13086_v18, %v13085_v58  ;;  %v13088_v6 = vpop.f32.mrb[54].mxu1 }
 0x52b   :  { %v13089_v56 = vpop.f32.mrb[55].mxu1 }
 0x52c   :  { %v13090_v17 = vadd.f32 %v13089_v56, %v13088_v6  ;;  %v21087_v56 = vmov 0.0  }
 0x52d   :  { %14557 = vmatprep.subr.bf16.mxu0 %v21087_v56  ;;  %14565 = vmatprep.mubr.msk.bf16.mxu0 %vm16765_vm4, %v21087_v56 }
 0x52e   :  { %v2593_v13 = vpack.c.bf16 %v13090_v17, %v13087_v60  ;;  %v11830_v17 = vld [vmem:[%s21008_s5] ss:$0 sm:$0xff] }
 0x530   :  { %14504 = vmatmul.mubr.msk.bf16.gmra.mrb[4].mxu1 %vm457_vm3, %v2593_v13 }
 0x531   :  { %14509 = vmatprep.mubr.msk.bf16.mxu1 %vm457_vm3, %v21210_v22 }
 0x538   :  { %14510 = vmatmul.mubr.msk.bf16.vlgmr.msra.gmra.mrb[0].mxu1 %vm457_vm3, %v21212_v57 }
 0x539   :  { %14513 = vmatprep.mubr.msk.bf16.mxu1 %vm457_vm3, %v21213_v3  ;;  %14518 = vmatpush3.bf16.msra.mxu1 %v18432_v34 }
 0x53a   :  { %14527 = vmatprep.subr.bf16.mxu1 %v18447_v54 }
 0x540   :  { %14514 = vmatmul.mubr.msk.bf16.gmra.mrb[4].mxu1 %vm457_vm3, %v21214_v4 }
 0x541   :  { %14519 = vmatprep.mubr.msk.bf16.mxu1 %vm457_vm3, %v21215_v42 }
 0x548   :  { %14520 = vmatmul.mubr.msk.bf16.vlgmr.msra.gmra.mrb[0].mxu1 %vm457_vm3, %v21217_v2  ;;  %v21229_v2 = vld [vmem:[#allocation6_spill] sm:$0xff] }
 0x549   :  { %14523 = vmatprep.mubr.msk.bf16.mxu1 %vm457_vm3, %v21218_v25  ;;  %14528 = vmatpush3.bf16.msra.mxu1 %v18447_v54  ;;  %v3787_v25 = vrot.slane %v66_v45, %v21229_v2  ;;  %v21271_v2 = vmov 0.0  }
 0x54a   :  { %14537 = vmatprep.subr.bf16.mxu1 %v18471_v11 }
 0x550   :  { %14524 = vmatmul.mubr.msk.bf16.gmra.mrb[4].mxu1 %vm457_vm3, %v21219_v20 }
 0x551   :  { %14529 = vmatprep.mubr.msk.bf16.mxu1 %vm457_vm3, %v21220_v27 }
 0x558   :  { %14530 = vmatmul.mubr.msk.bf16.vlgmr.msra.gmra.mrb[0].mxu1 %vm457_vm3, %v21221_v31 }
 0x559   :  { %14538 = vmatpush3.bf16.msra.mxu1 %v18471_v11  ;;  %14533 = vmatprep.mubr.msk.bf16.mxu1 %vm457_vm3, %v21222_v49 }
 0x55a   :  { %13276 = vmatprep.subr.bf16.mxu1 %v17102_v59  ;;  %v21226_v59 = vpack.c.bf16 %v18417_v23, %v18415_v32 }
 0x560   :  { %14534 = vmatmul.mubr.msk.bf16.gmra.mrb[4].mxu1 %vm457_vm3, %v21223_v36 }
 0x561   :  { %14539 = vmatprep.mubr.msk.bf16.mxu1 %vm457_vm3, %v21224_v51 }
 0x568   :  { %14540 = vmatmul.mubr.msk.bf16.vlgmr.msra.gmra.mrb[0].mxu1 %vm457_vm3, %v21225_v10 }
 0x569   :  { %13277 = vmatpush3.bf16.msra.mxu1 %v17114_v5  ;;  %14543 = vmatprep.mubr.msk.bf16.mxu1 %vm457_vm3, %v21226_v59  ;;  %v16495_v5 = vld [vmem:[%s21132_s3 + $0x3d4] ss:$8 sps:$4 sm:$0xff]  }
 0x56a   :  { %13278 = vmatprep.subr.bf16.mxu1 %v17106_v1  ;;  %v16492_v1 = vld [vmem:[%s21132_s3 + $0x3c0] ss:$8 sps:$4 sm:$0xff]  }
 0x56d   :  { %13279 = vmatpush3.bf16.msra.mxu1 %v17130_v16  ;;  %v16497_v16 = vld [vmem:[%s21132_s3 + $0x3d0] ss:$8 sps:$4 sm:$0xff]  }
 0x56e   :  { %13280 = vmatprep.subr.bf16.mxu1 %v17138_v19  ;;  %v16498_v19 = vld [vmem:[%s21132_s3 + $0x3e4] ss:$8 sps:$4 sm:$0xff]  }
 0x570   :  { %14544 = vmatmul.mubr.msk.bf16.gmra.mrb[4].mxu1 %vm457_vm3, %v21227_v9 }
 0x571   :  { %13281 = vmatpush3.bf16.msra.mxu1 %v17148_v28  ;;  %3627 = vmatprep.mubr.bf16.mxu1 %v16494_v8  ;;  %v16500_v28 = vld [vmem:[%s21132_s3 + $0x3e0] ss:$8 sps:$4 sm:$0xff]  }
 0x572   :  { %13282 = vmatprep.subr.bf16.mxu1 %v17150_v29  ;;  %v16501_v29 = vld [vmem:[%s21132_s3 + $0x3f4] ss:$8 sps:$4 sm:$0xff]  }
 0x575   :  { %13283 = vmatpush3.bf16.msra.mxu1 %v17166_v47  ;;  %v16503_v47 = vld [vmem:[%s21132_s3 + $0x3f0] ss:$8 sps:$4 sm:$0xff]  }
 0x576   :  { %13284 = vmatprep.subr.bf16.mxu1 %v17174_v50  ;;  %v16504_v50 = vld [vmem:[%s21130_s23 + $0x78] sm:$0x3f]  }
 0x579   :  { %13285 = vmatpush3.bf16.msra.mxu1 %v17184_v61  ;;  %v18564_v61 = vand.u32 %v16504_v50, %v16952_v43 }
 0x57a   :  { %13286 = vmatprep.subr.bf16.mxu1 %v17186_v62 }
 0x57b   :  { %21228 = vst [vmem:[#allocation39_spill] sm:$0xff] %v18564_v61 }
 0x57d   :  { %13287 = vmatpush3.bf16.msra.mxu1 %v17203_v12 }
 0x57e   :  { %13288 = vmatprep.subr.bf16.mxu1 %v21201_v21 }
 0x581   :  { %13289 = vmatpush3.bf16.msra.mxu1 %v21202_v33 }
 0x582   :  { %13290 = vmatprep.subr.bf16.mxu1 %v21203_v39 }
 0x585   :  { %13291 = vmatpush3.bf16.msra.mxu1 %v21204_v53 }
 0x586   :  { %14547 = vmatprep.subr.bf16.mxu1 %v18564_v61 }
 0x588   :  { %3628 = vmatmul.mubr.bf16.vlgmr.msra.gmra.mrb[56].mxu1 %v16492_v1 }
 0x589   :  { %3635 = vmatprep.mubr.bf16.mxu1 %v16495_v5  ;;  %14548 = vmatpush3.bf16.msra.mxu1 %v18564_v61 }
 0x58a   :  { %14597 = vmatprep.subr.bf16.mxu1 %v21087_v56 }
 0x590   :  { %3636 = vmatmul.mubr.bf16.gmra.mrb[60].mxu1 %v16497_v16 }
 0x591   :  { %3643 = vmatprep.mubr.bf16.mxu1 %v16498_v19 }
 0x598   :  { %3644 = vmatmul.mubr.bf16.gmra.mrb[64].mxu1 %v16500_v28 }
 0x599   :  { %3651 = vmatprep.mubr.bf16.mxu1 %v16501_v29 }
 0x5a0   :  { %3652 = vmatmul.mubr.bf16.gmra.mrb[68].mxu1 %v16503_v47 }
 0x65b   :  { %v13292_v62 = vpop.f32.mrb[56].mxu1 }
 0x65c   :  { %v13293_v12 = vpop.f32.mrb[57].mxu1 }
 0x65d   :  { %v13294_v21 = vadd.f32 %v13293_v12, %v13292_v62  ;;  %v13295_v33 = vpop.f32.mrb[58].mxu1 }
 0x65e   :  { %v13296_v39 = vpop.f32.mrb[59].mxu1 }
 0x65f   :  { %v13297_v53 = vadd.f32 %v13296_v39, %v13295_v33 }
 0x661   :  { %v3660_v14 = vpack.c.bf16 %v13297_v53, %v13294_v21 }
 0x663   :  { %v13298_v0 = vpop.f32.mrb[60].mxu1  ;;  %14549 = vmatprep.mubr.msk.bf16.mxu1 %vm457_vm3, %v3660_v14 }
 0x664   :  { %v13299_v52 = vpop.f32.mrb[61].mxu1 }
 0x665   :  { %v13300_v46 = vadd.f32 %v13299_v52, %v13298_v0  ;;  %v13301_v30 = vpop.f32.mrb[62].mxu1 }
 0x666   :  { %v13302_v55 = vpop.f32.mrb[63].mxu1 }
 0x667   :  { %v13303_v41 = vadd.f32 %v13302_v55, %v13301_v30 }
 0x669   :  { %v3661_v35 = vpack.c.bf16 %v13303_v41, %v13300_v46 }
 0x66b   :  { %v13304_v48 = vpop.f32.mrb[64].mxu1  ;;  %14550 = vmatmul.mubr.msk.bf16.vlgmr.msra.gmra.mrb[0].mxu1 %vm457_vm3, %v3661_v35 }
 0x66c   :  { %v13305_v44 = vpop.f32.mrb[65].mxu1 }
 0x66d   :  { %v13306_v26 = vadd.f32 %v13305_v44, %v13304_v48  ;;  %v13307_v7 = vpop.f32.mrb[66].mxu1 }
 0x66e   :  { %v13308_v38 = vpop.f32.mrb[67].mxu1 }
 0x66f   :  { %v13309_v24 = vadd.f32 %v13308_v38, %v13307_v7  ;;  %v16505_v38 = vld [vmem:[%s21006_s6] sm:$0xff]  }
 0x671   :  { %v3662_v63 = vpack.c.bf16 %v13309_v24, %v13306_v26  ;;  %v16506_v24 = vld [vmem:[%s21006_s6 + $0x10] sm:$0xff]  }
 0x673   :  { %v13310_v32 = vpop.f32.mrb[68].mxu1  ;;  %14553 = vmatprep.mubr.msk.bf16.mxu1 %vm457_vm3, %v3662_v63  ;;  %v16507_v63 = vld [vmem:[%s21007_s7] sm:$0xff]  }
 0x674   :  { %v13311_v23 = vpop.f32.mrb[69].mxu1 }
 0x675   :  { %v13312_v37 = vadd.f32 %v13311_v23, %v13310_v32  ;;  %v13313_v58 = vpop.f32.mrb[70].mxu1  ;;  %v16508_v32 = vld [vmem:[%s21007_s7 + $0x18] sm:$0xff]   ;;  %v16509_v23 = vld [vmem:[%s21007_s7 + $0x8] ss:$0 sps:$4 sm:$0x77]  }
 0x676   :  { %v13314_v18 = vpop.f32.mrb[71].mxu1 }
 0x677   :  { %v13315_v60 = vadd.f32 %v13314_v18, %v13313_v58 }
 0x679   :  { %v3663_v6 = vpack.c.bf16 %v13315_v60, %v13312_v37  ;;  %v21230_v37 = vmov 65535   ;;  %v16510_v60 = vld [vmem:[%s21007_s7 + $0x20] ss:$0 sps:$4 sm:$0x77]  }
 0x67a   :  { %v3878_v58 = vsel %vm3876_vm14, 4294967295, %v21230_v37 }
 0x67b   :  { %14554 = vmatmul.mubr.msk.bf16.gmra.mrb[4].mxu1 %vm457_vm3, %v3663_v6  ;;  %v18633_v18 = vsel %vm3877_vm15, %v3878_v58, 0 }
 0x67c   :  { %14605 = vmatprep.mubr.msk.bf16.mxu1 %vm16765_vm4, %v21087_v56  ;;  %v18639_v6 = vand.u32 %v16509_v23, %v18633_v18 }
 0x67e   :  { %21231 = vst [vmem:[#allocation38_spill] sm:$0xff] %v18639_v6 }
 0x73e   :  { %v14551_v13 = vpop.f32.mrb[0].mxu1 }
 0x73f   :  { %v15625_v22 = vadd.f32 %v14551_v13, %v11830_v17  ;;  %v3721_v40 = vpop.f32.mrb[1].mxu1 }
 0x740   :  { %v15626_v57 = vadd.f32 %v11830_v17, %v3721_v40  ;;  %v14552_v3 = vpop.f32.mrb[2].mxu1 }
 0x741   :  { %vm3762_vm5 = vcmp.gt.f32.partialorder %v15625_v22, 0.0  ;;  %v3770_v4 = vmul.f32 0.2, %v15625_v22  ;;  %v15627_v42 = vadd.f32 %v14552_v3, %v11830_v17  ;;  %v3724_v15 = vpop.f32.mrb[3].mxu1 }
 0x742   :  { %vm3760_vm6 = vcmp.gt.f32.partialorder %v15626_v57, 0.0  ;;  %v3768_v20 = vmul.f32 0.2, %v15626_v57  ;;  %v15628_v27 = vadd.f32 %v11830_v17, %v3724_v15 }
 0x743   :  { %v3778_v31 = vsel %vm3762_vm5, %v15625_v22, %v3770_v4  ;;  %vm3763_vm7 = vcmp.gt.f32.partialorder %v15627_v42, 0.0  ;;  %v3771_v49 = vmul.f32 0.2, %v15627_v42 }
 0x744   :  { %v3776_v36 = vsel %vm3760_vm6, %v15626_v57, %v3768_v20  ;;  %vm3761_vm8 = vcmp.gt.f32.partialorder %v15628_v27, 0.0  ;;  %v3769_v51 = vmul.f32 0.2, %v15628_v27  ;;  %v3790_v59 = vadd.f32 %v3787_v25, %v3778_v31  ;;  %v16511_v20 = vld [vmem:[%s21006_s6 + $0x8] sm:$0xff]  }
 0x745   :  { %v3779_v10 = vsel %vm3763_vm7, %v15627_v42, %v3771_v49  ;;  %v3788_v1 = vadd.f32 %v3787_v25, %v3776_v36  ;;  %v16513_v31 = vld [vmem:[%s21006_s6 + $0x28] sm:$0xff]   ;;  %v16514_v49 = vld [vmem:[%s21006_s6 + $0x30] sm:$0xff]   ;;  %v16515_v36 = vld [vmem:[%s21006_s6 + $0x38] sm:$0xff]  }
 0x746   :  { %v3791_v8 = vadd.f32 %v3787_v25, %v3779_v10  ;;  %v3777_v9 = vsel %vm3761_vm8, %v15628_v27, %v3769_v51  ;;  %v16512_v27 = vld [vmem:[%s21006_s6 + $0x18] sm:$0xff]   ;;  %v16516_v51 = vld [vmem:[%s21006_s6 + $0x48] sm:$0xff]  }
 0x747   :  { %v3789_v5 = vadd.f32 %v3787_v25, %v3777_v9  ;;  %v16522_v10 = vld [vmem:[%s21007_s7 + $0xc] sm:$0xff]  }
 0x748   :  { %v18585_v16 = vpack.c.bf16 %v3791_v8, %v3790_v59  ;;  %v16517_v59 = vld [vmem:[%s21006_s6 + $0x50] sm:$0xff]  }
 0x749   :  { %v18587_v19 = vpack.c.bf16 %v3789_v5, %v3788_v1  ;;  %v16523_v8 = vld [vmem:[%s21007_s7 + $0x14] ss:$0 sps:$4 sm:$0x77]   ;;  %v16518_v1 = vld [vmem:[%s21006_s6 + $0x58] sm:$0xff]   ;;  %v16519_v5 = vld [vmem:[%s21006_s6 + $0x68] sm:$0xff]  }
 0x74a   :  { %v18762_v9 = vand.u32 %v16523_v8, %v18633_v18 }
 0x74b   :  { %14558 = vmatpush3.bf16.msra.mxu0 %v18587_v19  ;;  %14598 = vmatpush3.bf16.msra.mxu1 %v18587_v19 }
 0x74c   :  { %14559 = vmatprep.subr.bf16.mxu0 %v21087_v56  ;;  %14599 = vmatprep.subr.bf16.mxu1 %v21087_v56  ;;  %21233 = vst [vmem:[#allocation42_spill] sm:$0xff] %v18762_v9 }
 0x74e   :  { %v14555_v28 = vpop.f32.mrb[4].mxu1 }
 0x74f   :  { %v15629_v29 = vadd.f32 %v14555_v28, %v11830_v17  ;;  %v3737_v47 = vpop.f32.mrb[5].mxu1  ;;  %14560 = vmatpush3.bf16.msra.mxu0 %v18585_v16  ;;  %14600 = vmatpush3.bf16.msra.mxu1 %v18585_v16  ;;  %v16520_v28 = vld [vmem:[%s21006_s6 + $0x70] sm:$0xff]  }
 0x750   :  { %v15630_v50 = vadd.f32 %v11830_v17, %v3737_v47  ;;  %v14556_v62 = vpop.f32.mrb[6].mxu1  ;;  %14561 = vmatprep.subr.bf16.mxu0 %v21087_v56  ;;  %14601 = vmatprep.subr.bf16.mxu1 %v21087_v56 }
 0x751   :  { %vm3766_vm9 = vcmp.gt.f32.partialorder %v15629_v29, 0.0  ;;  %v3774_v12 = vmul.f32 0.2, %v15629_v29  ;;  %v15631_v21 = vadd.f32 %v14556_v62, %v11830_v17  ;;  %v3740_v33 = vpop.f32.mrb[7].mxu1  ;;  %v16521_v62 = vld [vmem:[%s21006_s6 + $0x78] sm:$0xff]  }
 0x752   :  { %vm3764_vm10 = vcmp.gt.f32.partialorder %v15630_v50, 0.0  ;;  %v3772_v39 = vmul.f32 0.2, %v15630_v50  ;;  %v15632_v53 = vadd.f32 %v11830_v17, %v3740_v33  ;;  %v18642_v17 = vand.u32 %v16510_v60, %v18633_v18 }
 0x753   :  { %v3782_v14 = vsel %vm3766_vm9, %v15629_v29, %v3774_v12  ;;  %vm3767_vm11 = vcmp.gt.f32.partialorder %v15631_v21, 0.0  ;;  %v3775_v0 = vmul.f32 0.2, %v15631_v21  ;;  %v21234_v29 = vld [vmem:[#allocation12_spill] sm:$0xff]  ;;  %v21235_v12 = vld [vmem:[#allocation9_spill] sm:$0xff] }
 0x754   :  { %v3780_v52 = vsel %vm3764_vm10, %v15630_v50, %v3772_v39  ;;  %vm3765_vm12 = vcmp.gt.f32.partialorder %v15632_v53, 0.0  ;;  %v3773_v46 = vmul.f32 0.2, %v15632_v53  ;;  %v3794_v55 = vadd.f32 %v3787_v25, %v3782_v14  ;;  %21232 = vst [vmem:[#allocation41_spill] sm:$0xff] %v18642_v17 }
 0x755   :  { %v3783_v30 = vsel %vm3767_vm11, %v15631_v21, %v3775_v0  ;;  %v3792_v48 = vadd.f32 %v3787_v25, %v3780_v52  ;;  %v16221_v47 = vunpack.i.h.bf16 %v21234_v29  ;;  %v16220_v50 = vunpack.i.l.bf16 %v21234_v29 }
 0x756   :  { %v3795_v41 = vadd.f32 %v3787_v25, %v3783_v30  ;;  %v3781_v35 = vsel %vm3765_vm12, %v15632_v53, %v3773_v46  ;;  %v21237_v53 = vld [vmem:[#allocation4_spill] sm:$0xff] }
 0x757   :  { %v3793_v44 = vadd.f32 %v3787_v25, %v3781_v35  ;;  %v5865_v33 = vsel %vm113_vm2, %v16221_v47, %v21235_v12  ;;  %v5864_v39 = vsel %vm113_vm2, %v16220_v50, %v21235_v12  ;;  %vm9808_vm2 = vcmask 211968  }
 0x758   :  { %v18597_v26 = vpack.c.bf16 %v3795_v41, %v3794_v55  ;;  %v18825_v14 = vpack.c.bf16 %v5865_v33, %v5864_v39 }
 0x759   :  { %v18599_v7 = vpack.c.bf16 %v3793_v44, %v3792_v48 }
 0x75b   :  { %14562 = vmatpush3.bf16.msra.mxu0 %v18599_v7  ;;  %14602 = vmatpush3.bf16.msra.mxu1 %v18599_v7 }
 0x75c   :  { %14563 = vmatprep.subr.bf16.mxu0 %v21087_v56  ;;  %14603 = vmatprep.subr.bf16.mxu1 %v21087_v56 }
 0x75f   :  { %14564 = vmatpush3.bf16.msra.mxu0 %v18597_v26  ;;  %14604 = vmatpush3.bf16.msra.mxu1 %v18597_v26 }
 0x760   :  { %14569 = vmatprep.subr.bf16.mxu0 %v21087_v56  ;;  %14609 = vmatprep.subr.bf16.mxu1 %v21087_v56 }
 0x762   :  { %14566 = vmatmul.mubr.msk.bf16.vlgmr.msra.gmra.mrb[192].mxu0 %vm3814_vm13, %v16505_v38  ;;  %14606 = vmatmul.mubr.msk.bf16.vlgmr.msra.gmra.mrb[72].mxu1 %vm3814_vm13, %v16506_v24  ;;  %v16524_v38 = vld [vmem:[%s21007_s7 + $0x24] sm:$0xff]  }
 0x763   :  { %14570 = vmatpush3.bf16.msra.mxu0 %v16507_v63  ;;  %14610 = vmatpush3.bf16.msra.mxu1 %v16508_v32  ;;  %v16525_v63 = vld [vmem:[%s21007_s7 + $0x2c] ss:$0 sps:$4 sm:$0x77]  }
 0x764   :  { %14571 = vmatprep.subr.bf16.mxu0 %v21087_v56  ;;  %14611 = vmatprep.subr.bf16.mxu1 %v21087_v56  ;;  %v18842_v60 = vand.u32 %v16525_v63, %v18633_v18  ;;  %v16535_v63 = vld [vmem:[%s21006_s6 + $0x40] sm:$0xff]  }
 0x765   :  { %14573 = vmatprep.mubr.msk.bf16.mxu0 %vm16765_vm4, %v21087_v56  ;;  %14613 = vmatprep.mubr.msk.bf16.mxu1 %vm16765_vm4, %v21087_v56 }
 0x766   :  { %21238 = vst [vmem:[#allocation12_spill] sm:$0xff] %v18842_v60 }
 0x767   :  { %14572 = vmatpush3.bf16.msra.mxu0 %v18639_v6  ;;  %14612 = vmatpush3.bf16.msra.mxu1 %v18642_v17 }
 0x768   :  { %14577 = vmatprep.subr.bf16.mxu0 %v21087_v56  ;;  %14617 = vmatprep.subr.bf16.mxu1 %v21087_v56 }
 0x835   :  { %v3852_v13 = vpop.f32.mrb[192].mxu0  ;;  %v4086_v45 = vpop.f32.mrb[72].mxu1 }
 0x836   :  { %v14567_v22 = vpop.f32.mrb[193].mxu0  ;;  %v14607_v40 = vpop.f32.mrb[73].mxu1 }
 0x837   :  { %v3855_v57 = vpop.f32.mrb[194].mxu0  ;;  %v4089_v3 = vpop.f32.mrb[74].mxu1  ;;  %v16528_v22 = vld [vmem:[%s21007_s7 + $0x38] ss:$0 sps:$4 sm:$0x77]  }
 0x838   :  { %v3859_v4 = vpack.c.bf16 %v3855_v57, %v3852_v13  ;;  %v4093_v42 = vpack.c.bf16 %v4089_v3, %v4086_v45  ;;  %v14568_v15 = vpop.f32.mrb[195].mxu0  ;;  %v14608_v25 = vpop.f32.mrb[75].mxu1  ;;  %v16526_v13 = vld [vmem:[%s21006_s6 + $0x20] sm:$0xff]   ;;  %v16527_v45 = vld [vmem:[%s21007_s7 + $0x30] sm:$0xff]   ;;  %v18874_v40 = vand.u32 %v16528_v22, %v18633_v18 }
 0x83a   :  { %14574 = vmatmul.mubr.msk.bf16.vlgmr.msra.gmra.mrb[196].mxu0 %vm3872_vm1, %v3859_v4  ;;  %14614 = vmatmul.mubr.msk.bf16.vlgmr.msra.gmra.mrb[76].mxu1 %vm3872_vm1, %v4093_v42  ;;  %21239 = vst [vmem:[#allocation9_spill] sm:$0xff] %v18874_v40 }
 0x83b   :  { %14578 = vmatpush3.bf16.msra.mxu0 %v18587_v19  ;;  %14618 = vmatpush3.bf16.msra.mxu1 %v18587_v19 }
 0x83c   :  { %14579 = vmatprep.subr.bf16.mxu0 %v21087_v56  ;;  %14619 = vmatprep.subr.bf16.mxu1 %v21087_v56 }
 0x83d   :  { %14585 = vmatprep.mubr.msk.bf16.mxu0 %vm16765_vm4, %v21087_v56  ;;  %14625 = vmatprep.mubr.msk.bf16.mxu1 %vm16765_vm4, %v21087_v56 }
 0x83f   :  { %14580 = vmatpush3.bf16.msra.mxu0 %v18585_v16  ;;  %14620 = vmatpush3.bf16.msra.mxu1 %v18585_v16 }
 0x840   :  { %14581 = vmatprep.subr.bf16.mxu0 %v21087_v56  ;;  %14621 = vmatprep.subr.bf16.mxu1 %v21087_v56 }
 0x843   :  { %14582 = vmatpush3.bf16.msra.mxu0 %v18599_v7  ;;  %14622 = vmatpush3.bf16.msra.mxu1 %v18599_v7 }
 0x844   :  { %14583 = vmatprep.subr.bf16.mxu0 %v21087_v56  ;;  %14623 = vmatprep.subr.bf16.mxu1 %v21087_v56 }
 0x847   :  { %14584 = vmatpush3.bf16.msra.mxu0 %v18597_v26  ;;  %14624 = vmatpush3.bf16.msra.mxu1 %v18597_v26 }
 0x848   :  { %14657 = vmatprep.subr.bf16.mxu1 %v21087_v56  ;;  %14589 = vmatprep.subr.bf16.mxu0 %v21087_v56 }
 0x84a   :  { %14586 = vmatmul.mubr.msk.bf16.vlgmr.msra.gmra.mrb[200].mxu0 %vm3814_vm13, %v16511_v20  ;;  %14626 = vmatmul.mubr.msk.bf16.vlgmr.msra.gmra.mrb[80].mxu1 %vm3814_vm13, %v16512_v27 }
 0x84b   :  { %14658 = vmatpush3.bf16.msra.mxu1 %v18587_v19  ;;  %14665 = vmatprep.mubr.msk.bf16.mxu1 %vm16765_vm4, %v21087_v56 }
 0x84c   :  { %14659 = vmatprep.subr.bf16.mxu1 %v21087_v56  ;;  %14593 = vmatprep.mubr.msk.bf16.mxu0 %vm16765_vm4, %v21087_v56 }
 0x84d   :  { %14590 = vmatpush3.bf16.msra.mxu0 %v16522_v10 }
 0x84e   :  { %14591 = vmatprep.subr.bf16.mxu0 %v21087_v56 }
 0x84f   :  { %14660 = vmatpush3.bf16.msra.mxu1 %v18585_v16 }
 0x850   :  { %14661 = vmatprep.subr.bf16.mxu1 %v21087_v56 }
 0x851   :  { %14592 = vmatpush3.bf16.msra.mxu0 %v18762_v9 }
 0x852   :  { %14629 = vmatprep.subr.bf16.mxu0 %v21087_v56 }
 0x853   :  { %14662 = vmatpush3.bf16.msra.mxu1 %v18599_v7 }
 0x854   :  { %14663 = vmatprep.subr.bf16.mxu1 %v21087_v56 }
 0x857   :  { %14664 = vmatpush3.bf16.msra.mxu1 %v18597_v26 }
 0x858   :  { %14677 = vmatprep.subr.bf16.mxu1 %v21087_v56 }
 0x85a   :  { %14666 = vmatmul.mubr.msk.bf16.vlgmr.msra.gmra.mrb[84].mxu1 %vm3814_vm13, %v16513_v31 }
 0x85b   :  { %14678 = vmatpush3.bf16.msra.mxu1 %v18587_v19  ;;  %14685 = vmatprep.mubr.msk.bf16.mxu1 %vm16765_vm4, %v21087_v56 }
 0x85c   :  { %14679 = vmatprep.subr.bf16.mxu1 %v21087_v56 }
 0x85f   :  { %14680 = vmatpush3.bf16.msra.mxu1 %v18585_v16 }
 0x860   :  { %14681 = vmatprep.subr.bf16.mxu1 %v21087_v56 }
 0x863   :  { %14682 = vmatpush3.bf16.msra.mxu1 %v18599_v7 }
 0x864   :  { %14683 = vmatprep.subr.bf16.mxu1 %v21087_v56 }
 0x867   :  { %14684 = vmatpush3.bf16.msra.mxu1 %v18597_v26 }
 0x868   :  { %14697 = vmatprep.subr.bf16.mxu1 %v21087_v56 }
 0x86a   :  { %14686 = vmatmul.mubr.msk.bf16.vlgmr.msra.gmra.mrb[88].mxu1 %vm3814_vm13, %v16514_v49 }
 0x86b   :  { %14698 = vmatpush3.bf16.msra.mxu1 %v18587_v19  ;;  %14705 = vmatprep.mubr.msk.bf16.mxu1 %vm16765_vm4, %v21087_v56 }
 0x86c   :  { %14699 = vmatprep.subr.bf16.mxu1 %v21087_v56 }
 0x86f   :  { %14700 = vmatpush3.bf16.msra.mxu1 %v18585_v16 }
 0x870   :  { %14701 = vmatprep.subr.bf16.mxu1 %v21087_v56 }
 0x873   :  { %14702 = vmatpush3.bf16.msra.mxu1 %v18599_v7 }
 0x874   :  { %14703 = vmatprep.subr.bf16.mxu1 %v21087_v56 }
 0x877   :  { %14704 = vmatpush3.bf16.msra.mxu1 %v18597_v26 }
 0x878   :  { %14737 = vmatprep.subr.bf16.mxu1 %v21087_v56 }
 0x87a   :  { %14706 = vmatmul.mubr.msk.bf16.vlgmr.msra.gmra.mrb[92].mxu1 %vm3814_vm13, %v16515_v36 }
 0x87b   :  { %14738 = vmatpush3.bf16.msra.mxu1 %v18587_v19  ;;  %14745 = vmatprep.mubr.msk.bf16.mxu1 %vm16765_vm4, %v21087_v56 }
 0x87c   :  { %14739 = vmatprep.subr.bf16.mxu1 %v21087_v56 }
 0x87f   :  { %14740 = vmatpush3.bf16.msra.mxu1 %v18585_v16 }
 0x880   :  { %14741 = vmatprep.subr.bf16.mxu1 %v21087_v56 }
 0x883   :  { %14742 = vmatpush3.bf16.msra.mxu1 %v18599_v7 }
 0x884   :  { %14743 = vmatprep.subr.bf16.mxu1 %v21087_v56 }
 0x887   :  { %14744 = vmatpush3.bf16.msra.mxu1 %v18597_v26 }
 0x888   :  { %14757 = vmatprep.subr.bf16.mxu1 %v21087_v56 }
 0x88a   :  { %14746 = vmatmul.mubr.msk.bf16.vlgmr.msra.gmra.mrb[96].mxu1 %vm3814_vm13, %v16516_v51 }
 0x88b   :  { %14758 = vmatpush3.bf16.msra.mxu1 %v18587_v19  ;;  %14765 = vmatprep.mubr.msk.bf16.mxu1 %vm16765_vm4, %v21087_v56 }
 0x88c   :  { %14759 = vmatprep.subr.bf16.mxu1 %v21087_v56 }
 0x88f   :  { %14760 = vmatpush3.bf16.msra.mxu1 %v18585_v16 }
 0x890   :  { %14761 = vmatprep.subr.bf16.mxu1 %v21087_v56 }
 0x893   :  { %14762 = vmatpush3.bf16.msra.mxu1 %v18599_v7 }
 0x894   :  { %14763 = vmatprep.subr.bf16.mxu1 %v21087_v56 }
 0x897   :  { %14764 = vmatpush3.bf16.msra.mxu1 %v18597_v26 }
 0x898   :  { %14777 = vmatprep.subr.bf16.mxu1 %v21087_v56 }
 0x89a   :  { %14766 = vmatmul.mubr.msk.bf16.vlgmr.msra.gmra.mrb[100].mxu1 %vm3814_vm13, %v16517_v59 }
 0x89b   :  { %14778 = vmatpush3.bf16.msra.mxu1 %v18587_v19  ;;  %14785 = vmatprep.mubr.msk.bf16.mxu1 %vm16765_vm4, %v21087_v56 }
 0x89c   :  { %14779 = vmatprep.subr.bf16.mxu1 %v21087_v56 }
 0x89f   :  { %14780 = vmatpush3.bf16.msra.mxu1 %v18585_v16 }
 0x8a0   :  { %14781 = vmatprep.subr.bf16.mxu1 %v21087_v56 }
 0x8a3   :  { %14782 = vmatpush3.bf16.msra.mxu1 %v18599_v7 }
 0x8a4   :  { %14783 = vmatprep.subr.bf16.mxu1 %v21087_v56 }
 0x8a7   :  { %14784 = vmatpush3.bf16.msra.mxu1 %v18597_v26 }
 0x8a8   :  { %14817 = vmatprep.subr.bf16.mxu1 %v21087_v56 }
 0x8aa   :  { %14786 = vmatmul.mubr.msk.bf16.vlgmr.msra.gmra.mrb[104].mxu1 %vm3814_vm13, %v16518_v1  ;;  %v12189_v1 = vld [vmem:[%s21010_s8] ss:$0 sm:$0xff] }
 0x8ab   :  { %14818 = vmatpush3.bf16.msra.mxu1 %v18587_v19  ;;  %14825 = vmatprep.mubr.msk.bf16.mxu1 %vm16765_vm4, %v21087_v56 }
 0x8ac   :  { %14819 = vmatprep.subr.bf16.mxu1 %v21087_v56 }
 0x8af   :  { %14820 = vmatpush3.bf16.msra.mxu1 %v18585_v16 }
 0x8b0   :  { %14821 = vmatprep.subr.bf16.mxu1 %v21087_v56 }
 0x8b3   :  { %14822 = vmatpush3.bf16.msra.mxu1 %v18599_v7 }
 0x8b4   :  { %14823 = vmatprep.subr.bf16.mxu1 %v21087_v56 }
 0x8b7   :  { %14824 = vmatpush3.bf16.msra.mxu1 %v18597_v26 }
 0x8b8   :  { %14837 = vmatprep.subr.bf16.mxu1 %v21087_v56 }
 0x8ba   :  { %14826 = vmatmul.mubr.msk.bf16.vlgmr.msra.gmra.mrb[108].mxu1 %vm3814_vm13, %v16519_v5 }
 0x8bb   :  { %14838 = vmatpush3.bf16.msra.mxu1 %v18587_v19  ;;  %14845 = vmatprep.mubr.msk.bf16.mxu1 %vm16765_vm4, %v21087_v56 }
 0x8bc   :  { %14839 = vmatprep.subr.bf16.mxu1 %v21087_v56 }
 0x8bf   :  { %14840 = vmatpush3.bf16.msra.mxu1 %v18585_v16 }
 0x8c0   :  { %14841 = vmatprep.subr.bf16.mxu1 %v21087_v56 }
 0x8c3   :  { %14842 = vmatpush3.bf16.msra.mxu1 %v18599_v7 }
 0x8c4   :  { %14843 = vmatprep.subr.bf16.mxu1 %v21087_v56 }
 0x8c7   :  { %14844 = vmatpush3.bf16.msra.mxu1 %v18597_v26 }
 0x8c8   :  { %14857 = vmatprep.subr.bf16.mxu1 %v21087_v56 }
 0x8ca   :  { %14846 = vmatmul.mubr.msk.bf16.vlgmr.msra.gmra.mrb[112].mxu1 %vm3814_vm13, %v16520_v28 }
 0x8cb   :  { %14858 = vmatpush3.bf16.msra.mxu1 %v18587_v19  ;;  %14865 = vmatprep.mubr.msk.bf16.mxu1 %vm16765_vm4, %v21087_v56 }
 0x8cc   :  { %14859 = vmatprep.subr.bf16.mxu1 %v21087_v56 }
 0x8cf   :  { %14860 = vmatpush3.bf16.msra.mxu1 %v18585_v16 }
 0x8d0   :  { %14861 = vmatprep.subr.bf16.mxu1 %v21087_v56 }
 0x8d3   :  { %14862 = vmatpush3.bf16.msra.mxu1 %v18599_v7 }
 0x8d4   :  { %14863 = vmatprep.subr.bf16.mxu1 %v21087_v56 }
 0x8d7   :  { %14864 = vmatpush3.bf16.msra.mxu1 %v18597_v26 }
 0x8d8   :  { %14877 = vmatprep.subr.bf16.mxu1 %v21237_v53 }
 0x8da   :  { %14866 = vmatmul.mubr.msk.bf16.vlgmr.msra.gmra.mrb[116].mxu1 %vm3814_vm13, %v16521_v62 }
 0x8db   :  { %14878 = vmatpush3.bf16.msra.mxu1 %v21237_v53 }
 0x8dc   :  { %13494 = vmatprep.subr.bf16.mxu1 %v18825_v14 }
 0x90d   :  { %v18830_v0 = vpop.f32.mrb[76].mxu1 }
 0x90e   :  { %v14615_v52 = vpop.f32.mrb[77].mxu1 }
 0x90f   :  { %v18832_v46 = vpop.f32.mrb[78].mxu1  ;;  %v16529_v52 = vld [vmem:[%s21007_s7 + $0x3c] sm:$0xff]  }
 0x910   :  { %v14616_v30 = vpop.f32.mrb[79].mxu1 }
 0x911   :  { %v16530_v30 = vld [vmem:[%s21007_s7 + $0x44] ss:$0 sps:$4 sm:$0x77]  }
 0x91d   :  { %v3971_v55 = vpop.f32.mrb[200].mxu0  ;;  %v4201_v41 = vpop.f32.mrb[80].mxu1 }
 0x91e   :  { %v14587_v35 = vpop.f32.mrb[201].mxu0  ;;  %v14627_v48 = vpop.f32.mrb[81].mxu1 }
 0x91f   :  { %v3974_v44 = vpop.f32.mrb[202].mxu0  ;;  %v4204_v24 = vpop.f32.mrb[82].mxu1  ;;  %v16532_v35 = vld [vmem:[%s21007_s7 + $0x50] ss:$0 sps:$4 sm:$0x77]  }
 0x920   :  { %v3978_v32 = vpack.c.bf16 %v3974_v44, %v3971_v55  ;;  %v14588_v23 = vpop.f32.mrb[203].mxu0  ;;  %v4208_v37 = vpack.c.bf16 %v4204_v24, %v4201_v41  ;;  %v14628_v58 = vpop.f32.mrb[83].mxu1  ;;  %v18910_v48 = vand.u32 %v16532_v35, %v18633_v18  ;;  %v16533_v44 = vld [vmem:[%s21007_s7 + $0x54] sm:$0xff]  }
 0x921   :  { %v16537_v23 = vld [vmem:[%s21007_s7 + $0x68] ss:$0 sps:$4 sm:$0x77]  }
 0x922   :  { %14594 = vmatmul.mubr.msk.bf16.vlgmr.msra.gmra.mrb[196].mxu0 %vm3872_vm1, %v3978_v32  ;;  %21241 = vst [vmem:[#allocation4_spill] sm:$0xff] %v18910_v48  ;;  %v16536_v32 = vld [vmem:[%s21007_s7 + $0x60] sm:$0xff]  }
 0x923   :  { %14630 = vmatpush3.bf16.msra.mxu0 %v16524_v38  ;;  %14633 = vmatprep.mubr.msk.bf16.mxu0 %vm16765_vm4, %v21087_v56  ;;  %v16534_v38 = vld [vmem:[%s21007_s7 + $0x5c] ss:$0 sps:$4 sm:$0x77]  }
 0x924   :  { %14631 = vmatprep.subr.bf16.mxu0 %v21087_v56  ;;  %v18925_v24 = vand.u32 %v16534_v38, %v18633_v18 }
 0x926   :  { %21242 = vst [vmem:[#allocation43_spill] sm:$0xff] %v18925_v24 }
 0x927   :  { %14632 = vmatpush3.bf16.msra.mxu0 %v18842_v60 }
 0x928   :  { %14637 = vmatprep.subr.bf16.mxu0 %v21087_v56 }
 0x92a   :  { %14634 = vmatmul.mubr.msk.bf16.vlgmr.msra.gmra.mrb[204].mxu0 %vm3872_vm1, %v4208_v37  ;;  %v18957_v37 = vand.u32 %v16537_v23, %v18633_v18 }
 0x92b   :  { %14638 = vmatpush3.bf16.msra.mxu0 %v18587_v19  ;;  %14645 = vmatprep.mubr.msk.bf16.mxu0 %vm16765_vm4, %v21087_v56 }
 0x92c   :  { %14639 = vmatprep.subr.bf16.mxu0 %v21087_v56  ;;  %21243 = vst [vmem:[#allocation44_spill] sm:$0xff] %v18957_v37 }
 0x92d   :  { %v4431_v57 = vpop.f32.mrb[84].mxu1 }
 0x92e   :  { %v14667_v3 = vpop.f32.mrb[85].mxu1 }
 0x92f   :  { %14640 = vmatpush3.bf16.msra.mxu0 %v18585_v16  ;;  %v4434_v4 = vpop.f32.mrb[86].mxu1 }
 0x930   :  { %14641 = vmatprep.subr.bf16.mxu0 %v21087_v56  ;;  %v4438_v42 = vpack.c.bf16 %v4434_v4, %v4431_v57  ;;  %v14668_v15 = vpop.f32.mrb[87].mxu1 }
 0x933   :  { %14642 = vmatpush3.bf16.msra.mxu0 %v18599_v7 }
 0x934   :  { %14643 = vmatprep.subr.bf16.mxu0 %v21087_v56 }
 0x937   :  { %14644 = vmatpush3.bf16.msra.mxu0 %v18597_v26 }
 0x938   :  { %14649 = vmatprep.subr.bf16.mxu0 %v21087_v56 }
 0x93a   :  { %14646 = vmatmul.mubr.msk.bf16.vlgmr.msra.gmra.mrb[208].mxu0 %vm3814_vm13, %v16526_v13 }
 0x93b   :  { %14653 = vmatprep.mubr.msk.bf16.mxu0 %vm16765_vm4, %v21087_v56  ;;  %14650 = vmatpush3.bf16.msra.mxu0 %v16527_v45 }
 0x93c   :  { %14651 = vmatprep.subr.bf16.mxu0 %v21087_v56 }
 0x93d   :  { %v4546_v25 = vpop.f32.mrb[88].mxu1 }
 0x93e   :  { %v14687_v20 = vpop.f32.mrb[89].mxu1 }
 0x93f   :  { %14652 = vmatpush3.bf16.msra.mxu0 %v18874_v40  ;;  %v4549_v27 = vpop.f32.mrb[90].mxu1 }
 0x940   :  { %14669 = vmatprep.subr.bf16.mxu0 %v21087_v56  ;;  %v4553_v31 = vpack.c.bf16 %v4549_v27, %v4546_v25  ;;  %v14688_v49 = vpop.f32.mrb[91].mxu1 }
 0x94d   :  { %v4661_v36 = vpop.f32.mrb[92].mxu1 }
 0x94e   :  { %v14707_v51 = vpop.f32.mrb[93].mxu1 }
 0x94f   :  { %v4664_v10 = vpop.f32.mrb[94].mxu1 }
 0x950   :  { %v4668_v59 = vpack.c.bf16 %v4664_v10, %v4661_v36  ;;  %v14708_v8 = vpop.f32.mrb[95].mxu1 }
 0x951   :  { %v16538_v8 = vld [vmem:[%s21007_s7 + $0x6c] sm:$0xff]  }
 0x95d   :  { %v4891_v58 = vpop.f32.mrb[96].mxu1 }
 0x95e   :  { %v14747_v13 = vpop.f32.mrb[97].mxu1 }
 0x95f   :  { %v4894_v45 = vpop.f32.mrb[98].mxu1 }
 0x960   :  { %v4898_v22 = vpack.c.bf16 %v4894_v45, %v4891_v58  ;;  %v14748_v57 = vpop.f32.mrb[99].mxu1 }
 0x96d   :  { %v5006_v3 = vpop.f32.mrb[100].mxu1 }
 0x96e   :  { %v14767_v4 = vpop.f32.mrb[101].mxu1 }
 0x9f5   :  { %v4032_v5 = vpop.f32.mrb[196].mxu0 }
 0x9f6   :  { %v15633_v28 = vadd.f32 %v12189_v1, %v4032_v5  ;;  %v14595_v29 = vpop.f32.mrb[197].mxu0 }
 0x9f7   :  { %v4035_v47 = vpop.f32.mrb[198].mxu0 }
 0x9f8   :  { %v15636_v50 = vadd.f32 %v12189_v1, %v4035_v47  ;;  %v14596_v62 = vpop.f32.mrb[199].mxu0  ;;  %v18882_v12 = vadd.f32 %v15633_v28, %v18830_v0  ;;  %v18895_v0 = vand.u32 %v16530_v30, %v18633_v18  ;;  %v16539_v1 = vld [vmem:[%s21007_s7 + $0x74] ss:$0 sps:$4 sm:$0x77]   ;;  %v16540_v47 = vld [vmem:[%s21007_s7 + $0x78] sm:$0xff]  }
 0x9f9   :  { %v18969_v29 = vand.u32 %v16539_v1, %v18633_v18  ;;  %v16598_v1 = vld [vmem:[%s21132_s3 + $0x4] ss:$8 sps:$4 sm:$0xff]  }
 0x9fa   :  { %v18885_v21 = vadd.f32 %v15636_v50, %v18832_v46  ;;  %21240 = vst [vmem:[#allocation7_spill] sm:$0xff] %v18895_v0  ;;  %v16531_v46 = vld [vmem:[%s21007_s7 + $0x48] sm:$0xff]   ;;  %v16541_v50 = vld [vmem:[%s21007_s7 + $0x80] ss:$0 sps:$4 sm:$0x77]  }
 0x9fb   :  { %21244 = vst [vmem:[#allocation45_spill] sm:$0xff] %v18969_v29  ;;  %v18984_v62 = vand.u32 %v16541_v50, %v18633_v18  ;;  %v21256_v50 = vld [vmem:[#allocation20_spill] sm:$0xff] }
 0x9fd   :  { %21245 = vst [vmem:[#allocation46_spill] sm:$0xff] %v18984_v62 }
 0xa0d   :  { %v4316_v33 = vpop.f32.mrb[208].mxu0 }
 0xa0e   :  { %v14647_v39 = vpop.f32.mrb[209].mxu0 }
 0xa0f   :  { %v4319_v53 = vpop.f32.mrb[210].mxu0  ;;  %v16543_v39 = vld [vmem:[%s21007_s7 + $0x8c] ss:$0 sps:$4 sm:$0x77]  }
 0xa10   :  { %v4323_v55 = vpack.c.bf16 %v4319_v53, %v4316_v33  ;;  %v14648_v41 = vpop.f32.mrb[211].mxu0  ;;  %v16542_v33 = vld [vmem:[%s21007_s7 + $0x84] sm:$0xff]   ;;  %v18999_v53 = vand.u32 %v16543_v39, %v18633_v18  ;;  %v21258_v39 = vld [vmem:[#allocation22_spill] sm:$0xff] }
 0xa12   :  { %14654 = vmatmul.mubr.msk.bf16.vlgmr.msra.gmra.mrb[204].mxu0 %vm3872_vm1, %v4323_v55  ;;  %21246 = vst [vmem:[#allocation47_spill] sm:$0xff] %v18999_v53 }
 0xa13   :  { %14670 = vmatpush3.bf16.msra.mxu0 %v16529_v52  ;;  %14673 = vmatprep.mubr.msk.bf16.mxu0 %vm16765_vm4, %v21087_v56  ;;  %v16544_v52 = vld [vmem:[%s21006_s6 + $0x60] sm:$0xff]  }
 0xa14   :  { %14671 = vmatprep.subr.bf16.mxu0 %v21087_v56 }
 0xa17   :  { %14672 = vmatpush3.bf16.msra.mxu0 %v18895_v0 }
 0xa18   :  { %14689 = vmatprep.subr.bf16.mxu0 %v21087_v56 }
 0xa1e   :  { %14674 = vmatmul.mubr.msk.bf16.vlgmr.msra.gmra.mrb[204].mxu0 %vm3872_vm1, %v4438_v42  ;;  %v5009_v42 = vpop.f32.mrb[102].mxu1 }
 0xa1f   :  { %14690 = vmatpush3.bf16.msra.mxu0 %v16531_v46  ;;  %14693 = vmatprep.mubr.msk.bf16.mxu0 %vm16765_vm4, %v21087_v56  ;;  %v5013_v15 = vpack.c.bf16 %v5009_v42, %v5006_v3  ;;  %v14768_v25 = vpop.f32.mrb[103].mxu1  ;;  %v16547_v42 = vld [vmem:[%s21007_s7 + $0x9c] sm:$0xff]  }
 0xa20   :  { %14691 = vmatprep.subr.bf16.mxu0 %v21087_v56  ;;  %v5121_v20 = vpop.f32.mrb[104].mxu1 }
 0xa21   :  { %v14787_v27 = vpop.f32.mrb[105].mxu1 }
 0xa23   :  { %14692 = vmatpush3.bf16.msra.mxu0 %v18910_v48 }
 0xa24   :  { %14709 = vmatprep.subr.bf16.mxu0 %v21087_v56 }
 0xa2a   :  { %14694 = vmatmul.mubr.msk.bf16.vlgmr.msra.gmra.mrb[204].mxu0 %vm3872_vm1, %v4553_v31  ;;  %v5124_v31 = vpop.f32.mrb[106].mxu1 }
 0xa2b   :  { %14710 = vmatpush3.bf16.msra.mxu0 %v16533_v44  ;;  %14713 = vmatprep.mubr.msk.bf16.mxu0 %vm16765_vm4, %v21087_v56  ;;  %v5128_v49 = vpack.c.bf16 %v5124_v31, %v5121_v20  ;;  %v14788_v36 = vpop.f32.mrb[107].mxu1  ;;  %v16549_v31 = vld [vmem:[%s21007_s7 + $0xa8] sm:$0xff]  }
 0xa2c   :  { %14711 = vmatprep.subr.bf16.mxu0 %v21087_v56 }
 0xa2f   :  { %14712 = vmatpush3.bf16.msra.mxu0 %v18925_v24 }
 0xa30   :  { %14717 = vmatprep.subr.bf16.mxu0 %v21087_v56 }
 0xa36   :  { %14714 = vmatmul.mubr.msk.bf16.vlgmr.msra.gmra.mrb[204].mxu0 %vm3872_vm1, %v4668_v59 }
 0xa37   :  { %14718 = vmatpush3.bf16.msra.mxu0 %v18587_v19  ;;  %14725 = vmatprep.mubr.msk.bf16.mxu0 %vm16765_vm4, %v21087_v56 }
 0xa38   :  { %14719 = vmatprep.subr.bf16.mxu0 %v21087_v56 }
 0xa3b   :  { %14720 = vmatpush3.bf16.msra.mxu0 %v18585_v16 }
 0xa3c   :  { %14721 = vmatprep.subr.bf16.mxu0 %v21087_v56 }
 0xa3f   :  { %14722 = vmatpush3.bf16.msra.mxu0 %v18599_v7 }
 0xa40   :  { %14723 = vmatprep.subr.bf16.mxu0 %v21087_v56 }
 0xa43   :  { %14724 = vmatpush3.bf16.msra.mxu0 %v18597_v26 }
 0xa44   :  { %14729 = vmatprep.subr.bf16.mxu0 %v21087_v56 }
 0xa46   :  { %14726 = vmatmul.mubr.msk.bf16.vlgmr.msra.gmra.mrb[212].mxu0 %vm3814_vm13, %v16535_v63 }
 0xa47   :  { %14730 = vmatpush3.bf16.msra.mxu0 %v16536_v32  ;;  %14733 = vmatprep.mubr.msk.bf16.mxu0 %vm16765_vm4, %v21087_v56 }
 0xa48   :  { %14731 = vmatprep.subr.bf16.mxu0 %v21087_v56 }
 0xa4b   :  { %14732 = vmatpush3.bf16.msra.mxu0 %v18957_v37 }
 0xa4c   :  { %14749 = vmatprep.subr.bf16.mxu0 %v21087_v56 }
 0xb19   :  { %v4776_v51 = vpop.f32.mrb[212].mxu0 }
 0xb1a   :  { %v14727_v10 = vpop.f32.mrb[213].mxu0 }
 0xb1b   :  { %v4779_v59 = vpop.f32.mrb[214].mxu0  ;;  %v16552_v10 = vld [vmem:[%s21007_s7 + $0xbc] ss:$0 sps:$4 sm:$0x77]  }
 0xb1c   :  { %v4783_v5 = vpack.c.bf16 %v4779_v59, %v4776_v51  ;;  %v14728_v28 = vpop.f32.mrb[215].mxu0  ;;  %v16551_v51 = vld [vmem:[%s21007_s7 + $0xb4] sm:$0xff]   ;;  %v19073_v59 = vand.u32 %v16552_v10, %v18633_v18 }
 0xb1d   :  { %v21254_v28 = vld [vmem:[#allocation18_spill] sm:$0xff] }
 0xb1e   :  { %14734 = vmatmul.mubr.msk.bf16.vlgmr.msra.gmra.mrb[204].mxu0 %vm3872_vm1, %v4783_v5  ;;  %21250 = vst [vmem:[#allocation51_spill] sm:$0xff] %v19073_v59  ;;  %v21253_v5 = vld [vmem:[#allocation15_spill] sm:$0xff]  ;;  %v16620_v10 = vld [vmem:[%s21132_s3 + $0xf4] ss:$8 sps:$4 sm:$0xff]  }
 0xb1f   :  { %14750 = vmatpush3.bf16.msra.mxu0 %v16538_v8  ;;  %14753 = vmatprep.mubr.msk.bf16.mxu0 %vm16765_vm4, %v21087_v56  ;;  %v21251_v8 = vld [vmem:[#allocation13_spill] sm:$0xff] }
 0xb20   :  { %14751 = vmatprep.subr.bf16.mxu0 %v21087_v56 }
 0xb23   :  { %14752 = vmatpush3.bf16.msra.mxu0 %v18969_v29 }
 0xb24   :  { %14769 = vmatprep.subr.bf16.mxu0 %v21087_v56 }
 0xb2a   :  { %14754 = vmatmul.mubr.msk.bf16.vlgmr.msra.gmra.mrb[204].mxu0 %vm3872_vm1, %v4898_v22 }
 0xb2b   :  { %14770 = vmatpush3.bf16.msra.mxu0 %v16540_v47  ;;  %14773 = vmatprep.mubr.msk.bf16.mxu0 %vm16765_vm4, %v21087_v56  ;;  %v21255_v47 = vld [vmem:[#allocation17_spill] sm:$0xff] }
 0xb2c   :  { %14771 = vmatprep.subr.bf16.mxu0 %v21087_v56 }
 0xb2f   :  { %14772 = vmatpush3.bf16.msra.mxu0 %v18984_v62 }
 0xb30   :  { %14789 = vmatprep.subr.bf16.mxu0 %v21087_v56 }
 0xb36   :  { %14774 = vmatmul.mubr.msk.bf16.vlgmr.msra.gmra.mrb[204].mxu0 %vm3872_vm1, %v5013_v15  ;;  %v16548_v15 = vld [vmem:[%s21007_s7 + $0xa4] ss:$0 sps:$4 sm:$0x77]  }
 0xb37   :  { %14790 = vmatpush3.bf16.msra.mxu0 %v16542_v33  ;;  %14793 = vmatprep.mubr.msk.bf16.mxu0 %vm16765_vm4, %v21087_v56  ;;  %v19043_v27 = vand.u32 %v16548_v15, %v18633_v18  ;;  %v21257_v33 = vld [vmem:[#allocation19_spill] sm:$0xff] }
 0xb38   :  { %14791 = vmatprep.subr.bf16.mxu0 %v21087_v56  ;;  %v16614_v15 = vld [vmem:[%s21132_s3 + $0xc4] ss:$8 sps:$4 sm:$0xff]  }
 0xb39   :  { %21248 = vst [vmem:[#allocation49_spill] sm:$0xff] %v19043_v27 }
 0xb3b   :  { %14792 = vmatpush3.bf16.msra.mxu0 %v18999_v53 }
 0xb3c   :  { %14797 = vmatprep.subr.bf16.mxu0 %v21087_v56 }
 0xb42   :  { %14794 = vmatmul.mubr.msk.bf16.vlgmr.msra.gmra.mrb[204].mxu0 %vm3872_vm1, %v5128_v49  ;;  %v16550_v49 = vld [vmem:[%s21007_s7 + $0xb0] ss:$0 sps:$4 sm:$0x77]  }
 0xb43   :  { %14798 = vmatpush3.bf16.msra.mxu0 %v18587_v19  ;;  %14805 = vmatprep.mubr.msk.bf16.mxu0 %vm16765_vm4, %v21087_v56  ;;  %v16545_v19 = vld [vmem:[%s21007_s7 + $0x90] sm:$0xff]   ;;  %v19058_v36 = vand.u32 %v16550_v49, %v18633_v18  ;;  %v16618_v49 = vld [vmem:[%s21132_s3 + $0xe4] ss:$8 sps:$4 sm:$0xff]  }
 0xb44   :  { %14799 = vmatprep.subr.bf16.mxu0 %v21087_v56 }
 0xb45   :  { %21249 = vst [vmem:[#allocation50_spill] sm:$0xff] %v19058_v36 }
 0xb47   :  { %14800 = vmatpush3.bf16.msra.mxu0 %v18585_v16  ;;  %v16546_v16 = vld [vmem:[%s21007_s7 + $0x98] ss:$0 sps:$4 sm:$0x77]  }
 0xb48   :  { %14801 = vmatprep.subr.bf16.mxu0 %v21087_v56 }
 0xb4b   :  { %14802 = vmatpush3.bf16.msra.mxu0 %v18599_v7  ;;  %v5351_v7 = vpop.f32.mrb[108].mxu1 }
 0xb4c   :  { %14803 = vmatprep.subr.bf16.mxu0 %v21087_v56  ;;  %v14827_v30 = vpop.f32.mrb[109].mxu1 }
 0xb4d   :  { %v5354_v55 = vpop.f32.mrb[110].mxu1  ;;  %v21263_v30 = vld [vmem:[#allocation25_spill] sm:$0xff] }
 0xb4e   :  { %v5358_v41 = vpack.c.bf16 %v5354_v55, %v5351_v7  ;;  %v14828_v46 = vpop.f32.mrb[111].mxu1  ;;  %v21262_v7 = vld [vmem:[#allocation26_spill] sm:$0xff]  ;;  %v21264_v55 = vld [vmem:[#allocation28_spill] sm:$0xff] }
 0xb4f   :  { %14804 = vmatpush3.bf16.msra.mxu0 %v18597_v26  ;;  %v19031_v26 = vand.u32 %v16546_v16, %v18633_v18  ;;  %v5466_v35 = vpop.f32.mrb[112].mxu1  ;;  %v21252_v18 = vld [vmem:[#allocation16_spill] sm:$0xff]  ;;  %v21261_v16 = vld [vmem:[#allocation23_spill] sm:$0xff] }
 0xb50   :  { %14809 = vmatprep.subr.bf16.mxu0 %v21087_v56  ;;  %v14847_v44 = vpop.f32.mrb[113].mxu1  ;;  %v16599_v46 = vld [vmem:[%s21132_s3] ss:$8 sps:$4 sm:$0xff]  }
 0xb51   :  { %21247 = vst [vmem:[#allocation48_spill] sm:$0xff] %v19031_v26  ;;  %v5469_v38 = vpop.f32.mrb[114].mxu1  ;;  %v16601_v44 = vld [vmem:[%s21132_s3 + $0x10] ss:$8 sps:$4 sm:$0xff]  }
 0xb52   :  { %14806 = vmatmul.mubr.msk.bf16.vlgmr.msra.gmra.mrb[216].mxu0 %vm3814_vm13, %v16544_v52  ;;  %v5473_v63 = vpack.c.bf16 %v5469_v38, %v5466_v35  ;;  %v14848_v32 = vpop.f32.mrb[115].mxu1  ;;  %v21259_v52 = vld [vmem:[#allocation21_spill] sm:$0xff]  ;;  %v16602_v38 = vld [vmem:[%s21132_s3 + $0x24] ss:$8 sps:$4 sm:$0xff]  }
 0xb53   :  { %14810 = vmatpush3.bf16.msra.mxu0 %v16545_v19  ;;  %14813 = vmatprep.mubr.msk.bf16.mxu0 %vm16765_vm4, %v21087_v56  ;;  %v5581_v23 = vpop.f32.mrb[116].mxu1  ;;  %v21260_v19 = vld [vmem:[#allocation24_spill] sm:$0xff]  ;;  %v16600_v35 = vld [vmem:[%s21132_s3 + $0x14] ss:$8 sps:$4 sm:$0xff]  }
 0xb54   :  { %14811 = vmatprep.subr.bf16.mxu0 %v21087_v56  ;;  %v14867_v58 = vpop.f32.mrb[117].mxu1  ;;  %v16604_v32 = vld [vmem:[%s21132_s3 + $0x34] ss:$8 sps:$4 sm:$0xff]  }
 0xb55   :  { %v5584_v13 = vpop.f32.mrb[118].mxu1  ;;  %v16606_v58 = vld [vmem:[%s21132_s3 + $0x84] ss:$8 sps:$4 sm:$0xff]  }
 0xb56   :  { %v5588_v45 = vpack.c.bf16 %v5584_v13, %v5581_v23  ;;  %v14868_v22 = vpop.f32.mrb[119].mxu1  ;;  %v16605_v23 = vld [vmem:[%s21132_s3 + $0x30] ss:$8 sps:$4 sm:$0xff]   ;;  %v16607_v13 = vld [vmem:[%s21132_s3 + $0x80] ss:$8 sps:$4 sm:$0xff]  }
 0xb57   :  { %14812 = vmatpush3.bf16.msra.mxu0 %v19031_v26  ;;  %v16609_v22 = vld [vmem:[%s21132_s3 + $0x90] ss:$8 sps:$4 sm:$0xff]  }
 0xb58   :  { %14829 = vmatprep.subr.bf16.mxu0 %v21087_v56 }
 0xc25   :  { %v5236_v57 = vpop.f32.mrb[216].mxu0 }
 0xc26   :  { %v14807_v3 = vpop.f32.mrb[217].mxu0 }
 0xc27   :  { %v5239_v4 = vpop.f32.mrb[218].mxu0  ;;  %v16611_v3 = vld [vmem:[%s21132_s3 + $0xa0] ss:$8 sps:$4 sm:$0xff]  }
 0xc28   :  { %v5243_v25 = vpack.c.bf16 %v5239_v4, %v5236_v57  ;;  %v14808_v20 = vpop.f32.mrb[219].mxu0  ;;  %v16610_v57 = vld [vmem:[%s21132_s3 + $0xa4] ss:$8 sps:$4 sm:$0xff]   ;;  %v16612_v4 = vld [vmem:[%s21132_s3 + $0xb4] ss:$8 sps:$4 sm:$0xff]  }
 0xc29   :  { %v16616_v20 = vld [vmem:[%s21132_s3 + $0xd4] ss:$8 sps:$4 sm:$0xff]  }
 0xc2a   :  { %14814 = vmatmul.mubr.msk.bf16.vlgmr.msra.gmra.mrb[204].mxu0 %vm3872_vm1, %v5243_v25  ;;  %v16615_v25 = vld [vmem:[%s21132_s3 + $0xc0] ss:$8 sps:$4 sm:$0xff]  }
 0xc2b   :  { %14830 = vmatpush3.bf16.msra.mxu0 %v16547_v42  ;;  %14833 = vmatprep.mubr.msk.bf16.mxu0 %vm16765_vm4, %v21087_v56  ;;  %v16613_v42 = vld [vmem:[%s21132_s3 + $0xb0] ss:$8 sps:$4 sm:$0xff]  }
 0xc2c   :  { %14831 = vmatprep.subr.bf16.mxu0 %v21087_v56 }
 0xc2f   :  { %14832 = vmatpush3.bf16.msra.mxu0 %v19043_v27 }
 0xc30   :  { %14849 = vmatprep.subr.bf16.mxu0 %v21087_v56 }
 0xc36   :  { %14834 = vmatmul.mubr.msk.bf16.vlgmr.msra.gmra.mrb[204].mxu0 %vm3872_vm1, %v5358_v41  ;;  %v21265_v41 = vld [vmem:[#allocation27_spill] sm:$0xff] }
 0xc37   :  { %14850 = vmatpush3.bf16.msra.mxu0 %v16549_v31  ;;  %14853 = vmatprep.mubr.msk.bf16.mxu0 %vm16765_vm4, %v21087_v56  ;;  %v16617_v31 = vld [vmem:[%s21132_s3 + $0xd0] ss:$8 sps:$4 sm:$0xff]  }
 0xc38   :  { %14851 = vmatprep.subr.bf16.mxu0 %v21087_v56 }
 0xc3b   :  { %14852 = vmatpush3.bf16.msra.mxu0 %v19058_v36 }
 0xc3c   :  { %14869 = vmatprep.subr.bf16.mxu0 %v21087_v56 }
 0xc42   :  { %14854 = vmatmul.mubr.msk.bf16.vlgmr.msra.gmra.mrb[204].mxu0 %vm3872_vm1, %v5473_v63  ;;  %v16603_v63 = vld [vmem:[%s21132_s3 + $0x20] ss:$8 sps:$4 sm:$0xff]  }
 0xc43   :  { %14870 = vmatpush3.bf16.msra.mxu0 %v16551_v51  ;;  %14873 = vmatprep.mubr.msk.bf16.mxu0 %vm16765_vm4, %v21087_v56  ;;  %v16619_v51 = vld [vmem:[%s21132_s3 + $0xe0] ss:$8 sps:$4 sm:$0xff]  }
 0xc44   :  { %14871 = vmatprep.subr.bf16.mxu0 %v21087_v56 }
 0xc47   :  { %14872 = vmatpush3.bf16.msra.mxu0 %v19073_v59 }
 0xc48   :  { %13449 = vmatprep.subr.bf16.mxu0 %v18825_v14 }
 0xc4e   :  { %14874 = vmatmul.mubr.msk.bf16.vlgmr.msra.gmra.mrb[204].mxu0 %vm3872_vm1, %v5588_v45  ;;  %v16608_v45 = vld [vmem:[%s21132_s3 + $0x94] ss:$8 sps:$4 sm:$0xff]  }
 0xc4f   :  { %13450 = vmatpush3.bf16.msra.mxu0 %v21251_v8  ;;  %5928 = vmatprep.mubr.bf16.mxu0 %v16598_v1  ;;  %v16621_v1 = vld [vmem:[%s21132_s3 + $0xf0] ss:$8 sps:$4 sm:$0xff]  }
 0xc50   :  { %13451 = vmatprep.subr.bf16.mxu0 %v21252_v18 }
 0xc53   :  { %13452 = vmatpush3.bf16.msra.mxu0 %v21253_v5 }
 0xc54   :  { %13453 = vmatprep.subr.bf16.mxu0 %v21254_v28 }
 0xc57   :  { %13454 = vmatpush3.bf16.msra.mxu0 %v21255_v47 }
 0xc58   :  { %13455 = vmatprep.subr.bf16.mxu0 %v21256_v50 }
 0xc5b   :  { %13456 = vmatpush3.bf16.msra.mxu0 %v21257_v33 }
 0xc5c   :  { %13457 = vmatprep.subr.bf16.mxu0 %v21258_v39 }
 0xc5f   :  { %13458 = vmatpush3.bf16.msra.mxu0 %v21259_v52 }
 0xc60   :  { %13459 = vmatprep.subr.bf16.mxu0 %v21260_v19 }
 0xc63   :  { %13460 = vmatpush3.bf16.msra.mxu0 %v21261_v16 }
 0xc64   :  { %13461 = vmatprep.subr.bf16.mxu0 %v21262_v7 }
 0xc67   :  { %13462 = vmatpush3.bf16.msra.mxu0 %v21263_v30 }
 0xc68   :  { %13463 = vmatprep.subr.bf16.mxu0 %v21264_v55 }
 0xc6b   :  { %13464 = vmatpush3.bf16.msra.mxu0 %v21265_v41 }
 0xc6c   :  { %13539 = vmatprep.subr.bf16.mxu0 %v18825_v14 }
 0xc6e   :  { %5929 = vmatmul.mubr.bf16.vlgmr.msra.gmra.mrb[220].mxu0 %v16599_v46  ;;  %v16622_v46 = vld [vmem:[%s21132_s3 + $0x104] ss:$8 sps:$4 sm:$0xff]  }
 0xc6f   :  { %13540 = vmatpush3.bf16.msra.mxu0 %v21251_v8  ;;  %5936 = vmatprep.mubr.bf16.mxu0 %v16600_v35  ;;  %v16623_v35 = vld [vmem:[%s21132_s3 + $0x100] ss:$8 sps:$4 sm:$0xff]  }
 0xc70   :  { %13541 = vmatprep.subr.bf16.mxu0 %v21252_v18 }
 0xc73   :  { %13542 = vmatpush3.bf16.msra.mxu0 %v21253_v5 }
 0xc74   :  { %13543 = vmatprep.subr.bf16.mxu0 %v21254_v28 }
 0xc76   :  { %5937 = vmatmul.mubr.bf16.gmra.mrb[224].mxu0 %v16601_v44  ;;  %v16624_v44 = vld [vmem:[%s21132_s3 + $0x114] ss:$8 sps:$4 sm:$0xff]  }
 0xc77   :  { %13544 = vmatpush3.bf16.msra.mxu0 %v21255_v47  ;;  %5944 = vmatprep.mubr.bf16.mxu0 %v16602_v38  ;;  %v16625_v38 = vld [vmem:[%s21132_s3 + $0x110] ss:$8 sps:$4 sm:$0xff]  }
 0xc78   :  { %13545 = vmatprep.subr.bf16.mxu0 %v21256_v50 }
 0xc7b   :  { %13546 = vmatpush3.bf16.msra.mxu0 %v21257_v33 }
 0xc7c   :  { %13547 = vmatprep.subr.bf16.mxu0 %v21258_v39 }
 0xc7e   :  { %5945 = vmatmul.mubr.bf16.gmra.mrb[228].mxu0 %v16603_v63  ;;  %v16626_v63 = vld [vmem:[%s21132_s3 + $0x124] ss:$8 sps:$4 sm:$0xff]  }
 0xc7f   :  { %13548 = vmatpush3.bf16.msra.mxu0 %v21259_v52  ;;  %5952 = vmatprep.mubr.bf16.mxu0 %v16604_v32  ;;  %v16627_v32 = vld [vmem:[%s21132_s3 + $0x120] ss:$8 sps:$4 sm:$0xff]  }
 0xc80   :  { %13549 = vmatprep.subr.bf16.mxu0 %v21260_v19 }
 0xc83   :  { %13550 = vmatpush3.bf16.msra.mxu0 %v21261_v16 }
 0xc84   :  { %13551 = vmatprep.subr.bf16.mxu0 %v21262_v7 }
 0xc86   :  { %5953 = vmatmul.mubr.bf16.gmra.mrb[232].mxu0 %v16605_v23  ;;  %v16628_v23 = vld [vmem:[%s21132_s3 + $0x134] ss:$8 sps:$4 sm:$0xff]  }
 0xc87   :  { %13552 = vmatpush3.bf16.msra.mxu0 %v21263_v30  ;;  %6236 = vmatprep.mubr.bf16.mxu0 %v16606_v58  ;;  %v16629_v58 = vld [vmem:[%s21132_s3 + $0x130] ss:$8 sps:$4 sm:$0xff]  }
 0xc88   :  { %13553 = vmatprep.subr.bf16.mxu0 %v21264_v55 }
 0xc8b   :  { %13554 = vmatpush3.bf16.msra.mxu0 %v21265_v41 }
 0xc8c   :  { %13584 = vmatprep.subr.bf16.mxu0 %v18825_v14 }
 0xc8e   :  { %6237 = vmatmul.mubr.bf16.vlgmr.msra.gmra.mrb[236].mxu0 %v16607_v13  ;;  %v16630_v13 = vld [vmem:[%s21132_s3 + $0x184] ss:$8 sps:$4 sm:$0xff]  }
 0xc8f   :  { %13585 = vmatpush3.bf16.msra.mxu0 %v21251_v8  ;;  %6244 = vmatprep.mubr.bf16.mxu0 %v16608_v45  ;;  %v16631_v45 = vld [vmem:[%s21132_s3 + $0x180] ss:$8 sps:$4 sm:$0xff]  }
 0xc90   :  { %13586 = vmatprep.subr.bf16.mxu0 %v21252_v18 }
 0xc93   :  { %13587 = vmatpush3.bf16.msra.mxu0 %v21253_v5 }
 0xc94   :  { %13588 = vmatprep.subr.bf16.mxu0 %v21254_v28 }
 0xc96   :  { %6245 = vmatmul.mubr.bf16.gmra.mrb[240].mxu0 %v16609_v22  ;;  %v16632_v22 = vld [vmem:[%s21132_s3 + $0x194] ss:$8 sps:$4 sm:$0xff]  }
 0xc97   :  { %13589 = vmatpush3.bf16.msra.mxu0 %v21255_v47  ;;  %6252 = vmatprep.mubr.bf16.mxu0 %v16610_v57  ;;  %v16633_v57 = vld [vmem:[%s21132_s3 + $0x190] ss:$8 sps:$4 sm:$0xff]  }
 0xc98   :  { %13590 = vmatprep.subr.bf16.mxu0 %v21256_v50 }
 0xc9b   :  { %13591 = vmatpush3.bf16.msra.mxu0 %v21257_v33 }
 0xc9c   :  { %13592 = vmatprep.subr.bf16.mxu0 %v21258_v39 }
 0xc9e   :  { %6253 = vmatmul.mubr.bf16.gmra.mrb[244].mxu0 %v16611_v3  ;;  %v16634_v3 = vld [vmem:[%s21132_s3 + $0x1a4] ss:$8 sps:$4 sm:$0xff]  }
 0xc9f   :  { %13593 = vmatpush3.bf16.msra.mxu0 %v21259_v52  ;;  %6260 = vmatprep.mubr.bf16.mxu0 %v16612_v4  ;;  %v16635_v4 = vld [vmem:[%s21132_s3 + $0x1a0] ss:$8 sps:$4 sm:$0xff]  }
 0xca0   :  { %13594 = vmatprep.subr.bf16.mxu0 %v21260_v19 }
 0xca3   :  { %13595 = vmatpush3.bf16.msra.mxu0 %v21261_v16 }
 0xca4   :  { %13596 = vmatprep.subr.bf16.mxu0 %v21262_v7 }
 0xca6   :  { %6261 = vmatmul.mubr.bf16.gmra.mrb[248].mxu0 %v16613_v42  ;;  %v16636_v42 = vld [vmem:[%s21132_s3 + $0x1b4] ss:$8 sps:$4 sm:$0xff]  }
 0xca7   :  { %13597 = vmatpush3.bf16.msra.mxu0 %v21263_v30  ;;  %6390 = vmatprep.mubr.bf16.mxu0 %v16614_v15  ;;  %v16637_v15 = vld [vmem:[%s21132_s3 + $0x1b0] ss:$8 sps:$4 sm:$0xff]  }
 0xca8   :  { %13598 = vmatprep.subr.bf16.mxu0 %v21264_v55 }
 0xcab   :  { %13599 = vmatpush3.bf16.msra.mxu0 %v21265_v41 }
 0xcac   :  { %13629 = vmatprep.subr.bf16.mxu0 %v18825_v14 }
 0xcae   :  { %6391 = vmatmul.mubr.bf16.vlgmr.msra.gmra.mrb[252].mxu0 %v16615_v25  ;;  %v16638_v25 = vld [vmem:[%s21132_s3 + $0x1c4] ss:$8 sps:$4 sm:$0xff]  }
 0xcaf   :  { %13630 = vmatpush3.bf16.msra.mxu0 %v21251_v8  ;;  %6398 = vmatprep.mubr.bf16.mxu0 %v16616_v20  ;;  %v16639_v20 = vld [vmem:[%s21132_s3 + $0x1c0] ss:$8 sps:$4 sm:$0xff]  }
 0xcb0   :  { %13631 = vmatprep.subr.bf16.mxu0 %v21252_v18 }
 0xcb3   :  { %13632 = vmatpush3.bf16.msra.mxu0 %v21253_v5 }
 0xcb4   :  { %13633 = vmatprep.subr.bf16.mxu0 %v21254_v28 }
 0xcb6   :  { %6399 = vmatmul.mubr.bf16.gmra.mrb[0].mxu0 %v16617_v31  ;;  %v16640_v31 = vld [vmem:[%s21132_s3 + $0x1d4] ss:$8 sps:$4 sm:$0xff]  }
 0xcb7   :  { %13634 = vmatpush3.bf16.msra.mxu0 %v21255_v47  ;;  %6406 = vmatprep.mubr.bf16.mxu0 %v16618_v49  ;;  %v16641_v49 = vld [vmem:[%s21132_s3 + $0x1d0] ss:$8 sps:$4 sm:$0xff]  }
 0xcb8   :  { %13635 = vmatprep.subr.bf16.mxu0 %v21256_v50 }
 0xcbb   :  { %13636 = vmatpush3.bf16.msra.mxu0 %v21257_v33 }
 0xcbc   :  { %13637 = vmatprep.subr.bf16.mxu0 %v21258_v39 }
 0xcbe   :  { %6407 = vmatmul.mubr.bf16.gmra.mrb[4].mxu0 %v16619_v51  ;;  %v16642_v51 = vld [vmem:[%s21132_s3 + $0x1e4] ss:$8 sps:$4 sm:$0xff]  }
 0xcbf   :  { %13638 = vmatpush3.bf16.msra.mxu0 %v21259_v52  ;;  %6414 = vmatprep.mubr.bf16.mxu0 %v16620_v10  ;;  %v16643_v10 = vld [vmem:[%s21132_s3 + $0x1e0] ss:$8 sps:$4 sm:$0xff]  }
 0xcc0   :  { %13639 = vmatprep.subr.bf16.mxu0 %v21260_v19 }
 0xcc3   :  { %13640 = vmatpush3.bf16.msra.mxu0 %v21261_v16 }
 0xcc4   :  { %13641 = vmatprep.subr.bf16.mxu0 %v21262_v7 }
 0xcc6   :  { %6415 = vmatmul.mubr.bf16.gmra.mrb[8].mxu0 %v16621_v1  ;;  %v16644_v1 = vld [vmem:[%s21132_s3 + $0x1f4] ss:$8 sps:$4 sm:$0xff]  }
 0xcc7   :  { %13642 = vmatpush3.bf16.msra.mxu0 %v21263_v30  ;;  %6544 = vmatprep.mubr.bf16.mxu0 %v16622_v46 }
 0xcc8   :  { %13643 = vmatprep.subr.bf16.mxu0 %v21264_v55 }
 0xccb   :  { %13644 = vmatpush3.bf16.msra.mxu0 %v21265_v41 }
 0xccc   :  { %13719 = vmatprep.subr.bf16.mxu0 %v18825_v14 }
 0xcce   :  { %6545 = vmatmul.mubr.bf16.vlgmr.msra.gmra.mrb[12].mxu0 %v16623_v35 }
 0xccf   :  { %13720 = vmatpush3.bf16.msra.mxu0 %v21251_v8  ;;  %6552 = vmatprep.mubr.bf16.mxu0 %v16624_v44 }
 0xcd0   :  { %13721 = vmatprep.subr.bf16.mxu0 %v21252_v18 }
 0xcd3   :  { %13722 = vmatpush3.bf16.msra.mxu0 %v21253_v5 }
 0xcd4   :  { %13723 = vmatprep.subr.bf16.mxu0 %v21254_v28 }
 0xcd6   :  { %6553 = vmatmul.mubr.bf16.gmra.mrb[16].mxu0 %v16625_v38 }
 0xcd7   :  { %13724 = vmatpush3.bf16.msra.mxu0 %v21255_v47  ;;  %6560 = vmatprep.mubr.bf16.mxu0 %v16626_v63 }
 0xcd8   :  { %13725 = vmatprep.subr.bf16.mxu0 %v21256_v50 }
 0xcdb   :  { %13726 = vmatpush3.bf16.msra.mxu0 %v21257_v33 }
 0xcdc   :  { %13727 = vmatprep.subr.bf16.mxu0 %v21258_v39 }
 0xcde   :  { %6561 = vmatmul.mubr.bf16.gmra.mrb[20].mxu0 %v16627_v32 }
 0xcdf   :  { %13728 = vmatpush3.bf16.msra.mxu0 %v21259_v52  ;;  %6568 = vmatprep.mubr.bf16.mxu0 %v16628_v23 }
 0xce0   :  { %13729 = vmatprep.subr.bf16.mxu0 %v21260_v19 }
 0xce3   :  { %13730 = vmatpush3.bf16.msra.mxu0 %v21261_v16 }
 0xce4   :  { %13731 = vmatprep.subr.bf16.mxu0 %v21262_v7 }
 0xce6   :  { %6569 = vmatmul.mubr.bf16.gmra.mrb[24].mxu0 %v16629_v58 }
 0xce7   :  { %13732 = vmatpush3.bf16.msra.mxu0 %v21263_v30  ;;  %6852 = vmatprep.mubr.bf16.mxu0 %v16630_v13 }
 0xce8   :  { %13733 = vmatprep.subr.bf16.mxu0 %v21264_v55 }
 0xceb   :  { %13734 = vmatpush3.bf16.msra.mxu0 %v21265_v41 }
 0xcec   :  { %13764 = vmatprep.subr.bf16.mxu0 %v18825_v14 }
 0xcee   :  { %6853 = vmatmul.mubr.bf16.vlgmr.msra.gmra.mrb[28].mxu0 %v16631_v45  ;;  %v16647_v45 = vld [vmem:[%s21132_s3 + $0x200] ss:$8 sps:$4 sm:$0xff]  }
 0xcef   :  { %13765 = vmatpush3.bf16.msra.mxu0 %v21251_v8  ;;  %6860 = vmatprep.mubr.bf16.mxu0 %v16632_v22  ;;  %v16648_v22 = vld [vmem:[%s21132_s3 + $0x214] ss:$8 sps:$4 sm:$0xff]  }
 0xcf0   :  { %13766 = vmatprep.subr.bf16.mxu0 %v21252_v18 }
 0xcf3   :  { %13767 = vmatpush3.bf16.msra.mxu0 %v21253_v5 }
 0xcf4   :  { %13768 = vmatprep.subr.bf16.mxu0 %v21254_v28 }
 0xcf6   :  { %6861 = vmatmul.mubr.bf16.gmra.mrb[32].mxu0 %v16633_v57  ;;  %v16649_v57 = vld [vmem:[%s21132_s3 + $0x210] ss:$8 sps:$4 sm:$0xff]  }
 0xcf7   :  { %13769 = vmatpush3.bf16.msra.mxu0 %v21255_v47  ;;  %6868 = vmatprep.mubr.bf16.mxu0 %v16634_v3  ;;  %v16650_v3 = vld [vmem:[%s21132_s3 + $0x224] ss:$8 sps:$4 sm:$0xff]  }
 0xcf8   :  { %13770 = vmatprep.subr.bf16.mxu0 %v21256_v50 }
 0xcfb   :  { %13771 = vmatpush3.bf16.msra.mxu0 %v21257_v33 }
 0xcfc   :  { %13772 = vmatprep.subr.bf16.mxu0 %v21258_v39 }
 0xcfe   :  { %6869 = vmatmul.mubr.bf16.gmra.mrb[36].mxu0 %v16635_v4  ;;  %v16651_v4 = vld [vmem:[%s21132_s3 + $0x220] ss:$8 sps:$4 sm:$0xff]  }
 0xcff   :  { %13773 = vmatpush3.bf16.msra.mxu0 %v21259_v52  ;;  %6876 = vmatprep.mubr.bf16.mxu0 %v16636_v42  ;;  %v16652_v42 = vld [vmem:[%s21132_s3 + $0x234] ss:$8 sps:$4 sm:$0xff]  }
 0xd00   :  { %13774 = vmatprep.subr.bf16.mxu0 %v21260_v19 }
 0xd03   :  { %13775 = vmatpush3.bf16.msra.mxu0 %v21261_v16 }
 0xd04   :  { %13776 = vmatprep.subr.bf16.mxu0 %v21262_v7 }
 0xd06   :  { %6877 = vmatmul.mubr.bf16.gmra.mrb[40].mxu0 %v16637_v15 }
 0xd07   :  { %13777 = vmatpush3.bf16.msra.mxu0 %v21263_v30  ;;  %7006 = vmatprep.mubr.bf16.mxu0 %v16638_v25 }
 0xd08   :  { %13778 = vmatprep.subr.bf16.mxu0 %v21264_v55 }
 0xd0b   :  { %13779 = vmatpush3.bf16.msra.mxu0 %v21265_v41 }
 0xd0c   :  { %13809 = vmatprep.subr.bf16.mxu0 %v18825_v14 }
 0xd0e   :  { %7007 = vmatmul.mubr.bf16.vlgmr.msra.gmra.mrb[44].mxu0 %v16639_v20 }
 0xd0f   :  { %13810 = vmatpush3.bf16.msra.mxu0 %v21251_v8  ;;  %7014 = vmatprep.mubr.bf16.mxu0 %v16640_v31 }
 0xd10   :  { %13811 = vmatprep.subr.bf16.mxu0 %v21252_v18 }
 0xd13   :  { %13812 = vmatpush3.bf16.msra.mxu0 %v21253_v5 }
 0xd14   :  { %13813 = vmatprep.subr.bf16.mxu0 %v21254_v28 }
 0xd16   :  { %7015 = vmatmul.mubr.bf16.gmra.mrb[48].mxu0 %v16641_v49 }
 0xd17   :  { %13814 = vmatpush3.bf16.msra.mxu0 %v21255_v47  ;;  %7022 = vmatprep.mubr.bf16.mxu0 %v16642_v51 }
 0xd18   :  { %13815 = vmatprep.subr.bf16.mxu0 %v21256_v50 }
 0xd1b   :  { %13816 = vmatpush3.bf16.msra.mxu0 %v21257_v33 }
 0xd1c   :  { %13817 = vmatprep.subr.bf16.mxu0 %v21258_v39 }
 0xd1e   :  { %7023 = vmatmul.mubr.bf16.gmra.mrb[52].mxu0 %v16643_v10  ;;  %v16653_v10 = vld [vmem:[%s21132_s3 + $0x230] ss:$8 sps:$4 sm:$0xff]  }
 0xd1f   :  { %13818 = vmatpush3.bf16.msra.mxu0 %v21259_v52  ;;  %7030 = vmatprep.mubr.bf16.mxu0 %v16644_v1 }
 0xd20   :  { %13819 = vmatprep.subr.bf16.mxu0 %v21260_v19 }
 0xd21   :  { %v5642_v46 = vpop.f32.mrb[204].mxu0 }
 0xd22   :  { %v19329_v35 = vadd.f32 %v18882_v12, %v5642_v46  ;;  %v14875_v44 = vpop.f32.mrb[205].mxu0  ;;  %v16645_v12 = vld [vmem:[%s21132_s3 + $0x1f0] ss:$8 sps:$4 sm:$0xff]   ;;  %v16654_v46 = vld [vmem:[%s21132_s3 + $0x244] ss:$8 sps:$4 sm:$0xff]  }
 0xd23   :  { %13820 = vmatpush3.bf16.msra.mxu0 %v21261_v16  ;;  %v5645_v38 = vpop.f32.mrb[206].mxu0 }
 0xd24   :  { %21266 = vst [vmem:[#allocation13_spill] sm:$0xff] %v19329_v35  ;;  %v19333_v63 = vadd.f32 %v18885_v21, %v5645_v38  ;;  %13821 = vmatprep.subr.bf16.mxu0 %v21262_v7  ;;  %v14876_v32 = vpop.f32.mrb[207].mxu0  ;;  %v9809_v23 = vsel %vm9808_vm2, %v19329_v35, 0.0  ;;  %v16646_v21 = vld [vmem:[%s21132_s3 + $0x204] ss:$8 sps:$4 sm:$0xff]  }
 0xd26   :  { %21267 = vst [vmem:[#allocation16_spill] sm:$0xff] %v19333_v63  ;;  %v9810_v58 = vsel %vm9808_vm2, %v19333_v63, 0.0  ;;  %7031 = vmatmul.mubr.bf16.gmra.mrb[56].mxu0 %v16645_v12 }
 0xd27   :  { %v19343_v13 = vadd.f32 %v9810_v58, %v9809_v23  ;;  %13822 = vmatpush3.bf16.msra.mxu0 %v21263_v30  ;;  %7160 = vmatprep.mubr.bf16.mxu0 %v16646_v21  ;;  %v16655_v21 = vld [vmem:[%s21132_s3 + $0x240] ss:$8 sps:$4 sm:$0xff]  }
 0xd28   :  { %13823 = vmatprep.subr.bf16.mxu0 %v21264_v55 }
 0xd29   :  { %21268 = vst [vmem:[#allocation15_spill] sm:$0xff] %v19343_v13 }
 0xd2b   :  { %13824 = vmatpush3.bf16.msra.mxu0 %v21265_v41 }
 0xd2c   :  { %13854 = vmatprep.subr.bf16.mxu0 %v18825_v14 }
 0xd2e   :  { %7161 = vmatmul.mubr.bf16.vlgmr.msra.gmra.mrb[60].mxu0 %v16647_v45 }
 0xd2f   :  { %13855 = vmatpush3.bf16.msra.mxu0 %v21251_v8  ;;  %7168 = vmatprep.mubr.bf16.mxu0 %v16648_v22  ;;  %v16656_v22 = vld [vmem:[%s21132_s3 + $0x254] ss:$8 sps:$4 sm:$0xff]  }
 0xd30   :  { %13856 = vmatprep.subr.bf16.mxu0 %v21252_v18 }
 0xd33   :  { %13857 = vmatpush3.bf16.msra.mxu0 %v21253_v5 }
 0xd34   :  { %13858 = vmatprep.subr.bf16.mxu0 %v21254_v28 }
 0xd36   :  { %7169 = vmatmul.mubr.bf16.gmra.mrb[64].mxu0 %v16649_v57 }
 0xd37   :  { %13859 = vmatpush3.bf16.msra.mxu0 %v21255_v47  ;;  %7176 = vmatprep.mubr.bf16.mxu0 %v16650_v3 }
 0xd38   :  { %13860 = vmatprep.subr.bf16.mxu0 %v21256_v50 }
 0xd3b   :  { %13861 = vmatpush3.bf16.msra.mxu0 %v21257_v33 }
 0xd3c   :  { %13862 = vmatprep.subr.bf16.mxu0 %v21258_v39 }
 0xd3e   :  { %7177 = vmatmul.mubr.bf16.gmra.mrb[68].mxu0 %v16651_v4 }
 0xd3f   :  { %13863 = vmatpush3.bf16.msra.mxu0 %v21259_v52  ;;  %7184 = vmatprep.mubr.bf16.mxu0 %v16652_v42 }
 0xd40   :  { %13864 = vmatprep.subr.bf16.mxu0 %v21260_v19 }
 0xd41   :  { %v13465_v15 = vpop.f32.mrb[220].mxu0 }
 0xd42   :  { %v13466_v25 = vpop.f32.mrb[221].mxu0 }
 0xd43   :  { %v13467_v20 = vadd.f32 %v13466_v25, %v13465_v15  ;;  %v13468_v31 = vpop.f32.mrb[222].mxu0  ;;  %13865 = vmatpush3.bf16.msra.mxu0 %v21261_v16 }
 0xd44   :  { %v13469_v49 = vpop.f32.mrb[223].mxu0  ;;  %13866 = vmatprep.subr.bf16.mxu0 %v21262_v7 }
 0xd45   :  { %v13470_v51 = vadd.f32 %v13469_v49, %v13468_v31  ;;  %v16658_v49 = vld [vmem:[%s21132_s3 + $0x264] ss:$8 sps:$4 sm:$0xff]  }
 0xd46   :  { %7185 = vmatmul.mubr.bf16.gmra.mrb[72].mxu0 %v16653_v10 }
 0xd47   :  { %v5961_v1 = vpack.c.bf16 %v13470_v51, %v13467_v20  ;;  %13867 = vmatpush3.bf16.msra.mxu0 %v21263_v30  ;;  %7314 = vmatprep.mubr.bf16.mxu0 %v16654_v46  ;;  %v16657_v20 = vld [vmem:[%s21132_s3 + $0x250] ss:$8 sps:$4 sm:$0xff]  }
 0xd48   :  { %13868 = vmatprep.subr.bf16.mxu0 %v21264_v55 }
 0xd49   :  { %v13471_v44 = vpop.f32.mrb[224].mxu0  ;;  %14879 = vmatprep.mubr.msk.bf16.mxu1 %vm457_vm3, %v5961_v1 }
 0xd4a   :  { %v13472_v38 = vpop.f32.mrb[225].mxu0 }
 0xd4b   :  { %v13473_v32 = vadd.f32 %v13472_v38, %v13471_v44  ;;  %v13474_v23 = vpop.f32.mrb[226].mxu0  ;;  %13869 = vmatpush3.bf16.msra.mxu0 %v21265_v41 }
 0xd4c   :  { %v13475_v58 = vpop.f32.mrb[227].mxu0  ;;  %13944 = vmatprep.subr.bf16.mxu0 %v18825_v14 }
 0xd4d   :  { %v13476_v12 = vadd.f32 %v13475_v58, %v13474_v23  ;;  %v16660_v58 = vld [vmem:[%s21132_s3 + $0x274] ss:$8 sps:$4 sm:$0xff]  }
 0xd4e   :  { %7315 = vmatmul.mubr.bf16.vlgmr.msra.gmra.mrb[76].mxu0 %v16655_v21  ;;  %v16661_v21 = vld [vmem:[%s21132_s3 + $0x44] ss:$8 sps:$4 sm:$0xff]  }
 0xd4f   :  { %v5962_v45 = vpack.c.bf16 %v13476_v12, %v13473_v32  ;;  %13945 = vmatpush3.bf16.msra.mxu0 %v21251_v8  ;;  %7322 = vmatprep.mubr.bf16.mxu0 %v16656_v22  ;;  %v16659_v32 = vld [vmem:[%s21132_s3 + $0x260] ss:$8 sps:$4 sm:$0xff]  }
 0xd50   :  { %13946 = vmatprep.subr.bf16.mxu0 %v21252_v18 }
 0xd51   :  { %14880 = vmatmul.mubr.msk.bf16.vlgmr.msra.gmra.mrb[120].mxu1 %vm457_vm3, %v5962_v45  ;;  %v13477_v57 = vpop.f32.mrb[228].mxu0 }
 0xd52   :  { %13495 = vmatpush3.bf16.msra.mxu1 %v21251_v8  ;;  %v13478_v3 = vpop.f32.mrb[229].mxu0 }
 0xd53   :  { %13496 = vmatprep.subr.bf16.mxu1 %v21252_v18  ;;  %13947 = vmatpush3.bf16.msra.mxu0 %v21253_v5  ;;  %v13479_v4 = vadd.f32 %v13478_v3, %v13477_v57  ;;  %v13480_v42 = vpop.f32.mrb[230].mxu0 }
 0xd54   :  { %13948 = vmatprep.subr.bf16.mxu0 %v21254_v28  ;;  %v13481_v15 = vpop.f32.mrb[231].mxu0 }
 0xd55   :  { %v13482_v25 = vadd.f32 %v13481_v15, %v13480_v42  ;;  %v16662_v42 = vld [vmem:[%s21132_s3 + $0x270] ss:$8 sps:$4 sm:$0xff]  }
 0xd56   :  { %13497 = vmatpush3.bf16.msra.mxu1 %v21253_v5  ;;  %7323 = vmatmul.mubr.bf16.gmra.mrb[80].mxu0 %v16657_v20 }
 0xd57   :  { %13498 = vmatprep.subr.bf16.mxu1 %v21254_v28  ;;  %13949 = vmatpush3.bf16.msra.mxu0 %v21255_v47  ;;  %v5963_v31 = vpack.c.bf16 %v13482_v25, %v13479_v4  ;;  %v16663_v25 = vld [vmem:[%s21132_s3 + $0x2c4] ss:$8 sps:$4 sm:$0xff]  }
 0xd58   :  { %13950 = vmatprep.subr.bf16.mxu0 %v21256_v50  ;;  %7330 = vmatprep.mubr.bf16.mxu0 %v16658_v49 }
 0xd59   :  { %v13483_v51 = vpop.f32.mrb[232].mxu0  ;;  %14883 = vmatprep.mubr.msk.bf16.mxu1 %vm457_vm3, %v5963_v31 }
 0xd5a   :  { %13499 = vmatpush3.bf16.msra.mxu1 %v21255_v47  ;;  %v13484_v10 = vpop.f32.mrb[233].mxu0 }
 0xd5b   :  { %13500 = vmatprep.subr.bf16.mxu1 %v21256_v50  ;;  %13951 = vmatpush3.bf16.msra.mxu0 %v21257_v33  ;;  %v13485_v1 = vadd.f32 %v13484_v10, %v13483_v51  ;;  %v13486_v46 = vpop.f32.mrb[234].mxu0  ;;  %v16664_v10 = vld [vmem:[%s21132_s3 + $0x2c0] ss:$8 sps:$4 sm:$0xff]  }
 0xd5c   :  { %13952 = vmatprep.subr.bf16.mxu0 %v21258_v39  ;;  %v13487_v44 = vpop.f32.mrb[235].mxu0 }
 0xd5d   :  { %v13488_v38 = vadd.f32 %v13487_v44, %v13486_v46  ;;  %v21269_v46 = vld [vmem:[#allocation29_spill] sm:$0xff]  ;;  %v16666_v44 = vld [vmem:[%s21132_s3 + $0x40] ss:$8 sps:$4 sm:$0xff]  }
 0xd5e   :  { %13501 = vmatpush3.bf16.msra.mxu1 %v21257_v33  ;;  %7331 = vmatmul.mubr.bf16.gmra.mrb[84].mxu0 %v16659_v32  ;;  %v21270_v32 = vld [vmem:[#allocation30_spill] sm:$0xff] }
 0xd5f   :  { %13502 = vmatprep.subr.bf16.mxu1 %v21258_v39  ;;  %13953 = vmatpush3.bf16.msra.mxu0 %v21259_v52  ;;  %v5964_v23 = vpack.c.bf16 %v13488_v38, %v13485_v1  ;;  %v16665_v1 = vld [vmem:[%s21132_s3 + $0x2d4] ss:$8 sps:$4 sm:$0xff]  }
 0xd60   :  { %13954 = vmatprep.subr.bf16.mxu0 %v21260_v19  ;;  %7338 = vmatprep.mubr.bf16.mxu0 %v16660_v58  ;;  %v16667_v38 = vld [vmem:[%s21132_s3 + $0x54] ss:$8 sps:$4 sm:$0xff]   ;;  %v16669_v58 = vld [vmem:[%s21132_s3 + $0x2e4] ss:$8 sps:$4 sm:$0xff]  }
 0xd61   :  { %14884 = vmatmul.mubr.msk.bf16.gmra.mrb[124].mxu1 %vm457_vm3, %v5964_v23  ;;  %v13555_v12 = vpop.f32.mrb[236].mxu0  ;;  %v16668_v23 = vld [vmem:[%s21132_s3 + $0x2d0] ss:$8 sps:$4 sm:$0xff]  }
 0xd62   :  { %13503 = vmatpush3.bf16.msra.mxu1 %v21259_v52  ;;  %6082 = vmatprep.mubr.bf16.mxu1 %v16661_v21  ;;  %v13556_v45 = vpop.f32.mrb[237].mxu0  ;;  %v16671_v21 = vld [vmem:[%s21132_s3 + $0x64] ss:$8 sps:$4 sm:$0xff]  }
 0xd63   :  { %13504 = vmatprep.subr.bf16.mxu1 %v21260_v19  ;;  %13955 = vmatpush3.bf16.msra.mxu0 %v21261_v16  ;;  %v19438_v22 = vadd.f32 %v13556_v45, %v13555_v12  ;;  %v13558_v57 = vpop.f32.mrb[238].mxu0  ;;  %v16670_v12 = vld [vmem:[%s21132_s3 + $0x50] ss:$8 sps:$4 sm:$0xff]   ;;  %v16672_v45 = vld [vmem:[%s21132_s3 + $0x2e0] ss:$8 sps:$4 sm:$0xff]  }
 0xd64   :  { %13956 = vmatprep.subr.bf16.mxu0 %v21262_v7  ;;  %v13559_v3 = vpop.f32.mrb[239].mxu0 }
 0xd65   :  { %v19441_v4 = vadd.f32 %v13559_v3, %v13558_v57  ;;  %v16673_v57 = vld [vmem:[%s21132_s3 + $0x2f4] ss:$8 sps:$4 sm:$0xff]   ;;  %v16674_v3 = vld [vmem:[%s21132_s3 + $0x60] ss:$8 sps:$4 sm:$0xff]  }
 0xd66   :  { %13505 = vmatpush3.bf16.msra.mxu1 %v21261_v16  ;;  %7339 = vmatmul.mubr.bf16.gmra.mrb[88].mxu0 %v16662_v42  ;;  %v16675_v42 = vld [vmem:[%s21132_s3 + $0x74] ss:$8 sps:$4 sm:$0xff]  }
 0xd67   :  { %13506 = vmatprep.subr.bf16.mxu1 %v21262_v7  ;;  %13957 = vmatpush3.bf16.msra.mxu0 %v21263_v30 }
 0xd68   :  { %13958 = vmatprep.subr.bf16.mxu0 %v21264_v55  ;;  %7622 = vmatprep.mubr.bf16.mxu0 %v16663_v25  ;;  %v16676_v25 = vld [vmem:[%s21132_s3 + $0x2f0] ss:$8 sps:$4 sm:$0xff]  }
 0xd69   :  { %v13561_v20 = vpop.f32.mrb[240].mxu0 }
 0xd6a   :  { %13507 = vmatpush3.bf16.msra.mxu1 %v21263_v30  ;;  %v13562_v31 = vpop.f32.mrb[241].mxu0 }
 0xd6b   :  { %13508 = vmatprep.subr.bf16.mxu1 %v21264_v55  ;;  %13959 = vmatpush3.bf16.msra.mxu0 %v21265_v41  ;;  %v19458_v49 = vadd.f32 %v13562_v31, %v13561_v20  ;;  %v19460_v51 = vpop.f32.mrb[242].mxu0  ;;  %v16677_v20 = vld [vmem:[%s21132_s3 + $0x304] ss:$8 sps:$4 sm:$0xff]   ;;  %v16678_v31 = vld [vmem:[%s21132_s3 + $0x70] ss:$8 sps:$4 sm:$0xff]  }
 0xd6c   :  { %13989 = vmatprep.subr.bf16.mxu0 %v18825_v14 }
 0xd6e   :  { %13509 = vmatpush3.bf16.msra.mxu1 %v21265_v41  ;;  %7623 = vmatmul.mubr.bf16.vlgmr.msra.gmra.mrb[92].mxu0 %v16664_v10  ;;  %v16679_v10 = vld [vmem:[%s21132_s3 + $0x300] ss:$8 sps:$4 sm:$0xff]  }
 0xd6f   :  { %13990 = vmatpush3.bf16.msra.mxu0 %v21251_v8  ;;  %7630 = vmatprep.mubr.bf16.mxu0 %v16665_v1  ;;  %v16680_v1 = vld [vmem:[%s21132_s3 + $0x314] ss:$8 sps:$4 sm:$0xff]  }
 0xd70   :  { %13991 = vmatprep.subr.bf16.mxu0 %v21252_v18  ;;  %14887 = vmatprep.subr.bf16.mxu1 %v21269_v46 }
 0xd71   :  { %6083 = vmatmul.mubr.bf16.vlgmr.msra.gmra.mrb[128].mxu1 %v16666_v44  ;;  %v16682_v44 = vld [vmem:[%s21132_s3 + $0x324] ss:$8 sps:$4 sm:$0xff]  }
 0xd72   :  { %6090 = vmatprep.mubr.bf16.mxu1 %v16667_v38  ;;  %14888 = vmatpush3.bf16.msra.mxu1 %v21269_v46  ;;  %v16681_v46 = vld [vmem:[%s21132_s3 + $0x310] ss:$8 sps:$4 sm:$0xff]   ;;  %v16683_v38 = vld [vmem:[%s21132_s3 + $0x320] ss:$8 sps:$4 sm:$0xff]  }
 0xd73   :  { %13992 = vmatpush3.bf16.msra.mxu0 %v21253_v5  ;;  %14897 = vmatprep.subr.bf16.mxu1 %v21270_v32 }
 0xd74   :  { %13993 = vmatprep.subr.bf16.mxu0 %v21254_v28 }
 0xd76   :  { %7631 = vmatmul.mubr.bf16.gmra.mrb[96].mxu0 %v16668_v23  ;;  %v16684_v23 = vld [vmem:[%s21132_s3 + $0x334] ss:$8 sps:$4 sm:$0xff]  }
 0xd77   :  { %13994 = vmatpush3.bf16.msra.mxu0 %v21255_v47  ;;  %7638 = vmatprep.mubr.bf16.mxu0 %v16669_v58  ;;  %v16685_v58 = vld [vmem:[%s21132_s3 + $0x330] ss:$8 sps:$4 sm:$0xff]  }
 0xd78   :  { %13995 = vmatprep.subr.bf16.mxu0 %v21256_v50 }
 0xd79   :  { %6091 = vmatmul.mubr.bf16.gmra.mrb[132].mxu1 %v16670_v12  ;;  %v16686_v12 = vld [vmem:[%s21132_s3 + $0x344] ss:$8 sps:$4 sm:$0xff]  }
 0xd7a   :  { %6098 = vmatprep.mubr.bf16.mxu1 %v16671_v21  ;;  %v16687_v21 = vld [vmem:[%s21132_s3 + $0x340] ss:$8 sps:$4 sm:$0xff]  }
 0xd7b   :  { %13996 = vmatpush3.bf16.msra.mxu0 %v21257_v33 }
 0xd7c   :  { %13997 = vmatprep.subr.bf16.mxu0 %v21258_v39 }
 0xd7e   :  { %7639 = vmatmul.mubr.bf16.gmra.mrb[100].mxu0 %v16672_v45  ;;  %v16688_v45 = vld [vmem:[%s21132_s3 + $0x354] ss:$8 sps:$4 sm:$0xff]  }
 0xd7f   :  { %13998 = vmatpush3.bf16.msra.mxu0 %v21259_v52  ;;  %7646 = vmatprep.mubr.bf16.mxu0 %v16673_v57  ;;  %v16689_v57 = vld [vmem:[%s21132_s3 + $0x350] ss:$8 sps:$4 sm:$0xff]  }
 0xd80   :  { %13999 = vmatprep.subr.bf16.mxu0 %v21260_v19 }
 0xd81   :  { %6099 = vmatmul.mubr.bf16.gmra.mrb[136].mxu1 %v16674_v3  ;;  %v16690_v3 = vld [vmem:[%s21132_s3 + $0x364] ss:$8 sps:$4 sm:$0xff]  }
 0xd82   :  { %6106 = vmatprep.mubr.bf16.mxu1 %v16675_v42  ;;  %v16691_v42 = vld [vmem:[%s21132_s3 + $0x360] ss:$8 sps:$4 sm:$0xff]  }
 0xd83   :  { %14000 = vmatpush3.bf16.msra.mxu0 %v21261_v16 }
 0xd84   :  { %14001 = vmatprep.subr.bf16.mxu0 %v21262_v7 }
 0xd86   :  { %7647 = vmatmul.mubr.bf16.gmra.mrb[104].mxu0 %v16676_v25  ;;  %v16692_v25 = vld [vmem:[%s21132_s3 + $0x374] ss:$8 sps:$4 sm:$0xff]  }
 0xd87   :  { %14002 = vmatpush3.bf16.msra.mxu0 %v21263_v30  ;;  %7776 = vmatprep.mubr.bf16.mxu0 %v16677_v20  ;;  %v13565_v20 = vpop.f32.mrb[243].mxu0 }
 0xd88   :  { %14003 = vmatprep.subr.bf16.mxu0 %v21264_v55 }
 0xd89   :  { %6107 = vmatmul.mubr.bf16.gmra.mrb[140].mxu1 %v16678_v31  ;;  %v19599_v31 = vadd.f32 %v13565_v20, %v19460_v51 }
 0xd8b   :  { %14004 = vmatpush3.bf16.msra.mxu0 %v21265_v41 }
 0xd8c   :  { %14034 = vmatprep.subr.bf16.mxu0 %v18825_v14 }
 0xd8e   :  { %7777 = vmatmul.mubr.bf16.vlgmr.msra.gmra.mrb[108].mxu0 %v16679_v10  ;;  %v16693_v10 = vld [vmem:[%s21132_s3 + $0x370] ss:$8 sps:$4 sm:$0xff]  }
 0xd8f   :  { %14035 = vmatpush3.bf16.msra.mxu0 %v21251_v8  ;;  %7784 = vmatprep.mubr.bf16.mxu0 %v16680_v1 }
 0xd90   :  { %14036 = vmatprep.subr.bf16.mxu0 %v21252_v18 }
 0xd93   :  { %14037 = vmatpush3.bf16.msra.mxu0 %v21253_v5 }
 0xd94   :  { %14038 = vmatprep.subr.bf16.mxu0 %v21254_v28 }
 0xd96   :  { %7785 = vmatmul.mubr.bf16.gmra.mrb[112].mxu0 %v16681_v46  ;;  %v16694_v46 = vld [vmem:[%s21132_s3 + $0x384] ss:$8 sps:$4 sm:$0xff]  }
 0xd97   :  { %14039 = vmatpush3.bf16.msra.mxu0 %v21255_v47  ;;  %7792 = vmatprep.mubr.bf16.mxu0 %v16682_v44  ;;  %v13567_v44 = vpop.f32.mrb[244].mxu0 }
 0xd98   :  { %14040 = vmatprep.subr.bf16.mxu0 %v21256_v50  ;;  %v13568_v51 = vpop.f32.mrb[245].mxu0 }
 0xd9b   :  { %14041 = vmatpush3.bf16.msra.mxu0 %v21257_v33 }
 0xd9c   :  { %14042 = vmatprep.subr.bf16.mxu0 %v21258_v39 }
 0xd9e   :  { %7793 = vmatmul.mubr.bf16.gmra.mrb[116].mxu0 %v16683_v38  ;;  %v19612_v38 = vadd.f32 %v13568_v51, %v13567_v44  ;;  %v16697_v44 = vld [vmem:[%s21132_s3 + $0x390] ss:$8 sps:$4 sm:$0xff]  }
 0xd9f   :  { %14043 = vmatpush3.bf16.msra.mxu0 %v21259_v52  ;;  %7800 = vmatprep.mubr.bf16.mxu0 %v16684_v23  ;;  %v13570_v23 = vpop.f32.mrb[246].mxu0 }
 0xda0   :  { %14044 = vmatprep.subr.bf16.mxu0 %v21260_v19 }
 0xda3   :  { %14045 = vmatpush3.bf16.msra.mxu0 %v21261_v16 }
 0xda4   :  { %14046 = vmatprep.subr.bf16.mxu0 %v21262_v7 }
 0xda6   :  { %7801 = vmatmul.mubr.bf16.gmra.mrb[120].mxu0 %v16685_v58  ;;  %v13571_v58 = vpop.f32.mrb[247].mxu0 }
 0xda7   :  { %14047 = vmatpush3.bf16.msra.mxu0 %v21263_v30  ;;  %7930 = vmatprep.mubr.bf16.mxu0 %v16686_v12  ;;  %v19615_v12 = vadd.f32 %v13571_v58, %v13570_v23  ;;  %v16698_v23 = vld [vmem:[%s21132_s3 + $0x3a4] ss:$8 sps:$4 sm:$0xff]  }
 0xda8   :  { %14048 = vmatprep.subr.bf16.mxu0 %v21264_v55 }
 0xdab   :  { %14049 = vmatpush3.bf16.msra.mxu0 %v21265_v41 }
 0xdac   :  { %14079 = vmatprep.subr.bf16.mxu0 %v18825_v14 }
 0xdae   :  { %7931 = vmatmul.mubr.bf16.vlgmr.msra.gmra.mrb[124].mxu0 %v16687_v21  ;;  %v16695_v21 = vld [vmem:[%s21132_s3 + $0x380] ss:$8 sps:$4 sm:$0xff]  }
 0xdaf   :  { %14080 = vmatpush3.bf16.msra.mxu0 %v21251_v8  ;;  %7938 = vmatprep.mubr.bf16.mxu0 %v16688_v45 }
 0xdb0   :  { %14081 = vmatprep.subr.bf16.mxu0 %v21252_v18 }
 0xdb3   :  { %14082 = vmatpush3.bf16.msra.mxu0 %v21253_v5 }
 0xdb4   :  { %14083 = vmatprep.subr.bf16.mxu0 %v21254_v28 }
 0xdb6   :  { %7939 = vmatmul.mubr.bf16.gmra.mrb[128].mxu0 %v16689_v57  ;;  %v16696_v57 = vld [vmem:[%s21132_s3 + $0x394] ss:$8 sps:$4 sm:$0xff]  }
 0xdb7   :  { %14084 = vmatpush3.bf16.msra.mxu0 %v21255_v47  ;;  %7946 = vmatprep.mubr.bf16.mxu0 %v16690_v3  ;;  %v13573_v3 = vpop.f32.mrb[248].mxu0 }
 0xdb8   :  { %14085 = vmatprep.subr.bf16.mxu0 %v21256_v50 }
 0xdbb   :  { %14086 = vmatpush3.bf16.msra.mxu0 %v21257_v33 }
 0xdbc   :  { %14087 = vmatprep.subr.bf16.mxu0 %v21258_v39 }
 0xdbe   :  { %7947 = vmatmul.mubr.bf16.gmra.mrb[132].mxu0 %v16691_v42  ;;  %v13574_v42 = vpop.f32.mrb[249].mxu0 }
 0xdbf   :  { %14088 = vmatpush3.bf16.msra.mxu0 %v21259_v52  ;;  %7954 = vmatprep.mubr.bf16.mxu0 %v16692_v25  ;;  %v19625_v25 = vadd.f32 %v13574_v42, %v13573_v3  ;;  %v13576_v20 = vpop.f32.mrb[250].mxu0 }
 0xdc0   :  { %14089 = vmatprep.subr.bf16.mxu0 %v21260_v19 }
 0xdc3   :  { %14090 = vmatpush3.bf16.msra.mxu0 %v21261_v16 }
 0xdc4   :  { %14091 = vmatprep.subr.bf16.mxu0 %v21262_v7 }
 0xdc6   :  { %7955 = vmatmul.mubr.bf16.gmra.mrb[136].mxu0 %v16693_v10  ;;  %v13577_v10 = vpop.f32.mrb[251].mxu0 }
 0xdc7   :  { %14092 = vmatpush3.bf16.msra.mxu0 %v21263_v30  ;;  %8084 = vmatprep.mubr.bf16.mxu0 %v16694_v46  ;;  %v19627_v46 = vadd.f32 %v13577_v10, %v13576_v20  ;;  %v13600_v58 = vpop.f32.mrb[252].mxu0  ;;  %v16699_v10 = vld [vmem:[%s21132_s3 + $0x3a0] ss:$8 sps:$4 sm:$0xff]  }
 0xdc8   :  { %14093 = vmatprep.subr.bf16.mxu0 %v21264_v55 }
 0xdcb   :  { %14094 = vmatpush3.bf16.msra.mxu0 %v21265_v41 }
 0xdcc   :  { %15037 = vmatprep.subr.bf16.mxu0 %v21087_v56 }
 0xdce   :  { %8085 = vmatmul.mubr.bf16.vlgmr.msra.gmra.mrb[140].mxu0 %v16695_v21  ;;  %v13601_v21 = vpop.f32.mrb[253].mxu0 }
 0xdcf   :  { %8092 = vmatprep.mubr.bf16.mxu0 %v16696_v57  ;;  %v19637_v57 = vadd.f32 %v13601_v21, %v13600_v58  ;;  %v13603_v3 = vpop.f32.mrb[254].mxu0 }
 0xdd0   :  { %v13604_v42 = vpop.f32.mrb[255].mxu0 }
 0xdd1   :  { %v19639_v20 = vadd.f32 %v13604_v42, %v13603_v3  ;;  %v13606_v51 = vpop.f32.mrb[0].mxu0 }
 0xdd2   :  { %v13607_v58 = vpop.f32.mrb[1].mxu0 }
 0xdd3   :  { %v19649_v21 = vadd.f32 %v13607_v58, %v13606_v51  ;;  %v13609_v45 = vpop.f32.mrb[2].mxu0 }
 0xdd4   :  { %v13610_v3 = vpop.f32.mrb[3].mxu0 }
 0xdd5   :  { %v19651_v42 = vadd.f32 %v13610_v3, %v13609_v45  ;;  %v13612_v1 = vpop.f32.mrb[4].mxu0 }
 0xdd6   :  { %8093 = vmatmul.mubr.bf16.gmra.mrb[144].mxu0 %v16697_v44  ;;  %v13613_v15 = vpop.f32.mrb[5].mxu0 }
 0xdd7   :  { %8100 = vmatprep.mubr.bf16.mxu0 %v16698_v23  ;;  %v16700_v23 = vld [vmem:[%s21132_s3 + $0x3b4] ss:$8 sps:$4 sm:$0xff]   ;;  %v19658_v56 = vadd.f32 %v13613_v15, %v13612_v1 }
 0xdde   :  { %8101 = vmatmul.mubr.bf16.gmra.mrb[148].mxu0 %v16699_v10  ;;  %v16701_v10 = vld [vmem:[%s21132_s3 + $0x3b0] ss:$8 sps:$4 sm:$0xff]  }
 0xddf   :  { %8108 = vmatprep.mubr.bf16.mxu0 %v16700_v23  ;;  %v13615_v23 = vpop.f32.mrb[6].mxu0 }
 0xde0   :  { %v13616_v51 = vpop.f32.mrb[7].mxu0 }
 0xde1   :  { %v19662_v58 = vadd.f32 %v13616_v51, %v13615_v23  ;;  %v13618_v45 = vpop.f32.mrb[8].mxu0 }
 0xde2   :  { %v13619_v3 = vpop.f32.mrb[9].mxu0 }
 0xde3   :  { %v19666_v35 = vadd.f32 %v13619_v3, %v13618_v45 }
 0xde6   :  { %8109 = vmatmul.mubr.bf16.gmra.mrb[152].mxu0 %v16701_v10  ;;  %v13621_v10 = vpop.f32.mrb[10].mxu0 }
 0xde7   :  { %15045 = vmatprep.mubr.msk.bf16.mxu0 %vm16765_vm4, %v21271_v2  ;;  %v13622_v13 = vpop.f32.mrb[11].mxu0 }
 0xde8   :  { %v19668_v43 = vadd.f32 %v13622_v13, %v13621_v10  ;;  %v13645_v15 = vpop.f32.mrb[12].mxu0 }
 0xde9   :  { %v13646_v1 = vpop.f32.mrb[13].mxu0 }
 0xdea   :  { %v19672_v59 = vadd.f32 %v13646_v1, %v13645_v15  ;;  %v13648_v23 = vpop.f32.mrb[14].mxu0 }
 0xdeb   :  { %v13649_v51 = vpop.f32.mrb[15].mxu0 }
 0xdec   :  { %v19674_v36 = vadd.f32 %v13649_v51, %v13648_v23  ;;  %v13651_v27 = vpop.f32.mrb[16].mxu0 }
 0xded   :  { %v13652_v3 = vpop.f32.mrb[17].mxu0 }
 0xdee   :  { %v19678_v63 = vadd.f32 %v13652_v3, %v13651_v27  ;;  %v13654_v13 = vpop.f32.mrb[18].mxu0 }
 0xdef   :  { %v13655_v10 = vpop.f32.mrb[19].mxu0 }
 0xdf0   :  { %v19680_v26 = vadd.f32 %v13655_v10, %v13654_v13  ;;  %v13657_v15 = vpop.f32.mrb[20].mxu0 }
 0xdf1   :  { %v13658_v1 = vpop.f32.mrb[21].mxu0 }
 0xdf2   :  { %v19684_v53 = vadd.f32 %v13658_v1, %v13657_v15  ;;  %v13660_v23 = vpop.f32.mrb[22].mxu0 }
 0xdf3   :  { %v13661_v51 = vpop.f32.mrb[23].mxu0 }
 0xdf4   :  { %v19686_v62 = vadd.f32 %v13661_v51, %v13660_v23  ;;  %v13663_v27 = vpop.f32.mrb[24].mxu0 }
 0xdf5   :  { %v13664_v3 = vpop.f32.mrb[25].mxu0 }
 0xdf6   :  { %v19690_v29 = vadd.f32 %v13664_v3, %v13663_v27  ;;  %v13666_v13 = vpop.f32.mrb[26].mxu0 }
 0xdf7   :  { %v13667_v10 = vpop.f32.mrb[27].mxu0 }
 0xdf8   :  { %v19692_v37 = vadd.f32 %v13667_v10, %v13666_v13  ;;  %v13735_v1 = vpop.f32.mrb[28].mxu0 }
 0xdf9   :  { %v13736_v48 = vpop.f32.mrb[29].mxu0 }
 0xdfa   :  { %v19696_v0 = vadd.f32 %v13736_v48, %v13735_v1  ;;  %v13738_v45 = vpop.f32.mrb[30].mxu0 }
 0xdfb   :  { %v13739_v60 = vpop.f32.mrb[31].mxu0 }
 0xdfc   :  { %v19698_v3 = vadd.f32 %v13739_v60, %v13738_v45  ;;  %v13741_v17 = vpop.f32.mrb[32].mxu0 }
 0xdfd   :  { %v13742_v13 = vpop.f32.mrb[33].mxu0 }
 0xdfe   :  { %v19702_v9 = vadd.f32 %v13742_v13, %v13741_v17  ;;  %v13744_v6 = vpop.f32.mrb[34].mxu0 }
 0xdff   :  { %v13745_v2 = vpop.f32.mrb[35].mxu0 }
 0xe00   :  { %v19705_v48 = vadd.f32 %v13745_v2, %v13744_v6 }
 0xe44   :  { %v13510_v15 = vpop.f32.mrb[128].mxu1 }
 0xe45   :  { %v13511_v24 = vpop.f32.mrb[129].mxu1 }
 0xe46   :  { %v13512_v23 = vadd.f32 %v13511_v24, %v13510_v15  ;;  %v13513_v51 = vpop.f32.mrb[130].mxu1  ;;  %v13747_v15 = vpop.f32.mrb[36].mxu0 }
 0xe47   :  { %v13514_v40 = vpop.f32.mrb[131].mxu1 }
 0xe48   :  { %v13515_v27 = vadd.f32 %v13514_v40, %v13513_v51  ;;  %v13748_v40 = vpop.f32.mrb[37].mxu0 }
 0xe49   :  { %v19709_v51 = vadd.f32 %v13748_v40, %v13747_v15 }
 0xe4a   :  { %v6115_v10 = vpack.c.bf16 %v13515_v27, %v13512_v23  ;;  %v13750_v27 = vpop.f32.mrb[38].mxu0 }
 0xe4b   :  { %21272 = vst [vmem:[#allocation18_spill] sm:$0xff] %v19709_v51  ;;  %v13751_v13 = vpop.f32.mrb[39].mxu0 }
 0xe4c   :  { %v13516_v24 = vpop.f32.mrb[132].mxu1  ;;  %14889 = vmatprep.mubr.msk.bf16.mxu1 %vm457_vm3, %v6115_v10  ;;  %v19711_v61 = vadd.f32 %v13751_v13, %v13750_v27  ;;  %v13753_v11 = vpop.f32.mrb[40].mxu0  ;;  %v21273_v27 = vld [vmem:[#allocation33_spill] sm:$0xff] }
 0xe4d   :  { %v13517_v1 = vpop.f32.mrb[133].mxu1  ;;  %v13754_v10 = vpop.f32.mrb[41].mxu0 }
 0xe4e   :  { %v13518_v60 = vadd.f32 %v13517_v1, %v13516_v24  ;;  %v13519_v45 = vpop.f32.mrb[134].mxu1  ;;  %v19715_v54 = vadd.f32 %v13754_v10, %v13753_v11  ;;  %v19717_v24 = vpop.f32.mrb[42].mxu0 }
 0xe4f   :  { %v13520_v17 = vpop.f32.mrb[135].mxu1 }
 0xe50   :  { %v13521_v44 = vadd.f32 %v13520_v17, %v13519_v45 }
 0xe52   :  { %v6116_v2 = vpack.c.bf16 %v13521_v44, %v13518_v60 }
 0xe54   :  { %v13522_v1 = vpop.f32.mrb[136].mxu1  ;;  %14890 = vmatmul.mubr.msk.bf16.vlgmr.msra.gmra.mrb[120].mxu1 %vm457_vm3, %v6116_v2  ;;  %v21275_v2 = vpack.c.bf16 %v19599_v31, %v19458_v49  ;;  %v21281_v49 = vpack.c.bf16 %v19662_v58, %v19658_v56  ;;  %v21282_v31 = vpack.c.bf16 %v19668_v43, %v19666_v35  ;;  %v21285_v56 = vpack.c.bf16 %v19686_v62, %v19684_v53  ;;  %v16704_v62 = vld [vmem:[%s21132_s3 + $0x154] ss:$8 sps:$4 sm:$0xff]   ;;  %v21288_v53 = vld [vmem:[#allocation36_spill] sm:$0xff] }
 0xe55   :  { %v13523_v15 = vpop.f32.mrb[137].mxu1  ;;  %14898 = vmatpush3.bf16.msra.mxu1 %v21270_v32  ;;  %v21274_v32 = vpack.c.bf16 %v19441_v4, %v19438_v22  ;;  %v21279_v22 = vpack.c.bf16 %v19639_v20, %v19637_v57  ;;  %v21280_v4 = vpack.c.bf16 %v19651_v42, %v19649_v21  ;;  %v21286_v43 = vpack.c.bf16 %v19692_v37, %v19690_v29  ;;  %v21287_v37 = vld [vmem:[#allocation35_spill] sm:$0xff] }
 0xe56   :  { %v13524_v40 = vadd.f32 %v13523_v15, %v13522_v1  ;;  %v13525_v45 = vpop.f32.mrb[138].mxu1  ;;  %14907 = vmatprep.subr.bf16.mxu1 %v21273_v27  ;;  %v21276_v1 = vpack.c.bf16 %v19615_v12, %v19612_v38  ;;  %v21283_v38 = vpack.c.bf16 %v19674_v36, %v19672_v59  ;;  %v21284_v12 = vpack.c.bf16 %v19680_v26, %v19678_v63  ;;  %v16702_v26 = vld [vmem:[%s21132_s3 + $0x144] ss:$8 sps:$4 sm:$0xff]   ;;  %v16703_v29 = vld [vmem:[%s21132_s3 + $0x140] ss:$8 sps:$4 sm:$0xff]  }
 0xe57   :  { %v13526_v17 = vpop.f32.mrb[139].mxu1  ;;  %v16705_v36 = vld [vmem:[%s21132_s3 + $0x150] ss:$8 sps:$4 sm:$0xff]   ;;  %v16706_v59 = vld [vmem:[%s21132_s3 + $0x164] ss:$8 sps:$4 sm:$0xff]  }
 0xe58   :  { %v13527_v13 = vadd.f32 %v13526_v17, %v13525_v45  ;;  %v16707_v35 = vld [vmem:[%s21132_s3 + $0x160] ss:$8 sps:$4 sm:$0xff]   ;;  %v16708_v63 = vld [vmem:[%s21132_s3 + $0x174] ss:$8 sps:$4 sm:$0xff]  }
 0xe5a   :  { %v6117_v44 = vpack.c.bf16 %v13527_v13, %v13524_v40 }
 0xe5c   :  { %v13528_v60 = vpop.f32.mrb[140].mxu1  ;;  %14893 = vmatprep.mubr.msk.bf16.mxu1 %vm457_vm3, %v6117_v44 }
 0xe5d   :  { %v13529_v11 = vpop.f32.mrb[141].mxu1 }
 0xe5e   :  { %v13530_v10 = vadd.f32 %v13529_v11, %v13528_v60  ;;  %v13531_v6 = vpop.f32.mrb[142].mxu1 }
 0xe5f   :  { %v13532_v23 = vpop.f32.mrb[143].mxu1 }
 0xe60   :  { %v13533_v34 = vadd.f32 %v13532_v23, %v13531_v6  ;;  %v21278_v23 = vpack.c.bf16 %v19627_v46, %v19625_v25  ;;  %v16709_v25 = vld [vmem:[%s21132_s3 + $0x170] ss:$8 sps:$4 sm:$0xff]   ;;  %v13757_v46 = vpop.f32.mrb[43].mxu0 }
 0xe61   :  { %v19819_v57 = vadd.f32 %v13757_v46, %v19717_v24  ;;  %v13780_v21 = vpop.f32.mrb[44].mxu0 }
 0xe62   :  { %v6118_v51 = vpack.c.bf16 %v13533_v34, %v13530_v10  ;;  %v21277_v34 = vld [vmem:[#allocation34_spill] sm:$0xff]  ;;  %v13781_v42 = vpop.f32.mrb[45].mxu0 }
 0xe63   :  { %v19823_v58 = vadd.f32 %v13781_v42, %v13780_v21 }
 0xe64   :  { %14894 = vmatmul.mubr.msk.bf16.gmra.mrb[124].mxu1 %vm457_vm3, %v6118_v51  ;;  %v13783_v51 = vpop.f32.mrb[46].mxu0 }
 0xe65   :  { %14899 = vmatprep.mubr.msk.bf16.mxu1 %vm457_vm3, %v21274_v32  ;;  %v13784_v6 = vpop.f32.mrb[47].mxu0 }
 0xe66   :  { %v19825_v15 = vadd.f32 %v13784_v6, %v13783_v51  ;;  %v13786_v45 = vpop.f32.mrb[48].mxu0 }
 0xe6c   :  { %14900 = vmatmul.mubr.msk.bf16.vlgmr.msra.gmra.mrb[120].mxu1 %vm457_vm3, %v21275_v2 }
 0xe6d   :  { %14903 = vmatprep.mubr.msk.bf16.mxu1 %vm457_vm3, %v21276_v1  ;;  %14908 = vmatpush3.bf16.msra.mxu1 %v21273_v27  ;;  %v13787_v27 = vpop.f32.mrb[49].mxu0 }
 0xe6e   :  { %14917 = vmatprep.subr.bf16.mxu1 %v21277_v34  ;;  %v19829_v17 = vadd.f32 %v13787_v27, %v13786_v45  ;;  %v13789_v24 = vpop.f32.mrb[50].mxu0 }
 0xe6f   :  { %v13790_v13 = vpop.f32.mrb[51].mxu0 }
 0xe70   :  { %v19831_v44 = vadd.f32 %v13790_v13, %v13789_v24  ;;  %v13792_v11 = vpop.f32.mrb[52].mxu0 }
 0xe71   :  { %v13793_v10 = vpop.f32.mrb[53].mxu0 }
 0xe72   :  { %v19835_v32 = vadd.f32 %v13793_v10, %v13792_v11  ;;  %v13795_v2 = vpop.f32.mrb[54].mxu0 }
 0xe73   :  { %v13796_v1 = vpop.f32.mrb[55].mxu0 }
 0xe74   :  { %14904 = vmatmul.mubr.msk.bf16.gmra.mrb[124].mxu1 %vm457_vm3, %v21278_v23 }
 0xe75   :  { %14909 = vmatprep.mubr.msk.bf16.mxu1 %vm457_vm3, %v21279_v22  ;;  %v13798_v22 = vpop.f32.mrb[56].mxu0 }
 0xe7c   :  { %14910 = vmatmul.mubr.msk.bf16.vlgmr.msra.gmra.mrb[120].mxu1 %vm457_vm3, %v21280_v4  ;;  %v13799_v4 = vpop.f32.mrb[57].mxu0 }
 0xe7d   :  { %14918 = vmatpush3.bf16.msra.mxu1 %v21277_v34  ;;  %14913 = vmatprep.mubr.msk.bf16.mxu1 %vm457_vm3, %v21281_v49  ;;  %v19837_v34 = vadd.f32 %v13796_v1, %v13795_v2  ;;  %v19841_v49 = vadd.f32 %v13799_v4, %v13798_v22 }
 0xe7e   :  { %13674 = vmatprep.subr.bf16.mxu1 %v18825_v14 }
 0xe84   :  { %14914 = vmatmul.mubr.msk.bf16.gmra.mrb[124].mxu1 %vm457_vm3, %v21282_v31  ;;  %v13801_v31 = vpop.f32.mrb[58].mxu0 }
 0xe85   :  { %14919 = vmatprep.mubr.msk.bf16.mxu1 %vm457_vm3, %v21283_v38  ;;  %v13802_v38 = vpop.f32.mrb[59].mxu0 }
 0xe8c   :  { %14920 = vmatmul.mubr.msk.bf16.vlgmr.msra.gmra.mrb[120].mxu1 %vm457_vm3, %v21284_v12  ;;  %v19843_v12 = vadd.f32 %v13802_v38, %v13801_v31 }
 0xe8d   :  { %13675 = vmatpush3.bf16.msra.mxu1 %v21251_v8  ;;  %14923 = vmatprep.mubr.msk.bf16.mxu1 %vm457_vm3, %v21285_v56  ;;  %v13825_v56 = vpop.f32.mrb[60].mxu0 }
 0xe8e   :  { %13676 = vmatprep.subr.bf16.mxu1 %v21252_v18 }
 0xe91   :  { %13677 = vmatpush3.bf16.msra.mxu1 %v21253_v5 }
 0xe92   :  { %13678 = vmatprep.subr.bf16.mxu1 %v21254_v28 }
 0xe94   :  { %14924 = vmatmul.mubr.msk.bf16.gmra.mrb[124].mxu1 %vm457_vm3, %v21286_v43  ;;  %v13826_v43 = vpop.f32.mrb[61].mxu0 }
 0xe95   :  { %13679 = vmatpush3.bf16.msra.mxu1 %v21255_v47  ;;  %6698 = vmatprep.mubr.bf16.mxu1 %v16702_v26 }
 0xe96   :  { %13680 = vmatprep.subr.bf16.mxu1 %v21256_v50 }
 0xe99   :  { %13681 = vmatpush3.bf16.msra.mxu1 %v21257_v33 }
 0xe9a   :  { %13682 = vmatprep.subr.bf16.mxu1 %v21258_v39 }
 0xe9d   :  { %13683 = vmatpush3.bf16.msra.mxu1 %v21259_v52 }
 0xe9e   :  { %13684 = vmatprep.subr.bf16.mxu1 %v21260_v19 }
 0xea1   :  { %13685 = vmatpush3.bf16.msra.mxu1 %v21261_v16 }
 0xea2   :  { %13686 = vmatprep.subr.bf16.mxu1 %v21262_v7 }
 0xea5   :  { %13687 = vmatpush3.bf16.msra.mxu1 %v21263_v30 }
 0xea6   :  { %13688 = vmatprep.subr.bf16.mxu1 %v21264_v55 }
 0xea9   :  { %13689 = vmatpush3.bf16.msra.mxu1 %v21265_v41 }
 0xeaa   :  { %14927 = vmatprep.subr.bf16.mxu1 %v21287_v37 }
 0xeac   :  { %6699 = vmatmul.mubr.bf16.vlgmr.msra.gmra.mrb[144].mxu1 %v16703_v29  ;;  %v13828_v29 = vpop.f32.mrb[62].mxu0 }
 0xead   :  { %6706 = vmatprep.mubr.bf16.mxu1 %v16704_v62  ;;  %14928 = vmatpush3.bf16.msra.mxu1 %v21287_v37  ;;  %v19847_v37 = vadd.f32 %v13826_v43, %v13825_v56  ;;  %v13829_v62 = vpop.f32.mrb[63].mxu0 }
 0xeae   :  { %14937 = vmatprep.subr.bf16.mxu1 %v21288_v53 }
 0xeb4   :  { %6707 = vmatmul.mubr.bf16.gmra.mrb[148].mxu1 %v16705_v36  ;;  %v19849_v36 = vadd.f32 %v13829_v62, %v13828_v29 }
 0xeb5   :  { %6714 = vmatprep.mubr.bf16.mxu1 %v16706_v59  ;;  %v13831_v59 = vpop.f32.mrb[64].mxu0 }
 0xebc   :  { %6715 = vmatmul.mubr.bf16.gmra.mrb[152].mxu1 %v16707_v35  ;;  %v13832_v35 = vpop.f32.mrb[65].mxu0 }
 0xebd   :  { %6722 = vmatprep.mubr.bf16.mxu1 %v16708_v63  ;;  %v13834_v46 = vpop.f32.mrb[66].mxu0 }
 0xebe   :  { %v13835_v21 = vpop.f32.mrb[67].mxu0 }
 0xebf   :  { %v19855_v42 = vadd.f32 %v13835_v21, %v13834_v46  ;;  %v13837_v51 = vpop.f32.mrb[68].mxu0 }
 0xec0   :  { %v13838_v6 = vpop.f32.mrb[69].mxu0 }
 0xec1   :  { %v19859_v27 = vadd.f32 %v13838_v6, %v13837_v51  ;;  %v13840_v24 = vpop.f32.mrb[70].mxu0 }
 0xec2   :  { %v13841_v13 = vpop.f32.mrb[71].mxu0 }
 0xec3   :  { %v19861_v11 = vadd.f32 %v13841_v13, %v13840_v24  ;;  %v13843_v10 = vpop.f32.mrb[72].mxu0 }
 0xec4   :  { %6723 = vmatmul.mubr.bf16.gmra.mrb[156].mxu1 %v16709_v25  ;;  %v19853_v25 = vadd.f32 %v13832_v35, %v13831_v59  ;;  %v13844_v2 = vpop.f32.mrb[73].mxu0 }
 0xec5   :  { %v19865_v22 = vadd.f32 %v13844_v2, %v13843_v10  ;;  %v13846_v4 = vpop.f32.mrb[74].mxu0 }
 0xec6   :  { %v13847_v31 = vpop.f32.mrb[75].mxu0 }
 0xec7   :  { %v19867_v38 = vadd.f32 %v13847_v31, %v13846_v4  ;;  %v13870_v56 = vpop.f32.mrb[76].mxu0 }
 0xec8   :  { %v13871_v43 = vpop.f32.mrb[77].mxu0 }
 0xec9   :  { %v19871_v62 = vadd.f32 %v13871_v43, %v13870_v56  ;;  %v13873_v59 = vpop.f32.mrb[78].mxu0 }
 0xeca   :  { %v13874_v35 = vpop.f32.mrb[79].mxu0 }
 0xecb   :  { %v19873_v46 = vadd.f32 %v13874_v35, %v13873_v59  ;;  %v13876_v21 = vpop.f32.mrb[80].mxu0 }
 0xecc   :  { %v13877_v6 = vpop.f32.mrb[81].mxu0 }
 0xecd   :  { %v19877_v24 = vadd.f32 %v13877_v6, %v13876_v21  ;;  %v13879_v13 = vpop.f32.mrb[82].mxu0 }
 0xece   :  { %v13880_v10 = vpop.f32.mrb[83].mxu0 }
 0xecf   :  { %v19879_v2 = vadd.f32 %v13880_v10, %v13879_v13  ;;  %v13882_v31 = vpop.f32.mrb[84].mxu0 }
 0xed0   :  { %v13883_v56 = vpop.f32.mrb[85].mxu0 }
 0xed1   :  { %v19883_v43 = vadd.f32 %v13883_v56, %v13882_v31  ;;  %v13885_v59 = vpop.f32.mrb[86].mxu0 }
 0xed2   :  { %v13886_v35 = vpop.f32.mrb[87].mxu0 }
 0xed3   :  { %v19885_v29 = vadd.f32 %v13886_v35, %v13885_v59  ;;  %v13888_v21 = vpop.f32.mrb[88].mxu0 }
 0xed4   :  { %v13889_v6 = vpop.f32.mrb[89].mxu0 }
 0xed5   :  { %v19889_v1 = vadd.f32 %v13889_v6, %v13888_v21  ;;  %v13891_v13 = vpop.f32.mrb[90].mxu0 }
 0xed6   :  { %v13892_v10 = vpop.f32.mrb[91].mxu0 }
 0xed7   :  { %v19891_v45 = vadd.f32 %v13892_v10, %v13891_v13  ;;  %v13960_v4 = vpop.f32.mrb[92].mxu0 }
 0xf7f   :  { %v13690_v31 = vpop.f32.mrb[144].mxu1 }
 0xf80   :  { %v13691_v56 = vpop.f32.mrb[145].mxu1 }
 0xf81   :  { %v13692_v63 = vadd.f32 %v13691_v56, %v13690_v31  ;;  %v13693_v26 = vpop.f32.mrb[146].mxu1  ;;  %v13961_v31 = vpop.f32.mrb[93].mxu0 }
 0xf82   :  { %v13694_v59 = vpop.f32.mrb[147].mxu1 }
 0xf83   :  { %v13695_v35 = vadd.f32 %v13694_v59, %v13693_v26  ;;  %v19899_v59 = vadd.f32 %v13961_v31, %v13960_v4 }
 0xf85   :  { %v6731_v23 = vpack.c.bf16 %v13695_v35, %v13692_v63  ;;  %v21289_v63 = vld [vmem:[#allocation37_spill] sm:$0xff]  ;;  %21290 = vst [vmem:[#allocation17_spill] sm:$0xff] %v19899_v59 }
 0xf87   :  { %v13696_v60 = vpop.f32.mrb[148].mxu1  ;;  %14929 = vmatprep.mubr.msk.bf16.mxu1 %vm457_vm3, %v6731_v23  ;;  %v13963_v23 = vpop.f32.mrb[94].mxu0 }
 0xf88   :  { %v13697_v51 = vpop.f32.mrb[149].mxu1 }
 0xf89   :  { %v13698_v21 = vadd.f32 %v13697_v51, %v13696_v60  ;;  %v13699_v6 = vpop.f32.mrb[150].mxu1  ;;  %v13964_v51 = vpop.f32.mrb[95].mxu0 }
 0xf8a   :  { %v13700_v40 = vpop.f32.mrb[151].mxu1 }
 0xf8b   :  { %v13701_v20 = vadd.f32 %v13700_v40, %v13699_v6  ;;  %v19901_v40 = vadd.f32 %v13964_v51, %v13963_v23 }
 0xf8d   :  { %v6732_v13 = vpack.c.bf16 %v13701_v20, %v13698_v21  ;;  %21291 = vst [vmem:[#allocation20_spill] sm:$0xff] %v19901_v40  ;;  %v13966_v20 = vpop.f32.mrb[96].mxu0 }
 0xf8e   :  { %v13967_v21 = vpop.f32.mrb[97].mxu0 }
 0xf8f   :  { %v13702_v10 = vpop.f32.mrb[152].mxu1  ;;  %14930 = vmatmul.mubr.msk.bf16.vlgmr.msra.gmra.mrb[120].mxu1 %vm457_vm3, %v6732_v13 }
 0xf90   :  { %v13703_v41 = vpop.f32.mrb[153].mxu1  ;;  %14938 = vmatpush3.bf16.msra.mxu1 %v21288_v53  ;;  %v19905_v53 = vadd.f32 %v13967_v21, %v13966_v20 }
 0xf91   :  { %v13704_v56 = vadd.f32 %v13703_v41, %v13702_v10  ;;  %v13705_v26 = vpop.f32.mrb[154].mxu1  ;;  %14947 = vmatprep.subr.bf16.mxu1 %v21289_v63  ;;  %v13969_v41 = vpop.f32.mrb[98].mxu0 }
 0xf92   :  { %v13706_v60 = vpop.f32.mrb[155].mxu1  ;;  %v13970_v10 = vpop.f32.mrb[99].mxu0 }
 0xf93   :  { %v13707_v35 = vadd.f32 %v13706_v60, %v13705_v26  ;;  %v19908_v4 = vadd.f32 %v13970_v10, %v13969_v41  ;;  %v13972_v31 = vpop.f32.mrb[100].mxu0 }
 0xf94   :  { %v13973_v26 = vpop.f32.mrb[101].mxu0 }
 0xf95   :  { %v6733_v6 = vpack.c.bf16 %v13707_v35, %v13704_v56  ;;  %v19912_v51 = vadd.f32 %v13973_v26, %v13972_v31  ;;  %v13975_v35 = vpop.f32.mrb[102].mxu0  ;;  %v21293_v31 = vpack.c.bf16 %v19705_v48, %v19702_v9  ;;  %v21299_v9 = vpack.c.bf16 %v19831_v44, %v19829_v17 }
 0xf96   :  { %v13976_v21 = vpop.f32.mrb[103].mxu0  ;;  %v21303_v48 = vpack.c.bf16 %v19849_v36, %v19847_v37  ;;  %v21307_v17 = vpack.c.bf16 %v19873_v46, %v19871_v62  ;;  %v21308_v44 = vpack.c.bf16 %v19879_v2, %v19877_v24  ;;  %v21312_v37 = vld [vmem:[#allocation25_spill] sm:$0xff]  ;;  %v21313_v36 = vld [vmem:[#allocation28_spill] sm:$0xff] }
 0xf97   :  { %v13708_v55 = vpop.f32.mrb[156].mxu1  ;;  %14933 = vmatprep.mubr.msk.bf16.mxu1 %vm457_vm3, %v6733_v6  ;;  %v19914_v59 = vadd.f32 %v13976_v21, %v13975_v35  ;;  %v13978_v40 = vpop.f32.mrb[104].mxu0  ;;  %v16717_v62 = vld [vmem:[%s21132_s3 + $0x2b0] ss:$8 sps:$4 sm:$0xff]  }
 0xf98   :  { %v13709_v30 = vpop.f32.mrb[157].mxu1  ;;  %v13979_v6 = vpop.f32.mrb[105].mxu0 }
 0xf99   :  { %v13710_v23 = vadd.f32 %v13709_v30, %v13708_v55  ;;  %v13711_v60 = vpop.f32.mrb[158].mxu1  ;;  %v19918_v7 = vadd.f32 %v13979_v6, %v13978_v40  ;;  %v13981_v30 = vpop.f32.mrb[106].mxu0  ;;  %v21292_v55 = vpack.c.bf16 %v19698_v3, %v19696_v0  ;;  %v21296_v40 = vld [vmem:[#allocation40_spill] sm:$0xff]  ;;  %v21298_v0 = vpack.c.bf16 %v19825_v15, %v19823_v58 }
 0xf9a   :  { %v13712_v20 = vpop.f32.mrb[159].mxu1  ;;  %v21302_v3 = vpack.c.bf16 %v19843_v12, %v19841_v49  ;;  %v21305_v58 = vpack.c.bf16 %v19861_v11, %v19859_v27  ;;  %v21306_v15 = vpack.c.bf16 %v19867_v38, %v19865_v22  ;;  %v16710_v49 = vld [vmem:[%s21132_s3 + $0x284] ss:$8 sps:$4 sm:$0xff]   ;;  %v21311_v12 = vld [vmem:[#allocation26_spill] sm:$0xff]  ;;  %v13982_v46 = vpop.f32.mrb[107].mxu0 }
 0xf9b   :  { %v13713_v13 = vadd.f32 %v13712_v20, %v13711_v60  ;;  %v16712_v27 = vld [vmem:[%s21132_s3 + $0x294] ss:$8 sps:$4 sm:$0xff]   ;;  %v21316_v11 = vld [vmem:[#allocation8_spill] sm:$0xff]  ;;  %v20033_v24 = vadd.f32 %v13982_v46, %v13981_v30 }
 0xf9c   :  { %v16714_v22 = vld [vmem:[%s21132_s3 + $0x2a4] ss:$8 sps:$4 sm:$0xff]   ;;  %v16715_v38 = vld [vmem:[%s21132_s3 + $0x2a0] ss:$8 sps:$4 sm:$0xff]  }
 0xf9d   :  { %v6734_v41 = vpack.c.bf16 %v13713_v13, %v13710_v23  ;;  %v21294_v13 = vld [vmem:[#allocation18_spill] sm:$0xff]  ;;  %v21297_v23 = vpack.c.bf16 %v19819_v57, %v19715_v54  ;;  %v21301_v54 = vld [vmem:[#allocation32_spill] sm:$0xff]  ;;  %v21304_v57 = vpack.c.bf16 %v19855_v42, %v19853_v25  ;;  %v21314_v25 = vld [vmem:[#allocation27_spill] sm:$0xff] }
 0xf9e   :  { %v21295_v26 = vpack.c.bf16 %v19711_v61, %v21294_v13  ;;  %v21300_v61 = vpack.c.bf16 %v19837_v34, %v19835_v32  ;;  %v21309_v32 = vpack.c.bf16 %v19885_v29, %v19883_v43  ;;  %v21310_v34 = vpack.c.bf16 %v19891_v45, %v19889_v1  ;;  %v21315_v42 = vld [vmem:[#allocation31_spill] sm:$0xff]  ;;  %v16713_v1 = vld [vmem:[%s21132_s3 + $0x290] ss:$8 sps:$4 sm:$0xff]   ;;  %v16716_v29 = vld [vmem:[%s21132_s3 + $0x2b4] ss:$8 sps:$4 sm:$0xff]   ;;  %v14005_v43 = vpop.f32.mrb[108].mxu0 }
 0xf9f   :  { %14934 = vmatmul.mubr.msk.bf16.gmra.mrb[124].mxu1 %vm457_vm3, %v6734_v41  ;;  %v16711_v45 = vld [vmem:[%s21132_s3 + $0x280] ss:$8 sps:$4 sm:$0xff]  }
 0xfa0   :  { %14939 = vmatprep.mubr.msk.bf16.mxu1 %vm457_vm3, %v21292_v55 }
 0xfa7   :  { %14940 = vmatmul.mubr.msk.bf16.vlgmr.msra.gmra.mrb[120].mxu1 %vm457_vm3, %v21293_v31 }
 0xfa8   :  { %14943 = vmatprep.mubr.msk.bf16.mxu1 %vm457_vm3, %v21295_v26  ;;  %14948 = vmatpush3.bf16.msra.mxu1 %v21289_v63  ;;  %v14006_v63 = vpop.f32.mrb[109].mxu0 }
 0xfa9   :  { %14957 = vmatprep.subr.bf16.mxu1 %v21296_v40  ;;  %v20037_v60 = vadd.f32 %v14006_v63, %v14005_v43  ;;  %v14008_v35 = vpop.f32.mrb[110].mxu0 }
 0xfaa   :  { %v14009_v20 = vpop.f32.mrb[111].mxu0 }
 0xfab   :  { %v20039_v21 = vadd.f32 %v14009_v20, %v14008_v35  ;;  %v14011_v41 = vpop.f32.mrb[112].mxu0 }
 0xfac   :  { %v14012_v55 = vpop.f32.mrb[113].mxu0 }
 0xfad   :  { %v20043_v31 = vadd.f32 %v14012_v55, %v14011_v41  ;;  %v14014_v30 = vpop.f32.mrb[114].mxu0 }
 0xfae   :  { %v14015_v13 = vpop.f32.mrb[115].mxu0 }
 0xfaf   :  { %14944 = vmatmul.mubr.msk.bf16.gmra.mrb[124].mxu1 %vm457_vm3, %v21297_v23  ;;  %v20045_v26 = vadd.f32 %v14015_v13, %v14014_v30  ;;  %v14017_v23 = vpop.f32.mrb[116].mxu0 }
 0xfb0   :  { %14949 = vmatprep.mubr.msk.bf16.mxu1 %vm457_vm3, %v21298_v0  ;;  %v14018_v0 = vpop.f32.mrb[117].mxu0 }
 0xfb7   :  { %14950 = vmatmul.mubr.msk.bf16.vlgmr.msra.gmra.mrb[120].mxu1 %vm457_vm3, %v21299_v9  ;;  %v20049_v9 = vadd.f32 %v14018_v0, %v14017_v23 }
 0xfb8   :  { %14953 = vmatprep.mubr.msk.bf16.mxu1 %vm457_vm3, %v21300_v61  ;;  %14958 = vmatpush3.bf16.msra.mxu1 %v21296_v40  ;;  %v14020_v61 = vpop.f32.mrb[118].mxu0 }
 0xfb9   :  { %14967 = vmatprep.subr.bf16.mxu1 %v21301_v54 }
 0xfbf   :  { %14954 = vmatmul.mubr.msk.bf16.gmra.mrb[124].mxu1 %vm457_vm3, %v21302_v3 }
 0xfc0   :  { %14959 = vmatprep.mubr.msk.bf16.mxu1 %vm457_vm3, %v21303_v48 }
 0xfc7   :  { %14960 = vmatmul.mubr.msk.bf16.vlgmr.msra.gmra.mrb[120].mxu1 %vm457_vm3, %v21304_v57 }
 0xfc8   :  { %14968 = vmatpush3.bf16.msra.mxu1 %v21301_v54  ;;  %14963 = vmatprep.mubr.msk.bf16.mxu1 %vm457_vm3, %v21305_v58  ;;  %v14021_v54 = vpop.f32.mrb[119].mxu0 }
 0xfc9   :  { %13899 = vmatprep.subr.bf16.mxu1 %v18825_v14  ;;  %v20051_v3 = vadd.f32 %v14021_v54, %v14020_v61  ;;  %v14023_v57 = vpop.f32.mrb[120].mxu0 }
 0xfca   :  { %v14024_v58 = vpop.f32.mrb[121].mxu0 }
 0xfcf   :  { %14964 = vmatmul.mubr.msk.bf16.gmra.mrb[124].mxu1 %vm457_vm3, %v21306_v15  ;;  %v20055_v15 = vadd.f32 %v14024_v58, %v14023_v57 }
 0xfd0   :  { %14969 = vmatprep.mubr.msk.bf16.mxu1 %vm457_vm3, %v21307_v17  ;;  %v14026_v17 = vpop.f32.mrb[122].mxu0 }
 0xfd7   :  { %14970 = vmatmul.mubr.msk.bf16.vlgmr.msra.gmra.mrb[120].mxu1 %vm457_vm3, %v21308_v44  ;;  %v14027_v44 = vpop.f32.mrb[123].mxu0 }
 0xfd8   :  { %13900 = vmatpush3.bf16.msra.mxu1 %v21251_v8  ;;  %14973 = vmatprep.mubr.msk.bf16.mxu1 %vm457_vm3, %v21309_v32  ;;  %v20057_v32 = vadd.f32 %v14027_v44, %v14026_v17 }
 0xfd9   :  { %13901 = vmatprep.subr.bf16.mxu1 %v21252_v18 }
 0xfdc   :  { %13902 = vmatpush3.bf16.msra.mxu1 %v21253_v5 }
 0xfdd   :  { %13903 = vmatprep.subr.bf16.mxu1 %v21254_v28 }
 0xfdf   :  { %14974 = vmatmul.mubr.msk.bf16.gmra.mrb[124].mxu1 %vm457_vm3, %v21310_v34  ;;  %v14050_v34 = vpop.f32.mrb[124].mxu0 }
 0xfe0   :  { %13904 = vmatpush3.bf16.msra.mxu1 %v21255_v47  ;;  %7468 = vmatprep.mubr.bf16.mxu1 %v16710_v49  ;;  %v14051_v49 = vpop.f32.mrb[125].mxu0 }
 0xfe1   :  { %13905 = vmatprep.subr.bf16.mxu1 %v21256_v50 }
 0xfe4   :  { %13906 = vmatpush3.bf16.msra.mxu1 %v21257_v33 }
 0xfe5   :  { %13907 = vmatprep.subr.bf16.mxu1 %v21258_v39 }
 0xfe8   :  { %13908 = vmatpush3.bf16.msra.mxu1 %v21259_v52 }
 0xfe9   :  { %13909 = vmatprep.subr.bf16.mxu1 %v21260_v19 }
 0xfec   :  { %13910 = vmatpush3.bf16.msra.mxu1 %v21261_v16 }
 0xfed   :  { %13911 = vmatprep.subr.bf16.mxu1 %v21311_v12 }
 0xff0   :  { %13912 = vmatpush3.bf16.msra.mxu1 %v21312_v37 }
 0xff1   :  { %13913 = vmatprep.subr.bf16.mxu1 %v21313_v36 }
 0xff4   :  { %13914 = vmatpush3.bf16.msra.mxu1 %v21314_v25 }
 0xff5   :  { %14977 = vmatprep.subr.bf16.mxu1 %v21315_v42 }
 0xff7   :  { %7469 = vmatmul.mubr.bf16.vlgmr.msra.gmra.mrb[160].mxu1 %v16711_v45  ;;  %v20061_v45 = vadd.f32 %v14051_v49, %v14050_v34 }
 0xff8   :  { %7476 = vmatprep.mubr.bf16.mxu1 %v16712_v27  ;;  %14978 = vmatpush3.bf16.msra.mxu1 %v21315_v42  ;;  %v14053_v27 = vpop.f32.mrb[126].mxu0 }
 0xff9   :  { %14987 = vmatprep.subr.bf16.mxu1 %v21316_v11 }
 0xfff   :  { %7477 = vmatmul.mubr.bf16.gmra.mrb[164].mxu1 %v16713_v1  ;;  %v14054_v1 = vpop.f32.mrb[127].mxu0 }
0x1000   :  { %7484 = vmatprep.mubr.bf16.mxu1 %v16714_v22  ;;  %v20063_v22 = vadd.f32 %v14054_v1, %v14053_v27 }
0x1007   :  { %7485 = vmatmul.mubr.bf16.gmra.mrb[168].mxu1 %v16715_v38  ;;  %v14056_v38 = vpop.f32.mrb[128].mxu0 }
0x1008   :  { %7492 = vmatprep.mubr.bf16.mxu1 %v16716_v29  ;;  %v14057_v29 = vpop.f32.mrb[129].mxu0 }
0x1009   :  { %v20067_v46 = vadd.f32 %v14057_v29, %v14056_v38  ;;  %v14059_v43 = vpop.f32.mrb[130].mxu0 }
0x100a   :  { %v14060_v63 = vpop.f32.mrb[131].mxu0 }
0x100b   :  { %v20069_v35 = vadd.f32 %v14060_v63, %v14059_v43  ;;  %v14062_v20 = vpop.f32.mrb[132].mxu0 }
0x100c   :  { %v14063_v41 = vpop.f32.mrb[133].mxu0 }
0x100d   :  { %v20073_v30 = vadd.f32 %v14063_v41, %v14062_v20  ;;  %v14065_v13 = vpop.f32.mrb[134].mxu0 }
0x100e   :  { %v14066_v23 = vpop.f32.mrb[135].mxu0 }
0x100f   :  { %7493 = vmatmul.mubr.bf16.gmra.mrb[172].mxu1 %v16717_v62  ;;  %v20075_v0 = vadd.f32 %v14066_v23, %v14065_v13  ;;  %v14068_v61 = vpop.f32.mrb[136].mxu0 }
0x1010   :  { %v14069_v54 = vpop.f32.mrb[137].mxu0 }
0x1011   :  { %v20079_v58 = vadd.f32 %v14069_v54, %v14068_v61  ;;  %v14071_v17 = vpop.f32.mrb[138].mxu0 }
0x1012   :  { %v14072_v44 = vpop.f32.mrb[139].mxu0 }
0x1013   :  { %v20081_v34 = vadd.f32 %v14072_v44, %v14071_v17  ;;  %v14095_v49 = vpop.f32.mrb[140].mxu0 }
0x1014   :  { %v14096_v27 = vpop.f32.mrb[141].mxu0 }
0x1015   :  { %v20085_v38 = vadd.f32 %v14096_v27, %v14095_v49  ;;  %v14098_v29 = vpop.f32.mrb[142].mxu0 }
0x1016   :  { %v14099_v43 = vpop.f32.mrb[143].mxu0 }
0x1017   :  { %v20087_v63 = vadd.f32 %v14099_v43, %v14098_v29  ;;  %v14101_v20 = vpop.f32.mrb[144].mxu0 }
0x1018   :  { %v14102_v13 = vpop.f32.mrb[145].mxu0 }
0x1019   :  { %v20091_v23 = vadd.f32 %v14102_v13, %v14101_v20  ;;  %v14104_v61 = vpop.f32.mrb[146].mxu0 }
0x101a   :  { %v14105_v54 = vpop.f32.mrb[147].mxu0 }
0x101b   :  { %v20093_v17 = vadd.f32 %v14105_v54, %v14104_v61  ;;  %v14107_v49 = vpop.f32.mrb[148].mxu0 }
0x101c   :  { %v14108_v27 = vpop.f32.mrb[149].mxu0 }
0x101d   :  { %v20097_v1 = vadd.f32 %v14108_v27, %v14107_v49  ;;  %v14110_v29 = vpop.f32.mrb[150].mxu0 }
0x101e   :  { %v14111_v43 = vpop.f32.mrb[151].mxu0 }
0x101f   :  { %v20099_v57 = vadd.f32 %v14111_v43, %v14110_v29  ;;  %v14113_v20 = vpop.f32.mrb[152].mxu0 }
0x1020   :  { %v14114_v13 = vpop.f32.mrb[153].mxu0 }
0x1021   :  { %v20103_v55 = vadd.f32 %v14114_v13, %v14113_v20  ;;  %v14116_v61 = vpop.f32.mrb[154].mxu0 }
0x1022   :  { %v14117_v54 = vpop.f32.mrb[155].mxu0 }
0x1023   :  { %v14118_v62 = vadd.f32 %v14117_v54, %v14116_v61 }
0x1025   :  { %v8120_v44 = vpack.c.bf16 %v14118_v62, %v20103_v55  ;;  %v21317_v55 = vld [vmem:[#allocation10_spill] sm:$0xff] }
0x10ca   :  { %v13915_v42 = vpop.f32.mrb[160].mxu1 }
0x10cb   :  { %v13916_v48 = vpop.f32.mrb[161].mxu1 }
0x10cc   :  { %v13917_v49 = vadd.f32 %v13916_v48, %v13915_v42  ;;  %v13918_v27 = vpop.f32.mrb[162].mxu1 }
0x10cd   :  { %v13919_v40 = vpop.f32.mrb[163].mxu1 }
0x10ce   :  { %v13920_v6 = vadd.f32 %v13919_v40, %v13918_v27 }
0x10d0   :  { %v7501_v29 = vpack.c.bf16 %v13920_v6, %v13917_v49 }
0x10d2   :  { %v13921_v43 = vpop.f32.mrb[164].mxu1  ;;  %14979 = vmatprep.mubr.msk.bf16.mxu1 %vm457_vm3, %v7501_v29 }
0x10d3   :  { %v13922_v41 = vpop.f32.mrb[165].mxu1 }
0x10d4   :  { %v13923_v2 = vadd.f32 %v13922_v41, %v13921_v43  ;;  %v13924_v10 = vpop.f32.mrb[166].mxu1  ;;  %v21321_v43 = vpack.c.bf16 %v19908_v4, %v19905_v53  ;;  %v21326_v53 = vpack.c.bf16 %v20045_v26, %v20043_v31  ;;  %v21329_v4 = vpack.c.bf16 %v20057_v32, %v20055_v15 }
0x10d5   :  { %v13925_v20 = vpop.f32.mrb[167].mxu1  ;;  %v21334_v31 = vpack.c.bf16 %v20087_v63, %v20085_v38  ;;  %v21335_v26 = vpack.c.bf16 %v20093_v17, %v20091_v23 }
0x10d6   :  { %v13926_v13 = vadd.f32 %v13925_v20, %v13924_v10  ;;  %v21322_v20 = vpack.c.bf16 %v19914_v59, %v19912_v51  ;;  %v21327_v59 = vpack.c.bf16 %v20051_v3, %v20049_v9  ;;  %v21330_v51 = vpack.c.bf16 %v20063_v22, %v20061_v45  ;;  %v16718_v9 = vld [vmem:[%s21132_s3 + $0x3c4] ss:$8 sps:$4 sm:$0xff]  }
0x10d8   :  { %v7502_v56 = vpack.c.bf16 %v13926_v13, %v13923_v2  ;;  %v21323_v13 = vld [vmem:[#allocation11_spill] sm:$0xff] }
0x10da   :  { %v13927_v25 = vpop.f32.mrb[168].mxu1  ;;  %14980 = vmatmul.mubr.msk.bf16.vlgmr.msra.gmra.mrb[120].mxu1 %vm457_vm3, %v7502_v56  ;;  %v21318_v56 = vld [vmem:[#allocation20_spill] sm:$0xff] }
0x10db   :  { %v13928_v62 = vpop.f32.mrb[169].mxu1  ;;  %14988 = vmatpush3.bf16.msra.mxu1 %v21316_v11  ;;  %v21319_v11 = vld [vmem:[#allocation17_spill] sm:$0xff] }
0x10dc   :  { %v13929_v48 = vadd.f32 %v13928_v62, %v13927_v25  ;;  %v13930_v42 = vpop.f32.mrb[170].mxu1  ;;  %14997 = vmatprep.subr.bf16.mxu1 %v21317_v55  ;;  %v21320_v25 = vpack.c.bf16 %v21318_v56, %v21319_v11  ;;  %v21324_v62 = vpack.c.bf16 %v20033_v24, %v19918_v7  ;;  %v21328_v7 = vld [vmem:[#allocation14_spill] sm:$0xff]  ;;  %v21331_v24 = vpack.c.bf16 %v20069_v35, %v20067_v46 }
0x10dd   :  { %v13931_v6 = vpop.f32.mrb[171].mxu1 }
0x10de   :  { %v13932_v40 = vadd.f32 %v13931_v6, %v13930_v42 }
0x10e0   :  { %v7503_v61 = vpack.c.bf16 %v13932_v40, %v13929_v48  ;;  %v21325_v48 = vpack.c.bf16 %v20039_v21, %v20037_v60  ;;  %v21332_v60 = vpack.c.bf16 %v20075_v0, %v20073_v30  ;;  %v21333_v21 = vpack.c.bf16 %v20081_v34, %v20079_v58 }
0x10e2   :  { %v13933_v54 = vpop.f32.mrb[172].mxu1  ;;  %14983 = vmatprep.mubr.msk.bf16.mxu1 %vm457_vm3, %v7503_v61 }
0x10e3   :  { %v13934_v41 = vpop.f32.mrb[173].mxu1 }
0x10e4   :  { %v13935_v49 = vadd.f32 %v13934_v41, %v13933_v54  ;;  %v13936_v10 = vpop.f32.mrb[174].mxu1 }
0x10e5   :  { %v13937_v2 = vpop.f32.mrb[175].mxu1 }
0x10e6   :  { %v13938_v27 = vadd.f32 %v13937_v2, %v13936_v10 }
0x10e8   :  { %v7504_v29 = vpack.c.bf16 %v13938_v27, %v13935_v49  ;;  %v16726_v49 = vld [vmem:[%s21008_s5] ss:$0 sm:$0xff] }
0x10ea   :  { %14984 = vmatmul.mubr.msk.bf16.gmra.mrb[124].mxu1 %vm457_vm3, %v7504_v29 }
0x10eb   :  { %14989 = vmatprep.mubr.msk.bf16.mxu1 %vm457_vm3, %v21320_v25 }
0x10f2   :  { %14990 = vmatmul.mubr.msk.bf16.vlgmr.msra.gmra.mrb[120].mxu1 %vm457_vm3, %v21321_v43  ;;  %v16727_v43 = vld [vmem:[%s21009_s2] sm:$0x3] }
0x10f3   :  { %14993 = vmatprep.mubr.msk.bf16.mxu1 %vm457_vm3, %v21322_v20  ;;  %14998 = vmatpush3.bf16.msra.mxu1 %v21317_v55  ;;  %v21340_v20 = vld [vmem:[#allocation5_spill] sm:$0xff] }
0x10f4   :  { %15007 = vmatprep.subr.bf16.mxu1 %v21323_v13 }
0x10fa   :  { %14994 = vmatmul.mubr.msk.bf16.gmra.mrb[124].mxu1 %vm457_vm3, %v21324_v62 }
0x10fb   :  { %14999 = vmatprep.mubr.msk.bf16.mxu1 %vm457_vm3, %v21325_v48 }
0x1102   :  { %15000 = vmatmul.mubr.msk.bf16.vlgmr.msra.gmra.mrb[120].mxu1 %vm457_vm3, %v21326_v53 }
0x1103   :  { %15003 = vmatprep.mubr.msk.bf16.mxu1 %vm457_vm3, %v21327_v59  ;;  %15008 = vmatpush3.bf16.msra.mxu1 %v21323_v13  ;;  %v21341_v13 = vsub.s32 1, %v21340_v20 }
0x1104   :  { %15017 = vmatprep.subr.bf16.mxu1 %v21328_v7 }
0x1105   :  { %v8387_v62 = vrot.slane %v16727_v43, %v21341_v13 }
0x110a   :  { %15004 = vmatmul.mubr.msk.bf16.gmra.mrb[124].mxu1 %vm457_vm3, %v21329_v4 }
0x110b   :  { %15009 = vmatprep.mubr.msk.bf16.mxu1 %vm457_vm3, %v21330_v51 }
0x1112   :  { %15010 = vmatmul.mubr.msk.bf16.vlgmr.msra.gmra.mrb[120].mxu1 %vm457_vm3, %v21331_v24 }
0x1113   :  { %15018 = vmatpush3.bf16.msra.mxu1 %v21328_v7  ;;  %15013 = vmatprep.mubr.msk.bf16.mxu1 %vm457_vm3, %v21332_v60 }
0x1114   :  { %14124 = vmatprep.subr.bf16.mxu1 %v18825_v14  ;;  %v21336_v14 = vpack.c.bf16 %v20099_v57, %v20097_v1 }
0x111a   :  { %15014 = vmatmul.mubr.msk.bf16.gmra.mrb[124].mxu1 %vm457_vm3, %v21333_v21 }
0x111b   :  { %15019 = vmatprep.mubr.msk.bf16.mxu1 %vm457_vm3, %v21334_v31 }
0x1122   :  { %15020 = vmatmul.mubr.msk.bf16.vlgmr.msra.gmra.mrb[120].mxu1 %vm457_vm3, %v21335_v26 }
0x1123   :  { %14125 = vmatpush3.bf16.msra.mxu1 %v21251_v8  ;;  %15023 = vmatprep.mubr.msk.bf16.mxu1 %vm457_vm3, %v21336_v14  ;;  %v21337_v8 = vld [vmem:[#allocation27_spill] sm:$0xff] }
0x1124   :  { %14126 = vmatprep.subr.bf16.mxu1 %v21252_v18  ;;  %v21338_v18 = vld [vmem:[#allocation39_spill] sm:$0xff] }
0x1127   :  { %14127 = vmatpush3.bf16.msra.mxu1 %v21253_v5  ;;  %v16719_v5 = vld [vmem:[%s21132_s3 + $0x3c0] ss:$8 sps:$4 sm:$0xff]  }
0x1128   :  { %14128 = vmatprep.subr.bf16.mxu1 %v21254_v28  ;;  %v16720_v28 = vld [vmem:[%s21132_s3 + $0x3d4] ss:$8 sps:$4 sm:$0xff]  }
0x112a   :  { %15024 = vmatmul.mubr.msk.bf16.gmra.mrb[124].mxu1 %vm457_vm3, %v8120_v44 }
0x112b   :  { %14129 = vmatpush3.bf16.msra.mxu1 %v21255_v47  ;;  %8238 = vmatprep.mubr.bf16.mxu1 %v16718_v9  ;;  %v21339_v47 = vmov 0.0  }
0x112c   :  { %14130 = vmatprep.subr.bf16.mxu1 %v21256_v50  ;;  %v16721_v50 = vld [vmem:[%s21132_s3 + $0x3d0] ss:$8 sps:$4 sm:$0xff]  }
0x112f   :  { %14131 = vmatpush3.bf16.msra.mxu1 %v21257_v33  ;;  %v16722_v33 = vld [vmem:[%s21132_s3 + $0x3e4] ss:$8 sps:$4 sm:$0xff]  }
0x1130   :  { %14132 = vmatprep.subr.bf16.mxu1 %v21258_v39  ;;  %v16723_v39 = vld [vmem:[%s21132_s3 + $0x3e0] ss:$8 sps:$4 sm:$0xff]  }
0x1133   :  { %14133 = vmatpush3.bf16.msra.mxu1 %v21259_v52  ;;  %v16724_v52 = vld [vmem:[%s21132_s3 + $0x3f4] ss:$8 sps:$4 sm:$0xff]  }
0x1134   :  { %14134 = vmatprep.subr.bf16.mxu1 %v21260_v19  ;;  %v16725_v19 = vld [vmem:[%s21132_s3 + $0x3f0] ss:$8 sps:$4 sm:$0xff]  }
0x1137   :  { %14135 = vmatpush3.bf16.msra.mxu1 %v21261_v16 }
0x1138   :  { %14136 = vmatprep.subr.bf16.mxu1 %v21311_v12 }
0x113b   :  { %14137 = vmatpush3.bf16.msra.mxu1 %v21312_v37 }
0x113c   :  { %14138 = vmatprep.subr.bf16.mxu1 %v21313_v36 }
0x113f   :  { %14139 = vmatpush3.bf16.msra.mxu1 %v21337_v8 }
0x1140   :  { %15027 = vmatprep.subr.bf16.mxu1 %v21338_v18 }
0x1142   :  { %8239 = vmatmul.mubr.bf16.vlgmr.msra.gmra.mrb[176].mxu1 %v16719_v5 }
0x1143   :  { %8246 = vmatprep.mubr.bf16.mxu1 %v16720_v28  ;;  %15028 = vmatpush3.bf16.msra.mxu1 %v21338_v18 }
0x1144   :  { %15077 = vmatprep.subr.bf16.mxu1 %v21339_v47 }
0x114a   :  { %8247 = vmatmul.mubr.bf16.gmra.mrb[180].mxu1 %v16721_v50 }
0x114b   :  { %8254 = vmatprep.mubr.bf16.mxu1 %v16722_v33 }
0x1152   :  { %8255 = vmatmul.mubr.bf16.gmra.mrb[184].mxu1 %v16723_v39 }
0x1153   :  { %8262 = vmatprep.mubr.bf16.mxu1 %v16724_v52 }
0x115a   :  { %8263 = vmatmul.mubr.bf16.gmra.mrb[188].mxu1 %v16725_v19 }
0x1215   :  { %v14140_v16 = vpop.f32.mrb[176].mxu1 }
0x1216   :  { %v14141_v12 = vpop.f32.mrb[177].mxu1 }
0x1217   :  { %v14142_v37 = vadd.f32 %v14141_v12, %v14140_v16  ;;  %v14143_v36 = vpop.f32.mrb[178].mxu1 }
0x1218   :  { %v14144_v3 = vpop.f32.mrb[179].mxu1 }
0x1219   :  { %v14145_v15 = vadd.f32 %v14144_v3, %v14143_v36 }
0x121b   :  { %v8271_v32 = vpack.c.bf16 %v14145_v15, %v14142_v37 }
0x121d   :  { %v14146_v45 = vpop.f32.mrb[180].mxu1  ;;  %15029 = vmatprep.mubr.msk.bf16.mxu1 %vm457_vm3, %v8271_v32 }
0x121e   :  { %v14147_v22 = vpop.f32.mrb[181].mxu1 }
0x121f   :  { %v14148_v46 = vadd.f32 %v14147_v22, %v14146_v45  ;;  %v14149_v35 = vpop.f32.mrb[182].mxu1 }
0x1220   :  { %v14150_v30 = vpop.f32.mrb[183].mxu1 }
0x1221   :  { %v14151_v0 = vadd.f32 %v14150_v30, %v14149_v35 }
0x1223   :  { %v8272_v57 = vpack.c.bf16 %v14151_v0, %v14148_v46 }
0x1225   :  { %v14152_v58 = vpop.f32.mrb[184].mxu1  ;;  %15030 = vmatmul.mubr.msk.bf16.vlgmr.msra.gmra.mrb[120].mxu1 %vm457_vm3, %v8272_v57 }
0x1226   :  { %v14153_v34 = vpop.f32.mrb[185].mxu1 }
0x1227   :  { %v14154_v1 = vadd.f32 %v14153_v34, %v14152_v58  ;;  %v14155_v38 = vpop.f32.mrb[186].mxu1  ;;  %v16728_v58 = vld [vmem:[%s21006_s6] sm:$0xff]   ;;  %v16729_v34 = vld [vmem:[%s21006_s6 + $0x10] sm:$0xff]  }
0x1228   :  { %v14156_v63 = vpop.f32.mrb[187].mxu1 }
0x1229   :  { %v14157_v23 = vadd.f32 %v14156_v63, %v14155_v38  ;;  %v21342_v38 = vld [vmem:[#allocation38_spill] sm:$0xff] }
0x122a   :  { %v16731_v63 = vld [vmem:[%s21006_s6 + $0x20] sm:$0xff]  }
0x122b   :  { %v8273_v17 = vpack.c.bf16 %v14157_v23, %v14154_v1  ;;  %v16730_v1 = vld [vmem:[%s21007_s7] sm:$0xff]   ;;  %v16732_v23 = vld [vmem:[%s21006_s6 + $0x28] sm:$0xff]  }
0x122d   :  { %v14158_v44 = vpop.f32.mrb[188].mxu1  ;;  %15033 = vmatprep.mubr.msk.bf16.mxu1 %vm457_vm3, %v8273_v17  ;;  %v16733_v17 = vld [vmem:[%s21006_s6 + $0x30] sm:$0xff]  }
0x122e   :  { %v14159_v42 = vpop.f32.mrb[189].mxu1 }
0x122f   :  { %v14160_v55 = vadd.f32 %v14159_v42, %v14158_v44  ;;  %v14161_v6 = vpop.f32.mrb[190].mxu1  ;;  %v16734_v44 = vld [vmem:[%s21006_s6 + $0x40] sm:$0xff]   ;;  %v16735_v42 = vld [vmem:[%s21006_s6 + $0x48] sm:$0xff]  }
0x1230   :  { %v14162_v40 = vpop.f32.mrb[191].mxu1 }
0x1231   :  { %v14163_v61 = vadd.f32 %v14162_v40, %v14161_v6  ;;  %v16737_v6 = vld [vmem:[%s21006_s6 + $0x60] sm:$0xff]   ;;  %v16738_v40 = vld [vmem:[%s21006_s6 + $0x68] sm:$0xff]  }
0x1233   :  { %v8274_v54 = vpack.c.bf16 %v14163_v61, %v14160_v55  ;;  %v16736_v55 = vld [vmem:[%s21006_s6 + $0x50] sm:$0xff]  }
0x1234   :  { %v16739_v61 = vld [vmem:[%s21006_s6 + $0x70] sm:$0xff]  }
0x1235   :  { %15034 = vmatmul.mubr.msk.bf16.gmra.mrb[124].mxu1 %vm457_vm3, %v8274_v54 }
0x1236   :  { %15085 = vmatprep.mubr.msk.bf16.mxu1 %vm16765_vm4, %v21339_v47 }
0x12f8   :  { %v15031_v41 = vpop.f32.mrb[120].mxu1 }
0x12f9   :  { %v15639_v10 = vadd.f32 %v16726_v49, %v15031_v41  ;;  %v8321_v2 = vpop.f32.mrb[121].mxu1 }
0x12fa   :  { %v15640_v27 = vadd.f32 %v16726_v49, %v8321_v2  ;;  %v15032_v29 = vpop.f32.mrb[122].mxu1 }
0x12fb   :  { %vm8362_vm5 = vcmp.gt.f32.partialorder %v15639_v10, 0.0  ;;  %v8370_v56 = vmul.f32 0.2, %v15639_v10  ;;  %v15641_v11 = vadd.f32 %v16726_v49, %v15032_v29  ;;  %v8324_v25 = vpop.f32.mrb[123].mxu1  ;;  %v16741_v29 = vld [vmem:[%s21007_s7 + $0xc] sm:$0xff]  }
0x12fc   :  { %vm8360_vm6 = vcmp.gt.f32.partialorder %v15640_v27, 0.0  ;;  %v8368_v48 = vmul.f32 0.2, %v15640_v27  ;;  %v15642_v53 = vadd.f32 %v16726_v49, %v8324_v25 }
0x12fd   :  { %v8378_v59 = vsel %vm8362_vm5, %v15639_v10, %v8370_v56  ;;  %vm8363_vm7 = vcmp.gt.f32.partialorder %v15641_v11, 0.0  ;;  %v8371_v7 = vmul.f32 0.2, %v15641_v11  ;;  %v21343_v56 = vld [vmem:[#allocation42_spill] sm:$0xff]  ;;  %vm11768_vm5 = vcmask 81920  }
0x12fe   :  { %v8376_v4 = vsel %vm8360_vm6, %v15640_v27, %v8368_v48  ;;  %vm8361_vm8 = vcmp.gt.f32.partialorder %v15642_v53, 0.0  ;;  %v8369_v51 = vmul.f32 0.2, %v15642_v53  ;;  %v8390_v60 = vadd.f32 %v8387_v62, %v8378_v59  ;;  %v16740_v27 = vld [vmem:[%s21006_s6 + $0x8] sm:$0xff]  }
0x12ff   :  { %v8379_v24 = vsel %vm8363_vm7, %v15641_v11, %v8371_v7  ;;  %v8388_v26 = vadd.f32 %v8387_v62, %v8376_v4  ;;  %v16742_v4 = vld [vmem:[%s21007_s7 + $0x18] sm:$0xff]   ;;  %vm11822_vm7 = vcmask 1040384  }
0x1300   :  { %v8391_v21 = vadd.f32 %v8387_v62, %v8379_v24  ;;  %v8377_v31 = vsel %vm8361_vm8, %v15642_v53, %v8369_v51  ;;  %v21344_v51 = vld [vmem:[#allocation41_spill] sm:$0xff]  ;;  %vm11824_vm8 = vcmask 1024  }
0x1301   :  { %v8389_v14 = vadd.f32 %v8387_v62, %v8377_v31  ;;  %v16743_v24 = vld [vmem:[%s21006_s6 + $0x18] sm:$0xff]  }
0x1302   :  { %v20235_v9 = vpack.c.bf16 %v8391_v21, %v8390_v60  ;;  %v16744_v60 = vld [vmem:[%s21007_s7 + $0x24] sm:$0xff]  }
0x1303   :  { %v20237_v8 = vpack.c.bf16 %v8389_v14, %v8388_v26  ;;  %v21345_v21 = vld [vmem:[#allocation12_spill] sm:$0xff] }
0x1305   :  { %15038 = vmatpush3.bf16.msra.mxu0 %v20237_v8  ;;  %15078 = vmatpush3.bf16.msra.mxu1 %v20237_v8 }
0x1306   :  { %15039 = vmatprep.subr.bf16.mxu0 %v21339_v47  ;;  %15079 = vmatprep.subr.bf16.mxu1 %v21339_v47 }
0x1308   :  { %v15035_v18 = vpop.f32.mrb[124].mxu1 }
0x1309   :  { %v15643_v5 = vadd.f32 %v16726_v49, %v15035_v18  ;;  %v8337_v28 = vpop.f32.mrb[125].mxu1  ;;  %15040 = vmatpush3.bf16.msra.mxu0 %v20235_v9  ;;  %15080 = vmatpush3.bf16.msra.mxu1 %v20235_v9 }
0x130a   :  { %v15644_v50 = vadd.f32 %v16726_v49, %v8337_v28  ;;  %v15036_v33 = vpop.f32.mrb[126].mxu1  ;;  %15041 = vmatprep.subr.bf16.mxu0 %v21339_v47  ;;  %15081 = vmatprep.subr.bf16.mxu1 %v21339_v47 }
0x130b   :  { %vm8366_vm9 = vcmp.gt.f32.partialorder %v15643_v5, 0.0  ;;  %v8374_v39 = vmul.f32 0.2, %v15643_v5  ;;  %v15645_v52 = vadd.f32 %v16726_v49, %v15036_v33  ;;  %v8340_v19 = vpop.f32.mrb[127].mxu1 }
0x130c   :  { %vm8364_vm10 = vcmp.gt.f32.partialorder %v15644_v50, 0.0  ;;  %v8372_v16 = vmul.f32 0.2, %v15644_v50  ;;  %v15646_v12 = vadd.f32 %v16726_v49, %v8340_v19 }
0x130d   :  { %v8382_v37 = vsel %vm8366_vm9, %v15643_v5, %v8374_v39  ;;  %vm8367_vm11 = vcmp.gt.f32.partialorder %v15645_v52, 0.0  ;;  %v8375_v36 = vmul.f32 0.2, %v15645_v52 }
0x130e   :  { %v8380_v3 = vsel %vm8364_vm10, %v15644_v50, %v8372_v16  ;;  %vm8365_vm12 = vcmp.gt.f32.partialorder %v15646_v12, 0.0  ;;  %v8373_v15 = vmul.f32 0.2, %v15646_v12  ;;  %v8394_v45 = vadd.f32 %v8387_v62, %v8382_v37 }
0x130f   :  { %v8383_v32 = vsel %vm8367_vm11, %v15645_v52, %v8375_v36  ;;  %v8392_v35 = vadd.f32 %v8387_v62, %v8380_v3 }
0x1310   :  { %v8395_v22 = vadd.f32 %v8387_v62, %v8383_v32  ;;  %v8381_v46 = vsel %vm8365_vm12, %v15646_v12, %v8373_v15 }
0x1311   :  { %v8393_v30 = vadd.f32 %v8387_v62, %v8381_v46  ;;  %v16745_v46 = vld [vmem:[%s21007_s7 + $0x30] sm:$0xff]  }
0x1312   :  { %v20247_v0 = vpack.c.bf16 %v8395_v22, %v8394_v45 }
0x1313   :  { %v20249_v57 = vpack.c.bf16 %v8393_v30, %v8392_v35  ;;  %v21346_v35 = vld [vmem:[#allocation9_spill] sm:$0xff]  ;;  %v16746_v30 = vld [vmem:[%s21007_s7 + $0x3c] sm:$0xff]  }
0x1315   :  { %15042 = vmatpush3.bf16.msra.mxu0 %v20249_v57  ;;  %15082 = vmatpush3.bf16.msra.mxu1 %v20249_v57 }
0x1316   :  { %15043 = vmatprep.subr.bf16.mxu0 %v21339_v47  ;;  %15083 = vmatprep.subr.bf16.mxu1 %v21339_v47 }
0x1319   :  { %15044 = vmatpush3.bf16.msra.mxu0 %v20247_v0  ;;  %15084 = vmatpush3.bf16.msra.mxu1 %v20247_v0 }
0x131a   :  { %15117 = vmatprep.subr.bf16.mxu1 %v21339_v47  ;;  %15049 = vmatprep.subr.bf16.mxu0 %v21339_v47 }
0x131c   :  { %15046 = vmatmul.mubr.msk.bf16.vlgmr.msra.gmra.mrb[156].mxu0 %vm3814_vm13, %v16728_v58  ;;  %15086 = vmatmul.mubr.msk.bf16.vlgmr.msra.gmra.mrb[192].mxu1 %vm3814_vm13, %v16729_v34  ;;  %v21347_v58 = vld [vmem:[#allocation7_spill] sm:$0xff] }
0x131d   :  { %15118 = vmatpush3.bf16.msra.mxu1 %v20237_v8  ;;  %15125 = vmatprep.mubr.msk.bf16.mxu1 %vm16765_vm4, %v21339_v47  ;;  %v16747_v34 = vld [vmem:[%s21007_s7 + $0x48] sm:$0xff]  }
0x131e   :  { %15119 = vmatprep.subr.bf16.mxu1 %v21339_v47  ;;  %15050 = vmatpush3.bf16.msra.mxu0 %v16730_v1  ;;  %v21348_v1 = vld [vmem:[#allocation4_spill] sm:$0xff] }
0x131f   :  { %15051 = vmatprep.subr.bf16.mxu0 %v21339_v47  ;;  %15053 = vmatprep.mubr.msk.bf16.mxu0 %vm16765_vm4, %v21339_v47 }
0x1321   :  { %15120 = vmatpush3.bf16.msra.mxu1 %v20235_v9 }
0x1322   :  { %15121 = vmatprep.subr.bf16.mxu1 %v21339_v47  ;;  %15052 = vmatpush3.bf16.msra.mxu0 %v21342_v38  ;;  %v16748_v38 = vld [vmem:[%s21006_s6 + $0x38] sm:$0xff]  }
0x1323   :  { %15057 = vmatprep.subr.bf16.mxu0 %v21339_v47 }
0x1325   :  { %15122 = vmatpush3.bf16.msra.mxu1 %v20249_v57 }
0x1326   :  { %15123 = vmatprep.subr.bf16.mxu1 %v21339_v47 }
0x1329   :  { %15124 = vmatpush3.bf16.msra.mxu1 %v20247_v0 }
0x132a   :  { %15137 = vmatprep.subr.bf16.mxu1 %v21339_v47 }
0x132c   :  { %15126 = vmatmul.mubr.msk.bf16.vlgmr.msra.gmra.mrb[196].mxu1 %vm3814_vm13, %v16731_v63  ;;  %v16749_v63 = vld [vmem:[%s21007_s7 + $0x54] sm:$0xff]  }
0x132d   :  { %15138 = vmatpush3.bf16.msra.mxu1 %v20237_v8  ;;  %15145 = vmatprep.mubr.msk.bf16.mxu1 %vm16765_vm4, %v21339_v47 }
0x132e   :  { %15139 = vmatprep.subr.bf16.mxu1 %v21339_v47 }
0x1331   :  { %15140 = vmatpush3.bf16.msra.mxu1 %v20235_v9 }
0x1332   :  { %15141 = vmatprep.subr.bf16.mxu1 %v21339_v47 }
0x1335   :  { %15142 = vmatpush3.bf16.msra.mxu1 %v20249_v57 }
0x1336   :  { %15143 = vmatprep.subr.bf16.mxu1 %v21339_v47 }
0x1339   :  { %15144 = vmatpush3.bf16.msra.mxu1 %v20247_v0 }
0x133a   :  { %15157 = vmatprep.subr.bf16.mxu1 %v21339_v47 }
0x133c   :  { %15146 = vmatmul.mubr.msk.bf16.vlgmr.msra.gmra.mrb[200].mxu1 %vm3814_vm13, %v16732_v23  ;;  %v21349_v23 = vld [vmem:[#allocation43_spill] sm:$0xff] }
0x133d   :  { %15158 = vmatpush3.bf16.msra.mxu1 %v20237_v8  ;;  %15165 = vmatprep.mubr.msk.bf16.mxu1 %vm16765_vm4, %v21339_v47 }
0x133e   :  { %15159 = vmatprep.subr.bf16.mxu1 %v21339_v47 }
0x1341   :  { %15160 = vmatpush3.bf16.msra.mxu1 %v20235_v9 }
0x1342   :  { %15161 = vmatprep.subr.bf16.mxu1 %v21339_v47 }
0x1345   :  { %15162 = vmatpush3.bf16.msra.mxu1 %v20249_v57 }
0x1346   :  { %15163 = vmatprep.subr.bf16.mxu1 %v21339_v47 }
0x1349   :  { %15164 = vmatpush3.bf16.msra.mxu1 %v20247_v0 }
0x134a   :  { %15197 = vmatprep.subr.bf16.mxu1 %v21339_v47 }
0x134c   :  { %15166 = vmatmul.mubr.msk.bf16.vlgmr.msra.gmra.mrb[204].mxu1 %vm3814_vm13, %v16733_v17 }
0x134d   :  { %15198 = vmatpush3.bf16.msra.mxu1 %v20237_v8  ;;  %15205 = vmatprep.mubr.msk.bf16.mxu1 %vm16765_vm4, %v21339_v47 }
0x134e   :  { %15199 = vmatprep.subr.bf16.mxu1 %v21339_v47 }
0x1351   :  { %15200 = vmatpush3.bf16.msra.mxu1 %v20235_v9 }
0x1352   :  { %15201 = vmatprep.subr.bf16.mxu1 %v21339_v47 }
0x1355   :  { %15202 = vmatpush3.bf16.msra.mxu1 %v20249_v57 }
0x1356   :  { %15203 = vmatprep.subr.bf16.mxu1 %v21339_v47 }
0x1359   :  { %15204 = vmatpush3.bf16.msra.mxu1 %v20247_v0 }
0x135a   :  { %15217 = vmatprep.subr.bf16.mxu1 %v21339_v47 }
0x135c   :  { %15206 = vmatmul.mubr.msk.bf16.vlgmr.msra.gmra.mrb[208].mxu1 %vm3814_vm13, %v16734_v44 }
0x135d   :  { %15218 = vmatpush3.bf16.msra.mxu1 %v20237_v8  ;;  %15225 = vmatprep.mubr.msk.bf16.mxu1 %vm16765_vm4, %v21339_v47 }
0x135e   :  { %15219 = vmatprep.subr.bf16.mxu1 %v21339_v47 }
0x1361   :  { %15220 = vmatpush3.bf16.msra.mxu1 %v20235_v9 }
0x1362   :  { %15221 = vmatprep.subr.bf16.mxu1 %v21339_v47 }
0x1365   :  { %15222 = vmatpush3.bf16.msra.mxu1 %v20249_v57 }
0x1366   :  { %15223 = vmatprep.subr.bf16.mxu1 %v21339_v47 }
0x1369   :  { %15224 = vmatpush3.bf16.msra.mxu1 %v20247_v0 }
0x136a   :  { %15237 = vmatprep.subr.bf16.mxu1 %v21339_v47 }
0x136c   :  { %15226 = vmatmul.mubr.msk.bf16.vlgmr.msra.gmra.mrb[212].mxu1 %vm3814_vm13, %v16735_v42 }
0x136d   :  { %15238 = vmatpush3.bf16.msra.mxu1 %v20237_v8  ;;  %15245 = vmatprep.mubr.msk.bf16.mxu1 %vm16765_vm4, %v21339_v47 }
0x136e   :  { %15239 = vmatprep.subr.bf16.mxu1 %v21339_v47 }
0x1371   :  { %15240 = vmatpush3.bf16.msra.mxu1 %v20235_v9 }
0x1372   :  { %15241 = vmatprep.subr.bf16.mxu1 %v21339_v47 }
0x1375   :  { %15242 = vmatpush3.bf16.msra.mxu1 %v20249_v57 }
0x1376   :  { %15243 = vmatprep.subr.bf16.mxu1 %v21339_v47 }
0x1379   :  { %15244 = vmatpush3.bf16.msra.mxu1 %v20247_v0 }
0x137a   :  { %15277 = vmatprep.subr.bf16.mxu1 %v21339_v47 }
0x137c   :  { %15246 = vmatmul.mubr.msk.bf16.vlgmr.msra.gmra.mrb[216].mxu1 %vm3814_vm13, %v16736_v55 }
0x137d   :  { %15278 = vmatpush3.bf16.msra.mxu1 %v20237_v8  ;;  %15285 = vmatprep.mubr.msk.bf16.mxu1 %vm16765_vm4, %v21339_v47 }
0x137e   :  { %15279 = vmatprep.subr.bf16.mxu1 %v21339_v47 }
0x1381   :  { %15280 = vmatpush3.bf16.msra.mxu1 %v20235_v9 }
0x1382   :  { %15281 = vmatprep.subr.bf16.mxu1 %v21339_v47 }
0x1385   :  { %15282 = vmatpush3.bf16.msra.mxu1 %v20249_v57 }
0x1386   :  { %15283 = vmatprep.subr.bf16.mxu1 %v21339_v47 }
0x1389   :  { %15284 = vmatpush3.bf16.msra.mxu1 %v20247_v0 }
0x138a   :  { %15297 = vmatprep.subr.bf16.mxu1 %v21339_v47 }
0x138c   :  { %15286 = vmatmul.mubr.msk.bf16.vlgmr.msra.gmra.mrb[220].mxu1 %vm3814_vm13, %v16737_v6 }
0x138d   :  { %15298 = vmatpush3.bf16.msra.mxu1 %v20237_v8  ;;  %15305 = vmatprep.mubr.msk.bf16.mxu1 %vm16765_vm4, %v21339_v47 }
0x138e   :  { %15299 = vmatprep.subr.bf16.mxu1 %v21339_v47 }
0x1391   :  { %15300 = vmatpush3.bf16.msra.mxu1 %v20235_v9 }
0x1392   :  { %15301 = vmatprep.subr.bf16.mxu1 %v21339_v47 }
0x1395   :  { %15302 = vmatpush3.bf16.msra.mxu1 %v20249_v57 }
0x1396   :  { %15303 = vmatprep.subr.bf16.mxu1 %v21339_v47 }
0x1399   :  { %15304 = vmatpush3.bf16.msra.mxu1 %v20247_v0 }
0x139a   :  { %15317 = vmatprep.subr.bf16.mxu1 %v21339_v47 }
0x139c   :  { %15306 = vmatmul.mubr.msk.bf16.vlgmr.msra.gmra.mrb[224].mxu1 %vm3814_vm13, %v16738_v40 }
0x139d   :  { %15318 = vmatpush3.bf16.msra.mxu1 %v20237_v8  ;;  %15325 = vmatprep.mubr.msk.bf16.mxu1 %vm16765_vm4, %v21339_v47 }
0x139e   :  { %15319 = vmatprep.subr.bf16.mxu1 %v21339_v47 }
0x13a1   :  { %15320 = vmatpush3.bf16.msra.mxu1 %v20235_v9 }
0x13a2   :  { %15321 = vmatprep.subr.bf16.mxu1 %v21339_v47 }
0x13a5   :  { %15322 = vmatpush3.bf16.msra.mxu1 %v20249_v57 }
0x13a6   :  { %15323 = vmatprep.subr.bf16.mxu1 %v21339_v47 }
0x13a9   :  { %15324 = vmatpush3.bf16.msra.mxu1 %v20247_v0 }
0x13aa   :  { %15357 = vmatprep.subr.bf16.mxu1 %v21339_v47 }
0x13ac   :  { %15326 = vmatmul.mubr.msk.bf16.vlgmr.msra.gmra.mrb[228].mxu1 %vm3814_vm13, %v16739_v61 }
0x13ad   :  { %15359 = vmatprep.mubr.msk.bf16.mxu1 %vm16765_vm4, %v21339_v47 }
0x13ef   :  { %v8434_v54 = vpop.f32.mrb[156].mxu0  ;;  %v8610_v11 = vpop.f32.mrb[192].mxu1 }
0x13f0   :  { %v15047_v41 = vpop.f32.mrb[157].mxu0  ;;  %v15087_v25 = vpop.f32.mrb[193].mxu1 }
0x13f1   :  { %v8437_v49 = vpop.f32.mrb[158].mxu0  ;;  %v8613_v43 = vpop.f32.mrb[194].mxu1 }
0x13f2   :  { %v8441_v10 = vpack.c.bf16 %v8437_v49, %v8434_v54  ;;  %v15048_v2 = vpop.f32.mrb[159].mxu0  ;;  %v8617_v20 = vpack.c.bf16 %v8613_v43, %v8610_v11  ;;  %v15088_v13 = vpop.f32.mrb[195].mxu1 }
0x13f4   :  { %15054 = vmatmul.mubr.msk.bf16.vlgmr.msra.gmra.mrb[160].mxu0 %vm3872_vm1, %v8441_v10 }
0x13f5   :  { %15058 = vmatpush3.bf16.msra.mxu0 %v20237_v8  ;;  %15065 = vmatprep.mubr.msk.bf16.mxu0 %vm16765_vm4, %v21339_v47 }
0x13f6   :  { %15059 = vmatprep.subr.bf16.mxu0 %v21339_v47 }
0x13f9   :  { %15060 = vmatpush3.bf16.msra.mxu0 %v20235_v9 }
0x13fa   :  { %15061 = vmatprep.subr.bf16.mxu0 %v21339_v47 }
0x13fd   :  { %15062 = vmatpush3.bf16.msra.mxu0 %v20249_v57 }
0x13fe   :  { %15063 = vmatprep.subr.bf16.mxu0 %v21339_v47 }
0x13ff   :  { %v8786_v31 = vpop.f32.mrb[196].mxu1 }
0x1400   :  { %v15127_v26 = vpop.f32.mrb[197].mxu1 }
0x1401   :  { %15064 = vmatpush3.bf16.msra.mxu0 %v20247_v0  ;;  %v8789_v14 = vpop.f32.mrb[198].mxu1 }
0x1402   :  { %15069 = vmatprep.subr.bf16.mxu0 %v21339_v47  ;;  %v15128_v18 = vpop.f32.mrb[199].mxu1  ;;  %v8793_v5 = vpack.c.bf16 %v8789_v14, %v8786_v31 }
0x1404   :  { %15066 = vmatmul.mubr.msk.bf16.vlgmr.msra.gmra.mrb[164].mxu0 %vm3814_vm13, %v16740_v27 }
0x1405   :  { %15070 = vmatpush3.bf16.msra.mxu0 %v16741_v29  ;;  %15073 = vmatprep.mubr.msk.bf16.mxu0 %vm16765_vm4, %v21339_v47 }
0x1406   :  { %15071 = vmatprep.subr.bf16.mxu0 %v21339_v47 }
0x1409   :  { %15072 = vmatpush3.bf16.msra.mxu0 %v21343_v56 }
0x140a   :  { %15089 = vmatprep.subr.bf16.mxu0 %v21339_v47 }
0x140f   :  { %v8874_v28 = vpop.f32.mrb[200].mxu1 }
0x1410   :  { %v15147_v50 = vpop.f32.mrb[201].mxu1 }
0x1411   :  { %v8877_v33 = vpop.f32.mrb[202].mxu1 }
0x1412   :  { %v8881_v39 = vpack.c.bf16 %v8877_v33, %v8874_v28  ;;  %v15148_v52 = vpop.f32.mrb[203].mxu1 }
0x141f   :  { %v8962_v19 = vpop.f32.mrb[204].mxu1 }
0x1420   :  { %v15167_v16 = vpop.f32.mrb[205].mxu1 }
0x1421   :  { %v8965_v12 = vpop.f32.mrb[206].mxu1 }
0x1422   :  { %v8969_v37 = vpack.c.bf16 %v8965_v12, %v8962_v19  ;;  %v15168_v36 = vpop.f32.mrb[207].mxu1 }
0x142f   :  { %v9138_v17 = vpop.f32.mrb[208].mxu1 }
0x1430   :  { %v15207_v44 = vpop.f32.mrb[209].mxu1 }
0x1431   :  { %v9141_v42 = vpop.f32.mrb[210].mxu1  ;;  %v21358_v44 = vld [vmem:[#allocation3_spill] sm:$0xff] }
0x1432   :  { %v15208_v55 = vpop.f32.mrb[211].mxu1  ;;  %v9145_v6 = vpack.c.bf16 %v9141_v42, %v9138_v17  ;;  %v16553_v17 = vld [vmem:[%s21011_s12] sm:$0x3f]  }
0x1433   :  { %v9903_v42 = vand.u32 %v16553_v17, %v21358_v44  ;;  %v20618_v55 = vld [vmem:[%s21135_s4] sm:$0x3] }
0x1435   :  { %15358 = vmatpush3.bf16.msra.mxu1 %v9903_v42 }
0x1436   :  { %15363 = vmatprep.subr.bf16.mxu1 %v21339_v47 }
0x143f   :  { %v9226_v40 = vpop.f32.mrb[212].mxu1 }
0x1440   :  { %v15227_v61 = vpop.f32.mrb[213].mxu1 }
0x1441   :  { %v9229_v54 = vpop.f32.mrb[214].mxu1  ;;  %v16554_v61 = vld [vmem:[%s21012_s11] sm:$0xff]  }
0x1442   :  { %v9233_v41 = vpack.c.bf16 %v9229_v54, %v9226_v40  ;;  %v15228_v49 = vpop.f32.mrb[215].mxu1  ;;  %v16555_v54 = vld [vmem:[%s21012_s11 + $0x8] sm:$0x1f]  }
0x1443   :  { %v21359_v49 = vld [vmem:[#allocation15_spill] sm:$0xff] }
0x144f   :  { %v9314_v10 = vpop.f32.mrb[216].mxu1 }
0x1450   :  { %v15247_v2 = vpop.f32.mrb[217].mxu1 }
0x1451   :  { %v9317_v27 = vpop.f32.mrb[218].mxu1 }
0x1452   :  { %v9321_v29 = vpack.c.bf16 %v9317_v27, %v9314_v10  ;;  %v15248_v56 = vpop.f32.mrb[219].mxu1  ;;  %v9812_v10 = vrot.slane %v21359_v49, 4  ;;  %v16761_v27 = vld [vmem:[%s21010_s8] ss:$0 sm:$0xff] }
0x14d7   :  { %v8522_v62 = vpop.f32.mrb[164].mxu0 }
0x14d8   :  { %v15067_v48 = vpop.f32.mrb[165].mxu0 }
0x14d9   :  { %v8525_v53 = vpop.f32.mrb[166].mxu0  ;;  %v21350_v48 = vld [vmem:[#allocation44_spill] sm:$0xff] }
0x14da   :  { %v8529_v59 = vpack.c.bf16 %v8525_v53, %v8522_v62  ;;  %v15068_v7 = vpop.f32.mrb[167].mxu0  ;;  %v16750_v62 = vld [vmem:[%s21007_s7 + $0x60] sm:$0xff]   ;;  %v16751_v53 = vld [vmem:[%s21007_s7 + $0x6c] sm:$0xff]  }
0x14db   :  { %v16752_v7 = vld [vmem:[%s21007_s7 + $0x78] sm:$0xff]  }
0x14dc   :  { %15074 = vmatmul.mubr.msk.bf16.vlgmr.msra.gmra.mrb[160].mxu0 %vm3872_vm1, %v8529_v59  ;;  %v21351_v59 = vld [vmem:[#allocation45_spill] sm:$0xff] }
0x14dd   :  { %15090 = vmatpush3.bf16.msra.mxu0 %v16742_v4  ;;  %15093 = vmatprep.mubr.msk.bf16.mxu0 %vm16765_vm4, %v21339_v47  ;;  %v21352_v4 = vld [vmem:[#allocation46_spill] sm:$0xff] }
0x14de   :  { %15091 = vmatprep.subr.bf16.mxu0 %v21339_v47 }
0x14e1   :  { %15092 = vmatpush3.bf16.msra.mxu0 %v21344_v51  ;;  %v16753_v51 = vld [vmem:[%s21006_s6 + $0x58] sm:$0xff]  }
0x14e2   :  { %15097 = vmatprep.subr.bf16.mxu0 %v21339_v47 }
0x14e8   :  { %15094 = vmatmul.mubr.msk.bf16.vlgmr.msra.gmra.mrb[160].mxu0 %vm3872_vm1, %v8617_v20 }
0x14e9   :  { %15098 = vmatpush3.bf16.msra.mxu0 %v20237_v8  ;;  %15105 = vmatprep.mubr.msk.bf16.mxu0 %vm16765_vm4, %v21339_v47 }
0x14ea   :  { %15099 = vmatprep.subr.bf16.mxu0 %v21339_v47 }
0x14ed   :  { %15100 = vmatpush3.bf16.msra.mxu0 %v20235_v9 }
0x14ee   :  { %15101 = vmatprep.subr.bf16.mxu0 %v21339_v47 }
0x14f1   :  { %15102 = vmatpush3.bf16.msra.mxu0 %v20249_v57 }
0x14f2   :  { %15103 = vmatprep.subr.bf16.mxu0 %v21339_v47 }
0x14f5   :  { %15104 = vmatpush3.bf16.msra.mxu0 %v20247_v0 }
0x14f6   :  { %15109 = vmatprep.subr.bf16.mxu0 %v21339_v47 }
0x14f8   :  { %15106 = vmatmul.mubr.msk.bf16.vlgmr.msra.gmra.mrb[168].mxu0 %vm3814_vm13, %v16743_v24  ;;  %v16754_v24 = vld [vmem:[%s21007_s7 + $0x84] sm:$0xff]  }
0x14f9   :  { %15110 = vmatpush3.bf16.msra.mxu0 %v16744_v60  ;;  %15113 = vmatprep.mubr.msk.bf16.mxu0 %vm16765_vm4, %v21339_v47  ;;  %v21353_v60 = vld [vmem:[#allocation47_spill] sm:$0xff] }
0x14fa   :  { %15111 = vmatprep.subr.bf16.mxu0 %v21339_v47 }
0x14fd   :  { %15112 = vmatpush3.bf16.msra.mxu0 %v21345_v21  ;;  %v9490_v21 = vpop.f32.mrb[220].mxu1 }
0x14fe   :  { %15129 = vmatprep.subr.bf16.mxu0 %v21339_v47  ;;  %v15287_v31 = vpop.f32.mrb[221].mxu1 }
0x14ff   :  { %v9493_v26 = vpop.f32.mrb[222].mxu1 }
0x1500   :  { %v15288_v14 = vpop.f32.mrb[223].mxu1  ;;  %v9497_v18 = vpack.c.bf16 %v9493_v26, %v9490_v21 }
0x15cb   :  { %v8698_v3 = vpop.f32.mrb[168].mxu0 }
0x15cc   :  { %v15107_v15 = vpop.f32.mrb[169].mxu0 }
0x15cd   :  { %v8701_v32 = vpop.f32.mrb[170].mxu0 }
0x15ce   :  { %v8705_v45 = vpack.c.bf16 %v8701_v32, %v8698_v3  ;;  %v15108_v22 = vpop.f32.mrb[171].mxu0 }
0x15cf   :  { %v16755_v22 = vld [vmem:[%s21007_s7 + $0x90] sm:$0xff]  }
0x15d0   :  { %15114 = vmatmul.mubr.msk.bf16.vlgmr.msra.gmra.mrb[160].mxu0 %vm3872_vm1, %v8705_v45 }
0x15d1   :  { %15130 = vmatpush3.bf16.msra.mxu0 %v16745_v46  ;;  %15133 = vmatprep.mubr.msk.bf16.mxu0 %vm16765_vm4, %v21339_v47  ;;  %v21354_v46 = vld [vmem:[#allocation48_spill] sm:$0xff] }
0x15d2   :  { %15131 = vmatprep.subr.bf16.mxu0 %v21339_v47 }
0x15d5   :  { %15132 = vmatpush3.bf16.msra.mxu0 %v21346_v35  ;;  %v16756_v35 = vld [vmem:[%s21007_s7 + $0x9c] sm:$0xff]  }
0x15d6   :  { %15149 = vmatprep.subr.bf16.mxu0 %v21339_v47 }
0x15dc   :  { %15134 = vmatmul.mubr.msk.bf16.vlgmr.msra.gmra.mrb[160].mxu0 %vm3872_vm1, %v8793_v5  ;;  %v9578_v5 = vpop.f32.mrb[224].mxu1 }
0x15dd   :  { %15150 = vmatpush3.bf16.msra.mxu0 %v16746_v30  ;;  %15153 = vmatprep.mubr.msk.bf16.mxu0 %vm16765_vm4, %v21339_v47  ;;  %v15307_v28 = vpop.f32.mrb[225].mxu1  ;;  %v21355_v30 = vld [vmem:[#allocation49_spill] sm:$0xff] }
0x15de   :  { %15151 = vmatprep.subr.bf16.mxu0 %v21339_v47  ;;  %v9581_v50 = vpop.f32.mrb[226].mxu1 }
0x15df   :  { %v9585_v33 = vpack.c.bf16 %v9581_v50, %v9578_v5  ;;  %v21360_v5 = vld [vmem:[#allocation13_spill] sm:$0xff]  ;;  %v21361_v50 = vld [vmem:[#allocation16_spill] sm:$0xff] }
0x15e1   :  { %15152 = vmatpush3.bf16.msra.mxu0 %v21347_v58  ;;  %v16757_v58 = vld [vmem:[%s21007_s7 + $0xa8] sm:$0xff]  }
0x15e2   :  { %15169 = vmatprep.subr.bf16.mxu0 %v21339_v47 }
0x15e8   :  { %15154 = vmatmul.mubr.msk.bf16.vlgmr.msra.gmra.mrb[160].mxu0 %vm3872_vm1, %v8881_v39  ;;  %v15308_v39 = vpop.f32.mrb[227].mxu1 }
0x15e9   :  { %15170 = vmatpush3.bf16.msra.mxu0 %v16747_v34  ;;  %15173 = vmatprep.mubr.msk.bf16.mxu0 %vm16765_vm4, %v21339_v47  ;;  %v9666_v52 = vpop.f32.mrb[228].mxu1  ;;  %v21356_v34 = vld [vmem:[#allocation50_spill] sm:$0xff] }
0x15ea   :  { %15171 = vmatprep.subr.bf16.mxu0 %v21339_v47  ;;  %v15327_v19 = vpop.f32.mrb[229].mxu1 }
0x15eb   :  { %v9669_v16 = vpop.f32.mrb[230].mxu1 }
0x15ec   :  { %v9673_v12 = vpack.c.bf16 %v9669_v16, %v9666_v52 }
0x15ed   :  { %15172 = vmatpush3.bf16.msra.mxu0 %v21348_v1 }
0x15ee   :  { %15177 = vmatprep.subr.bf16.mxu0 %v21339_v47 }
0x15f4   :  { %15174 = vmatmul.mubr.msk.bf16.vlgmr.msra.gmra.mrb[160].mxu0 %vm3872_vm1, %v8969_v37  ;;  %v15328_v37 = vpop.f32.mrb[231].mxu1 }
0x15f5   :  { %15178 = vmatpush3.bf16.msra.mxu0 %v20237_v8  ;;  %15185 = vmatprep.mubr.msk.bf16.mxu0 %vm16765_vm4, %v21339_v47 }
0x15f6   :  { %15179 = vmatprep.subr.bf16.mxu0 %v21339_v47 }
0x15f9   :  { %15180 = vmatpush3.bf16.msra.mxu0 %v20235_v9 }
0x15fa   :  { %15181 = vmatprep.subr.bf16.mxu0 %v21339_v47 }
0x15fd   :  { %15182 = vmatpush3.bf16.msra.mxu0 %v20249_v57 }
0x15fe   :  { %15183 = vmatprep.subr.bf16.mxu0 %v21339_v47 }
0x1601   :  { %15184 = vmatpush3.bf16.msra.mxu0 %v20247_v0 }
0x1602   :  { %15189 = vmatprep.subr.bf16.mxu0 %v21339_v47 }
0x1604   :  { %15186 = vmatmul.mubr.msk.bf16.vlgmr.msra.gmra.mrb[172].mxu0 %vm3814_vm13, %v16748_v38 }
0x1605   :  { %15190 = vmatpush3.bf16.msra.mxu0 %v16749_v63  ;;  %15193 = vmatprep.mubr.msk.bf16.mxu0 %vm16765_vm4, %v21339_v47 }
0x1606   :  { %15191 = vmatprep.subr.bf16.mxu0 %v21339_v47 }
0x1609   :  { %15192 = vmatpush3.bf16.msra.mxu0 %v21349_v23 }
0x160a   :  { %15209 = vmatprep.subr.bf16.mxu0 %v21339_v47 }
0x16d7   :  { %v9050_v11 = vpop.f32.mrb[172].mxu0 }
0x16d8   :  { %v15187_v25 = vpop.f32.mrb[173].mxu0 }
0x16d9   :  { %v9053_v43 = vpop.f32.mrb[174].mxu0 }
0x16da   :  { %v9057_v20 = vpack.c.bf16 %v9053_v43, %v9050_v11  ;;  %v15188_v13 = vpop.f32.mrb[175].mxu0  ;;  %v9813_v11 = vadd.f32 %v9812_v10, %v21359_v49 }
0x16dc   :  { %15194 = vmatmul.mubr.msk.bf16.vlgmr.msra.gmra.mrb[160].mxu0 %vm3872_vm1, %v9057_v20 }
0x16dd   :  { %15210 = vmatpush3.bf16.msra.mxu0 %v16750_v62  ;;  %15213 = vmatprep.mubr.msk.bf16.mxu0 %vm16765_vm4, %v21339_v47 }
0x16de   :  { %15211 = vmatprep.subr.bf16.mxu0 %v21339_v47 }
0x16e1   :  { %15212 = vmatpush3.bf16.msra.mxu0 %v21350_v48  ;;  %v9814_v48 = vrot.slane %v9813_v11, 2 }
0x16e2   :  { %15229 = vmatprep.subr.bf16.mxu0 %v21339_v47 }
0x16e8   :  { %15214 = vmatmul.mubr.msk.bf16.vlgmr.msra.gmra.mrb[160].mxu0 %vm3872_vm1, %v9145_v6  ;;  %v9893_v6 = vpack.c.bf16 %v20618_v55, %v20618_v55 }
0x16e9   :  { %15230 = vmatpush3.bf16.msra.mxu0 %v16751_v53  ;;  %15233 = vmatprep.mubr.msk.bf16.mxu0 %vm16765_vm4, %v21339_v47 }
0x16ea   :  { %15231 = vmatprep.subr.bf16.mxu0 %v21339_v47  ;;  %v10973_v40 = vshrl.u32 %v9893_v6, 16  ;;  %15360 = vmatmul.mubr.msk.bf16.vlgmr.msra.gmra.mrb[232].mxu1 %vm457_vm3, %v9893_v6 }
0x16eb   :  { %15367 = vmatprep.mubr.msk.bf16.mxu1 %vm16765_vm4, %v21339_v47  ;;  %15364 = vmatpush3.bf16.msra.mxu1 %v16554_v61 }
0x16ec   :  { %15365 = vmatprep.subr.bf16.mxu1 %v21339_v47 }
0x16ed   :  { %15232 = vmatpush3.bf16.msra.mxu0 %v21351_v59 }
0x16ee   :  { %15249 = vmatprep.subr.bf16.mxu0 %v21339_v47 }
0x16f4   :  { %15234 = vmatmul.mubr.msk.bf16.vlgmr.msra.gmra.mrb[160].mxu0 %vm3872_vm1, %v9233_v41  ;;  %v9966_v41 = vsel %vm470_vm0, %v16555_v54, 0 }
0x16f5   :  { %15250 = vmatpush3.bf16.msra.mxu0 %v16752_v7  ;;  %15253 = vmatprep.mubr.msk.bf16.mxu0 %vm16765_vm4, %v21339_v47  ;;  %v9815_v7 = vadd.f32 %v9814_v48, %v9813_v11 }
0x16f6   :  { %15251 = vmatprep.subr.bf16.mxu0 %v21339_v47  ;;  %15366 = vmatpush3.bf16.msra.mxu1 %v9966_v41 }
0x16f7   :  { %15371 = vmatprep.subr.bf16.mxu1 %v21339_v47 }
0x16f9   :  { %15252 = vmatpush3.bf16.msra.mxu0 %v21352_v4 }
0x16fa   :  { %15257 = vmatprep.subr.bf16.mxu0 %v21339_v47 }
0x1700   :  { %15254 = vmatmul.mubr.msk.bf16.vlgmr.msra.gmra.mrb[160].mxu0 %vm3872_vm1, %v9321_v29 }
0x1701   :  { %15258 = vmatpush3.bf16.msra.mxu0 %v20237_v8  ;;  %15265 = vmatprep.mubr.msk.bf16.mxu0 %vm16765_vm4, %v21339_v47 }
0x1702   :  { %15259 = vmatprep.subr.bf16.mxu0 %v21339_v47 }
0x1705   :  { %15260 = vmatpush3.bf16.msra.mxu0 %v20235_v9 }
0x1706   :  { %15261 = vmatprep.subr.bf16.mxu0 %v21339_v47 }
0x1709   :  { %15262 = vmatpush3.bf16.msra.mxu0 %v20249_v57 }
0x170a   :  { %15263 = vmatprep.subr.bf16.mxu0 %v21339_v47 }
0x170d   :  { %15264 = vmatpush3.bf16.msra.mxu0 %v20247_v0 }
0x170e   :  { %15269 = vmatprep.subr.bf16.mxu0 %v21339_v47 }
0x1710   :  { %15266 = vmatmul.mubr.msk.bf16.vlgmr.msra.gmra.mrb[176].mxu0 %vm3814_vm13, %v16753_v51 }
0x1711   :  { %15270 = vmatpush3.bf16.msra.mxu0 %v16754_v24  ;;  %15273 = vmatprep.mubr.msk.bf16.mxu0 %vm16765_vm4, %v21339_v47  ;;  %v9816_v24 = vrot.slane %v9815_v7, 1 }
0x1712   :  { %15271 = vmatprep.subr.bf16.mxu0 %v21339_v47 }
0x1713   :  { %v9817_v31 = vadd.f32 %v9816_v24, %v9815_v7 }
0x1715   :  { %15272 = vmatpush3.bf16.msra.mxu0 %v21353_v60 }
0x1716   :  { %15289 = vmatprep.subr.bf16.mxu0 %v21339_v47 }
0x17e3   :  { %v9402_v36 = vpop.f32.mrb[176].mxu0 }
0x17e4   :  { %v15267_v3 = vpop.f32.mrb[177].mxu0 }
0x17e5   :  { %v9405_v15 = vpop.f32.mrb[178].mxu0 }
0x17e6   :  { %v9409_v32 = vpack.c.bf16 %v9405_v15, %v9402_v36  ;;  %v15268_v45 = vpop.f32.mrb[179].mxu0 }
0x17e8   :  { %15274 = vmatmul.mubr.msk.bf16.vlgmr.msra.gmra.mrb[160].mxu0 %vm3872_vm1, %v9409_v32 }
0x17e9   :  { %15290 = vmatpush3.bf16.msra.mxu0 %v16755_v22  ;;  %15293 = vmatprep.mubr.msk.bf16.mxu0 %vm16765_vm4, %v21339_v47 }
0x17ea   :  { %15291 = vmatprep.subr.bf16.mxu0 %v21339_v47 }
0x17ed   :  { %15292 = vmatpush3.bf16.msra.mxu0 %v21354_v46 }
0x17ee   :  { %15309 = vmatprep.subr.bf16.mxu0 %v21339_v47 }
0x17f4   :  { %15294 = vmatmul.mubr.msk.bf16.vlgmr.msra.gmra.mrb[160].mxu0 %vm3872_vm1, %v9497_v18 }
0x17f5   :  { %15310 = vmatpush3.bf16.msra.mxu0 %v16756_v35  ;;  %15313 = vmatprep.mubr.msk.bf16.mxu0 %vm16765_vm4, %v21339_v47 }
0x17f6   :  { %15311 = vmatprep.subr.bf16.mxu0 %v21339_v47 }
0x17f9   :  { %15312 = vmatpush3.bf16.msra.mxu0 %v21355_v30 }
0x17fa   :  { %15329 = vmatprep.subr.bf16.mxu0 %v21339_v47 }
0x1800   :  { %15314 = vmatmul.mubr.msk.bf16.vlgmr.msra.gmra.mrb[160].mxu0 %vm3872_vm1, %v9585_v33 }
0x1801   :  { %15330 = vmatpush3.bf16.msra.mxu0 %v16757_v58  ;;  %15333 = vmatprep.mubr.msk.bf16.mxu0 %vm16765_vm4, %v21339_v47 }
0x1802   :  { %15331 = vmatprep.subr.bf16.mxu0 %v21339_v47 }
0x1805   :  { %15332 = vmatpush3.bf16.msra.mxu0 %v21356_v34 }
0x1806   :  { %15337 = vmatprep.subr.bf16.mxu0 %v21339_v47 }
0x180c   :  { %15334 = vmatmul.mubr.msk.bf16.vlgmr.msra.gmra.mrb[160].mxu0 %vm3872_vm1, %v9673_v12 }
0x180d   :  { %15338 = vmatpush3.bf16.msra.mxu0 %v20237_v8  ;;  %15345 = vmatprep.mubr.msk.bf16.mxu0 %vm16765_vm4, %v21339_v47  ;;  %v16758_v8 = vld [vmem:[%s21006_s6 + $0x78] sm:$0xff]  }
0x180e   :  { %15339 = vmatprep.subr.bf16.mxu0 %v21339_v47 }
0x1811   :  { %15340 = vmatpush3.bf16.msra.mxu0 %v20235_v9  ;;  %v16759_v9 = vld [vmem:[%s21007_s7 + $0xb4] sm:$0xff]  }
0x1812   :  { %15341 = vmatprep.subr.bf16.mxu0 %v21339_v47 }
0x1815   :  { %15342 = vmatpush3.bf16.msra.mxu0 %v20249_v57  ;;  %v21357_v57 = vld [vmem:[#allocation51_spill] sm:$0xff] }
0x1816   :  { %15343 = vmatprep.subr.bf16.mxu0 %v21339_v47 }
0x1819   :  { %15344 = vmatpush3.bf16.msra.mxu0 %v20247_v0 }
0x181a   :  { %15349 = vmatprep.subr.bf16.mxu0 %v21339_v47 }
0x181c   :  { %15346 = vmatmul.mubr.msk.bf16.vlgmr.msra.gmra.mrb[180].mxu0 %vm3814_vm13, %v16758_v8 }
0x181d   :  { %15350 = vmatpush3.bf16.msra.mxu0 %v16759_v9  ;;  %15353 = vmatprep.mubr.msk.bf16.mxu0 %vm16765_vm4, %v21339_v47 }
0x181e   :  { %15351 = vmatprep.subr.bf16.mxu0 %v21339_v47 }
0x1821   :  { %15352 = vmatpush3.bf16.msra.mxu0 %v21357_v57 }
0x1822   :  { %15491 = vmatprep.subr.bf16.mxu0 %v21339_v47 }
0x18ef   :  { %v9754_v0 = vpop.f32.mrb[180].mxu0 }
0x18f0   :  { %v15347_v1 = vpop.f32.mrb[181].mxu0 }
0x18f1   :  { %v9757_v38 = vpop.f32.mrb[182].mxu0 }
0x18f2   :  { %v9761_v63 = vpack.c.bf16 %v9757_v38, %v9754_v0  ;;  %v15348_v23 = vpop.f32.mrb[183].mxu0 }
0x18f4   :  { %15354 = vmatmul.mubr.msk.bf16.vlgmr.msra.gmra.mrb[160].mxu0 %vm3872_vm1, %v9761_v63 }
0x18f5   :  { %15493 = vmatprep.mubr.msk.bf16.mxu0 %vm16765_vm4, %v21339_v47  ;;  %15492 = vmatpush3.bf16.msra.mxu0 %v9903_v42  ;;  %v69_v42 = vld [vmem:[%s21013_s9] sm:$0x1] }
0x18f6   :  { %15497 = vmatprep.subr.bf16.mxu0 %v21339_v47 }
0x18fc   :  { %15494 = vmatmul.mubr.msk.bf16.vlgmr.msra.gmra.mrb[184].mxu0 %vm457_vm3, %v10973_v40 }
0x18fd   :  { %15501 = vmatprep.mubr.msk.bf16.mxu0 %vm16765_vm4, %v21339_v47  ;;  %15498 = vmatpush3.bf16.msra.mxu0 %v16554_v61  ;;  %v21362_v61 = vld [vmem:[#allocation6_spill] sm:$0xff] }
0x18fe   :  { %15499 = vmatprep.subr.bf16.mxu0 %v21339_v47 }
0x1901   :  { %15500 = vmatpush3.bf16.msra.mxu0 %v9966_v41  ;;  %v12473_v41 = vld [vmem:[%s21014_s10] ss:$0 sm:$0xff] }
0x1902   :  { %15505 = vmatprep.subr.bf16.mxu0 %v21339_v47 }
0x19c7   :  { %v9799_v2 = vpop.f32.mrb[160].mxu0 }
0x19c8   :  { %v15647_v29 = vadd.f32 %v16761_v27, %v9799_v2  ;;  %v15355_v56 = vpop.f32.mrb[161].mxu0 }
0x19c9   :  { %v9802_v25 = vpop.f32.mrb[162].mxu0 }
0x19ca   :  { %v15648_v43 = vadd.f32 %v16761_v27, %v9802_v25  ;;  %v15356_v20 = vpop.f32.mrb[163].mxu0  ;;  %v9819_v13 = vsel %vm9808_vm2, %v15647_v29, 0.0 }
0x19cc   :  { %v9820_v62 = vsel %vm9808_vm2, %v15648_v43, 0.0 }
0x19cd   :  { %v9821_v53 = vadd.f32 %v9820_v62, %v9819_v13  ;;  %v16556_v62 = vld [vmem:[%s21012_s11 + $0x10] sm:$0xff]  }
0x19cf   :  { %v9822_v59 = vrot.slane %v9821_v53, 4 }
0x19d1   :  { %v9823_v4 = vadd.f32 %v9822_v59, %v9821_v53  ;;  %v16557_v59 = vld [vmem:[%s21012_s11 + $0x18] sm:$0x1f]  }
0x19d3   :  { %v9824_v51 = vrot.slane %v9823_v4, 2 }
0x19d5   :  { %v9825_v60 = vadd.f32 %v9824_v51, %v9823_v4  ;;  %v10031_v4 = vsel %vm470_vm0, %v16557_v59, 0  ;;  %v16558_v51 = vld [vmem:[%s21012_s11 + $0x20] sm:$0xff]  }
0x19d7   :  { %v9826_v21 = vrot.slane %v9825_v60, 1 }
0x19d9   :  { %v9827_v26 = vadd.f32 %v9826_v21, %v9825_v60  ;;  %v16559_v60 = vld [vmem:[%s21012_s11 + $0x28] sm:$0x1f]  }
0x19db   :  { %v9828_v14 = vadd.f32 %v9827_v26, %v9817_v31  ;;  %v10096_v31 = vsel %vm470_vm0, %v16559_v60, 0  ;;  %v16560_v26 = vld [vmem:[%s21012_s11 + $0x30] sm:$0xff]  }
0x19dd   :  { %v9830_v18 = vmul.f32 0.03125, %v9828_v14 }
0x19df   :  { %v9831_v28 = vsub.f32 %v21360_v5, %v9830_v18  ;;  %v9832_v33 = vsub.f32 %v21361_v50, %v9830_v18  ;;  %v9845_v39 = vsub.f32 %v15647_v29, %v9830_v18  ;;  %v9846_v52 = vsub.f32 %v15648_v43, %v9830_v18  ;;  %v16561_v18 = vld [vmem:[%s21012_s11 + $0x38] sm:$0x1f]   ;;  %v16562_v50 = vld [vmem:[%s21012_s11 + $0x40] sm:$0xff]  }
0x19e1   :  { %v9833_v19 = vmul.f32 %v9831_v28, %v9831_v28  ;;  %v9834_v16 = vmul.f32 %v9832_v33, %v9832_v33  ;;  %v9847_v12 = vmul.f32 %v9845_v39, %v9845_v39  ;;  %v9848_v37 = vmul.f32 %v9846_v52, %v9846_v52 }
0x19e3   :  { %v9835_v36 = vsel %vm9808_vm2, %v9833_v19, 0.0  ;;  %v9836_v3 = vsel %vm9808_vm2, %v9834_v16, 0.0  ;;  %v9849_v15 = vsel %vm9808_vm2, %v9847_v12, 0.0  ;;  %v9850_v32 = vsel %vm9808_vm2, %v9848_v37, 0.0  ;;  %v16564_v16 = vld [vmem:[%s21012_s11 + $0x50] sm:$0xff]  }
0x19e4   :  { %v9837_v45 = vadd.f32 %v9836_v3, %v9835_v36  ;;  %v9851_v22 = vadd.f32 %v9850_v32, %v9849_v15  ;;  %v16565_v37 = vld [vmem:[%s21012_s11 + $0x58] sm:$0x1f]   ;;  %v16566_v15 = vld [vmem:[%s21012_s11 + $0x60] sm:$0xff]  }
0x19e5   :  { %v10288_v3 = vsel %vm470_vm0, %v16565_v37, 0 }
0x19e6   :  { %v9838_v46 = vrot.slane %v9837_v45, 4  ;;  %v9852_v35 = vrot.slane %v9851_v22, 4 }
0x19e8   :  { %v9839_v30 = vadd.f32 %v9838_v46, %v9837_v45  ;;  %v9853_v58 = vadd.f32 %v9852_v35, %v9851_v22  ;;  %v16567_v45 = vld [vmem:[%s21012_s11 + $0x68] sm:$0x1f]   ;;  %v16568_v35 = vld [vmem:[%s21012_s11 + $0x70] sm:$0xff]  }
0x19e9   :  { %v10352_v46 = vsel %vm470_vm0, %v16567_v45, 0 }
0x19ea   :  { %v9840_v34 = vrot.slane %v9839_v30, 2  ;;  %v9854_v8 = vrot.slane %v9853_v58, 2 }
0x19ec   :  { %v9841_v9 = vadd.f32 %v9840_v34, %v9839_v30  ;;  %v9855_v57 = vadd.f32 %v9854_v8, %v9853_v58  ;;  %v16569_v58 = vld [vmem:[%s21012_s11 + $0x78] sm:$0x1f]  }
0x19ed   :  { %v10416_v8 = vsel %vm470_vm0, %v16569_v58, 0 }
0x19ee   :  { %v9842_v0 = vrot.slane %v9841_v9, 1  ;;  %v9856_v1 = vrot.slane %v9855_v57, 1 }
0x19f0   :  { %v9843_v38 = vadd.f32 %v9842_v0, %v9841_v9  ;;  %v9857_v63 = vadd.f32 %v9856_v1, %v9855_v57  ;;  %v16570_v9 = vld [vmem:[%s21012_s11 + $0x80] sm:$0xff]   ;;  %v16571_v0 = vld [vmem:[%s21012_s11 + $0x88] sm:$0x1f]  }
0x19f2   :  { %v9858_v23 = vadd.f32 %v9857_v63, %v9843_v38  ;;  %v10480_v38 = vsel %vm470_vm0, %v16571_v0, 0 }
0x19f4   :  { %v9859_v17 = vmul.f32 0.03125, %v9858_v23 }
0x19f6   :  { %v9860_v44 = vadd.f32 1e-05, %v9859_v17 }
0x19f8   :  { %16586 = vrsqrt.f32 %v9860_v44 }
0x1a02   :  { %v16587_v6 = vpop.eup %16586 }
0x1a03   :  { %v9862_v40 = vmul.f32 %v16587_v6, %v69_v42  ;;  %v16572_v42 = vld [vmem:[%s21012_s11 + $0x90] sm:$0xff]  }
0x1a05   :  { %v9866_v54 = vrot.slane %v9862_v40, %v21362_v61  ;;  %v16573_v40 = vld [vmem:[%s21012_s11 + $0x98] sm:$0x1f]  }
0x1a07   :  { %v9867_v49 = vmul.f32 %v9866_v54, %v9831_v28  ;;  %v9868_v10 = vmul.f32 %v9866_v54, %v9832_v33  ;;  %v9883_v2 = vmul.f32 %v9866_v54, %v9845_v39  ;;  %v9884_v27 = vmul.f32 %v9866_v54, %v9846_v52  ;;  %v16563_v39 = vld [vmem:[%s21012_s11 + $0x48] sm:$0x1f]  }
0x1a08   :  { %v10160_v28 = vsel %vm470_vm0, %v16561_v18, 0  ;;  %v10224_v19 = vsel %vm470_vm0, %v16563_v39, 0 }
0x1a09   :  { %v9875_v29 = vadd.f32 %v12473_v41, %v9867_v49  ;;  %v20661_v56 = vadd.f32 %v12473_v41, %v9868_v10  ;;  %v9885_v11 = vadd.f32 %v12473_v41, %v9883_v2  ;;  %v20663_v25 = vadd.f32 %v12473_v41, %v9884_v27  ;;  %v16574_v49 = vld [vmem:[%s21012_s11 + $0xa0] sm:$0xff]   ;;  %v16575_v2 = vld [vmem:[%s21012_s11 + $0xa8] sm:$0x1f]  }
0x1a0a   :  { %v10545_v41 = vsel %vm470_vm0, %v16573_v40, 0  ;;  %v73_v40 = vld [vmem:[%s21019_s15] sm:$0x1] }
0x1a0b   :  { %vm9887_vm3 = vcmp.gt.f32.partialorder %v9885_v11, 0.0  ;;  %v9889_v43 = vmul.f32 0.2, %v9885_v11  ;;  %vm9877_vm13 = vcmp.gt.f32.partialorder %v9875_v29, 0.0  ;;  %v9879_v20 = vmul.f32 0.2, %v9875_v29 }
0x1a0c   :  { %v9890_v63 = vmul.f32 0.2, %v20663_v25  ;;  %vm9888_vm14 = vcmp.gt.f32.partialorder %v20663_v25, 0.0  ;;  %v9880_v23 = vmul.f32 0.2, %v20661_v56  ;;  %vm9878_vm15 = vcmp.gt.f32.partialorder %v20661_v56, 0.0 }
0x1a0d   :  { %v9891_v13 = vsel %vm9887_vm3, %v9885_v11, %v9889_v43  ;;  %v9881_v53 = vsel %vm9877_vm13, %v9875_v29, %v9879_v20  ;;  %v10610_v29 = vsel %vm470_vm0, %v16575_v2, 0  ;;  %v76_v2 = vld [vmem:[%s21020_s16] sm:$0x1] }
0x1a0e   :  { %v20668_v48 = vpack.c.bf16 %v9891_v13, %v9891_v13  ;;  %v20673_v7 = vpack.c.bf16 %v9881_v53, %v9881_v53  ;;  %v9892_v17 = vsel %vm9888_vm14, %v20663_v25, %v9890_v63  ;;  %v9882_v44 = vsel %vm9878_vm15, %v20661_v56, %v9880_v23  ;;  %v16576_v56 = vld [vmem:[%s21012_s11 + $0xb0] sm:$0xff]   ;;  %v16577_v25 = vld [vmem:[%s21012_s11 + $0xb8] sm:$0x1f]   ;;  %v16578_v13 = vld [vmem:[%s21012_s11 + $0xc0] sm:$0xff]  }
0x1a0f   :  { %v20836_v6 = vpack.c.bf16 %v9892_v17, %v9892_v17  ;;  %v20841_v54 = vpack.c.bf16 %v9882_v44, %v9882_v44  ;;  %v10674_v20 = vsel %vm470_vm0, %v16577_v25, 0  ;;  %v72_v44 = vld [vmem:[%s21018_s14] sm:$0x1] }
0x1a10   :  { %15502 = vmatmul.mubr.msk.bf16.vlgmr.msra.gmra.mrb[184].mxu0 %vm9808_vm2, %v20668_v48  ;;  %15368 = vmatmul.mubr.msk.bf16.vlgmr.msra.gmra.mrb[232].mxu1 %vm9808_vm2, %v20673_v7  ;;  %v20692_v24 = vshrl.u32 %v20668_v48, 16  ;;  %v20698_v21 = vshrl.u32 %v20673_v7, 16  ;;  %v11111_v14 = vrot.slane %v20668_v48, 1  ;;  %v10080_v5 = vrot.slane %v20673_v7, 1 }
0x1a11   :  { %15506 = vmatpush3.bf16.msra.mxu0 %v16556_v62  ;;  %15372 = vmatpush3.bf16.msra.mxu1 %v16556_v62  ;;  %v11201_v12 = vrot.slane %v20668_v48, 2  ;;  %v10208_v36 = vrot.slane %v20673_v7, 2  ;;  %v11291_v30 = vrot.slane %v20668_v48, 3  ;;  %v10336_v34 = vrot.slane %v20673_v7, 3  ;;  %v16579_v48 = vld [vmem:[%s21012_s11 + $0xc8] sm:$0x1f]  }
0x1a12   :  { %15507 = vmatprep.subr.bf16.mxu0 %v21339_v47  ;;  %15373 = vmatprep.subr.bf16.mxu1 %v21339_v47  ;;  %v11156_v33 = vrot.slane %v20692_v24, 1  ;;  %v10144_v52 = vrot.slane %v20698_v21, 1  ;;  %v11246_v32 = vrot.slane %v20692_v24, 2  ;;  %v10272_v22 = vrot.slane %v20698_v21, 2  ;;  %v16580_v7 = vld [vmem:[%s21012_s11 + $0xd0] sm:$0xff]  }
0x1a13   :  { %15375 = vmatprep.mubr.msk.bf16.mxu1 %vm16765_vm4, %v21339_v47  ;;  %15509 = vmatprep.mubr.msk.bf16.mxu0 %vm16765_vm4, %v21339_v47  ;;  %v11336_v57 = vrot.slane %v20692_v24, 3  ;;  %v10400_v1 = vrot.slane %v20698_v21, 3  ;;  %v20860_v10 = vshrl.u32 %v20836_v6, 16  ;;  %v20866_v27 = vshrl.u32 %v20841_v54, 16 }
0x1a14   :  { %v11473_v11 = vrot.slane %v20836_v6, 1  ;;  %v10594_v43 = vrot.slane %v20841_v54, 1  ;;  %v10738_v59 = vsel %vm470_vm0, %v16579_v48, 0 }
0x1a15   :  { %15508 = vmatpush3.bf16.msra.mxu0 %v10031_v4  ;;  %15374 = vmatpush3.bf16.msra.mxu1 %v10031_v4  ;;  %v11518_v62 = vrot.slane %v20860_v10, 1  ;;  %v10658_v53 = vrot.slane %v20866_v27, 1  ;;  %v11563_v4 = vrot.slane %v20836_v6, 2 }
0x1a16   :  { %15513 = vmatprep.subr.bf16.mxu0 %v21339_v47  ;;  %15379 = vmatprep.subr.bf16.mxu1 %v21339_v47 }
0x1a1c   :  { %15510 = vmatmul.mubr.msk.bf16.vlgmr.msra.gmra.mrb[184].mxu0 %vm9808_vm2, %v20692_v24  ;;  %15376 = vmatmul.mubr.msk.bf16.vlgmr.msra.gmra.mrb[232].mxu1 %vm9808_vm2, %v20698_v21  ;;  %v10722_v24 = vrot.slane %v20841_v54, 2  ;;  %v16582_v21 = vld [vmem:[%s21012_s11 + $0xe0] sm:$0xff]  }
0x1a1d   :  { %15514 = vmatpush3.bf16.msra.mxu0 %v16558_v51  ;;  %15380 = vmatpush3.bf16.msra.mxu1 %v16558_v51  ;;  %v16581_v51 = vld [vmem:[%s21012_s11 + $0xd8] sm:$0x1f]  }
0x1a1e   :  { %15515 = vmatprep.subr.bf16.mxu0 %v21339_v47  ;;  %15381 = vmatprep.subr.bf16.mxu1 %v21339_v47  ;;  %v10802_v60 = vsel %vm470_vm0, %v16581_v51, 0 }
0x1a1f   :  { %15383 = vmatprep.mubr.msk.bf16.mxu1 %vm16765_vm4, %v21339_v47  ;;  %15517 = vmatprep.mubr.msk.bf16.mxu0 %vm16765_vm4, %v21339_v47 }
0x1a21   :  { %15516 = vmatpush3.bf16.msra.mxu0 %v10096_v31  ;;  %15382 = vmatpush3.bf16.msra.mxu1 %v10096_v31  ;;  %v11608_v31 = vrot.slane %v20860_v10, 2 }
0x1a22   :  { %15521 = vmatprep.subr.bf16.mxu0 %v21339_v47  ;;  %15387 = vmatprep.subr.bf16.mxu1 %v21339_v47 }
0x1a28   :  { %15518 = vmatmul.mubr.msk.bf16.vlgmr.msra.gmra.mrb[184].mxu0 %vm9808_vm2, %v11111_v14  ;;  %15384 = vmatmul.mubr.msk.bf16.vlgmr.msra.gmra.mrb[232].mxu1 %vm9808_vm2, %v10080_v5  ;;  %v10786_v14 = vrot.slane %v20866_v27, 2  ;;  %v16584_v5 = vld [vmem:[%s21012_s11 + $0xf0] sm:$0xff]  }
0x1a29   :  { %15522 = vmatpush3.bf16.msra.mxu0 %v16560_v26  ;;  %15388 = vmatpush3.bf16.msra.mxu1 %v16560_v26  ;;  %v16583_v26 = vld [vmem:[%s21012_s11 + $0xe8] sm:$0x1f]  }
0x1a2a   :  { %15523 = vmatprep.subr.bf16.mxu0 %v21339_v47  ;;  %15389 = vmatprep.subr.bf16.mxu1 %v21339_v47  ;;  %v10866_v18 = vsel %vm470_vm0, %v16583_v26, 0 }
0x1a2b   :  { %15391 = vmatprep.mubr.msk.bf16.mxu1 %vm16765_vm4, %v21339_v47  ;;  %15525 = vmatprep.mubr.msk.bf16.mxu0 %vm16765_vm4, %v21339_v47 }
0x1a2d   :  { %15524 = vmatpush3.bf16.msra.mxu0 %v10160_v28  ;;  %15390 = vmatpush3.bf16.msra.mxu1 %v10160_v28  ;;  %v11653_v28 = vrot.slane %v20836_v6, 3 }
0x1a2e   :  { %15529 = vmatprep.subr.bf16.mxu0 %v21339_v47  ;;  %15395 = vmatprep.subr.bf16.mxu1 %v21339_v47 }
0x1a34   :  { %15526 = vmatmul.mubr.msk.bf16.vlgmr.msra.gmra.mrb[184].mxu0 %vm9808_vm2, %v11156_v33  ;;  %15392 = vmatmul.mubr.msk.bf16.vlgmr.msra.gmra.mrb[232].mxu1 %vm9808_vm2, %v10144_v52  ;;  %v10850_v33 = vrot.slane %v20841_v54, 3  ;;  %v11698_v52 = vrot.slane %v20860_v10, 3 }
0x1a35   :  { %15530 = vmatpush3.bf16.msra.mxu0 %v16562_v50  ;;  %15396 = vmatpush3.bf16.msra.mxu1 %v16562_v50  ;;  %v16585_v50 = vld [vmem:[%s21012_s11 + $0xf8] sm:$0x1f]  }
0x1a36   :  { %15531 = vmatprep.subr.bf16.mxu0 %v21339_v47  ;;  %15397 = vmatprep.subr.bf16.mxu1 %v21339_v47  ;;  %v10930_v39 = vsel %vm470_vm0, %v16585_v50, 0  ;;  %vm11800_vm0 = vcmask 82945  }
0x1a37   :  { %15399 = vmatprep.mubr.msk.bf16.mxu1 %vm16765_vm4, %v21339_v47  ;;  %15533 = vmatprep.mubr.msk.bf16.mxu0 %vm16765_vm4, %v21339_v47 }
0x1a39   :  { %15532 = vmatpush3.bf16.msra.mxu0 %v10224_v19  ;;  %15398 = vmatpush3.bf16.msra.mxu1 %v10224_v19  ;;  %v10914_v19 = vrot.slane %v20866_v27, 3 }
0x1a3a   :  { %15537 = vmatprep.subr.bf16.mxu0 %v21339_v47  ;;  %15403 = vmatprep.subr.bf16.mxu1 %v21339_v47 }
0x1a40   :  { %15534 = vmatmul.mubr.msk.bf16.vlgmr.msra.gmra.mrb[184].mxu0 %vm9808_vm2, %v11201_v12  ;;  %15400 = vmatmul.mubr.msk.bf16.vlgmr.msra.gmra.mrb[232].mxu1 %vm9808_vm2, %v10208_v36  ;;  %v24_v36 = vstv %s21016_s18 }
0x1a41   :  { %15538 = vmatpush3.bf16.msra.mxu0 %v16564_v16  ;;  %15404 = vmatpush3.bf16.msra.mxu1 %v16564_v16  ;;  %v77_v16 = vld [vmem:[%s21015_s17] sm:$0x1]  ;;  %25 = vst [vmem:[#allocation2] sm:$0x1] %v24_v36 }
0x1a42   :  { %15539 = vmatprep.subr.bf16.mxu0 %v21339_v47  ;;  %15405 = vmatprep.subr.bf16.mxu1 %v21339_v47  ;;  %v11797_v12 = vrot.slane %v77_v16, %v21362_v61 }
0x1a43   :  { %15407 = vmatprep.mubr.msk.bf16.mxu1 %vm16765_vm4, %v21339_v47  ;;  %15541 = vmatprep.mubr.msk.bf16.mxu0 %vm16765_vm4, %v21339_v47 }
0x1a44   :  { %v11799_v37 = vmul.f32 %v20618_v55, %v11797_v12 }
0x1a45   :  { %15540 = vmatpush3.bf16.msra.mxu0 %v10288_v3  ;;  %15406 = vmatpush3.bf16.msra.mxu1 %v10288_v3  ;;  %v71_v3 = vld [vmem:[%s21017_s13] sm:$0x1] }
0x1a46   :  { %15545 = vmatprep.subr.bf16.mxu0 %v21339_v47  ;;  %15411 = vmatprep.subr.bf16.mxu1 %v21339_v47 }
0x1a4c   :  { %15542 = vmatmul.mubr.msk.bf16.vlgmr.msra.gmra.mrb[184].mxu0 %vm9808_vm2, %v11246_v32  ;;  %15408 = vmatmul.mubr.msk.bf16.vlgmr.msra.gmra.mrb[232].mxu1 %vm9808_vm2, %v10272_v22 }
0x1a4d   :  { %15546 = vmatpush3.bf16.msra.mxu0 %v16566_v15  ;;  %15412 = vmatpush3.bf16.msra.mxu1 %v16566_v15 }
0x1a4e   :  { %15547 = vmatprep.subr.bf16.mxu0 %v21339_v47  ;;  %15413 = vmatprep.subr.bf16.mxu1 %v21339_v47 }
0x1a4f   :  { %15415 = vmatprep.mubr.msk.bf16.mxu1 %vm16765_vm4, %v21339_v47  ;;  %15549 = vmatprep.mubr.msk.bf16.mxu0 %vm16765_vm4, %v21339_v47 }
0x1a51   :  { %15548 = vmatpush3.bf16.msra.mxu0 %v10352_v46  ;;  %15414 = vmatpush3.bf16.msra.mxu1 %v10352_v46 }
0x1a52   :  { %15553 = vmatprep.subr.bf16.mxu0 %v21339_v47  ;;  %15419 = vmatprep.subr.bf16.mxu1 %v21339_v47 }
0x1a58   :  { %15550 = vmatmul.mubr.msk.bf16.vlgmr.msra.gmra.mrb[184].mxu0 %vm9808_vm2, %v11291_v30  ;;  %15416 = vmatmul.mubr.msk.bf16.vlgmr.msra.gmra.mrb[232].mxu1 %vm9808_vm2, %v10336_v34 }
0x1a59   :  { %15554 = vmatpush3.bf16.msra.mxu0 %v16568_v35  ;;  %15420 = vmatpush3.bf16.msra.mxu1 %v16568_v35 }
0x1a5a   :  { %15555 = vmatprep.subr.bf16.mxu0 %v21339_v47  ;;  %15421 = vmatprep.subr.bf16.mxu1 %v21339_v47 }
0x1a5b   :  { %15423 = vmatprep.mubr.msk.bf16.mxu1 %vm16765_vm4, %v21339_v47  ;;  %15557 = vmatprep.mubr.msk.bf16.mxu0 %vm16765_vm4, %v21339_v47 }
0x1a5d   :  { %15556 = vmatpush3.bf16.msra.mxu0 %v10416_v8  ;;  %15422 = vmatpush3.bf16.msra.mxu1 %v10416_v8 }
0x1a5e   :  { %15561 = vmatprep.subr.bf16.mxu0 %v21339_v47  ;;  %15427 = vmatprep.subr.bf16.mxu1 %v21339_v47 }
0x1a64   :  { %15558 = vmatmul.mubr.msk.bf16.vlgmr.msra.gmra.mrb[184].mxu0 %vm9808_vm2, %v11336_v57  ;;  %15424 = vmatmul.mubr.msk.bf16.vlgmr.msra.gmra.mrb[232].mxu1 %vm9808_vm2, %v10400_v1 }
0x1a65   :  { %15562 = vmatpush3.bf16.msra.mxu0 %v16570_v9  ;;  %15428 = vmatpush3.bf16.msra.mxu1 %v16570_v9 }
0x1a66   :  { %15563 = vmatprep.subr.bf16.mxu0 %v21339_v47  ;;  %15429 = vmatprep.subr.bf16.mxu1 %v21339_v47 }
0x1a67   :  { %15431 = vmatprep.mubr.msk.bf16.mxu1 %vm16765_vm4, %v21339_v47  ;;  %15565 = vmatprep.mubr.msk.bf16.mxu0 %vm16765_vm4, %v21339_v47 }
0x1a69   :  { %15564 = vmatpush3.bf16.msra.mxu0 %v10480_v38  ;;  %15430 = vmatpush3.bf16.msra.mxu1 %v10480_v38 }
0x1a6a   :  { %15569 = vmatprep.subr.bf16.mxu0 %v21339_v47  ;;  %15435 = vmatprep.subr.bf16.mxu1 %v21339_v47 }
0x1a70   :  { %15566 = vmatmul.mubr.msk.bf16.vlgmr.msra.gmra.mrb[184].mxu0 %vm9808_vm2, %v20836_v6  ;;  %15432 = vmatmul.mubr.msk.bf16.vlgmr.msra.gmra.mrb[232].mxu1 %vm9808_vm2, %v20841_v54 }
0x1a71   :  { %15570 = vmatpush3.bf16.msra.mxu0 %v16572_v42  ;;  %15436 = vmatpush3.bf16.msra.mxu1 %v16572_v42 }
0x1a72   :  { %15571 = vmatprep.subr.bf16.mxu0 %v21339_v47  ;;  %15437 = vmatprep.subr.bf16.mxu1 %v21339_v47 }
0x1a73   :  { %15439 = vmatprep.mubr.msk.bf16.mxu1 %vm16765_vm4, %v21339_v47  ;;  %15573 = vmatprep.mubr.msk.bf16.mxu0 %vm16765_vm4, %v21339_v47 }
0x1a75   :  { %15572 = vmatpush3.bf16.msra.mxu0 %v10545_v41  ;;  %15438 = vmatpush3.bf16.msra.mxu1 %v10545_v41 }
0x1a76   :  { %15577 = vmatprep.subr.bf16.mxu0 %v21339_v47  ;;  %15443 = vmatprep.subr.bf16.mxu1 %v21339_v47 }
0x1a7c   :  { %15574 = vmatmul.mubr.msk.bf16.vlgmr.msra.gmra.mrb[184].mxu0 %vm9808_vm2, %v20860_v10  ;;  %15440 = vmatmul.mubr.msk.bf16.vlgmr.msra.gmra.mrb[232].mxu1 %vm9808_vm2, %v20866_v27 }
0x1a7d   :  { %15578 = vmatpush3.bf16.msra.mxu0 %v16574_v49  ;;  %15444 = vmatpush3.bf16.msra.mxu1 %v16574_v49 }
0x1a7e   :  { %15579 = vmatprep.subr.bf16.mxu0 %v21339_v47  ;;  %15445 = vmatprep.subr.bf16.mxu1 %v21339_v47 }
0x1a7f   :  { %15447 = vmatprep.mubr.msk.bf16.mxu1 %vm16765_vm4, %v21339_v47  ;;  %15581 = vmatprep.mubr.msk.bf16.mxu0 %vm16765_vm4, %v21339_v47 }
0x1a81   :  { %15580 = vmatpush3.bf16.msra.mxu0 %v10610_v29  ;;  %15446 = vmatpush3.bf16.msra.mxu1 %v10610_v29 }
0x1a82   :  { %15585 = vmatprep.subr.bf16.mxu0 %v21339_v47  ;;  %15451 = vmatprep.subr.bf16.mxu1 %v21339_v47 }
0x1a88   :  { %15582 = vmatmul.mubr.msk.bf16.vlgmr.msra.gmra.mrb[184].mxu0 %vm9808_vm2, %v11473_v11  ;;  %15448 = vmatmul.mubr.msk.bf16.vlgmr.msra.gmra.mrb[232].mxu1 %vm9808_vm2, %v10594_v43 }
0x1a89   :  { %15586 = vmatpush3.bf16.msra.mxu0 %v16576_v56  ;;  %15452 = vmatpush3.bf16.msra.mxu1 %v16576_v56 }
0x1a8a   :  { %15587 = vmatprep.subr.bf16.mxu0 %v21339_v47  ;;  %15453 = vmatprep.subr.bf16.mxu1 %v21339_v47 }
0x1a8b   :  { %15455 = vmatprep.mubr.msk.bf16.mxu1 %vm16765_vm4, %v21339_v47  ;;  %15589 = vmatprep.mubr.msk.bf16.mxu0 %vm16765_vm4, %v21339_v47 }
0x1a8d   :  { %15588 = vmatpush3.bf16.msra.mxu0 %v10674_v20  ;;  %15454 = vmatpush3.bf16.msra.mxu1 %v10674_v20  ;;  %v11767_v20 = vmul.f32 %v20618_v55, %v77_v16 }
0x1a8e   :  { %15593 = vmatprep.subr.bf16.mxu0 %v21339_v47  ;;  %15459 = vmatprep.subr.bf16.mxu1 %v21339_v47 }
0x1a8f   :  { %v11769_v48 = vsel %vm11768_vm5, %v11767_v20, 0.0 }
0x1a94   :  { %15590 = vmatmul.mubr.msk.bf16.vlgmr.msra.gmra.mrb[184].mxu0 %vm9808_vm2, %v11518_v62  ;;  %15456 = vmatmul.mubr.msk.bf16.vlgmr.msra.gmra.mrb[232].mxu1 %vm9808_vm2, %v10658_v53 }
0x1a95   :  { %15594 = vmatpush3.bf16.msra.mxu0 %v16578_v13  ;;  %15460 = vmatpush3.bf16.msra.mxu1 %v16578_v13 }
0x1a96   :  { %15595 = vmatprep.subr.bf16.mxu0 %v21339_v47  ;;  %15461 = vmatprep.subr.bf16.mxu1 %v21339_v47 }
0x1a97   :  { %15463 = vmatprep.mubr.msk.bf16.mxu1 %vm16765_vm4, %v21339_v47  ;;  %15597 = vmatprep.mubr.msk.bf16.mxu0 %vm16765_vm4, %v21339_v47 }
0x1a99   :  { %15596 = vmatpush3.bf16.msra.mxu0 %v10738_v59  ;;  %15462 = vmatpush3.bf16.msra.mxu1 %v10738_v59 }
0x1a9a   :  { %15601 = vmatprep.subr.bf16.mxu0 %v21339_v47  ;;  %15467 = vmatprep.subr.bf16.mxu1 %v21339_v47 }
0x1aa0   :  { %15598 = vmatmul.mubr.msk.bf16.vlgmr.msra.gmra.mrb[184].mxu0 %vm9808_vm2, %v11563_v4  ;;  %15464 = vmatmul.mubr.msk.bf16.vlgmr.msra.gmra.mrb[232].mxu1 %vm9808_vm2, %v10722_v24 }
0x1aa1   :  { %15602 = vmatpush3.bf16.msra.mxu0 %v16580_v7  ;;  %15468 = vmatpush3.bf16.msra.mxu1 %v16580_v7  ;;  %v78_v7 = vld [vmem:[#allocation2] sm:$0x1] }
0x1aa2   :  { %15603 = vmatprep.subr.bf16.mxu0 %v21339_v47  ;;  %15469 = vmatprep.subr.bf16.mxu1 %v21339_v47 }
0x1aa3   :  { %15471 = vmatprep.mubr.msk.bf16.mxu1 %vm16765_vm4, %v21339_v47  ;;  %15605 = vmatprep.mubr.msk.bf16.mxu0 %vm16765_vm4, %v21339_v47 }
0x1aa5   :  { %15604 = vmatpush3.bf16.msra.mxu0 %v10802_v60  ;;  %15470 = vmatpush3.bf16.msra.mxu1 %v10802_v60 }
0x1aa6   :  { %15609 = vmatprep.subr.bf16.mxu0 %v21339_v47  ;;  %15475 = vmatprep.subr.bf16.mxu1 %v21339_v47 }
0x1aac   :  { %15606 = vmatmul.mubr.msk.bf16.vlgmr.msra.gmra.mrb[184].mxu0 %vm9808_vm2, %v11608_v31  ;;  %15472 = vmatmul.mubr.msk.bf16.vlgmr.msra.gmra.mrb[232].mxu1 %vm9808_vm2, %v10786_v14 }
0x1aad   :  { %15610 = vmatpush3.bf16.msra.mxu0 %v16582_v21  ;;  %15476 = vmatpush3.bf16.msra.mxu1 %v16582_v21 }
0x1aae   :  { %15611 = vmatprep.subr.bf16.mxu0 %v21339_v47  ;;  %15477 = vmatprep.subr.bf16.mxu1 %v21339_v47 }
0x1aaf   :  { %15479 = vmatprep.mubr.msk.bf16.mxu1 %vm16765_vm4, %v21339_v47  ;;  %15613 = vmatprep.mubr.msk.bf16.mxu0 %vm16765_vm4, %v21339_v47 }
0x1ab1   :  { %15612 = vmatpush3.bf16.msra.mxu0 %v10866_v18  ;;  %15478 = vmatpush3.bf16.msra.mxu1 %v10866_v18 }
0x1ab2   :  { %15617 = vmatprep.subr.bf16.mxu0 %v21339_v47  ;;  %15483 = vmatprep.subr.bf16.mxu1 %v21339_v47 }
0x1ab8   :  { %15614 = vmatmul.mubr.msk.bf16.vlgmr.msra.gmra.mrb[184].mxu0 %vm9808_vm2, %v11653_v28  ;;  %15480 = vmatmul.mubr.msk.bf16.vlgmr.msra.gmra.mrb[232].mxu1 %vm9808_vm2, %v10850_v33 }
0x1ab9   :  { %15618 = vmatpush3.bf16.msra.mxu0 %v16584_v5  ;;  %15484 = vmatpush3.bf16.msra.mxu1 %v16584_v5 }
0x1aba   :  { %15619 = vmatprep.subr.bf16.mxu0 %v21339_v47  ;;  %15485 = vmatprep.subr.bf16.mxu1 %v21339_v47 }
0x1abb   :  { %15487 = vmatprep.mubr.msk.bf16.mxu1 %vm16765_vm4, %v21339_v47  ;;  %15621 = vmatprep.mubr.msk.bf16.mxu0 %vm16765_vm4, %v21339_v47  ;;  %v11801_v47 = vsel %vm11800_vm0, %v11799_v37, 0.0 }
0x1abc   :  { %11802 = vadd.xlane.f32.xlu0 %v11801_v47 }
0x1abd   :  { %15620 = vmatpush3.bf16.msra.mxu0 %v10930_v39  ;;  %15486 = vmatpush3.bf16.msra.mxu1 %v10930_v39 }
0x1ac4   :  { %15622 = vmatmul.mubr.msk.bf16.vlgmr.msra.gmra.mrb[184].mxu0 %vm9808_vm2, %v11698_v52  ;;  %15488 = vmatmul.mubr.msk.bf16.vlgmr.msra.gmra.mrb[232].mxu1 %vm9808_vm2, %v10914_v19  ;;  %vm11763_vm2 = vcmask 253952  }
0x1b49   :  { %v11803_v53 = vpop.xlane.xlu0 %11802 }
0x1b4a   :  { %v11805_v59 = vrot.slane %v11803_v53, 1 }
0x1b97   :  { %v11736_v15 = vpop.f32.mrb[184].mxu0  ;;  %v10966_v32 = vpop.f32.mrb[232].mxu1 }
0x1b98   :  { %v15650_v45 = vadd.f32 %v11736_v15, %v71_v3  ;;  %v15623_v22 = vpop.f32.mrb[185].mxu0  ;;  %v15649_v46 = vadd.f32 %v10966_v32, %v71_v3  ;;  %v15489_v61 = vpop.f32.mrb[233].mxu1 }
0x1b99   :  { %v11739_v35 = vpop.f32.mrb[186].mxu0  ;;  %v10969_v30 = vpop.f32.mrb[234].mxu1 }
0x1b9a   :  { %v15624_v58 = vpop.f32.mrb[187].mxu0  ;;  %v11744_v34 = vadd.f32 %v15650_v45, %v15649_v46  ;;  %v15490_v8 = vpop.f32.mrb[235].mxu1 }
0x1b9c   :  { %v11746_v9 = vmul.f32 0.5, %v11744_v34 }
0x1b9e   :  { %v11747_v57 = vsub.f32 %v15649_v46, %v11746_v9  ;;  %v11750_v0 = vsub.f32 %v15650_v45, %v11746_v9 }
0x1ba0   :  { %v11748_v1 = vmul.f32 %v11747_v57, %v11747_v57  ;;  %v11751_v38 = vmul.f32 %v11750_v0, %v11750_v0 }
0x1ba2   :  { %v11752_v63 = vadd.f32 %v11751_v38, %v11748_v1 }
0x1ba4   :  { %v11753_v23 = vmul.f32 0.5, %v11752_v63 }
0x1ba6   :  { %v11754_v17 = vadd.f32 1e-05, %v11753_v23 }
0x1ba8   :  { %16588 = vrsqrt.f32 %v11754_v17 }
0x1bb2   :  { %v16589_v42 = vpop.eup %16588 }
0x1bb3   :  { %v11756_v6 = vmul.f32 %v16589_v42, %v72_v44 }
0x1bb5   :  { %v11757_v54 = vmul.f32 %v11756_v6, %v11747_v57  ;;  %v11784_v41 = vmul.f32 %v11756_v6, %v11750_v0 }
0x1bb7   :  { %v11785_v49 = vadd.f32 %v11784_v41, %v73_v40  ;;  %v11758_v10 = vadd.f32 %v11757_v54, %v73_v40 }
0x1bb9   :  { %vm11786_vm4 = vcmp.gt.f32.partialorder %v11785_v49, 0.0  ;;  %v11787_v27 = vmul.f32 0.2, %v11785_v49  ;;  %vm11759_vm1 = vcmp.gt.f32.partialorder %v11758_v10, 0.0  ;;  %v11760_v29 = vmul.f32 0.2, %v11758_v10 }
0x1bbb   :  { %v11788_v56 = vsel %vm11786_vm4, %v11785_v49, %v11787_v27  ;;  %v11761_v11 = vsel %vm11759_vm1, %v11758_v10, %v11760_v29 }
0x1bbc   :  { %v11789_v25 = vmul.f32 %v11788_v56, %v76_v2  ;;  %v11762_v43 = vmul.f32 %v11761_v11, %v76_v2 }
0x1bbe   :  { %v11790_v13 = vsel %vm11763_vm2, %v11789_v25, 0.0  ;;  %v11764_v62 = vsel %vm11763_vm2, %v11762_v43, 0.0 }
0x1bbf   :  { %11791 = vadd.xlane.f32.xlu1 %v11790_v13  ;;  %11765 = vadd.xlane.f32.xlu0 %v11764_v62 }
0x1bc3   :  { %11770 = vadd.xlane.f32.xlu0 %v11769_v48 }
0x1c4c   :  { %v11792_v4 = vpop.xlane.xlu1 %11791  ;;  %v11766_v51 = vpop.xlane.xlu0 %11765 }
0x1c4d   :  { %v11807_v24 = vadd.f32 %v11805_v59, %v11792_v4 }
0x1c4f   :  { %v11808_v60 = vadd.f32 %v11807_v24, %v78_v7 }
0x1c50   :  { %v11771_v21 = vpop.xlane.xlu0 %11770 }
0x1c51   :  { %v11809_v31 = vand.u32 2147483647, %v11808_v60  ;;  %v11772_v26 = vadd.f32 %v11771_v21, %v11766_v51  ;;  %vm11816_vm6 = vcmp.ge.f32.partialorder %v11808_v60, 0.0 }
0x1c53   :  { %v11810_v14 = vsub.f32 0.0, %v11809_v31  ;;  %v11773_v18 = vadd.f32 %v11772_v26, %v78_v7 }
0x1c55   :  { %v11811_v55 = vmul.f32 1.442695, %v11810_v14  ;;  %v11774_v5 = vand.u32 2147483647, %v11773_v18  ;;  %vm11781_vm9 = vcmp.ge.f32.partialorder %v11773_v18, 0.0 }
0x1c57   :  { %16590 = vpow2.f32 %v11811_v55  ;;  %v11775_v28 = vsub.f32 0.0, %v11774_v5 }
0x1c59   :  { %v11776_v50 = vmul.f32 1.442695, %v11775_v28 }
0x1c5b   :  { %16592 = vpow2.f32 %v11776_v50 }
0x1c61   :  { %v16591_v33 = vpop.eup %16590 }
0x1c62   :  { %v11813_v39 = vadd.f32 1.0, %v16591_v33 }
0x1c64   :  { %16594 = vrcp.f32 %v11813_v39 }
0x1c65   :  { %v16593_v52 = vpop.eup %16592 }
0x1c66   :  { %v11778_v19 = vadd.f32 1.0, %v16593_v52 }
0x1c68   :  { %16596 = vrcp.f32 %v11778_v19 }
0x1c6e   :  { %v16595_v16 = vpop.eup %16594 }
0x1c6f   :  { %v11817_v12 = vsub.f32 1.0, %v16595_v16 }
0x1c71   :  { %v11818_v37 = vsel %vm11816_vm6, %v16595_v16, %v11817_v12 }
0x1c72   :  { %v16597_v47 = vpop.eup %16596  ;;  %v11820_v3 = vrot.slane %v11818_v37, 7 }
0x1c73   :  { %v11782_v36 = vsub.f32 1.0, %v16597_v47 }
0x1c75   :  { %v11783_v15 = vsel %vm11781_vm9, %v16597_v47, %v11782_v36 }
0x1c76   :  { %v11823_v32 = vsel %vm11822_vm7, %v11783_v15, %v11820_v3 }
0x1c77   :  { %11825 = vst.msk [vmem:[%s21021_s19] sm:$0x3] %vm11824_vm8, %v11823_v32 }

</bundles_post_ra>
